<compile_context>
chip_gen: v7x
topology: tpu7x:2x2x1
jax: 0.10.0
libtpu: 0.0.40
codegen_flags: <defaults>
</compile_context>

<pallas_src>
import functools

import jax
import jax.numpy as jnp
from jax import lax
from jax.experimental import pallas as pl
from jax.experimental.pallas import tpu as pltpu

NEG_INF = -1e30  # stands in for the -inf diagonal of INF(); exp underflows to 0 exactly


def _row_tile(m, cap=512):
    """Largest row-tile <= cap that divides m (multiple of 8), else m itself."""
    if m <= cap:
        return m
    t = cap - (cap % 8)
    while t >= 8:
        if m % t == 0:
            return t
        t -= 8
    return m


# ----------------------------------------------------------------------------
# Pallas kernels
# ----------------------------------------------------------------------------
def conv5x5_kernel(xp_ref, w_ref, b_ref, o_ref):
    """Direct 5x5 conv (input pre-padded) for one batch element.

    xp_ref: (1, H+4, W+4, Cin)      w_ref: (5, 5*Cin, Cout)  [(kw, cin) packed]
    b_ref : (1, Cout)               o_ref: (1, H, W, Cout)
    """
    H, W, Cout = o_ref.shape[1], o_ref.shape[2], o_ref.shape[3]
    Cin = xp_ref.shape[3]
    xp = xp_ref[0].astype(jnp.bfloat16)                    # (H+4, W+4, Cin)
    acc = jnp.zeros((H * W, Cout), jnp.float32)
    lane_aligned = (Cin % 128 == 0)                        # trace-time shape decision
    for kh in range(5):
        wk = w_ref[kh].astype(jnp.bfloat16)                # (5*Cin, Cout)
        if lane_aligned:
            # big-K im2col over the kw taps: one MXU matmul with K = 5*Cin
            patch = jnp.concatenate(
                [xp[kh:kh + H, kw:kw + W, :] for kw in range(5)], axis=-1)
            acc = acc + jnp.dot(patch.reshape(H * W, 5 * Cin), wk,
                                preferred_element_type=jnp.float32)
        else:
            # toy / unaligned channel counts: per-tap accumulation (still MXU)
            for kw in range(5):
                patch = xp[kh:kh + H, kw:kw + W, :].reshape(H * W, Cin)
                acc = acc + jnp.dot(patch, wk[kw * Cin:(kw + 1) * Cin, :],
                                    preferred_element_type=jnp.float32)
    acc = acc + b_ref[...].astype(jnp.float32)             # (1, Cout) broadcasts
    o_ref[0] = acc.reshape(H, W, Cout).astype(o_ref.dtype)


def bn_stats_kernel(x_ref, sum_ref, sq_ref):
    """Pass 1 of training-mode BatchNorm: accumulate per-channel sum / sum-of-squares."""
    @pl.when(pl.program_id(0) == 0)
    def _():
        sum_ref[...] = jnp.zeros_like(sum_ref)
        sq_ref[...] = jnp.zeros_like(sq_ref)
    x = x_ref[...].astype(jnp.float32)                     # (TM, C)
    sum_ref[...] += jnp.sum(x, axis=0, keepdims=True)
    sq_ref[...] += jnp.sum(x * x, axis=0, keepdims=True)


def bn_apply_kernel(inv_n, x_ref, sum_ref, sq_ref, g_ref, b_ref, o_ref):
    """Pass 2: normalize with batch stats (biased var, eps=1e-5), affine, ReLU."""
    x = x_ref[...].astype(jnp.float32)                     # (TM, C)
    mean = sum_ref[...] * inv_n                            # (1, C)
    var = jnp.maximum(sq_ref[...] * inv_n - mean * mean, 0.0)
    inv = lax.rsqrt(var + 1e-5)
    y = (x - mean) * (inv * g_ref[...].astype(jnp.float32)) + b_ref[...].astype(jnp.float32)
    o_ref[...] = jnp.maximum(y, 0.0).astype(o_ref.dtype)


def matmul_bias_kernel(x_ref, w_ref, b_ref, o_ref):
    """Fused 1x1 conv(s): (TM, Cin) @ (Cin, Cout) + bias, bf16 operands / f32 accum."""
    o_ref[...] = (jnp.dot(x_ref[...].astype(jnp.bfloat16),
                          w_ref[...].astype(jnp.bfloat16),
                          preferred_element_type=jnp.float32)
                  + b_ref[...].astype(jnp.float32)).astype(o_ref.dtype)


def cc_attn_kernel(q_ref, k_ref, v_ref, qt_ref, kt_ref, vt_ref, x_ref, gamma_ref,
                   o_w_ref, o_h_ref):
    """Criss-cross attention for one batch element, all contractions on the MXU.

    q/k: (1,H,W,Cq)   v/x: (1,H,W,C)   qt/kt: (1,W,H,Cq)   vt: (1,W,H,C)
    o_w_ref: (1,H,W,C) = gamma*out_W + x      o_h_ref: (1,W,H,C) = gamma*out_H
    (the wrapper adds o_w + transpose(o_h) — pure layout glue)
    """
    H = x_ref.shape[1]
    q = q_ref[0].astype(jnp.bfloat16)      # (H, W, Cq)
    k = k_ref[0].astype(jnp.bfloat16)
    v = v_ref[0].astype(jnp.bfloat16)      # (H, W, C)
    qt = qt_ref[0].astype(jnp.bfloat16)    # (W, H, Cq)
    kt = kt_ref[0].astype(jnp.bfloat16)
    vt = vt_ref[0].astype(jnp.bfloat16)    # (W, H, C)
    x = x_ref[0].astype(jnp.float32)
    gamma = gamma_ref[0, 0]

    # batched matmuls: contract channel, batch over the leading spatial axis
    dn_e = (((2,), (2,)), ((0,), (0,)))
    # e_h[w,h,g] = sum_c q[h,w,c] * k[g,w,c]   (column attention, batched over w)
    e_h = lax.dot_general(qt, kt, dn_e, preferred_element_type=jnp.float32)   # (W,H,H)
    hi = lax.broadcasted_iota(jnp.int32, (1, H, H), 1)
    gi = lax.broadcasted_iota(jnp.int32, (1, H, H), 2)
    e_h = jnp.where(hi == gi, NEG_INF, e_h)                                   # -inf diag
    # e_w[h,w,v'] = sum_c q[h,w,c] * k[h,v',c] (row attention, batched over h)
    e_w = lax.dot_general(q, k, dn_e, preferred_element_type=jnp.float32)     # (H,W,W)

    # joint softmax over the H+W attended positions — split form, no concat buffer
    m_h = jnp.max(e_h, axis=2)                     # (W, H)
    m_w = jnp.max(e_w, axis=2)                     # (H, W)
    m = jnp.maximum(m_h.T, m_w)                    # (H, W)
    m_t = m.T                                      # (W, H)
    p_h = jnp.exp(e_h - m_t[:, :, None])           # (W, H, H)
    p_w = jnp.exp(e_w - m[:, :, None])             # (H, W, W)
    denom = jnp.sum(p_h, axis=2).T + jnp.sum(p_w, axis=2)   # (H, W)
    inv = pl.reciprocal(denom, approx=True)        # (H, W)  (EUP, off the VALU path)
    att_h = (p_h * inv.T[:, :, None]).astype(jnp.bfloat16)  # (W, H, H)
    att_w = (p_w * inv[:, :, None]).astype(jnp.bfloat16)    # (H, W, W)

    dn_o = (((2,), (1,)), ((0,), (0,)))
    # out_h[w,h,c] = sum_g  att_h[w,h,g]  * v[g,w,c]   (= vt[w,g,c])
    out_h = lax.dot_general(att_h, vt, dn_o, preferred_element_type=jnp.float32)  # (W,H,C)
    # out_w[h,w,c] = sum_v' att_w[h,w,v'] * v[h,v',c]
    out_w = lax.dot_general(att_w, v, dn_o, preferred_element_type=jnp.float32)   # (H,W,C)

    o_w_ref[0] = (gamma * out_w + x).astype(o_w_ref.dtype)
    o_h_ref[0] = (gamma * out_h).astype(o_h_ref.dtype)


# ----------------------------------------------------------------------------
# Wrappers (pallas_call plumbing)
# ----------------------------------------------------------------------------
def conv5x5_bias(x, w, b):
    B, H, W, Cin = x.shape
    Cout = w.shape[-1]
    # 'same' padding done once by XLA (halo-in-kernel padding would save one padded
    # HBM round-trip per conv layer; kept here for lowering robustness).
    xp = jnp.pad(x, ((0, 0), (2, 2), (2, 2), (0, 0)))
    w5 = w.reshape(5, 5 * Cin, Cout)                       # (kh, kw*Cin, Cout)
    return pl.pallas_call(
        conv5x5_kernel,
        out_shape=jax.ShapeDtypeStruct((B, H, W, Cout), x.dtype),
        grid=(B,),
        in_specs=[
            pl.BlockSpec((1, H + 4, W + 4, Cin), lambda bi: (bi, 0, 0, 0)),
            pl.BlockSpec((5, 5 * Cin, Cout), lambda bi: (0, 0, 0)),
            pl.BlockSpec((1, Cout), lambda bi: (0, 0)),
        ],
        out_specs=pl.BlockSpec((1, H, W, Cout), lambda bi: (bi, 0, 0, 0)),
        compiler_params=pltpu.CompilerParams(dimension_semantics=("parallel",)),
    )(xp, w5, b)


def bn_relu(x, gamma, beta):
    """Training-mode BatchNorm2d + ReLU, two-pass, row-tiled."""
    B, H, W, C = x.shape
    M = B * H * W
    xf = x.reshape(M, C)
    TM = _row_tile(M)
    nt = M // TM

    sums, sqs = pl.pallas_call(
        bn_stats_kernel,
        out_shape=(jax.ShapeDtypeStruct((1, C), jnp.float32),
                   jax.ShapeDtypeStruct((1, C), jnp.float32)),
        grid=(nt,),
        in_specs=[pl.BlockSpec((TM, C), lambda i: (i, 0))],
        out_specs=(pl.BlockSpec((1, C), lambda i: (0, 0)),
                   pl.BlockSpec((1, C), lambda i: (0, 0))),
        compiler_params=pltpu.CompilerParams(dimension_semantics=("arbitrary",)),
    )(xf)

    y = pl.pallas_call(
        functools.partial(bn_apply_kernel, 1.0 / float(M)),
        out_shape=jax.ShapeDtypeStruct((M, C), x.dtype),
        grid=(nt,),
        in_specs=[
            pl.BlockSpec((TM, C), lambda i: (i, 0)),
            pl.BlockSpec((1, C), lambda i: (0, 0)),
            pl.BlockSpec((1, C), lambda i: (0, 0)),
            pl.BlockSpec((1, C), lambda i: (0, 0)),
            pl.BlockSpec((1, C), lambda i: (0, 0)),
        ],
        out_specs=pl.BlockSpec((TM, C), lambda i: (i, 0)),
        compiler_params=pltpu.CompilerParams(dimension_semantics=("parallel",)),
    )(xf, sums, sqs, gamma, beta)
    return y.reshape(B, H, W, C)


def matmul_bias(x, w, b):
    M, Cin = x.shape
    Cout = w.shape[-1]
    TM = _row_tile(M)
    return pl.pallas_call(
        matmul_bias_kernel,
        out_shape=jax.ShapeDtypeStruct((M, Cout), x.dtype),
        grid=(M // TM,),
        in_specs=[
            pl.BlockSpec((TM, Cin), lambda i: (i, 0)),
            pl.BlockSpec((Cin, Cout), lambda i: (0, 0)),
            pl.BlockSpec((1, Cout), lambda i: (0, 0)),
        ],
        out_specs=pl.BlockSpec((TM, Cout), lambda i: (i, 0)),
        compiler_params=pltpu.CompilerParams(dimension_semantics=("parallel",)),
    )(x, w, b)


def cc_attention(q, k, v, x, gamma):
    B, H, W, C = x.shape
    Cq = q.shape[-1]
    # W-major copies so every batched dot_general has leading batch dims (MXU path).
    q_t = jnp.transpose(q, (0, 2, 1, 3))
    k_t = jnp.transpose(k, (0, 2, 1, 3))
    v_t = jnp.transpose(v, (0, 2, 1, 3))
    o_w, o_h = pl.pallas_call(
        cc_attn_kernel,
        out_shape=(jax.ShapeDtypeStruct((B, H, W, C), x.dtype),
                   jax.ShapeDtypeStruct((B, W, H, C), x.dtype)),
        grid=(B,),
        in_specs=[
            pl.BlockSpec((1, H, W, Cq), lambda b: (b, 0, 0, 0)),
            pl.BlockSpec((1, H, W, Cq), lambda b: (b, 0, 0, 0)),
            pl.BlockSpec((1, H, W, C), lambda b: (b, 0, 0, 0)),
            pl.BlockSpec((1, W, H, Cq), lambda b: (b, 0, 0, 0)),
            pl.BlockSpec((1, W, H, Cq), lambda b: (b, 0, 0, 0)),
            pl.BlockSpec((1, W, H, C), lambda b: (b, 0, 0, 0)),
            pl.BlockSpec((1, H, W, C), lambda b: (b, 0, 0, 0)),
            pl.BlockSpec((1, 1), lambda b: (0, 0)),
        ],
        out_specs=(pl.BlockSpec((1, H, W, C), lambda b: (b, 0, 0, 0)),
                   pl.BlockSpec((1, W, H, C), lambda b: (b, 0, 0, 0))),
        compiler_params=pltpu.CompilerParams(dimension_semantics=("parallel",)),
    )(q, k, v, q_t, k_t, v_t, x, gamma)
    # layout glue: fold the W-major column-attention branch back to H-major and add.
    return o_w + jnp.transpose(o_h, (0, 2, 1, 3))


def cc_module_fwd(x, p):
    """CC_module.forward on NHWC input (q/k/v 1x1 convs fused into one matmul)."""
    B, H, W, C = x.shape
    Cq = p["wq"].shape[-1]
    xf = x.reshape(B * H * W, C)
    w_qkv = jnp.concatenate([p["wq"], p["wk"], p["wv"]], axis=1)   # (C, 2*Cq + C)
    b_qkv = jnp.concatenate([p["bq"], p["bk"], p["bv"]], axis=1)   # (1, 2*Cq + C)
    qkv = matmul_bias(xf, w_qkv, b_qkv)                            # lane-dense output
    q = qkv[:, :Cq].reshape(B, H, W, Cq)
    k = qkv[:, Cq:2 * Cq].reshape(B, H, W, Cq)
    v = qkv[:, 2 * Cq:].reshape(B, H, W, C)
    return cc_attention(q, k, v, x, p["cc_gamma"])


@jax.jit
def cnn_forward(relation_map_nchw, p):
    # layout: NCHW in / NCHW out, NHWC inside.
    x = jnp.transpose(relation_map_nchw, (0, 2, 3, 1))
    h = bn_relu(conv5x5_bias(x, p["w1"], p["b1"]), p["bn1_g"], p["bn1_b"])
    h = cc_module_fwd(h, p)
    h = bn_relu(conv5x5_bias(h, p["w2"], p["b2"]), p["bn2_g"], p["bn2_b"])
    h = cc_module_fwd(h, p)   # same CC_module instance (shared weights) as in PyTorch
    h = bn_relu(conv5x5_bias(h, p["w3"], p["b3"]), p["bn3_g"], p["bn3_b"])
    return jnp.transpose(h, (0, 3, 1, 2))


# ----------------------------------------------------------------------------
# Deterministic parameter init
# ----------------------------------------------------------------------------
def init_params(key, emb_size):
    inter = emb_size // 2
    in_dim = inter          # generalized; original hardcodes 256 (emb_size==512 only)
    cq = in_dim // 8
    ks = list(jax.random.split(key, 20))

    def nrm(k, shape, s=0.05):
        return (s * jax.random.normal(k, shape)).astype(jnp.float32)

    p = {}
    # conv_reason_e_l1 / l2 / l3 : weights stored as (KH, KW, Cin, Cout)
    p["w1"], p["b1"] = nrm(ks[0], (5, 5, emb_size, inter)), nrm(ks[1], (1, inter))
    p["bn1_g"] = 1.0 + nrm(ks[2], (1, inter), 0.1)
    p["bn1_b"] = nrm(ks[3], (1, inter), 0.1)
    p["w2"], p["b2"] = nrm(ks[4], (5, 5, inter, inter)), nrm(ks[5], (1, inter))
    p["bn2_g"] = 1.0 + nrm(ks[6], (1, inter), 0.1)
    p["bn2_b"] = nrm(ks[7], (1, inter), 0.1)
    p["w3"], p["b3"] = nrm(ks[8], (5, 5, inter, emb_size)), nrm(ks[9], (1, emb_size))
    p["bn3_g"] = 1.0 + nrm(ks[10], (1, emb_size), 0.1)
    p["bn3_b"] = nrm(ks[11], (1, emb_size), 0.1)
    # CC_module 1x1 convs: weights stored as (Cin, Cout)
    p["wq"], p["bq"] = nrm(ks[12], (in_dim, cq)), nrm(ks[13], (1, cq))
    p["wk"], p["bk"] = nrm(ks[14], (in_dim, cq)), nrm(ks[15], (1, cq))
    p["wv"], p["bv"] = nrm(ks[16], (in_dim, in_dim)), nrm(ks[17], (1, in_dim))
    # PyTorch inits gamma = 0 (attention branch would be a no-op); use 0.5 instead.
    p["cc_gamma"] = jnp.full((1, 1), 0.5, jnp.float32)
    return p


# ----------------------------------------------------------------------------
if __name__ == "__main__":
    key = jax.random.PRNGKey(0)
    kx, kp = jax.random.split(key)

    B, emb_size, H, W = 2, 32, 8, 8          # emb_size=32 -> inter=16, cq=2
    relation_map = jax.random.normal(kx, (B, emb_size, H, W), jnp.float32)
    params = init_params(kp, emb_size)

    out = cnn_forward(relation_map, params)
    jax.block_until_ready(out)
    assert out.shape == (B, emb_size, H, W), out.shape
    assert bool(jnp.all(jnp.isfinite(out)))
    print("KERNEL_OK")
</pallas_src>

<mosaic_0001>
module attributes {stable_mosaic.version = 11 : i64} {
  func.func @bn_stats_kernel(%arg0: i32, %arg1: memref<128x16xf32, #tpu.memory_space<vmem>>, %arg2: memref<1x16xf32, #tpu.memory_space<vmem>>, %arg3: memref<1x16xf32, #tpu.memory_space<vmem>>) attributes {dimension_semantics = [#tpu.dimension_semantics<arbitrary>], iteration_bounds = array<i64: 1>, scalar_prefetch = 0 : i64, scratch_operands = 0 : i64, tpu.core_type = #tpu.core_type<tc>, window_params = [{transform_indices = @transform_0, window_bounds = array<i64: 128, 16>}, {pipeline_mode = #tpu.pipeline_mode<synchronous>, transform_indices = @transform_1, window_bounds = array<i64: 1, 16>}, {pipeline_mode = #tpu.pipeline_mode<synchronous>, transform_indices = @transform_2, window_bounds = array<i64: 1, 16>}]} {
    %c0_i32 = arith.constant 0 : i32
    %0 = arith.cmpi eq, %arg0, %c0_i32 : i32
    %1 = arith.extui %0 : i1 to i32
    %c0_i32_0 = arith.constant 0 : i32
    %2 = arith.cmpi ne, %1, %c0_i32_0 : i32
    scf.if %2 {
      %cst_11 = arith.constant 0.000000e+00 : f32
      %15 = vector.broadcast %cst_11 : f32 to vector<1x16xf32>
      %c0_12 = arith.constant 0 : index
      %c0_13 = arith.constant 0 : index
      %16 = vector.load %arg2[%c0_12, %c0_13] : memref<1x16xf32, #tpu.memory_space<vmem>>, vector<1x16xf32>
      tpu.vector_store %arg2[%c0_12, %c0_13], %15 {strides = array<i32>} : memref<1x16xf32, #tpu.memory_space<vmem>>, vector<1x16xf32>,
      %cst_14 = arith.constant 0.000000e+00 : f32
      %17 = vector.broadcast %cst_14 : f32 to vector<1x16xf32>
      %c0_15 = arith.constant 0 : index
      %c0_16 = arith.constant 0 : index
      %18 = vector.load %arg3[%c0_15, %c0_16] : memref<1x16xf32, #tpu.memory_space<vmem>>, vector<1x16xf32>
      tpu.vector_store %arg3[%c0_15, %c0_16], %17 {strides = array<i32>} : memref<1x16xf32, #tpu.memory_space<vmem>>, vector<1x16xf32>,
    } else {
    }
    %c0 = arith.constant 0 : index
    %c0_1 = arith.constant 0 : index
    %3 = vector.load %arg1[%c0, %c0_1] : memref<128x16xf32, #tpu.memory_space<vmem>>, vector<128x16xf32>
    %c0_2 = arith.constant 0 : index
    %c0_3 = arith.constant 0 : index
    %4 = vector.load %arg2[%c0_2, %c0_3] : memref<1x16xf32, #tpu.memory_space<vmem>>, vector<1x16xf32>
    %cst = arith.constant dense<0.000000e+00> : vector<16xf32>
    %5 = vector.multi_reduction <add>, %3, %cst [0] : vector<128x16xf32> to vector<16xf32>
    %6 = vector.shape_cast %5 : vector<16xf32> to vector<1x16xf32>
    %7 = arith.addf %4, %6 : vector<1x16xf32>
    %c0_4 = arith.constant 0 : index
    %c0_5 = arith.constant 0 : index
    %8 = vector.load %arg2[%c0_4, %c0_5] : memref<1x16xf32, #tpu.memory_space<vmem>>, vector<1x16xf32>
    tpu.vector_store %arg2[%c0_4, %c0_5], %7 {strides = array<i32>} : memref<1x16xf32, #tpu.memory_space<vmem>>, vector<1x16xf32>,
    %c0_6 = arith.constant 0 : index
    %c0_7 = arith.constant 0 : index
    %9 = vector.load %arg3[%c0_6, %c0_7] : memref<1x16xf32, #tpu.memory_space<vmem>>, vector<1x16xf32>
    %10 = arith.mulf %3, %3 : vector<128x16xf32>
    %cst_8 = arith.constant dense<0.000000e+00> : vector<16xf32>
    %11 = vector.multi_reduction <add>, %10, %cst_8 [0] : vector<128x16xf32> to vector<16xf32>
    %12 = vector.shape_cast %11 : vector<16xf32> to vector<1x16xf32>
    %13 = arith.addf %9, %12 : vector<1x16xf32>
    %c0_9 = arith.constant 0 : index
    %c0_10 = arith.constant 0 : index
    %14 = vector.load %arg3[%c0_9, %c0_10] : memref<1x16xf32, #tpu.memory_space<vmem>>, vector<1x16xf32>
    tpu.vector_store %arg3[%c0_9, %c0_10], %13 {strides = array<i32>} : memref<1x16xf32, #tpu.memory_space<vmem>>, vector<1x16xf32>,
    return
  }
  func.func @transform_0(%arg0: i32) -> (i32, i32) {
    %c0_i32 = arith.constant 0 : i32
    %c0_i32_0 = arith.constant 0 : i32
    return %arg0, %c0_i32 : i32, i32
  }
  func.func @transform_1(%arg0: i32) -> (i32, i32) {
    %c0_i32 = arith.constant 0 : i32
    %c0_i32_0 = arith.constant 0 : i32
    %c0_i32_1 = arith.constant 0 : i32
    return %c0_i32, %c0_i32_0 : i32, i32
  }
  func.func @transform_2(%arg0: i32) -> (i32, i32) {
    %c0_i32 = arith.constant 0 : i32
    %c0_i32_0 = arith.constant 0 : i32
    %c0_i32_1 = arith.constant 0 : i32
    return %c0_i32, %c0_i32_0 : i32, i32
  }
}

module attributes {stable_mosaic.version = 11 : i64} {
  func.func @conv5x5_kernel(%arg0: i32, %arg1: memref<1x12x12x32xf32, #tpu.memory_space<vmem>>, %arg2: memref<5x160x16xf32, #tpu.memory_space<vmem>>, %arg3: memref<1x16xf32, #tpu.memory_space<vmem>>, %arg4: memref<1x8x8x16xf32, #tpu.memory_space<vmem>>) attributes {dimension_semantics = [#tpu.dimension_semantics<parallel>], iteration_bounds = array<i64: 2>, scalar_prefetch = 0 : i64, scratch_operands = 0 : i64, tpu.core_type = #tpu.core_type<tc>, window_params = [{transform_indices = @transform_0, window_bounds = array<i64: 1, 12, 12, 32>}, {pipeline_mode = #tpu.pipeline_mode<synchronous>, transform_indices = @transform_1, window_bounds = array<i64: 5, 160, 16>}, {pipeline_mode = #tpu.pipeline_mode<synchronous>, transform_indices = @transform_2, window_bounds = array<i64: 1, 16>}, {transform_indices = @transform_3, window_bounds = array<i64: 1, 8, 8, 16>}]} {
    %c0 = arith.constant 0 : index
    %c0_0 = arith.constant 0 : index
    %c0_1 = arith.constant 0 : index
    %c0_2 = arith.constant 0 : index
    %0 = vector.load %arg1[%c0, %c0_0, %c0_1, %c0_2] : memref<1x12x12x32xf32, #tpu.memory_space<vmem>>, vector<1x12x12x32xf32>
    %1 = vector.shape_cast %0 : vector<1x12x12x32xf32> to vector<12x12x32xf32>
    %2 = arith.truncf %1 : vector<12x12x32xf32> to vector<12x12x32xbf16>
    %cst = arith.constant 0.000000e+00 : f32
    %3 = vector.broadcast %cst : f32 to vector<64x16xf32>
    %c0_3 = arith.constant 0 : index
    %c0_4 = arith.constant 0 : index
    %c0_5 = arith.constant 0 : index
    %4 = vector.load %arg2[%c0_3, %c0_4, %c0_5] : memref<5x160x16xf32, #tpu.memory_space<vmem>>, vector<1x160x16xf32>
    %5 = vector.shape_cast %4 : vector<1x160x16xf32> to vector<160x16xf32>
    %6 = arith.truncf %5 : vector<160x16xf32> to vector<160x16xbf16>
    %7 = vector.extract_strided_slice %2 {offsets = [0, 0, 0], sizes = [8, 8, 32], strides = [1, 1, 1]} : vector<12x12x32xbf16> to vector<8x8x32xbf16>
    %8 = vector.shape_cast %7 : vector<8x8x32xbf16> to vector<64x32xbf16>
    %9 = vector.extract_strided_slice %6 {offsets = [0, 0], sizes = [32, 16], strides = [1, 1]} : vector<160x16xbf16> to vector<32x16xbf16>
    %cst_6 = arith.constant dense<0.000000e+00> : vector<64x16xf32>
    %10 = tpu.matmul %8, %9, %cst_6 {dimension_numbers = #tpu.dot_dimension_numbers<[1], [0], [0], [1], [0, 0, 1, 1], [], []>} : vector<64x32xbf16>, vector<32x16xbf16>, vector<64x16xf32> -> vector<64x16xf32>
    %11 = arith.addf %3, %10 : vector<64x16xf32>
    %12 = vector.extract_strided_slice %2 {offsets = [0, 1, 0], sizes = [8, 8, 32], strides = [1, 1, 1]} : vector<12x12x32xbf16> to vector<8x8x32xbf16>
    %13 = vector.shape_cast %12 : vector<8x8x32xbf16> to vector<64x32xbf16>
    %14 = vector.extract_strided_slice %6 {offsets = [32, 0], sizes = [32, 16], strides = [1, 1]} : vector<160x16xbf16> to vector<32x16xbf16>
    %cst_7 = arith.constant dense<0.000000e+00> : vector<64x16xf32>
    %15 = tpu.matmul %13, %14, %cst_7 {dimension_numbers = #tpu.dot_dimension_numbers<[1], [0], [0], [1], [0, 0, 1, 1], [], []>} : vector<64x32xbf16>, vector<32x16xbf16>, vector<64x16xf32> -> vector<64x16xf32>
    %16 = arith.addf %11, %15 : vector<64x16xf32>
    %17 = vector.extract_strided_slice %2 {offsets = [0, 2, 0], sizes = [8, 8, 32], strides = [1, 1, 1]} : vector<12x12x32xbf16> to vector<8x8x32xbf16>
    %18 = vector.shape_cast %17 : vector<8x8x32xbf16> to vector<64x32xbf16>
    %19 = vector.extract_strided_slice %6 {offsets = [64, 0], sizes = [32, 16], strides = [1, 1]} : vector<160x16xbf16> to vector<32x16xbf16>
    %cst_8 = arith.constant dense<0.000000e+00> : vector<64x16xf32>
    %20 = tpu.matmul %18, %19, %cst_8 {dimension_numbers = #tpu.dot_dimension_numbers<[1], [0], [0], [1], [0, 0, 1, 1], [], []>} : vector<64x32xbf16>, vector<32x16xbf16>, vector<64x16xf32> -> vector<64x16xf32>
    %21 = arith.addf %16, %20 : vector<64x16xf32>
    %22 = vector.extract_strided_slice %2 {offsets = [0, 3, 0], sizes = [8, 8, 32], strides = [1, 1, 1]} : vector<12x12x32xbf16> to vector<8x8x32xbf16>
    %23 = vector.shape_cast %22 : vector<8x8x32xbf16> to vector<64x32xbf16>
    %24 = vector.extract_strided_slice %6 {offsets = [96, 0], sizes = [32, 16], strides = [1, 1]} : vector<160x16xbf16> to vector<32x16xbf16>
    %cst_9 = arith.constant dense<0.000000e+00> : vector<64x16xf32>
    %25 = tpu.matmul %23, %24, %cst_9 {dimension_numbers = #tpu.dot_dimension_numbers<[1], [0], [0], [1], [0, 0, 1, 1], [], []>} : vector<64x32xbf16>, vector<32x16xbf16>, vector<64x16xf32> -> vector<64x16xf32>
    %26 = arith.addf %21, %25 : vector<64x16xf32>
    %27 = vector.extract_strided_slice %2 {offsets = [0, 4, 0], sizes = [8, 8, 32], strides = [1, 1, 1]} : vector<12x12x32xbf16> to vector<8x8x32xbf16>
    %28 = vector.shape_cast %27 : vector<8x8x32xbf16> to vector<64x32xbf16>
    %29 = vector.extract_strided_slice %6 {offsets = [128, 0], sizes = [32, 16], strides = [1, 1]} : vector<160x16xbf16> to vector<32x16xbf16>
    %cst_10 = arith.constant dense<0.000000e+00> : vector<64x16xf32>
    %30 = tpu.matmul %28, %29, %cst_10 {dimension_numbers = #tpu.dot_dimension_numbers<[1], [0], [0], [1], [0, 0, 1, 1], [], []>} : vector<64x32xbf16>, vector<32x16xbf16>, vector<64x16xf32> -> vector<64x16xf32>
    %31 = arith.addf %26, %30 : vector<64x16xf32>
    %c1 = arith.constant 1 : index
    %c0_11 = arith.constant 0 : index
    %c0_12 = arith.constant 0 : index
    %32 = vector.load %arg2[%c1, %c0_11, %c0_12] : memref<5x160x16xf32, #tpu.memory_space<vmem>>, vector<1x160x16xf32>
    %33 = vector.shape_cast %32 : vector<1x160x16xf32> to vector<160x16xf32>
    %34 = arith.truncf %33 : vector<160x16xf32> to vector<160x16xbf16>
    %35 = vector.extract_strided_slice %2 {offsets = [1, 0, 0], sizes = [8, 8, 32], strides = [1, 1, 1]} : vector<12x12x32xbf16> to vector<8x8x32xbf16>
    %36 = vector.shape_cast %35 : vector<8x8x32xbf16> to vector<64x32xbf16>
    %37 = vector.extract_strided_slice %34 {offsets = [0, 0], sizes = [32, 16], strides = [1, 1]} : vector<160x16xbf16> to vector<32x16xbf16>
    %cst_13 = arith.constant dense<0.000000e+00> : vector<64x16xf32>
    %38 = tpu.matmul %36, %37, %cst_13 {dimension_numbers = #tpu.dot_dimension_numbers<[1], [0], [0], [1], [0, 0, 1, 1], [], []>} : vector<64x32xbf16>, vector<32x16xbf16>, vector<64x16xf32> -> vector<64x16xf32>
    %39 = arith.addf %31, %38 : vector<64x16xf32>
    %40 = vector.extract_strided_slice %2 {offsets = [1, 1, 0], sizes = [8, 8, 32], strides = [1, 1, 1]} : vector<12x12x32xbf16> to vector<8x8x32xbf16>
    %41 = vector.shape_cast %40 : vector<8x8x32xbf16> to vector<64x32xbf16>
    %42 = vector.extract_strided_slice %34 {offsets = [32, 0], sizes = [32, 16], strides = [1, 1]} : vector<160x16xbf16> to vector<32x16xbf16>
    %cst_14 = arith.constant dense<0.000000e+00> : vector<64x16xf32>
    %43 = tpu.matmul %41, %42, %cst_14 {dimension_numbers = #tpu.dot_dimension_numbers<[1], [0], [0], [1], [0, 0, 1, 1], [], []>} : vector<64x32xbf16>, vector<32x16xbf16>, vector<64x16xf32> -> vector<64x16xf32>
    %44 = arith.addf %39, %43 : vector<64x16xf32>
    %45 = vector.extract_strided_slice %2 {offsets = [1, 2, 0], sizes = [8, 8, 32], strides = [1, 1, 1]} : vector<12x12x32xbf16> to vector<8x8x32xbf16>
    %46 = vector.shape_cast %45 : vector<8x8x32xbf16> to vector<64x32xbf16>
    %47 = vector.extract_strided_slice %34 {offsets = [64, 0], sizes = [32, 16], strides = [1, 1]} : vector<160x16xbf16> to vector<32x16xbf16>
    %cst_15 = arith.constant dense<0.000000e+00> : vector<64x16xf32>
    %48 = tpu.matmul %46, %47, %cst_15 {dimension_numbers = #tpu.dot_dimension_numbers<[1], [0], [0], [1], [0, 0, 1, 1], [], []>} : vector<64x32xbf16>, vector<32x16xbf16>, vector<64x16xf32> -> vector<64x16xf32>
    %49 = arith.addf %44, %48 : vector<64x16xf32>
    %50 = vector.extract_strided_slice %2 {offsets = [1, 3, 0], sizes = [8, 8, 32], strides = [1, 1, 1]} : vector<12x12x32xbf16> to vector<8x8x32xbf16>
    %51 = vector.shape_cast %50 : vector<8x8x32xbf16> to vector<64x32xbf16>
    %52 = vector.extract_strided_slice %34 {offsets = [96, 0], sizes = [32, 16], strides = [1, 1]} : vector<160x16xbf16> to vector<32x16xbf16>
    %cst_16 = arith.constant dense<0.000000e+00> : vector<64x16xf32>
    %53 = tpu.matmul %51, %52, %cst_16 {dimension_numbers = #tpu.dot_dimension_numbers<[1], [0], [0], [1], [0, 0, 1, 1], [], []>} : vector<64x32xbf16>, vector<32x16xbf16>, vector<64x16xf32> -> vector<64x16xf32>
    %54 = arith.addf %49, %53 : vector<64x16xf32>
    %55 = vector.extract_strided_slice %2 {offsets = [1, 4, 0], sizes = [8, 8, 32], strides = [1, 1, 1]} : vector<12x12x32xbf16> to vector<8x8x32xbf16>
    %56 = vector.shape_cast %55 : vector<8x8x32xbf16> to vector<64x32xbf16>
    %57 = vector.extract_strided_slice %34 {offsets = [128, 0], sizes = [32, 16], strides = [1, 1]} : vector<160x16xbf16> to vector<32x16xbf16>
    %cst_17 = arith.constant dense<0.000000e+00> : vector<64x16xf32>
    %58 = tpu.matmul %56, %57, %cst_17 {dimension_numbers = #tpu.dot_dimension_numbers<[1], [0], [0], [1], [0, 0, 1, 1], [], []>} : vector<64x32xbf16>, vector<32x16xbf16>, vector<64x16xf32> -> vector<64x16xf32>
    %59 = arith.addf %54, %58 : vector<64x16xf32>
    %c2 = arith.constant 2 : index
    %c0_18 = arith.constant 0 : index
    %c0_19 = arith.constant 0 : index
    %60 = vector.load %arg2[%c2, %c0_18, %c0_19] : memref<5x160x16xf32, #tpu.memory_space<vmem>>, vector<1x160x16xf32>
    %61 = vector.shape_cast %60 : vector<1x160x16xf32> to vector<160x16xf32>
    %62 = arith.truncf %61 : vector<160x16xf32> to vector<160x16xbf16>
    %63 = vector.extract_strided_slice %2 {offsets = [2, 0, 0], sizes = [8, 8, 32], strides = [1, 1, 1]} : vector<12x12x32xbf16> to vector<8x8x32xbf16>
    %64 = vector.shape_cast %63 : vector<8x8x32xbf16> to vector<64x32xbf16>
    %65 = vector.extract_strided_slice %62 {offsets = [0, 0], sizes = [32, 16], strides = [1, 1]} : vector<160x16xbf16> to vector<32x16xbf16>
    %cst_20 = arith.constant dense<0.000000e+00> : vector<64x16xf32>
    %66 = tpu.matmul %64, %65, %cst_20 {dimension_numbers = #tpu.dot_dimension_numbers<[1], [0], [0], [1], [0, 0, 1, 1], [], []>} : vector<64x32xbf16>, vector<32x16xbf16>, vector<64x16xf32> -> vector<64x16xf32>
    %67 = arith.addf %59, %66 : vector<64x16xf32>
    %68 = vector.extract_strided_slice %2 {offsets = [2, 1, 0], sizes = [8, 8, 32], strides = [1, 1, 1]} : vector<12x12x32xbf16> to vector<8x8x32xbf16>
    %69 = vector.shape_cast %68 : vector<8x8x32xbf16> to vector<64x32xbf16>
    %70 = vector.extract_strided_slice %62 {offsets = [32, 0], sizes = [32, 16], strides = [1, 1]} : vector<160x16xbf16> to vector<32x16xbf16>
    %cst_21 = arith.constant dense<0.000000e+00> : vector<64x16xf32>
    %71 = tpu.matmul %69, %70, %cst_21 {dimension_numbers = #tpu.dot_dimension_numbers<[1], [0], [0], [1], [0, 0, 1, 1], [], []>} : vector<64x32xbf16>, vector<32x16xbf16>, vector<64x16xf32> -> vector<64x16xf32>
    %72 = arith.addf %67, %71 : vector<64x16xf32>
    %73 = vector.extract_strided_slice %2 {offsets = [2, 2, 0], sizes = [8, 8, 32], strides = [1, 1, 1]} : vector<12x12x32xbf16> to vector<8x8x32xbf16>
    %74 = vector.shape_cast %73 : vector<8x8x32xbf16> to vector<64x32xbf16>
    %75 = vector.extract_strided_slice %62 {offsets = [64, 0], sizes = [32, 16], strides = [1, 1]} : vector<160x16xbf16> to vector<32x16xbf16>
    %cst_22 = arith.constant dense<0.000000e+00> : vector<64x16xf32>
    %76 = tpu.matmul %74, %75, %cst_22 {dimension_numbers = #tpu.dot_dimension_numbers<[1], [0], [0], [1], [0, 0, 1, 1], [], []>} : vector<64x32xbf16>, vector<32x16xbf16>, vector<64x16xf32> -> vector<64x16xf32>
    %77 = arith.addf %72, %76 : vector<64x16xf32>
    %78 = vector.extract_strided_slice %2 {offsets = [2, 3, 0], sizes = [8, 8, 32], strides = [1, 1, 1]} : vector<12x12x32xbf16> to vector<8x8x32xbf16>
    %79 = vector.shape_cast %78 : vector<8x8x32xbf16> to vector<64x32xbf16>
    %80 = vector.extract_strided_slice %62 {offsets = [96, 0], sizes = [32, 16], strides = [1, 1]} : vector<160x16xbf16> to vector<32x16xbf16>
    %cst_23 = arith.constant dense<0.000000e+00> : vector<64x16xf32>
    %81 = tpu.matmul %79, %80, %cst_23 {dimension_numbers = #tpu.dot_dimension_numbers<[1], [0], [0], [1], [0, 0, 1, 1], [], []>} : vector<64x32xbf16>, vector<32x16xbf16>, vector<64x16xf32> -> vector<64x16xf32>
    %82 = arith.addf %77, %81 : vector<64x16xf32>
    %83 = vector.extract_strided_slice %2 {offsets = [2, 4, 0], sizes = [8, 8, 32], strides = [1, 1, 1]} : vector<12x12x32xbf16> to vector<8x8x32xbf16>
    %84 = vector.shape_cast %83 : vector<8x8x32xbf16> to vector<64x32xbf16>
    %85 = vector.extract_strided_slice %62 {offsets = [128, 0], sizes = [32, 16], strides = [1, 1]} : vector<160x16xbf16> to vector<32x16xbf16>
    %cst_24 = arith.constant dense<0.000000e+00> : vector<64x16xf32>
    %86 = tpu.matmul %84, %85, %cst_24 {dimension_numbers = #tpu.dot_dimension_numbers<[1], [0], [0], [1], [0, 0, 1, 1], [], []>} : vector<64x32xbf16>, vector<32x16xbf16>, vector<64x16xf32> -> vector<64x16xf32>
    %87 = arith.addf %82, %86 : vector<64x16xf32>
    %c3 = arith.constant 3 : index
    %c0_25 = arith.constant 0 : index
    %c0_26 = arith.constant 0 : index
    %88 = vector.load %arg2[%c3, %c0_25, %c0_26] : memref<5x160x16xf32, #tpu.memory_space<vmem>>, vector<1x160x16xf32>
    %89 = vector.shape_cast %88 : vector<1x160x16xf32> to vector<160x16xf32>
    %90 = arith.truncf %89 : vector<160x16xf32> to vector<160x16xbf16>
    %91 = vector.extract_strided_slice %2 {offsets = [3, 0, 0], sizes = [8, 8, 32], strides = [1, 1, 1]} : vector<12x12x32xbf16> to vector<8x8x32xbf16>
    %92 = vector.shape_cast %91 : vector<8x8x32xbf16> to vector<64x32xbf16>
    %93 = vector.extract_strided_slice %90 {offsets = [0, 0], sizes = [32, 16], strides = [1, 1]} : vector<160x16xbf16> to vector<32x16xbf16>
    %cst_27 = arith.constant dense<0.000000e+00> : vector<64x16xf32>
    %94 = tpu.matmul %92, %93, %cst_27 {dimension_numbers = #tpu.dot_dimension_numbers<[1], [0], [0], [1], [0, 0, 1, 1], [], []>} : vector<64x32xbf16>, vector<32x16xbf16>, vector<64x16xf32> -> vector<64x16xf32>
    %95 = arith.addf %87, %94 : vector<64x16xf32>
    %96 = vector.extract_strided_slice %2 {offsets = [3, 1, 0], sizes = [8, 8, 32], strides = [1, 1, 1]} : vector<12x12x32xbf16> to vector<8x8x32xbf16>
    %97 = vector.shape_cast %96 : vector<8x8x32xbf16> to vector<64x32xbf16>
    %98 = vector.extract_strided_slice %90 {offsets = [32, 0], sizes = [32, 16], strides = [1, 1]} : vector<160x16xbf16> to vector<32x16xbf16>
    %cst_28 = arith.constant dense<0.000000e+00> : vector<64x16xf32>
    %99 = tpu.matmul %97, %98, %cst_28 {dimension_numbers = #tpu.dot_dimension_numbers<[1], [0], [0], [1], [0, 0, 1, 1], [], []>} : vector<64x32xbf16>, vector<32x16xbf16>, vector<64x16xf32> -> vector<64x16xf32>
    %100 = arith.addf %95, %99 : vector<64x16xf32>
    %101 = vector.extract_strided_slice %2 {offsets = [3, 2, 0], sizes = [8, 8, 32], strides = [1, 1, 1]} : vector<12x12x32xbf16> to vector<8x8x32xbf16>
    %102 = vector.shape_cast %101 : vector<8x8x32xbf16> to vector<64x32xbf16>
    %103 = vector.extract_strided_slice %90 {offsets = [64, 0], sizes = [32, 16], strides = [1, 1]} : vector<160x16xbf16> to vector<32x16xbf16>
    %cst_29 = arith.constant dense<0.000000e+00> : vector<64x16xf32>
    %104 = tpu.matmul %102, %103, %cst_29 {dimension_numbers = #tpu.dot_dimension_numbers<[1], [0], [0], [1], [0, 0, 1, 1], [], []>} : vector<64x32xbf16>, vector<32x16xbf16>, vector<64x16xf32> -> vector<64x16xf32>
    %105 = arith.addf %100, %104 : vector<64x16xf32>
    %106 = vector.extract_strided_slice %2 {offsets = [3, 3, 0], sizes = [8, 8, 32], strides = [1, 1, 1]} : vector<12x12x32xbf16> to vector<8x8x32xbf16>
    %107 = vector.shape_cast %106 : vector<8x8x32xbf16> to vector<64x32xbf16>
    %108 = vector.extract_strided_slice %90 {offsets = [96, 0], sizes = [32, 16], strides = [1, 1]} : vector<160x16xbf16> to vector<32x16xbf16>
    %cst_30 = arith.constant dense<0.000000e+00> : vector<64x16xf32>
    %109 = tpu.matmul %107, %108, %cst_30 {dimension_numbers = #tpu.dot_dimension_numbers<[1], [0], [0], [1], [0, 0, 1, 1], [], []>} : vector<64x32xbf16>, vector<32x16xbf16>, vector<64x16xf32> -> vector<64x16xf32>
    %110 = arith.addf %105, %109 : vector<64x16xf32>
    %111 = vector.extract_strided_slice %2 {offsets = [3, 4, 0], sizes = [8, 8, 32], strides = [1, 1, 1]} : vector<12x12x32xbf16> to vector<8x8x32xbf16>
    %112 = vector.shape_cast %111 : vector<8x8x32xbf16> to vector<64x32xbf16>
    %113 = vector.extract_strided_slice %90 {offsets = [128, 0], sizes = [32, 16], strides = [1, 1]} : vector<160x16xbf16> to vector<32x16xbf16>
    %cst_31 = arith.constant dense<0.000000e+00> : vector<64x16xf32>
    %114 = tpu.matmul %112, %113, %cst_31 {dimension_numbers = #tpu.dot_dimension_numbers<[1], [0], [0], [1], [0, 0, 1, 1], [], []>} : vector<64x32xbf16>, vector<32x16xbf16>, vector<64x16xf32> -> vector<64x16xf32>
    %115 = arith.addf %110, %114 : vector<64x16xf32>
    %c4 = arith.constant 4 : index
    %c0_32 = arith.constant 0 : index
    %c0_33 = arith.constant 0 : index
    %116 = vector.load %arg2[%c4, %c0_32, %c0_33] : memref<5x160x16xf32, #tpu.memory_space<vmem>>, vector<1x160x16xf32>
    %117 = vector.shape_cast %116 : vector<1x160x16xf32> to vector<160x16xf32>
    %118 = arith.truncf %117 : vector<160x16xf32> to vector<160x16xbf16>
    %119 = vector.extract_strided_slice %2 {offsets = [4, 0, 0], sizes = [8, 8, 32], strides = [1, 1, 1]} : vector<12x12x32xbf16> to vector<8x8x32xbf16>
    %120 = vector.shape_cast %119 : vector<8x8x32xbf16> to vector<64x32xbf16>
    %121 = vector.extract_strided_slice %118 {offsets = [0, 0], sizes = [32, 16], strides = [1, 1]} : vector<160x16xbf16> to vector<32x16xbf16>
    %cst_34 = arith.constant dense<0.000000e+00> : vector<64x16xf32>
    %122 = tpu.matmul %120, %121, %cst_34 {dimension_numbers = #tpu.dot_dimension_numbers<[1], [0], [0], [1], [0, 0, 1, 1], [], []>} : vector<64x32xbf16>, vector<32x16xbf16>, vector<64x16xf32> -> vector<64x16xf32>
    %123 = arith.addf %115, %122 : vector<64x16xf32>
    %124 = vector.extract_strided_slice %2 {offsets = [4, 1, 0], sizes = [8, 8, 32], strides = [1, 1, 1]} : vector<12x12x32xbf16> to vector<8x8x32xbf16>
    %125 = vector.shape_cast %124 : vector<8x8x32xbf16> to vector<64x32xbf16>
    %126 = vector.extract_strided_slice %118 {offsets = [32, 0], sizes = [32, 16], strides = [1, 1]} : vector<160x16xbf16> to vector<32x16xbf16>
    %cst_35 = arith.constant dense<0.000000e+00> : vector<64x16xf32>
    %127 = tpu.matmul %125, %126, %cst_35 {dimension_numbers = #tpu.dot_dimension_numbers<[1], [0], [0], [1], [0, 0, 1, 1], [], []>} : vector<64x32xbf16>, vector<32x16xbf16>, vector<64x16xf32> -> vector<64x16xf32>
    %128 = arith.addf %123, %127 : vector<64x16xf32>
    %129 = vector.extract_strided_slice %2 {offsets = [4, 2, 0], sizes = [8, 8, 32], strides = [1, 1, 1]} : vector<12x12x32xbf16> to vector<8x8x32xbf16>
    %130 = vector.shape_cast %129 : vector<8x8x32xbf16> to vector<64x32xbf16>
    %131 = vector.extract_strided_slice %118 {offsets = [64, 0], sizes = [32, 16], strides = [1, 1]} : vector<160x16xbf16> to vector<32x16xbf16>
    %cst_36 = arith.constant dense<0.000000e+00> : vector<64x16xf32>
    %132 = tpu.matmul %130, %131, %cst_36 {dimension_numbers = #tpu.dot_dimension_numbers<[1], [0], [0], [1], [0, 0, 1, 1], [], []>} : vector<64x32xbf16>, vector<32x16xbf16>, vector<64x16xf32> -> vector<64x16xf32>
    %133 = arith.addf %128, %132 : vector<64x16xf32>
    %134 = vector.extract_strided_slice %2 {offsets = [4, 3, 0], sizes = [8, 8, 32], strides = [1, 1, 1]} : vector<12x12x32xbf16> to vector<8x8x32xbf16>
    %135 = vector.shape_cast %134 : vector<8x8x32xbf16> to vector<64x32xbf16>
    %136 = vector.extract_strided_slice %118 {offsets = [96, 0], sizes = [32, 16], strides = [1, 1]} : vector<160x16xbf16> to vector<32x16xbf16>
    %cst_37 = arith.constant dense<0.000000e+00> : vector<64x16xf32>
    %137 = tpu.matmul %135, %136, %cst_37 {dimension_numbers = #tpu.dot_dimension_numbers<[1], [0], [0], [1], [0, 0, 1, 1], [], []>} : vector<64x32xbf16>, vector<32x16xbf16>, vector<64x16xf32> -> vector<64x16xf32>
    %138 = arith.addf %133, %137 : vector<64x16xf32>
    %139 = vector.extract_strided_slice %2 {offsets = [4, 4, 0], sizes = [8, 8, 32], strides = [1, 1, 1]} : vector<12x12x32xbf16> to vector<8x8x32xbf16>
    %140 = vector.shape_cast %139 : vector<8x8x32xbf16> to vector<64x32xbf16>
    %141 = vector.extract_strided_slice %118 {offsets = [128, 0], sizes = [32, 16], strides = [1, 1]} : vector<160x16xbf16> to vector<32x16xbf16>
    %cst_38 = arith.constant dense<0.000000e+00> : vector<64x16xf32>
    %142 = tpu.matmul %140, %141, %cst_38 {dimension_numbers = #tpu.dot_dimension_numbers<[1], [0], [0], [1], [0, 0, 1, 1], [], []>} : vector<64x32xbf16>, vector<32x16xbf16>, vector<64x16xf32> -> vector<64x16xf32>
    %143 = arith.addf %138, %142 : vector<64x16xf32>
    %c0_39 = arith.constant 0 : index
    %c0_40 = arith.constant 0 : index
    %144 = vector.load %arg3[%c0_39, %c0_40] : memref<1x16xf32, #tpu.memory_space<vmem>>, vector<1x16xf32>
    %145 = vector.broadcast %144 : vector<1x16xf32> to vector<64x16xf32>
    %146 = arith.addf %143, %145 : vector<64x16xf32>
    %147 = vector.shape_cast %146 : vector<64x16xf32> to vector<8x8x16xf32>
    %c0_41 = arith.constant 0 : index
    %c0_42 = arith.constant 0 : index
    %c0_43 = arith.constant 0 : index
    %c0_44 = arith.constant 0 : index
    %148 = vector.load %arg4[%c0_41, %c0_42, %c0_43, %c0_44] : memref<1x8x8x16xf32, #tpu.memory_space<vmem>>, vector<1x8x8x16xf32>
    %149 = vector.shape_cast %148 : vector<1x8x8x16xf32> to vector<8x8x16xf32>
    %150 = vector.shape_cast %147 : vector<8x8x16xf32> to vector<1x8x8x16xf32>
    tpu.vector_store %arg4[%c0_41, %c0_42, %c0_43, %c0_44], %150 {strides = array<i32>} : memref<1x8x8x16xf32, #tpu.memory_space<vmem>>, vector<1x8x8x16xf32>,
    return
  }
  func.func @transform_0(%arg0: i32) -> (i32, i32, i32, i32) {
    %c0_i32 = arith.constant 0 : i32
    %c0_i32_0 = arith.constant 0 : i32
    %c0_i32_1 = arith.constant 0 : i32
    %c0_i32_2 = arith.constant 0 : i32
    return %arg0, %c0_i32, %c0_i32_0, %c0_i32_1 : i32, i32, i32, i32
  }
  func.func @transform_1(%arg0: i32) -> (i32, i32, i32) {
    %c0_i32 = arith.constant 0 : i32
    %c0_i32_0 = arith.constant 0 : i32
    %c0_i32_1 = arith.constant 0 : i32
    %c0_i32_2 = arith.constant 0 : i32
    return %c0_i32, %c0_i32_0, %c0_i32_1 : i32, i32, i32
  }
  func.func @transform_2(%arg0: i32) -> (i32, i32) {
    %c0_i32 = arith.constant 0 : i32
    %c0_i32_0 = arith.constant 0 : i32
    %c0_i32_1 = arith.constant 0 : i32
    return %c0_i32, %c0_i32_0 : i32, i32
  }
  func.func @transform_3(%arg0: i32) -> (i32, i32, i32, i32) {
    %c0_i32 = arith.constant 0 : i32
    %c0_i32_0 = arith.constant 0 : i32
    %c0_i32_1 = arith.constant 0 : i32
    %c0_i32_2 = arith.constant 0 : i32
    return %arg0, %c0_i32, %c0_i32_0, %c0_i32_1 : i32, i32, i32, i32
  }
}

module attributes {stable_mosaic.version = 11 : i64} {
  func.func @bn_apply_kernel(%arg0: i32, %arg1: memref<128x16xf32, #tpu.memory_space<vmem>>, %arg2: memref<1x16xf32, #tpu.memory_space<vmem>>, %arg3: memref<1x16xf32, #tpu.memory_space<vmem>>, %arg4: memref<1x16xf32, #tpu.memory_space<vmem>>, %arg5: memref<1x16xf32, #tpu.memory_space<vmem>>, %arg6: memref<128x16xf32, #tpu.memory_space<vmem>>) attributes {dimension_semantics = [#tpu.dimension_semantics<parallel>], iteration_bounds = array<i64: 1>, scalar_prefetch = 0 : i64, scratch_operands = 0 : i64, tpu.core_type = #tpu.core_type<tc>, window_params = [{transform_indices = @transform_0, window_bounds = array<i64: 128, 16>}, {pipeline_mode = #tpu.pipeline_mode<synchronous>, transform_indices = @transform_1, window_bounds = array<i64: 1, 16>}, {pipeline_mode = #tpu.pipeline_mode<synchronous>, transform_indices = @transform_2, window_bounds = array<i64: 1, 16>}, {pipeline_mode = #tpu.pipeline_mode<synchronous>, transform_indices = @transform_3, window_bounds = array<i64: 1, 16>}, {pipeline_mode = #tpu.pipeline_mode<synchronous>, transform_indices = @transform_4, window_bounds = array<i64: 1, 16>}, {transform_indices = @transform_5, window_bounds = array<i64: 128, 16>}]} {
    %c0 = arith.constant 0 : index
    %c0_0 = arith.constant 0 : index
    %0 = vector.load %arg1[%c0, %c0_0] : memref<128x16xf32, #tpu.memory_space<vmem>>, vector<128x16xf32>
    %c0_1 = arith.constant 0 : index
    %c0_2 = arith.constant 0 : index
    %1 = vector.load %arg2[%c0_1, %c0_2] : memref<1x16xf32, #tpu.memory_space<vmem>>, vector<1x16xf32>
    %cst = arith.constant 7.812500e-03 : f32
    %2 = vector.broadcast %cst : f32 to vector<1x16xf32>
    %3 = arith.mulf %1, %2 : vector<1x16xf32>
    %c0_3 = arith.constant 0 : index
    %c0_4 = arith.constant 0 : index
    %4 = vector.load %arg3[%c0_3, %c0_4] : memref<1x16xf32, #tpu.memory_space<vmem>>, vector<1x16xf32>
    %cst_5 = arith.constant 7.812500e-03 : f32
    %5 = vector.broadcast %cst_5 : f32 to vector<1x16xf32>
    %6 = arith.mulf %4, %5 : vector<1x16xf32>
    %7 = arith.mulf %3, %3 : vector<1x16xf32>
    %8 = arith.subf %6, %7 : vector<1x16xf32>
    %cst_6 = arith.constant 0.000000e+00 : f32
    %9 = vector.broadcast %cst_6 : f32 to vector<1x16xf32>
    %10 = arith.maximumf %8, %9 : vector<1x16xf32>
    %cst_7 = arith.constant 9.99999974E-6 : f32
    %11 = vector.broadcast %cst_7 : f32 to vector<1x16xf32>
    %12 = arith.addf %10, %11 : vector<1x16xf32>
    %13 = math.rsqrt %12 : vector<1x16xf32>
    %14 = vector.broadcast %3 : vector<1x16xf32> to vector<128x16xf32>
    %15 = arith.subf %0, %14 : vector<128x16xf32>
    %c0_8 = arith.constant 0 : index
    %c0_9 = arith.constant 0 : index
    %16 = vector.load %arg4[%c0_8, %c0_9] : memref<1x16xf32, #tpu.memory_space<vmem>>, vector<1x16xf32>
    %17 = arith.mulf %13, %16 : vector<1x16xf32>
    %18 = vector.broadcast %17 : vector<1x16xf32> to vector<128x16xf32>
    %19 = arith.mulf %15, %18 : vector<128x16xf32>
    %c0_10 = arith.constant 0 : index
    %c0_11 = arith.constant 0 : index
    %20 = vector.load %arg5[%c0_10, %c0_11] : memref<1x16xf32, #tpu.memory_space<vmem>>, vector<1x16xf32>
    %21 = vector.broadcast %20 : vector<1x16xf32> to vector<128x16xf32>
    %22 = arith.addf %19, %21 : vector<128x16xf32>
    %cst_12 = arith.constant 0.000000e+00 : f32
    %23 = vector.broadcast %cst_12 : f32 to vector<128x16xf32>
    %24 = arith.maximumf %22, %23 : vector<128x16xf32>
    %c0_13 = arith.constant 0 : index
    %c0_14 = arith.constant 0 : index
    %25 = vector.load %arg6[%c0_13, %c0_14] : memref<128x16xf32, #tpu.memory_space<vmem>>, vector<128x16xf32>
    tpu.vector_store %arg6[%c0_13, %c0_14], %24 {strides = array<i32>} : memref<128x16xf32, #tpu.memory_space<vmem>>, vector<128x16xf32>,
    return
  }
  func.func @transform_0(%arg0: i32) -> (i32, i32) {
    %c0_i32 = arith.constant 0 : i32
    %c0_i32_0 = arith.constant 0 : i32
    return %arg0, %c0_i32 : i32, i32
  }
  func.func @transform_1(%arg0: i32) -> (i32, i32) {
    %c0_i32 = arith.constant 0 : i32
    %c0_i32_0 = arith.constant 0 : i32
    %c0_i32_1 = arith.constant 0 : i32
    return %c0_i32, %c0_i32_0 : i32, i32
  }
  func.func @transform_2(%arg0: i32) -> (i32, i32) {
    %c0_i32 = arith.constant 0 : i32
    %c0_i32_0 = arith.constant 0 : i32
    %c0_i32_1 = arith.constant 0 : i32
    return %c0_i32, %c0_i32_0 : i32, i32
  }
  func.func @transform_3(%arg0: i32) -> (i32, i32) {
    %c0_i32 = arith.constant 0 : i32
    %c0_i32_0 = arith.constant 0 : i32
    %c0_i32_1 = arith.constant 0 : i32
    return %c0_i32, %c0_i32_0 : i32, i32
  }
  func.func @transform_4(%arg0: i32) -> (i32, i32) {
    %c0_i32 = arith.constant 0 : i32
    %c0_i32_0 = arith.constant 0 : i32
    %c0_i32_1 = arith.constant 0 : i32
    return %c0_i32, %c0_i32_0 : i32, i32
  }
  func.func @transform_5(%arg0: i32) -> (i32, i32) {
    %c0_i32 = arith.constant 0 : i32
    %c0_i32_0 = arith.constant 0 : i32
    return %arg0, %c0_i32 : i32, i32
  }
}

module attributes {stable_mosaic.version = 11 : i64} {
  func.func @matmul_bias_kernel(%arg0: i32, %arg1: memref<128x16xf32, #tpu.memory_space<vmem>>, %arg2: memref<16x20xf32, #tpu.memory_space<vmem>>, %arg3: memref<1x20xf32, #tpu.memory_space<vmem>>, %arg4: memref<128x20xf32, #tpu.memory_space<vmem>>) attributes {dimension_semantics = [#tpu.dimension_semantics<parallel>], iteration_bounds = array<i64: 1>, scalar_prefetch = 0 : i64, scratch_operands = 0 : i64, tpu.core_type = #tpu.core_type<tc>, window_params = [{transform_indices = @transform_0, window_bounds = array<i64: 128, 16>}, {pipeline_mode = #tpu.pipeline_mode<synchronous>, transform_indices = @transform_1, window_bounds = array<i64: 16, 20>}, {pipeline_mode = #tpu.pipeline_mode<synchronous>, transform_indices = @transform_2, window_bounds = array<i64: 1, 20>}, {transform_indices = @transform_3, window_bounds = array<i64: 128, 20>}]} {
    %c0 = arith.constant 0 : index
    %c0_0 = arith.constant 0 : index
    %0 = vector.load %arg1[%c0, %c0_0] : memref<128x16xf32, #tpu.memory_space<vmem>>, vector<128x16xf32>
    %1 = arith.truncf %0 : vector<128x16xf32> to vector<128x16xbf16>
    %c0_1 = arith.constant 0 : index
    %c0_2 = arith.constant 0 : index
    %2 = vector.load %arg2[%c0_1, %c0_2] : memref<16x20xf32, #tpu.memory_space<vmem>>, vector<16x20xf32>
    %3 = arith.truncf %2 : vector<16x20xf32> to vector<16x20xbf16>
    %cst = arith.constant dense<0.000000e+00> : vector<128x20xf32>
    %4 = tpu.matmul %1, %3, %cst {dimension_numbers = #tpu.dot_dimension_numbers<[1], [0], [0], [1], [0, 0, 1, 1], [], []>} : vector<128x16xbf16>, vector<16x20xbf16>, vector<128x20xf32> -> vector<128x20xf32>
    %c0_3 = arith.constant 0 : index
    %c0_4 = arith.constant 0 : index
    %5 = vector.load %arg3[%c0_3, %c0_4] : memref<1x20xf32, #tpu.memory_space<vmem>>, vector<1x20xf32>
    %6 = vector.broadcast %5 : vector<1x20xf32> to vector<128x20xf32>
    %7 = arith.addf %4, %6 : vector<128x20xf32>
    %c0_5 = arith.constant 0 : index
    %c0_6 = arith.constant 0 : index
    %8 = vector.load %arg4[%c0_5, %c0_6] : memref<128x20xf32, #tpu.memory_space<vmem>>, vector<128x20xf32>
    tpu.vector_store %arg4[%c0_5, %c0_6], %7 {strides = array<i32>} : memref<128x20xf32, #tpu.memory_space<vmem>>, vector<128x20xf32>,
    return
  }
  func.func @transform_0(%arg0: i32) -> (i32, i32) {
    %c0_i32 = arith.constant 0 : i32
    %c0_i32_0 = arith.constant 0 : i32
    return %arg0, %c0_i32 : i32, i32
  }
  func.func @transform_1(%arg0: i32) -> (i32, i32) {
    %c0_i32 = arith.constant 0 : i32
    %c0_i32_0 = arith.constant 0 : i32
    %c0_i32_1 = arith.constant 0 : i32
    return %c0_i32, %c0_i32_0 : i32, i32
  }
  func.func @transform_2(%arg0: i32) -> (i32, i32) {
    %c0_i32 = arith.constant 0 : i32
    %c0_i32_0 = arith.constant 0 : i32
    %c0_i32_1 = arith.constant 0 : i32
    return %c0_i32, %c0_i32_0 : i32, i32
  }
  func.func @transform_3(%arg0: i32) -> (i32, i32) {
    %c0_i32 = arith.constant 0 : i32
    %c0_i32_0 = arith.constant 0 : i32
    return %arg0, %c0_i32 : i32, i32
  }
}

module attributes {stable_mosaic.version = 11 : i64} {
  func.func @cc_attn_kernel(%arg0: i32, %arg1: memref<1x8x8x2xf32, #tpu.memory_space<vmem>>, %arg2: memref<1x8x8x2xf32, #tpu.memory_space<vmem>>, %arg3: memref<1x8x8x16xf32, #tpu.memory_space<vmem>>, %arg4: memref<1x8x8x2xf32, #tpu.memory_space<vmem>>, %arg5: memref<1x8x8x2xf32, #tpu.memory_space<vmem>>, %arg6: memref<1x8x8x16xf32, #tpu.memory_space<vmem>>, %arg7: memref<1x8x8x16xf32, #tpu.memory_space<vmem>>, %arg8: memref<1x1xf32, #tpu.memory_space<vmem>>, %arg9: memref<1x8x8x16xf32, #tpu.memory_space<vmem>>, %arg10: memref<1x8x8x16xf32, #tpu.memory_space<vmem>>) attributes {dimension_semantics = [#tpu.dimension_semantics<parallel>], iteration_bounds = array<i64: 2>, scalar_prefetch = 0 : i64, scratch_operands = 0 : i64, tpu.core_type = #tpu.core_type<tc>, window_params = [{transform_indices = @transform_0, window_bounds = array<i64: 1, 8, 8, 2>}, {transform_indices = @transform_1, window_bounds = array<i64: 1, 8, 8, 2>}, {transform_indices = @transform_2, window_bounds = array<i64: 1, 8, 8, 16>}, {transform_indices = @transform_3, window_bounds = array<i64: 1, 8, 8, 2>}, {transform_indices = @transform_4, window_bounds = array<i64: 1, 8, 8, 2>}, {transform_indices = @transform_5, window_bounds = array<i64: 1, 8, 8, 16>}, {transform_indices = @transform_6, window_bounds = array<i64: 1, 8, 8, 16>}, {pipeline_mode = #tpu.pipeline_mode<synchronous>, transform_indices = @transform_7, window_bounds = array<i64: 1, 1>}, {transform_indices = @transform_8, window_bounds = array<i64: 1, 8, 8, 16>}, {transform_indices = @transform_9, window_bounds = array<i64: 1, 8, 8, 16>}]} {
    %c0 = arith.constant 0 : index
    %c0_0 = arith.constant 0 : index
    %c0_1 = arith.constant 0 : index
    %c0_2 = arith.constant 0 : index
    %0 = vector.load %arg1[%c0, %c0_0, %c0_1, %c0_2] : memref<1x8x8x2xf32, #tpu.memory_space<vmem>>, vector<1x8x8x2xf32>
    %1 = vector.shape_cast %0 : vector<1x8x8x2xf32> to vector<8x8x2xf32>
    %2 = arith.truncf %1 : vector<8x8x2xf32> to vector<8x8x2xbf16>
    %c0_3 = arith.constant 0 : index
    %c0_4 = arith.constant 0 : index
    %c0_5 = arith.constant 0 : index
    %c0_6 = arith.constant 0 : index
    %3 = vector.load %arg2[%c0_3, %c0_4, %c0_5, %c0_6] : memref<1x8x8x2xf32, #tpu.memory_space<vmem>>, vector<1x8x8x2xf32>
    %4 = vector.shape_cast %3 : vector<1x8x8x2xf32> to vector<8x8x2xf32>
    %5 = arith.truncf %4 : vector<8x8x2xf32> to vector<8x8x2xbf16>
    %c0_7 = arith.constant 0 : index
    %c0_8 = arith.constant 0 : index
    %c0_9 = arith.constant 0 : index
    %c0_10 = arith.constant 0 : index
    %6 = vector.load %arg3[%c0_7, %c0_8, %c0_9, %c0_10] : memref<1x8x8x16xf32, #tpu.memory_space<vmem>>, vector<1x8x8x16xf32>
    %7 = vector.shape_cast %6 : vector<1x8x8x16xf32> to vector<8x8x16xf32>
    %8 = arith.truncf %7 : vector<8x8x16xf32> to vector<8x8x16xbf16>
    %c0_11 = arith.constant 0 : index
    %c0_12 = arith.constant 0 : index
    %c0_13 = arith.constant 0 : index
    %c0_14 = arith.constant 0 : index
    %9 = vector.load %arg4[%c0_11, %c0_12, %c0_13, %c0_14] : memref<1x8x8x2xf32, #tpu.memory_space<vmem>>, vector<1x8x8x2xf32>
    %10 = vector.shape_cast %9 : vector<1x8x8x2xf32> to vector<8x8x2xf32>
    %11 = arith.truncf %10 : vector<8x8x2xf32> to vector<8x8x2xbf16>
    %c0_15 = arith.constant 0 : index
    %c0_16 = arith.constant 0 : index
    %c0_17 = arith.constant 0 : index
    %c0_18 = arith.constant 0 : index
    %12 = vector.load %arg5[%c0_15, %c0_16, %c0_17, %c0_18] : memref<1x8x8x2xf32, #tpu.memory_space<vmem>>, vector<1x8x8x2xf32>
    %13 = vector.shape_cast %12 : vector<1x8x8x2xf32> to vector<8x8x2xf32>
    %14 = arith.truncf %13 : vector<8x8x2xf32> to vector<8x8x2xbf16>
    %c0_19 = arith.constant 0 : index
    %c0_20 = arith.constant 0 : index
    %c0_21 = arith.constant 0 : index
    %c0_22 = arith.constant 0 : index
    %15 = vector.load %arg6[%c0_19, %c0_20, %c0_21, %c0_22] : memref<1x8x8x16xf32, #tpu.memory_space<vmem>>, vector<1x8x8x16xf32>
    %16 = vector.shape_cast %15 : vector<1x8x8x16xf32> to vector<8x8x16xf32>
    %17 = arith.truncf %16 : vector<8x8x16xf32> to vector<8x8x16xbf16>
    %c0_23 = arith.constant 0 : index
    %c0_24 = arith.constant 0 : index
    %c0_25 = arith.constant 0 : index
    %c0_26 = arith.constant 0 : index
    %18 = vector.load %arg7[%c0_23, %c0_24, %c0_25, %c0_26] : memref<1x8x8x16xf32, #tpu.memory_space<vmem>>, vector<1x8x8x16xf32>
    %19 = vector.shape_cast %18 : vector<1x8x8x16xf32> to vector<8x8x16xf32>
    %c0_27 = arith.constant 0 : index
    %c0_28 = arith.constant 0 : index
    %20 = vector.load %arg8[%c0_27, %c0_28] : memref<1x1xf32, #tpu.memory_space<vmem>>, vector<1x1xf32>
    %21 = vector.extract %20[0, 0] : f32 from vector<1x1xf32>
    %cst = arith.constant dense<0.000000e+00> : vector<8x8x8xf32>
    %22 = tpu.matmul %11, %14, %cst {dimension_numbers = #tpu.dot_dimension_numbers<[2], [2], [1], [1], [0, 0, 0, 1, 1, 1], [0], [0]>} : vector<8x8x2xbf16>, vector<8x8x2xbf16>, vector<8x8x8xf32> -> vector<8x8x8xf32>
    %23 = tpu.iota {dimensions = array<i32: 1>} : vector<1x8x8xi32>
    %24 = tpu.iota {dimensions = array<i32: 2>} : vector<1x8x8xi32>
    %25 = arith.cmpi eq, %23, %24 : vector<1x8x8xi32>
    %cst_29 = arith.constant -1.000000e+30 : f32
    %26 = vector.shape_cast %25 : vector<1x8x8xi1> to vector<1x8x8xi1>
    %27 = vector.broadcast %26 : vector<1x8x8xi1> to vector<8x8x8xi1>
    %28 = vector.broadcast %cst_29 : f32 to vector<8x8x8xf32>
    %29 = arith.select %27, %28, %22 : vector<8x8x8xi1>, vector<8x8x8xf32>
    %cst_30 = arith.constant dense<0.000000e+00> : vector<8x8x8xf32>
    %30 = tpu.matmul %2, %5, %cst_30 {dimension_numbers = #tpu.dot_dimension_numbers<[2], [2], [1], [1], [0, 0, 0, 1, 1, 1], [0], [0]>} : vector<8x8x2xbf16>, vector<8x8x2xbf16>, vector<8x8x8xf32> -> vector<8x8x8xf32>
    %cst_31 = arith.constant dense<0xFF800000> : vector<8x8xf32>
    %31 = vector.multi_reduction <maximumf>, %29, %cst_31 [2] : vector<8x8x8xf32> to vector<8x8xf32>
    %cst_32 = arith.constant dense<0xFF800000> : vector<8x8xf32>
    %32 = vector.multi_reduction <maximumf>, %30, %cst_32 [2] : vector<8x8x8xf32> to vector<8x8xf32>
    %33 = tpu.transpose %31, [1, 0] : vector<8x8xf32> -> vector<8x8xf32>
    %34 = arith.maximumf %33, %32 : vector<8x8xf32>
    %35 = tpu.transpose %34, [1, 0] : vector<8x8xf32> -> vector<8x8xf32>
    %36 = vector.shape_cast %35 : vector<8x8xf32> to vector<8x8x1xf32>
    %37 = vector.broadcast %36 : vector<8x8x1xf32> to vector<8x8x8xf32>
    %38 = arith.subf %29, %37 : vector<8x8x8xf32>
    %39 = math.exp %38 : vector<8x8x8xf32>
    %40 = vector.shape_cast %34 : vector<8x8xf32> to vector<8x8x1xf32>
    %41 = vector.broadcast %40 : vector<8x8x1xf32> to vector<8x8x8xf32>
    %42 = arith.subf %30, %41 : vector<8x8x8xf32>
    %43 = math.exp %42 : vector<8x8x8xf32>
    %cst_33 = arith.constant dense<0.000000e+00> : vector<8x8xf32>
    %44 = vector.multi_reduction <add>, %39, %cst_33 [2] : vector<8x8x8xf32> to vector<8x8xf32>
    %45 = tpu.transpose %44, [1, 0] : vector<8x8xf32> -> vector<8x8xf32>
    %cst_34 = arith.constant dense<0.000000e+00> : vector<8x8xf32>
    %46 = vector.multi_reduction <add>, %43, %cst_34 [2] : vector<8x8x8xf32> to vector<8x8xf32>
    %47 = arith.addf %45, %46 : vector<8x8xf32>
    %48 = tpu.reciprocal %47 {approx = true} : vector<8x8xf32> -> vector<8x8xf32>
    %49 = tpu.transpose %48, [1, 0] : vector<8x8xf32> -> vector<8x8xf32>
    %50 = vector.shape_cast %49 : vector<8x8xf32> to vector<8x8x1xf32>
    %51 = vector.broadcast %50 : vector<8x8x1xf32> to vector<8x8x8xf32>
    %52 = arith.mulf %39, %51 : vector<8x8x8xf32>
    %53 = arith.truncf %52 : vector<8x8x8xf32> to vector<8x8x8xbf16>
    %54 = vector.shape_cast %48 : vector<8x8xf32> to vector<8x8x1xf32>
    %55 = vector.broadcast %54 : vector<8x8x1xf32> to vector<8x8x8xf32>
    %56 = arith.mulf %43, %55 : vector<8x8x8xf32>
    %57 = arith.truncf %56 : vector<8x8x8xf32> to vector<8x8x8xbf16>
    %cst_35 = arith.constant dense<0.000000e+00> : vector<8x8x16xf32>
    %58 = tpu.matmul %53, %17, %cst_35 {dimension_numbers = #tpu.dot_dimension_numbers<[2], [1], [1], [2], [0, 0, 0, 1, 1, 2], [0], [0]>} : vector<8x8x8xbf16>, vector<8x8x16xbf16>, vector<8x8x16xf32> -> vector<8x8x16xf32>
    %cst_36 = arith.constant dense<0.000000e+00> : vector<8x8x16xf32>
    %59 = tpu.matmul %57, %8, %cst_36 {dimension_numbers = #tpu.dot_dimension_numbers<[2], [1], [1], [2], [0, 0, 0, 1, 1, 2], [0], [0]>} : vector<8x8x8xbf16>, vector<8x8x16xbf16>, vector<8x8x16xf32> -> vector<8x8x16xf32>
    %60 = vector.broadcast %21 : f32 to vector<8x8x16xf32>
    %61 = arith.mulf %60, %59 : vector<8x8x16xf32>
    %62 = arith.addf %61, %19 : vector<8x8x16xf32>
    %c0_37 = arith.constant 0 : index
    %c0_38 = arith.constant 0 : index
    %c0_39 = arith.constant 0 : index
    %c0_40 = arith.constant 0 : index
    %63 = vector.load %arg9[%c0_37, %c0_38, %c0_39, %c0_40] : memref<1x8x8x16xf32, #tpu.memory_space<vmem>>, vector<1x8x8x16xf32>
    %64 = vector.shape_cast %63 : vector<1x8x8x16xf32> to vector<8x8x16xf32>
    %65 = vector.shape_cast %62 : vector<8x8x16xf32> to vector<1x8x8x16xf32>
    tpu.vector_store %arg9[%c0_37, %c0_38, %c0_39, %c0_40], %65 {strides = array<i32>} : memref<1x8x8x16xf32, #tpu.memory_space<vmem>>, vector<1x8x8x16xf32>,
    %66 = vector.broadcast %21 : f32 to vector<8x8x16xf32>
    %67 = arith.mulf %66, %58 : vector<8x8x16xf32>
    %c0_41 = arith.constant 0 : index
    %c0_42 = arith.constant 0 : index
    %c0_43 = arith.constant 0 : index
    %c0_44 = arith.constant 0 : index
    %68 = vector.load %arg10[%c0_41, %c0_42, %c0_43, %c0_44] : memref<1x8x8x16xf32, #tpu.memory_space<vmem>>, vector<1x8x8x16xf32>
    %69 = vector.shape_cast %68 : vector<1x8x8x16xf32> to vector<8x8x16xf32>
    %70 = vector.shape_cast %67 : vector<8x8x16xf32> to vector<1x8x8x16xf32>
    tpu.vector_store %arg10[%c0_41, %c0_42, %c0_43, %c0_44], %70 {strides = array<i32>} : memref<1x8x8x16xf32, #tpu.memory_space<vmem>>, vector<1x8x8x16xf32>,
    return
  }
  func.func @transform_0(%arg0: i32) -> (i32, i32, i32, i32) {
    %c0_i32 = arith.constant 0 : i32
    %c0_i32_0 = arith.constant 0 : i32
    %c0_i32_1 = arith.constant 0 : i32
    %c0_i32_2 = arith.constant 0 : i32
    return %arg0, %c0_i32, %c0_i32_0, %c0_i32_1 : i32, i32, i32, i32
  }
  func.func @transform_1(%arg0: i32) -> (i32, i32, i32, i32) {
    %c0_i32 = arith.constant 0 : i32
    %c0_i32_0 = arith.constant 0 : i32
    %c0_i32_1 = arith.constant 0 : i32
    %c0_i32_2 = arith.constant 0 : i32
    return %arg0, %c0_i32, %c0_i32_0, %c0_i32_1 : i32, i32, i32, i32
  }
  func.func @transform_2(%arg0: i32) -> (i32, i32, i32, i32) {
    %c0_i32 = arith.constant 0 : i32
    %c0_i32_0 = arith.constant 0 : i32
    %c0_i32_1 = arith.constant 0 : i32
    %c0_i32_2 = arith.constant 0 : i32
    return %arg0, %c0_i32, %c0_i32_0, %c0_i32_1 : i32, i32, i32, i32
  }
  func.func @transform_3(%arg0: i32) -> (i32, i32, i32, i32) {
    %c0_i32 = arith.constant 0 : i32
    %c0_i32_0 = arith.constant 0 : i32
    %c0_i32_1 = arith.constant 0 : i32
    %c0_i32_2 = arith.constant 0 : i32
    return %arg0, %c0_i32, %c0_i32_0, %c0_i32_1 : i32, i32, i32, i32
  }
  func.func @transform_4(%arg0: i32) -> (i32, i32, i32, i32) {
    %c0_i32 = arith.constant 0 : i32
    %c0_i32_0 = arith.constant 0 : i32
    %c0_i32_1 = arith.constant 0 : i32
    %c0_i32_2 = arith.constant 0 : i32
    return %arg0, %c0_i32, %c0_i32_0, %c0_i32_1 : i32, i32, i32, i32
  }
  func.func @transform_5(%arg0: i32) -> (i32, i32, i32, i32) {
    %c0_i32 = arith.constant 0 : i32
    %c0_i32_0 = arith.constant 0 : i32
    %c0_i32_1 = arith.constant 0 : i32
    %c0_i32_2 = arith.constant 0 : i32
    return %arg0, %c0_i32, %c0_i32_0, %c0_i32_1 : i32, i32, i32, i32
  }
  func.func @transform_6(%arg0: i32) -> (i32, i32, i32, i32) {
    %c0_i32 = arith.constant 0 : i32
    %c0_i32_0 = arith.constant 0 : i32
    %c0_i32_1 = arith.constant 0 : i32
    %c0_i32_2 = arith.constant 0 : i32
    return %arg0, %c0_i32, %c0_i32_0, %c0_i32_1 : i32, i32, i32, i32
  }
  func.func @transform_7(%arg0: i32) -> (i32, i32) {
    %c0_i32 = arith.constant 0 : i32
    %c0_i32_0 = arith.constant 0 : i32
    %c0_i32_1 = arith.constant 0 : i32
    return %c0_i32, %c0_i32_0 : i32, i32
  }
  func.func @transform_8(%arg0: i32) -> (i32, i32, i32, i32) {
    %c0_i32 = arith.constant 0 : i32
    %c0_i32_0 = arith.constant 0 : i32
    %c0_i32_1 = arith.constant 0 : i32
    %c0_i32_2 = arith.constant 0 : i32
    return %arg0, %c0_i32, %c0_i32_0, %c0_i32_1 : i32, i32, i32, i32
  }
  func.func @transform_9(%arg0: i32) -> (i32, i32, i32, i32) {
    %c0_i32 = arith.constant 0 : i32
    %c0_i32_0 = arith.constant 0 : i32
    %c0_i32_1 = arith.constant 0 : i32
    %c0_i32_2 = arith.constant 0 : i32
    return %arg0, %c0_i32, %c0_i32_0, %c0_i32_1 : i32, i32, i32, i32
  }
}

module attributes {stable_mosaic.version = 11 : i64} {
  func.func @conv5x5_kernel(%arg0: i32, %arg1: memref<1x12x12x16xf32, #tpu.memory_space<vmem>>, %arg2: memref<5x80x16xf32, #tpu.memory_space<vmem>>, %arg3: memref<1x16xf32, #tpu.memory_space<vmem>>, %arg4: memref<1x8x8x16xf32, #tpu.memory_space<vmem>>) attributes {dimension_semantics = [#tpu.dimension_semantics<parallel>], iteration_bounds = array<i64: 2>, scalar_prefetch = 0 : i64, scratch_operands = 0 : i64, tpu.core_type = #tpu.core_type<tc>, window_params = [{transform_indices = @transform_0, window_bounds = array<i64: 1, 12, 12, 16>}, {pipeline_mode = #tpu.pipeline_mode<synchronous>, transform_indices = @transform_1, window_bounds = array<i64: 5, 80, 16>}, {pipeline_mode = #tpu.pipeline_mode<synchronous>, transform_indices = @transform_2, window_bounds = array<i64: 1, 16>}, {transform_indices = @transform_3, window_bounds = array<i64: 1, 8, 8, 16>}]} {
    %c0 = arith.constant 0 : index
    %c0_0 = arith.constant 0 : index
    %c0_1 = arith.constant 0 : index
    %c0_2 = arith.constant 0 : index
    %0 = vector.load %arg1[%c0, %c0_0, %c0_1, %c0_2] : memref<1x12x12x16xf32, #tpu.memory_space<vmem>>, vector<1x12x12x16xf32>
    %1 = vector.shape_cast %0 : vector<1x12x12x16xf32> to vector<12x12x16xf32>
    %2 = arith.truncf %1 : vector<12x12x16xf32> to vector<12x12x16xbf16>
    %cst = arith.constant 0.000000e+00 : f32
    %3 = vector.broadcast %cst : f32 to vector<64x16xf32>
    %c0_3 = arith.constant 0 : index
    %c0_4 = arith.constant 0 : index
    %c0_5 = arith.constant 0 : index
    %4 = vector.load %arg2[%c0_3, %c0_4, %c0_5] : memref<5x80x16xf32, #tpu.memory_space<vmem>>, vector<1x80x16xf32>
    %5 = vector.shape_cast %4 : vector<1x80x16xf32> to vector<80x16xf32>
    %6 = arith.truncf %5 : vector<80x16xf32> to vector<80x16xbf16>
    %7 = vector.extract_strided_slice %2 {offsets = [0, 0, 0], sizes = [8, 8, 16], strides = [1, 1, 1]} : vector<12x12x16xbf16> to vector<8x8x16xbf16>
    %8 = vector.shape_cast %7 : vector<8x8x16xbf16> to vector<64x16xbf16>
    %9 = vector.extract_strided_slice %6 {offsets = [0, 0], sizes = [16, 16], strides = [1, 1]} : vector<80x16xbf16> to vector<16x16xbf16>
    %cst_6 = arith.constant dense<0.000000e+00> : vector<64x16xf32>
    %10 = tpu.matmul %8, %9, %cst_6 {dimension_numbers = #tpu.dot_dimension_numbers<[1], [0], [0], [1], [0, 0, 1, 1], [], []>} : vector<64x16xbf16>, vector<16x16xbf16>, vector<64x16xf32> -> vector<64x16xf32>
    %11 = arith.addf %3, %10 : vector<64x16xf32>
    %12 = vector.extract_strided_slice %2 {offsets = [0, 1, 0], sizes = [8, 8, 16], strides = [1, 1, 1]} : vector<12x12x16xbf16> to vector<8x8x16xbf16>
    %13 = vector.shape_cast %12 : vector<8x8x16xbf16> to vector<64x16xbf16>
    %14 = vector.extract_strided_slice %6 {offsets = [16, 0], sizes = [16, 16], strides = [1, 1]} : vector<80x16xbf16> to vector<16x16xbf16>
    %cst_7 = arith.constant dense<0.000000e+00> : vector<64x16xf32>
    %15 = tpu.matmul %13, %14, %cst_7 {dimension_numbers = #tpu.dot_dimension_numbers<[1], [0], [0], [1], [0, 0, 1, 1], [], []>} : vector<64x16xbf16>, vector<16x16xbf16>, vector<64x16xf32> -> vector<64x16xf32>
    %16 = arith.addf %11, %15 : vector<64x16xf32>
    %17 = vector.extract_strided_slice %2 {offsets = [0, 2, 0], sizes = [8, 8, 16], strides = [1, 1, 1]} : vector<12x12x16xbf16> to vector<8x8x16xbf16>
    %18 = vector.shape_cast %17 : vector<8x8x16xbf16> to vector<64x16xbf16>
    %19 = vector.extract_strided_slice %6 {offsets = [32, 0], sizes = [16, 16], strides = [1, 1]} : vector<80x16xbf16> to vector<16x16xbf16>
    %cst_8 = arith.constant dense<0.000000e+00> : vector<64x16xf32>
    %20 = tpu.matmul %18, %19, %cst_8 {dimension_numbers = #tpu.dot_dimension_numbers<[1], [0], [0], [1], [0, 0, 1, 1], [], []>} : vector<64x16xbf16>, vector<16x16xbf16>, vector<64x16xf32> -> vector<64x16xf32>
    %21 = arith.addf %16, %20 : vector<64x16xf32>
    %22 = vector.extract_strided_slice %2 {offsets = [0, 3, 0], sizes = [8, 8, 16], strides = [1, 1, 1]} : vector<12x12x16xbf16> to vector<8x8x16xbf16>
    %23 = vector.shape_cast %22 : vector<8x8x16xbf16> to vector<64x16xbf16>
    %24 = vector.extract_strided_slice %6 {offsets = [48, 0], sizes = [16, 16], strides = [1, 1]} : vector<80x16xbf16> to vector<16x16xbf16>
    %cst_9 = arith.constant dense<0.000000e+00> : vector<64x16xf32>
    %25 = tpu.matmul %23, %24, %cst_9 {dimension_numbers = #tpu.dot_dimension_numbers<[1], [0], [0], [1], [0, 0, 1, 1], [], []>} : vector<64x16xbf16>, vector<16x16xbf16>, vector<64x16xf32> -> vector<64x16xf32>
    %26 = arith.addf %21, %25 : vector<64x16xf32>
    %27 = vector.extract_strided_slice %2 {offsets = [0, 4, 0], sizes = [8, 8, 16], strides = [1, 1, 1]} : vector<12x12x16xbf16> to vector<8x8x16xbf16>
    %28 = vector.shape_cast %27 : vector<8x8x16xbf16> to vector<64x16xbf16>
    %29 = vector.extract_strided_slice %6 {offsets = [64, 0], sizes = [16, 16], strides = [1, 1]} : vector<80x16xbf16> to vector<16x16xbf16>
    %cst_10 = arith.constant dense<0.000000e+00> : vector<64x16xf32>
    %30 = tpu.matmul %28, %29, %cst_10 {dimension_numbers = #tpu.dot_dimension_numbers<[1], [0], [0], [1], [0, 0, 1, 1], [], []>} : vector<64x16xbf16>, vector<16x16xbf16>, vector<64x16xf32> -> vector<64x16xf32>
    %31 = arith.addf %26, %30 : vector<64x16xf32>
    %c1 = arith.constant 1 : index
    %c0_11 = arith.constant 0 : index
    %c0_12 = arith.constant 0 : index
    %32 = vector.load %arg2[%c1, %c0_11, %c0_12] : memref<5x80x16xf32, #tpu.memory_space<vmem>>, vector<1x80x16xf32>
    %33 = vector.shape_cast %32 : vector<1x80x16xf32> to vector<80x16xf32>
    %34 = arith.truncf %33 : vector<80x16xf32> to vector<80x16xbf16>
    %35 = vector.extract_strided_slice %2 {offsets = [1, 0, 0], sizes = [8, 8, 16], strides = [1, 1, 1]} : vector<12x12x16xbf16> to vector<8x8x16xbf16>
    %36 = vector.shape_cast %35 : vector<8x8x16xbf16> to vector<64x16xbf16>
    %37 = vector.extract_strided_slice %34 {offsets = [0, 0], sizes = [16, 16], strides = [1, 1]} : vector<80x16xbf16> to vector<16x16xbf16>
    %cst_13 = arith.constant dense<0.000000e+00> : vector<64x16xf32>
    %38 = tpu.matmul %36, %37, %cst_13 {dimension_numbers = #tpu.dot_dimension_numbers<[1], [0], [0], [1], [0, 0, 1, 1], [], []>} : vector<64x16xbf16>, vector<16x16xbf16>, vector<64x16xf32> -> vector<64x16xf32>
    %39 = arith.addf %31, %38 : vector<64x16xf32>
    %40 = vector.extract_strided_slice %2 {offsets = [1, 1, 0], sizes = [8, 8, 16], strides = [1, 1, 1]} : vector<12x12x16xbf16> to vector<8x8x16xbf16>
    %41 = vector.shape_cast %40 : vector<8x8x16xbf16> to vector<64x16xbf16>
    %42 = vector.extract_strided_slice %34 {offsets = [16, 0], sizes = [16, 16], strides = [1, 1]} : vector<80x16xbf16> to vector<16x16xbf16>
    %cst_14 = arith.constant dense<0.000000e+00> : vector<64x16xf32>
    %43 = tpu.matmul %41, %42, %cst_14 {dimension_numbers = #tpu.dot_dimension_numbers<[1], [0], [0], [1], [0, 0, 1, 1], [], []>} : vector<64x16xbf16>, vector<16x16xbf16>, vector<64x16xf32> -> vector<64x16xf32>
    %44 = arith.addf %39, %43 : vector<64x16xf32>
    %45 = vector.extract_strided_slice %2 {offsets = [1, 2, 0], sizes = [8, 8, 16], strides = [1, 1, 1]} : vector<12x12x16xbf16> to vector<8x8x16xbf16>
    %46 = vector.shape_cast %45 : vector<8x8x16xbf16> to vector<64x16xbf16>
    %47 = vector.extract_strided_slice %34 {offsets = [32, 0], sizes = [16, 16], strides = [1, 1]} : vector<80x16xbf16> to vector<16x16xbf16>
    %cst_15 = arith.constant dense<0.000000e+00> : vector<64x16xf32>
    %48 = tpu.matmul %46, %47, %cst_15 {dimension_numbers = #tpu.dot_dimension_numbers<[1], [0], [0], [1], [0, 0, 1, 1], [], []>} : vector<64x16xbf16>, vector<16x16xbf16>, vector<64x16xf32> -> vector<64x16xf32>
    %49 = arith.addf %44, %48 : vector<64x16xf32>
    %50 = vector.extract_strided_slice %2 {offsets = [1, 3, 0], sizes = [8, 8, 16], strides = [1, 1, 1]} : vector<12x12x16xbf16> to vector<8x8x16xbf16>
    %51 = vector.shape_cast %50 : vector<8x8x16xbf16> to vector<64x16xbf16>
    %52 = vector.extract_strided_slice %34 {offsets = [48, 0], sizes = [16, 16], strides = [1, 1]} : vector<80x16xbf16> to vector<16x16xbf16>
    %cst_16 = arith.constant dense<0.000000e+00> : vector<64x16xf32>
    %53 = tpu.matmul %51, %52, %cst_16 {dimension_numbers = #tpu.dot_dimension_numbers<[1], [0], [0], [1], [0, 0, 1, 1], [], []>} : vector<64x16xbf16>, vector<16x16xbf16>, vector<64x16xf32> -> vector<64x16xf32>
    %54 = arith.addf %49, %53 : vector<64x16xf32>
    %55 = vector.extract_strided_slice %2 {offsets = [1, 4, 0], sizes = [8, 8, 16], strides = [1, 1, 1]} : vector<12x12x16xbf16> to vector<8x8x16xbf16>
    %56 = vector.shape_cast %55 : vector<8x8x16xbf16> to vector<64x16xbf16>
    %57 = vector.extract_strided_slice %34 {offsets = [64, 0], sizes = [16, 16], strides = [1, 1]} : vector<80x16xbf16> to vector<16x16xbf16>
    %cst_17 = arith.constant dense<0.000000e+00> : vector<64x16xf32>
    %58 = tpu.matmul %56, %57, %cst_17 {dimension_numbers = #tpu.dot_dimension_numbers<[1], [0], [0], [1], [0, 0, 1, 1], [], []>} : vector<64x16xbf16>, vector<16x16xbf16>, vector<64x16xf32> -> vector<64x16xf32>
    %59 = arith.addf %54, %58 : vector<64x16xf32>
    %c2 = arith.constant 2 : index
    %c0_18 = arith.constant 0 : index
    %c0_19 = arith.constant 0 : index
    %60 = vector.load %arg2[%c2, %c0_18, %c0_19] : memref<5x80x16xf32, #tpu.memory_space<vmem>>, vector<1x80x16xf32>
    %61 = vector.shape_cast %60 : vector<1x80x16xf32> to vector<80x16xf32>
    %62 = arith.truncf %61 : vector<80x16xf32> to vector<80x16xbf16>
    %63 = vector.extract_strided_slice %2 {offsets = [2, 0, 0], sizes = [8, 8, 16], strides = [1, 1, 1]} : vector<12x12x16xbf16> to vector<8x8x16xbf16>
    %64 = vector.shape_cast %63 : vector<8x8x16xbf16> to vector<64x16xbf16>
    %65 = vector.extract_strided_slice %62 {offsets = [0, 0], sizes = [16, 16], strides = [1, 1]} : vector<80x16xbf16> to vector<16x16xbf16>
    %cst_20 = arith.constant dense<0.000000e+00> : vector<64x16xf32>
    %66 = tpu.matmul %64, %65, %cst_20 {dimension_numbers = #tpu.dot_dimension_numbers<[1], [0], [0], [1], [0, 0, 1, 1], [], []>} : vector<64x16xbf16>, vector<16x16xbf16>, vector<64x16xf32> -> vector<64x16xf32>
    %67 = arith.addf %59, %66 : vector<64x16xf32>
    %68 = vector.extract_strided_slice %2 {offsets = [2, 1, 0], sizes = [8, 8, 16], strides = [1, 1, 1]} : vector<12x12x16xbf16> to vector<8x8x16xbf16>
    %69 = vector.shape_cast %68 : vector<8x8x16xbf16> to vector<64x16xbf16>
    %70 = vector.extract_strided_slice %62 {offsets = [16, 0], sizes = [16, 16], strides = [1, 1]} : vector<80x16xbf16> to vector<16x16xbf16>
    %cst_21 = arith.constant dense<0.000000e+00> : vector<64x16xf32>
    %71 = tpu.matmul %69, %70, %cst_21 {dimension_numbers = #tpu.dot_dimension_numbers<[1], [0], [0], [1], [0, 0, 1, 1], [], []>} : vector<64x16xbf16>, vector<16x16xbf16>, vector<64x16xf32> -> vector<64x16xf32>
    %72 = arith.addf %67, %71 : vector<64x16xf32>
    %73 = vector.extract_strided_slice %2 {offsets = [2, 2, 0], sizes = [8, 8, 16], strides = [1, 1, 1]} : vector<12x12x16xbf16> to vector<8x8x16xbf16>
    %74 = vector.shape_cast %73 : vector<8x8x16xbf16> to vector<64x16xbf16>
    %75 = vector.extract_strided_slice %62 {offsets = [32, 0], sizes = [16, 16], strides = [1, 1]} : vector<80x16xbf16> to vector<16x16xbf16>
    %cst_22 = arith.constant dense<0.000000e+00> : vector<64x16xf32>
    %76 = tpu.matmul %74, %75, %cst_22 {dimension_numbers = #tpu.dot_dimension_numbers<[1], [0], [0], [1], [0, 0, 1, 1], [], []>} : vector<64x16xbf16>, vector<16x16xbf16>, vector<64x16xf32> -> vector<64x16xf32>
    %77 = arith.addf %72, %76 : vector<64x16xf32>
    %78 = vector.extract_strided_slice %2 {offsets = [2, 3, 0], sizes = [8, 8, 16], strides = [1, 1, 1]} : vector<12x12x16xbf16> to vector<8x8x16xbf16>
    %79 = vector.shape_cast %78 : vector<8x8x16xbf16> to vector<64x16xbf16>
    %80 = vector.extract_strided_slice %62 {offsets = [48, 0], sizes = [16, 16], strides = [1, 1]} : vector<80x16xbf16> to vector<16x16xbf16>
    %cst_23 = arith.constant dense<0.000000e+00> : vector<64x16xf32>
    %81 = tpu.matmul %79, %80, %cst_23 {dimension_numbers = #tpu.dot_dimension_numbers<[1], [0], [0], [1], [0, 0, 1, 1], [], []>} : vector<64x16xbf16>, vector<16x16xbf16>, vector<64x16xf32> -> vector<64x16xf32>
    %82 = arith.addf %77, %81 : vector<64x16xf32>
    %83 = vector.extract_strided_slice %2 {offsets = [2, 4, 0], sizes = [8, 8, 16], strides = [1, 1, 1]} : vector<12x12x16xbf16> to vector<8x8x16xbf16>
    %84 = vector.shape_cast %83 : vector<8x8x16xbf16> to vector<64x16xbf16>
    %85 = vector.extract_strided_slice %62 {offsets = [64, 0], sizes = [16, 16], strides = [1, 1]} : vector<80x16xbf16> to vector<16x16xbf16>
    %cst_24 = arith.constant dense<0.000000e+00> : vector<64x16xf32>
    %86 = tpu.matmul %84, %85, %cst_24 {dimension_numbers = #tpu.dot_dimension_numbers<[1], [0], [0], [1], [0, 0, 1, 1], [], []>} : vector<64x16xbf16>, vector<16x16xbf16>, vector<64x16xf32> -> vector<64x16xf32>
    %87 = arith.addf %82, %86 : vector<64x16xf32>
    %c3 = arith.constant 3 : index
    %c0_25 = arith.constant 0 : index
    %c0_26 = arith.constant 0 : index
    %88 = vector.load %arg2[%c3, %c0_25, %c0_26] : memref<5x80x16xf32, #tpu.memory_space<vmem>>, vector<1x80x16xf32>
    %89 = vector.shape_cast %88 : vector<1x80x16xf32> to vector<80x16xf32>
    %90 = arith.truncf %89 : vector<80x16xf32> to vector<80x16xbf16>
    %91 = vector.extract_strided_slice %2 {offsets = [3, 0, 0], sizes = [8, 8, 16], strides = [1, 1, 1]} : vector<12x12x16xbf16> to vector<8x8x16xbf16>
    %92 = vector.shape_cast %91 : vector<8x8x16xbf16> to vector<64x16xbf16>
    %93 = vector.extract_strided_slice %90 {offsets = [0, 0], sizes = [16, 16], strides = [1, 1]} : vector<80x16xbf16> to vector<16x16xbf16>
    %cst_27 = arith.constant dense<0.000000e+00> : vector<64x16xf32>
    %94 = tpu.matmul %92, %93, %cst_27 {dimension_numbers = #tpu.dot_dimension_numbers<[1], [0], [0], [1], [0, 0, 1, 1], [], []>} : vector<64x16xbf16>, vector<16x16xbf16>, vector<64x16xf32> -> vector<64x16xf32>
    %95 = arith.addf %87, %94 : vector<64x16xf32>
    %96 = vector.extract_strided_slice %2 {offsets = [3, 1, 0], sizes = [8, 8, 16], strides = [1, 1, 1]} : vector<12x12x16xbf16> to vector<8x8x16xbf16>
    %97 = vector.shape_cast %96 : vector<8x8x16xbf16> to vector<64x16xbf16>
    %98 = vector.extract_strided_slice %90 {offsets = [16, 0], sizes = [16, 16], strides = [1, 1]} : vector<80x16xbf16> to vector<16x16xbf16>
    %cst_28 = arith.constant dense<0.000000e+00> : vector<64x16xf32>
    %99 = tpu.matmul %97, %98, %cst_28 {dimension_numbers = #tpu.dot_dimension_numbers<[1], [0], [0], [1], [0, 0, 1, 1], [], []>} : vector<64x16xbf16>, vector<16x16xbf16>, vector<64x16xf32> -> vector<64x16xf32>
    %100 = arith.addf %95, %99 : vector<64x16xf32>
    %101 = vector.extract_strided_slice %2 {offsets = [3, 2, 0], sizes = [8, 8, 16], strides = [1, 1, 1]} : vector<12x12x16xbf16> to vector<8x8x16xbf16>
    %102 = vector.shape_cast %101 : vector<8x8x16xbf16> to vector<64x16xbf16>
    %103 = vector.extract_strided_slice %90 {offsets = [32, 0], sizes = [16, 16], strides = [1, 1]} : vector<80x16xbf16> to vector<16x16xbf16>
    %cst_29 = arith.constant dense<0.000000e+00> : vector<64x16xf32>
    %104 = tpu.matmul %102, %103, %cst_29 {dimension_numbers = #tpu.dot_dimension_numbers<[1], [0], [0], [1], [0, 0, 1, 1], [], []>} : vector<64x16xbf16>, vector<16x16xbf16>, vector<64x16xf32> -> vector<64x16xf32>
    %105 = arith.addf %100, %104 : vector<64x16xf32>
    %106 = vector.extract_strided_slice %2 {offsets = [3, 3, 0], sizes = [8, 8, 16], strides = [1, 1, 1]} : vector<12x12x16xbf16> to vector<8x8x16xbf16>
    %107 = vector.shape_cast %106 : vector<8x8x16xbf16> to vector<64x16xbf16>
    %108 = vector.extract_strided_slice %90 {offsets = [48, 0], sizes = [16, 16], strides = [1, 1]} : vector<80x16xbf16> to vector<16x16xbf16>
    %cst_30 = arith.constant dense<0.000000e+00> : vector<64x16xf32>
    %109 = tpu.matmul %107, %108, %cst_30 {dimension_numbers = #tpu.dot_dimension_numbers<[1], [0], [0], [1], [0, 0, 1, 1], [], []>} : vector<64x16xbf16>, vector<16x16xbf16>, vector<64x16xf32> -> vector<64x16xf32>
    %110 = arith.addf %105, %109 : vector<64x16xf32>
    %111 = vector.extract_strided_slice %2 {offsets = [3, 4, 0], sizes = [8, 8, 16], strides = [1, 1, 1]} : vector<12x12x16xbf16> to vector<8x8x16xbf16>
    %112 = vector.shape_cast %111 : vector<8x8x16xbf16> to vector<64x16xbf16>
    %113 = vector.extract_strided_slice %90 {offsets = [64, 0], sizes = [16, 16], strides = [1, 1]} : vector<80x16xbf16> to vector<16x16xbf16>
    %cst_31 = arith.constant dense<0.000000e+00> : vector<64x16xf32>
    %114 = tpu.matmul %112, %113, %cst_31 {dimension_numbers = #tpu.dot_dimension_numbers<[1], [0], [0], [1], [0, 0, 1, 1], [], []>} : vector<64x16xbf16>, vector<16x16xbf16>, vector<64x16xf32> -> vector<64x16xf32>
    %115 = arith.addf %110, %114 : vector<64x16xf32>
    %c4 = arith.constant 4 : index
    %c0_32 = arith.constant 0 : index
    %c0_33 = arith.constant 0 : index
    %116 = vector.load %arg2[%c4, %c0_32, %c0_33] : memref<5x80x16xf32, #tpu.memory_space<vmem>>, vector<1x80x16xf32>
    %117 = vector.shape_cast %116 : vector<1x80x16xf32> to vector<80x16xf32>
    %118 = arith.truncf %117 : vector<80x16xf32> to vector<80x16xbf16>
    %119 = vector.extract_strided_slice %2 {offsets = [4, 0, 0], sizes = [8, 8, 16], strides = [1, 1, 1]} : vector<12x12x16xbf16> to vector<8x8x16xbf16>
    %120 = vector.shape_cast %119 : vector<8x8x16xbf16> to vector<64x16xbf16>
    %121 = vector.extract_strided_slice %118 {offsets = [0, 0], sizes = [16, 16], strides = [1, 1]} : vector<80x16xbf16> to vector<16x16xbf16>
    %cst_34 = arith.constant dense<0.000000e+00> : vector<64x16xf32>
    %122 = tpu.matmul %120, %121, %cst_34 {dimension_numbers = #tpu.dot_dimension_numbers<[1], [0], [0], [1], [0, 0, 1, 1], [], []>} : vector<64x16xbf16>, vector<16x16xbf16>, vector<64x16xf32> -> vector<64x16xf32>
    %123 = arith.addf %115, %122 : vector<64x16xf32>
    %124 = vector.extract_strided_slice %2 {offsets = [4, 1, 0], sizes = [8, 8, 16], strides = [1, 1, 1]} : vector<12x12x16xbf16> to vector<8x8x16xbf16>
    %125 = vector.shape_cast %124 : vector<8x8x16xbf16> to vector<64x16xbf16>
    %126 = vector.extract_strided_slice %118 {offsets = [16, 0], sizes = [16, 16], strides = [1, 1]} : vector<80x16xbf16> to vector<16x16xbf16>
    %cst_35 = arith.constant dense<0.000000e+00> : vector<64x16xf32>
    %127 = tpu.matmul %125, %126, %cst_35 {dimension_numbers = #tpu.dot_dimension_numbers<[1], [0], [0], [1], [0, 0, 1, 1], [], []>} : vector<64x16xbf16>, vector<16x16xbf16>, vector<64x16xf32> -> vector<64x16xf32>
    %128 = arith.addf %123, %127 : vector<64x16xf32>
    %129 = vector.extract_strided_slice %2 {offsets = [4, 2, 0], sizes = [8, 8, 16], strides = [1, 1, 1]} : vector<12x12x16xbf16> to vector<8x8x16xbf16>
    %130 = vector.shape_cast %129 : vector<8x8x16xbf16> to vector<64x16xbf16>
    %131 = vector.extract_strided_slice %118 {offsets = [32, 0], sizes = [16, 16], strides = [1, 1]} : vector<80x16xbf16> to vector<16x16xbf16>
    %cst_36 = arith.constant dense<0.000000e+00> : vector<64x16xf32>
    %132 = tpu.matmul %130, %131, %cst_36 {dimension_numbers = #tpu.dot_dimension_numbers<[1], [0], [0], [1], [0, 0, 1, 1], [], []>} : vector<64x16xbf16>, vector<16x16xbf16>, vector<64x16xf32> -> vector<64x16xf32>
    %133 = arith.addf %128, %132 : vector<64x16xf32>
    %134 = vector.extract_strided_slice %2 {offsets = [4, 3, 0], sizes = [8, 8, 16], strides = [1, 1, 1]} : vector<12x12x16xbf16> to vector<8x8x16xbf16>
    %135 = vector.shape_cast %134 : vector<8x8x16xbf16> to vector<64x16xbf16>
    %136 = vector.extract_strided_slice %118 {offsets = [48, 0], sizes = [16, 16], strides = [1, 1]} : vector<80x16xbf16> to vector<16x16xbf16>
    %cst_37 = arith.constant dense<0.000000e+00> : vector<64x16xf32>
    %137 = tpu.matmul %135, %136, %cst_37 {dimension_numbers = #tpu.dot_dimension_numbers<[1], [0], [0], [1], [0, 0, 1, 1], [], []>} : vector<64x16xbf16>, vector<16x16xbf16>, vector<64x16xf32> -> vector<64x16xf32>
    %138 = arith.addf %133, %137 : vector<64x16xf32>
    %139 = vector.extract_strided_slice %2 {offsets = [4, 4, 0], sizes = [8, 8, 16], strides = [1, 1, 1]} : vector<12x12x16xbf16> to vector<8x8x16xbf16>
    %140 = vector.shape_cast %139 : vector<8x8x16xbf16> to vector<64x16xbf16>
    %141 = vector.extract_strided_slice %118 {offsets = [64, 0], sizes = [16, 16], strides = [1, 1]} : vector<80x16xbf16> to vector<16x16xbf16>
    %cst_38 = arith.constant dense<0.000000e+00> : vector<64x16xf32>
    %142 = tpu.matmul %140, %141, %cst_38 {dimension_numbers = #tpu.dot_dimension_numbers<[1], [0], [0], [1], [0, 0, 1, 1], [], []>} : vector<64x16xbf16>, vector<16x16xbf16>, vector<64x16xf32> -> vector<64x16xf32>
    %143 = arith.addf %138, %142 : vector<64x16xf32>
    %c0_39 = arith.constant 0 : index
    %c0_40 = arith.constant 0 : index
    %144 = vector.load %arg3[%c0_39, %c0_40] : memref<1x16xf32, #tpu.memory_space<vmem>>, vector<1x16xf32>
    %145 = vector.broadcast %144 : vector<1x16xf32> to vector<64x16xf32>
    %146 = arith.addf %143, %145 : vector<64x16xf32>
    %147 = vector.shape_cast %146 : vector<64x16xf32> to vector<8x8x16xf32>
    %c0_41 = arith.constant 0 : index
    %c0_42 = arith.constant 0 : index
    %c0_43 = arith.constant 0 : index
    %c0_44 = arith.constant 0 : index
    %148 = vector.load %arg4[%c0_41, %c0_42, %c0_43, %c0_44] : memref<1x8x8x16xf32, #tpu.memory_space<vmem>>, vector<1x8x8x16xf32>
    %149 = vector.shape_cast %148 : vector<1x8x8x16xf32> to vector<8x8x16xf32>
    %150 = vector.shape_cast %147 : vector<8x8x16xf32> to vector<1x8x8x16xf32>
    tpu.vector_store %arg4[%c0_41, %c0_42, %c0_43, %c0_44], %150 {strides = array<i32>} : memref<1x8x8x16xf32, #tpu.memory_space<vmem>>, vector<1x8x8x16xf32>,
    return
  }
  func.func @transform_0(%arg0: i32) -> (i32, i32, i32, i32) {
    %c0_i32 = arith.constant 0 : i32
    %c0_i32_0 = arith.constant 0 : i32
    %c0_i32_1 = arith.constant 0 : i32
    %c0_i32_2 = arith.constant 0 : i32
    return %arg0, %c0_i32, %c0_i32_0, %c0_i32_1 : i32, i32, i32, i32
  }
  func.func @transform_1(%arg0: i32) -> (i32, i32, i32) {
    %c0_i32 = arith.constant 0 : i32
    %c0_i32_0 = arith.constant 0 : i32
    %c0_i32_1 = arith.constant 0 : i32
    %c0_i32_2 = arith.constant 0 : i32
    return %c0_i32, %c0_i32_0, %c0_i32_1 : i32, i32, i32
  }
  func.func @transform_2(%arg0: i32) -> (i32, i32) {
    %c0_i32 = arith.constant 0 : i32
    %c0_i32_0 = arith.constant 0 : i32
    %c0_i32_1 = arith.constant 0 : i32
    return %c0_i32, %c0_i32_0 : i32, i32
  }
  func.func @transform_3(%arg0: i32) -> (i32, i32, i32, i32) {
    %c0_i32 = arith.constant 0 : i32
    %c0_i32_0 = arith.constant 0 : i32
    %c0_i32_1 = arith.constant 0 : i32
    %c0_i32_2 = arith.constant 0 : i32
    return %arg0, %c0_i32, %c0_i32_0, %c0_i32_1 : i32, i32, i32, i32
  }
}

module attributes {stable_mosaic.version = 11 : i64} {
  func.func @conv5x5_kernel(%arg0: i32, %arg1: memref<1x12x12x16xf32, #tpu.memory_space<vmem>>, %arg2: memref<5x80x32xf32, #tpu.memory_space<vmem>>, %arg3: memref<1x32xf32, #tpu.memory_space<vmem>>, %arg4: memref<1x8x8x32xf32, #tpu.memory_space<vmem>>) attributes {dimension_semantics = [#tpu.dimension_semantics<parallel>], iteration_bounds = array<i64: 2>, scalar_prefetch = 0 : i64, scratch_operands = 0 : i64, tpu.core_type = #tpu.core_type<tc>, window_params = [{transform_indices = @transform_0, window_bounds = array<i64: 1, 12, 12, 16>}, {pipeline_mode = #tpu.pipeline_mode<synchronous>, transform_indices = @transform_1, window_bounds = array<i64: 5, 80, 32>}, {pipeline_mode = #tpu.pipeline_mode<synchronous>, transform_indices = @transform_2, window_bounds = array<i64: 1, 32>}, {transform_indices = @transform_3, window_bounds = array<i64: 1, 8, 8, 32>}]} {
    %c0 = arith.constant 0 : index
    %c0_0 = arith.constant 0 : index
    %c0_1 = arith.constant 0 : index
    %c0_2 = arith.constant 0 : index
    %0 = vector.load %arg1[%c0, %c0_0, %c0_1, %c0_2] : memref<1x12x12x16xf32, #tpu.memory_space<vmem>>, vector<1x12x12x16xf32>
    %1 = vector.shape_cast %0 : vector<1x12x12x16xf32> to vector<12x12x16xf32>
    %2 = arith.truncf %1 : vector<12x12x16xf32> to vector<12x12x16xbf16>
    %cst = arith.constant 0.000000e+00 : f32
    %3 = vector.broadcast %cst : f32 to vector<64x32xf32>
    %c0_3 = arith.constant 0 : index
    %c0_4 = arith.constant 0 : index
    %c0_5 = arith.constant 0 : index
    %4 = vector.load %arg2[%c0_3, %c0_4, %c0_5] : memref<5x80x32xf32, #tpu.memory_space<vmem>>, vector<1x80x32xf32>
    %5 = vector.shape_cast %4 : vector<1x80x32xf32> to vector<80x32xf32>
    %6 = arith.truncf %5 : vector<80x32xf32> to vector<80x32xbf16>
    %7 = vector.extract_strided_slice %2 {offsets = [0, 0, 0], sizes = [8, 8, 16], strides = [1, 1, 1]} : vector<12x12x16xbf16> to vector<8x8x16xbf16>
    %8 = vector.shape_cast %7 : vector<8x8x16xbf16> to vector<64x16xbf16>
    %9 = vector.extract_strided_slice %6 {offsets = [0, 0], sizes = [16, 32], strides = [1, 1]} : vector<80x32xbf16> to vector<16x32xbf16>
    %cst_6 = arith.constant dense<0.000000e+00> : vector<64x32xf32>
    %10 = tpu.matmul %8, %9, %cst_6 {dimension_numbers = #tpu.dot_dimension_numbers<[1], [0], [0], [1], [0, 0, 1, 1], [], []>} : vector<64x16xbf16>, vector<16x32xbf16>, vector<64x32xf32> -> vector<64x32xf32>
    %11 = arith.addf %3, %10 : vector<64x32xf32>
    %12 = vector.extract_strided_slice %2 {offsets = [0, 1, 0], sizes = [8, 8, 16], strides = [1, 1, 1]} : vector<12x12x16xbf16> to vector<8x8x16xbf16>
    %13 = vector.shape_cast %12 : vector<8x8x16xbf16> to vector<64x16xbf16>
    %14 = vector.extract_strided_slice %6 {offsets = [16, 0], sizes = [16, 32], strides = [1, 1]} : vector<80x32xbf16> to vector<16x32xbf16>
    %cst_7 = arith.constant dense<0.000000e+00> : vector<64x32xf32>
    %15 = tpu.matmul %13, %14, %cst_7 {dimension_numbers = #tpu.dot_dimension_numbers<[1], [0], [0], [1], [0, 0, 1, 1], [], []>} : vector<64x16xbf16>, vector<16x32xbf16>, vector<64x32xf32> -> vector<64x32xf32>
    %16 = arith.addf %11, %15 : vector<64x32xf32>
    %17 = vector.extract_strided_slice %2 {offsets = [0, 2, 0], sizes = [8, 8, 16], strides = [1, 1, 1]} : vector<12x12x16xbf16> to vector<8x8x16xbf16>
    %18 = vector.shape_cast %17 : vector<8x8x16xbf16> to vector<64x16xbf16>
    %19 = vector.extract_strided_slice %6 {offsets = [32, 0], sizes = [16, 32], strides = [1, 1]} : vector<80x32xbf16> to vector<16x32xbf16>
    %cst_8 = arith.constant dense<0.000000e+00> : vector<64x32xf32>
    %20 = tpu.matmul %18, %19, %cst_8 {dimension_numbers = #tpu.dot_dimension_numbers<[1], [0], [0], [1], [0, 0, 1, 1], [], []>} : vector<64x16xbf16>, vector<16x32xbf16>, vector<64x32xf32> -> vector<64x32xf32>
    %21 = arith.addf %16, %20 : vector<64x32xf32>
    %22 = vector.extract_strided_slice %2 {offsets = [0, 3, 0], sizes = [8, 8, 16], strides = [1, 1, 1]} : vector<12x12x16xbf16> to vector<8x8x16xbf16>
    %23 = vector.shape_cast %22 : vector<8x8x16xbf16> to vector<64x16xbf16>
    %24 = vector.extract_strided_slice %6 {offsets = [48, 0], sizes = [16, 32], strides = [1, 1]} : vector<80x32xbf16> to vector<16x32xbf16>
    %cst_9 = arith.constant dense<0.000000e+00> : vector<64x32xf32>
    %25 = tpu.matmul %23, %24, %cst_9 {dimension_numbers = #tpu.dot_dimension_numbers<[1], [0], [0], [1], [0, 0, 1, 1], [], []>} : vector<64x16xbf16>, vector<16x32xbf16>, vector<64x32xf32> -> vector<64x32xf32>
    %26 = arith.addf %21, %25 : vector<64x32xf32>
    %27 = vector.extract_strided_slice %2 {offsets = [0, 4, 0], sizes = [8, 8, 16], strides = [1, 1, 1]} : vector<12x12x16xbf16> to vector<8x8x16xbf16>
    %28 = vector.shape_cast %27 : vector<8x8x16xbf16> to vector<64x16xbf16>
    %29 = vector.extract_strided_slice %6 {offsets = [64, 0], sizes = [16, 32], strides = [1, 1]} : vector<80x32xbf16> to vector<16x32xbf16>
    %cst_10 = arith.constant dense<0.000000e+00> : vector<64x32xf32>
    %30 = tpu.matmul %28, %29, %cst_10 {dimension_numbers = #tpu.dot_dimension_numbers<[1], [0], [0], [1], [0, 0, 1, 1], [], []>} : vector<64x16xbf16>, vector<16x32xbf16>, vector<64x32xf32> -> vector<64x32xf32>
    %31 = arith.addf %26, %30 : vector<64x32xf32>
    %c1 = arith.constant 1 : index
    %c0_11 = arith.constant 0 : index
    %c0_12 = arith.constant 0 : index
    %32 = vector.load %arg2[%c1, %c0_11, %c0_12] : memref<5x80x32xf32, #tpu.memory_space<vmem>>, vector<1x80x32xf32>
    %33 = vector.shape_cast %32 : vector<1x80x32xf32> to vector<80x32xf32>
    %34 = arith.truncf %33 : vector<80x32xf32> to vector<80x32xbf16>
    %35 = vector.extract_strided_slice %2 {offsets = [1, 0, 0], sizes = [8, 8, 16], strides = [1, 1, 1]} : vector<12x12x16xbf16> to vector<8x8x16xbf16>
    %36 = vector.shape_cast %35 : vector<8x8x16xbf16> to vector<64x16xbf16>
    %37 = vector.extract_strided_slice %34 {offsets = [0, 0], sizes = [16, 32], strides = [1, 1]} : vector<80x32xbf16> to vector<16x32xbf16>
    %cst_13 = arith.constant dense<0.000000e+00> : vector<64x32xf32>
    %38 = tpu.matmul %36, %37, %cst_13 {dimension_numbers = #tpu.dot_dimension_numbers<[1], [0], [0], [1], [0, 0, 1, 1], [], []>} : vector<64x16xbf16>, vector<16x32xbf16>, vector<64x32xf32> -> vector<64x32xf32>
    %39 = arith.addf %31, %38 : vector<64x32xf32>
    %40 = vector.extract_strided_slice %2 {offsets = [1, 1, 0], sizes = [8, 8, 16], strides = [1, 1, 1]} : vector<12x12x16xbf16> to vector<8x8x16xbf16>
    %41 = vector.shape_cast %40 : vector<8x8x16xbf16> to vector<64x16xbf16>
    %42 = vector.extract_strided_slice %34 {offsets = [16, 0], sizes = [16, 32], strides = [1, 1]} : vector<80x32xbf16> to vector<16x32xbf16>
    %cst_14 = arith.constant dense<0.000000e+00> : vector<64x32xf32>
    %43 = tpu.matmul %41, %42, %cst_14 {dimension_numbers = #tpu.dot_dimension_numbers<[1], [0], [0], [1], [0, 0, 1, 1], [], []>} : vector<64x16xbf16>, vector<16x32xbf16>, vector<64x32xf32> -> vector<64x32xf32>
    %44 = arith.addf %39, %43 : vector<64x32xf32>
    %45 = vector.extract_strided_slice %2 {offsets = [1, 2, 0], sizes = [8, 8, 16], strides = [1, 1, 1]} : vector<12x12x16xbf16> to vector<8x8x16xbf16>
    %46 = vector.shape_cast %45 : vector<8x8x16xbf16> to vector<64x16xbf16>
    %47 = vector.extract_strided_slice %34 {offsets = [32, 0], sizes = [16, 32], strides = [1, 1]} : vector<80x32xbf16> to vector<16x32xbf16>
    %cst_15 = arith.constant dense<0.000000e+00> : vector<64x32xf32>
    %48 = tpu.matmul %46, %47, %cst_15 {dimension_numbers = #tpu.dot_dimension_numbers<[1], [0], [0], [1], [0, 0, 1, 1], [], []>} : vector<64x16xbf16>, vector<16x32xbf16>, vector<64x32xf32> -> vector<64x32xf32>
    %49 = arith.addf %44, %48 : vector<64x32xf32>
    %50 = vector.extract_strided_slice %2 {offsets = [1, 3, 0], sizes = [8, 8, 16], strides = [1, 1, 1]} : vector<12x12x16xbf16> to vector<8x8x16xbf16>
    %51 = vector.shape_cast %50 : vector<8x8x16xbf16> to vector<64x16xbf16>
    %52 = vector.extract_strided_slice %34 {offsets = [48, 0], sizes = [16, 32], strides = [1, 1]} : vector<80x32xbf16> to vector<16x32xbf16>
    %cst_16 = arith.constant dense<0.000000e+00> : vector<64x32xf32>
    %53 = tpu.matmul %51, %52, %cst_16 {dimension_numbers = #tpu.dot_dimension_numbers<[1], [0], [0], [1], [0, 0, 1, 1], [], []>} : vector<64x16xbf16>, vector<16x32xbf16>, vector<64x32xf32> -> vector<64x32xf32>
    %54 = arith.addf %49, %53 : vector<64x32xf32>
    %55 = vector.extract_strided_slice %2 {offsets = [1, 4, 0], sizes = [8, 8, 16], strides = [1, 1, 1]} : vector<12x12x16xbf16> to vector<8x8x16xbf16>
    %56 = vector.shape_cast %55 : vector<8x8x16xbf16> to vector<64x16xbf16>
    %57 = vector.extract_strided_slice %34 {offsets = [64, 0], sizes = [16, 32], strides = [1, 1]} : vector<80x32xbf16> to vector<16x32xbf16>
    %cst_17 = arith.constant dense<0.000000e+00> : vector<64x32xf32>
    %58 = tpu.matmul %56, %57, %cst_17 {dimension_numbers = #tpu.dot_dimension_numbers<[1], [0], [0], [1], [0, 0, 1, 1], [], []>} : vector<64x16xbf16>, vector<16x32xbf16>, vector<64x32xf32> -> vector<64x32xf32>
    %59 = arith.addf %54, %58 : vector<64x32xf32>
    %c2 = arith.constant 2 : index
    %c0_18 = arith.constant 0 : index
    %c0_19 = arith.constant 0 : index
    %60 = vector.load %arg2[%c2, %c0_18, %c0_19] : memref<5x80x32xf32, #tpu.memory_space<vmem>>, vector<1x80x32xf32>
    %61 = vector.shape_cast %60 : vector<1x80x32xf32> to vector<80x32xf32>
    %62 = arith.truncf %61 : vector<80x32xf32> to vector<80x32xbf16>
    %63 = vector.extract_strided_slice %2 {offsets = [2, 0, 0], sizes = [8, 8, 16], strides = [1, 1, 1]} : vector<12x12x16xbf16> to vector<8x8x16xbf16>
    %64 = vector.shape_cast %63 : vector<8x8x16xbf16> to vector<64x16xbf16>
    %65 = vector.extract_strided_slice %62 {offsets = [0, 0], sizes = [16, 32], strides = [1, 1]} : vector<80x32xbf16> to vector<16x32xbf16>
    %cst_20 = arith.constant dense<0.000000e+00> : vector<64x32xf32>
    %66 = tpu.matmul %64, %65, %cst_20 {dimension_numbers = #tpu.dot_dimension_numbers<[1], [0], [0], [1], [0, 0, 1, 1], [], []>} : vector<64x16xbf16>, vector<16x32xbf16>, vector<64x32xf32> -> vector<64x32xf32>
    %67 = arith.addf %59, %66 : vector<64x32xf32>
    %68 = vector.extract_strided_slice %2 {offsets = [2, 1, 0], sizes = [8, 8, 16], strides = [1, 1, 1]} : vector<12x12x16xbf16> to vector<8x8x16xbf16>
    %69 = vector.shape_cast %68 : vector<8x8x16xbf16> to vector<64x16xbf16>
    %70 = vector.extract_strided_slice %62 {offsets = [16, 0], sizes = [16, 32], strides = [1, 1]} : vector<80x32xbf16> to vector<16x32xbf16>
    %cst_21 = arith.constant dense<0.000000e+00> : vector<64x32xf32>
    %71 = tpu.matmul %69, %70, %cst_21 {dimension_numbers = #tpu.dot_dimension_numbers<[1], [0], [0], [1], [0, 0, 1, 1], [], []>} : vector<64x16xbf16>, vector<16x32xbf16>, vector<64x32xf32> -> vector<64x32xf32>
    %72 = arith.addf %67, %71 : vector<64x32xf32>
    %73 = vector.extract_strided_slice %2 {offsets = [2, 2, 0], sizes = [8, 8, 16], strides = [1, 1, 1]} : vector<12x12x16xbf16> to vector<8x8x16xbf16>
    %74 = vector.shape_cast %73 : vector<8x8x16xbf16> to vector<64x16xbf16>
    %75 = vector.extract_strided_slice %62 {offsets = [32, 0], sizes = [16, 32], strides = [1, 1]} : vector<80x32xbf16> to vector<16x32xbf16>
    %cst_22 = arith.constant dense<0.000000e+00> : vector<64x32xf32>
    %76 = tpu.matmul %74, %75, %cst_22 {dimension_numbers = #tpu.dot_dimension_numbers<[1], [0], [0], [1], [0, 0, 1, 1], [], []>} : vector<64x16xbf16>, vector<16x32xbf16>, vector<64x32xf32> -> vector<64x32xf32>
    %77 = arith.addf %72, %76 : vector<64x32xf32>
    %78 = vector.extract_strided_slice %2 {offsets = [2, 3, 0], sizes = [8, 8, 16], strides = [1, 1, 1]} : vector<12x12x16xbf16> to vector<8x8x16xbf16>
    %79 = vector.shape_cast %78 : vector<8x8x16xbf16> to vector<64x16xbf16>
    %80 = vector.extract_strided_slice %62 {offsets = [48, 0], sizes = [16, 32], strides = [1, 1]} : vector<80x32xbf16> to vector<16x32xbf16>
    %cst_23 = arith.constant dense<0.000000e+00> : vector<64x32xf32>
    %81 = tpu.matmul %79, %80, %cst_23 {dimension_numbers = #tpu.dot_dimension_numbers<[1], [0], [0], [1], [0, 0, 1, 1], [], []>} : vector<64x16xbf16>, vector<16x32xbf16>, vector<64x32xf32> -> vector<64x32xf32>
    %82 = arith.addf %77, %81 : vector<64x32xf32>
    %83 = vector.extract_strided_slice %2 {offsets = [2, 4, 0], sizes = [8, 8, 16], strides = [1, 1, 1]} : vector<12x12x16xbf16> to vector<8x8x16xbf16>
    %84 = vector.shape_cast %83 : vector<8x8x16xbf16> to vector<64x16xbf16>
    %85 = vector.extract_strided_slice %62 {offsets = [64, 0], sizes = [16, 32], strides = [1, 1]} : vector<80x32xbf16> to vector<16x32xbf16>
    %cst_24 = arith.constant dense<0.000000e+00> : vector<64x32xf32>
    %86 = tpu.matmul %84, %85, %cst_24 {dimension_numbers = #tpu.dot_dimension_numbers<[1], [0], [0], [1], [0, 0, 1, 1], [], []>} : vector<64x16xbf16>, vector<16x32xbf16>, vector<64x32xf32> -> vector<64x32xf32>
    %87 = arith.addf %82, %86 : vector<64x32xf32>
    %c3 = arith.constant 3 : index
    %c0_25 = arith.constant 0 : index
    %c0_26 = arith.constant 0 : index
    %88 = vector.load %arg2[%c3, %c0_25, %c0_26] : memref<5x80x32xf32, #tpu.memory_space<vmem>>, vector<1x80x32xf32>
    %89 = vector.shape_cast %88 : vector<1x80x32xf32> to vector<80x32xf32>
    %90 = arith.truncf %89 : vector<80x32xf32> to vector<80x32xbf16>
    %91 = vector.extract_strided_slice %2 {offsets = [3, 0, 0], sizes = [8, 8, 16], strides = [1, 1, 1]} : vector<12x12x16xbf16> to vector<8x8x16xbf16>
    %92 = vector.shape_cast %91 : vector<8x8x16xbf16> to vector<64x16xbf16>
    %93 = vector.extract_strided_slice %90 {offsets = [0, 0], sizes = [16, 32], strides = [1, 1]} : vector<80x32xbf16> to vector<16x32xbf16>
    %cst_27 = arith.constant dense<0.000000e+00> : vector<64x32xf32>
    %94 = tpu.matmul %92, %93, %cst_27 {dimension_numbers = #tpu.dot_dimension_numbers<[1], [0], [0], [1], [0, 0, 1, 1], [], []>} : vector<64x16xbf16>, vector<16x32xbf16>, vector<64x32xf32> -> vector<64x32xf32>
    %95 = arith.addf %87, %94 : vector<64x32xf32>
    %96 = vector.extract_strided_slice %2 {offsets = [3, 1, 0], sizes = [8, 8, 16], strides = [1, 1, 1]} : vector<12x12x16xbf16> to vector<8x8x16xbf16>
    %97 = vector.shape_cast %96 : vector<8x8x16xbf16> to vector<64x16xbf16>
    %98 = vector.extract_strided_slice %90 {offsets = [16, 0], sizes = [16, 32], strides = [1, 1]} : vector<80x32xbf16> to vector<16x32xbf16>
    %cst_28 = arith.constant dense<0.000000e+00> : vector<64x32xf32>
    %99 = tpu.matmul %97, %98, %cst_28 {dimension_numbers = #tpu.dot_dimension_numbers<[1], [0], [0], [1], [0, 0, 1, 1], [], []>} : vector<64x16xbf16>, vector<16x32xbf16>, vector<64x32xf32> -> vector<64x32xf32>
    %100 = arith.addf %95, %99 : vector<64x32xf32>
    %101 = vector.extract_strided_slice %2 {offsets = [3, 2, 0], sizes = [8, 8, 16], strides = [1, 1, 1]} : vector<12x12x16xbf16> to vector<8x8x16xbf16>
    %102 = vector.shape_cast %101 : vector<8x8x16xbf16> to vector<64x16xbf16>
    %103 = vector.extract_strided_slice %90 {offsets = [32, 0], sizes = [16, 32], strides = [1, 1]} : vector<80x32xbf16> to vector<16x32xbf16>
    %cst_29 = arith.constant dense<0.000000e+00> : vector<64x32xf32>
    %104 = tpu.matmul %102, %103, %cst_29 {dimension_numbers = #tpu.dot_dimension_numbers<[1], [0], [0], [1], [0, 0, 1, 1], [], []>} : vector<64x16xbf16>, vector<16x32xbf16>, vector<64x32xf32> -> vector<64x32xf32>
    %105 = arith.addf %100, %104 : vector<64x32xf32>
    %106 = vector.extract_strided_slice %2 {offsets = [3, 3, 0], sizes = [8, 8, 16], strides = [1, 1, 1]} : vector<12x12x16xbf16> to vector<8x8x16xbf16>
    %107 = vector.shape_cast %106 : vector<8x8x16xbf16> to vector<64x16xbf16>
    %108 = vector.extract_strided_slice %90 {offsets = [48, 0], sizes = [16, 32], strides = [1, 1]} : vector<80x32xbf16> to vector<16x32xbf16>
    %cst_30 = arith.constant dense<0.000000e+00> : vector<64x32xf32>
    %109 = tpu.matmul %107, %108, %cst_30 {dimension_numbers = #tpu.dot_dimension_numbers<[1], [0], [0], [1], [0, 0, 1, 1], [], []>} : vector<64x16xbf16>, vector<16x32xbf16>, vector<64x32xf32> -> vector<64x32xf32>
    %110 = arith.addf %105, %109 : vector<64x32xf32>
    %111 = vector.extract_strided_slice %2 {offsets = [3, 4, 0], sizes = [8, 8, 16], strides = [1, 1, 1]} : vector<12x12x16xbf16> to vector<8x8x16xbf16>
    %112 = vector.shape_cast %111 : vector<8x8x16xbf16> to vector<64x16xbf16>
    %113 = vector.extract_strided_slice %90 {offsets = [64, 0], sizes = [16, 32], strides = [1, 1]} : vector<80x32xbf16> to vector<16x32xbf16>
    %cst_31 = arith.constant dense<0.000000e+00> : vector<64x32xf32>
    %114 = tpu.matmul %112, %113, %cst_31 {dimension_numbers = #tpu.dot_dimension_numbers<[1], [0], [0], [1], [0, 0, 1, 1], [], []>} : vector<64x16xbf16>, vector<16x32xbf16>, vector<64x32xf32> -> vector<64x32xf32>
    %115 = arith.addf %110, %114 : vector<64x32xf32>
    %c4 = arith.constant 4 : index
    %c0_32 = arith.constant 0 : index
    %c0_33 = arith.constant 0 : index
    %116 = vector.load %arg2[%c4, %c0_32, %c0_33] : memref<5x80x32xf32, #tpu.memory_space<vmem>>, vector<1x80x32xf32>
    %117 = vector.shape_cast %116 : vector<1x80x32xf32> to vector<80x32xf32>
    %118 = arith.truncf %117 : vector<80x32xf32> to vector<80x32xbf16>
    %119 = vector.extract_strided_slice %2 {offsets = [4, 0, 0], sizes = [8, 8, 16], strides = [1, 1, 1]} : vector<12x12x16xbf16> to vector<8x8x16xbf16>
    %120 = vector.shape_cast %119 : vector<8x8x16xbf16> to vector<64x16xbf16>
    %121 = vector.extract_strided_slice %118 {offsets = [0, 0], sizes = [16, 32], strides = [1, 1]} : vector<80x32xbf16> to vector<16x32xbf16>
    %cst_34 = arith.constant dense<0.000000e+00> : vector<64x32xf32>
    %122 = tpu.matmul %120, %121, %cst_34 {dimension_numbers = #tpu.dot_dimension_numbers<[1], [0], [0], [1], [0, 0, 1, 1], [], []>} : vector<64x16xbf16>, vector<16x32xbf16>, vector<64x32xf32> -> vector<64x32xf32>
    %123 = arith.addf %115, %122 : vector<64x32xf32>
    %124 = vector.extract_strided_slice %2 {offsets = [4, 1, 0], sizes = [8, 8, 16], strides = [1, 1, 1]} : vector<12x12x16xbf16> to vector<8x8x16xbf16>
    %125 = vector.shape_cast %124 : vector<8x8x16xbf16> to vector<64x16xbf16>
    %126 = vector.extract_strided_slice %118 {offsets = [16, 0], sizes = [16, 32], strides = [1, 1]} : vector<80x32xbf16> to vector<16x32xbf16>
    %cst_35 = arith.constant dense<0.000000e+00> : vector<64x32xf32>
    %127 = tpu.matmul %125, %126, %cst_35 {dimension_numbers = #tpu.dot_dimension_numbers<[1], [0], [0], [1], [0, 0, 1, 1], [], []>} : vector<64x16xbf16>, vector<16x32xbf16>, vector<64x32xf32> -> vector<64x32xf32>
    %128 = arith.addf %123, %127 : vector<64x32xf32>
    %129 = vector.extract_strided_slice %2 {offsets = [4, 2, 0], sizes = [8, 8, 16], strides = [1, 1, 1]} : vector<12x12x16xbf16> to vector<8x8x16xbf16>
    %130 = vector.shape_cast %129 : vector<8x8x16xbf16> to vector<64x16xbf16>
    %131 = vector.extract_strided_slice %118 {offsets = [32, 0], sizes = [16, 32], strides = [1, 1]} : vector<80x32xbf16> to vector<16x32xbf16>
    %cst_36 = arith.constant dense<0.000000e+00> : vector<64x32xf32>
    %132 = tpu.matmul %130, %131, %cst_36 {dimension_numbers = #tpu.dot_dimension_numbers<[1], [0], [0], [1], [0, 0, 1, 1], [], []>} : vector<64x16xbf16>, vector<16x32xbf16>, vector<64x32xf32> -> vector<64x32xf32>
    %133 = arith.addf %128, %132 : vector<64x32xf32>
    %134 = vector.extract_strided_slice %2 {offsets = [4, 3, 0], sizes = [8, 8, 16], strides = [1, 1, 1]} : vector<12x12x16xbf16> to vector<8x8x16xbf16>
    %135 = vector.shape_cast %134 : vector<8x8x16xbf16> to vector<64x16xbf16>
    %136 = vector.extract_strided_slice %118 {offsets = [48, 0], sizes = [16, 32], strides = [1, 1]} : vector<80x32xbf16> to vector<16x32xbf16>
    %cst_37 = arith.constant dense<0.000000e+00> : vector<64x32xf32>
    %137 = tpu.matmul %135, %136, %cst_37 {dimension_numbers = #tpu.dot_dimension_numbers<[1], [0], [0], [1], [0, 0, 1, 1], [], []>} : vector<64x16xbf16>, vector<16x32xbf16>, vector<64x32xf32> -> vector<64x32xf32>
    %138 = arith.addf %133, %137 : vector<64x32xf32>
    %139 = vector.extract_strided_slice %2 {offsets = [4, 4, 0], sizes = [8, 8, 16], strides = [1, 1, 1]} : vector<12x12x16xbf16> to vector<8x8x16xbf16>
    %140 = vector.shape_cast %139 : vector<8x8x16xbf16> to vector<64x16xbf16>
    %141 = vector.extract_strided_slice %118 {offsets = [64, 0], sizes = [16, 32], strides = [1, 1]} : vector<80x32xbf16> to vector<16x32xbf16>
    %cst_38 = arith.constant dense<0.000000e+00> : vector<64x32xf32>
    %142 = tpu.matmul %140, %141, %cst_38 {dimension_numbers = #tpu.dot_dimension_numbers<[1], [0], [0], [1], [0, 0, 1, 1], [], []>} : vector<64x16xbf16>, vector<16x32xbf16>, vector<64x32xf32> -> vector<64x32xf32>
    %143 = arith.addf %138, %142 : vector<64x32xf32>
    %c0_39 = arith.constant 0 : index
    %c0_40 = arith.constant 0 : index
    %144 = vector.load %arg3[%c0_39, %c0_40] : memref<1x32xf32, #tpu.memory_space<vmem>>, vector<1x32xf32>
    %145 = vector.broadcast %144 : vector<1x32xf32> to vector<64x32xf32>
    %146 = arith.addf %143, %145 : vector<64x32xf32>
    %147 = vector.shape_cast %146 : vector<64x32xf32> to vector<8x8x32xf32>
    %c0_41 = arith.constant 0 : index
    %c0_42 = arith.constant 0 : index
    %c0_43 = arith.constant 0 : index
    %c0_44 = arith.constant 0 : index
    %148 = vector.load %arg4[%c0_41, %c0_42, %c0_43, %c0_44] : memref<1x8x8x32xf32, #tpu.memory_space<vmem>>, vector<1x8x8x32xf32>
    %149 = vector.shape_cast %148 : vector<1x8x8x32xf32> to vector<8x8x32xf32>
    %150 = vector.shape_cast %147 : vector<8x8x32xf32> to vector<1x8x8x32xf32>
    tpu.vector_store %arg4[%c0_41, %c0_42, %c0_43, %c0_44], %150 {strides = array<i32>} : memref<1x8x8x32xf32, #tpu.memory_space<vmem>>, vector<1x8x8x32xf32>,
    return
  }
  func.func @transform_0(%arg0: i32) -> (i32, i32, i32, i32) {
    %c0_i32 = arith.constant 0 : i32
    %c0_i32_0 = arith.constant 0 : i32
    %c0_i32_1 = arith.constant 0 : i32
    %c0_i32_2 = arith.constant 0 : i32
    return %arg0, %c0_i32, %c0_i32_0, %c0_i32_1 : i32, i32, i32, i32
  }
  func.func @transform_1(%arg0: i32) -> (i32, i32, i32) {
    %c0_i32 = arith.constant 0 : i32
    %c0_i32_0 = arith.constant 0 : i32
    %c0_i32_1 = arith.constant 0 : i32
    %c0_i32_2 = arith.constant 0 : i32
    return %c0_i32, %c0_i32_0, %c0_i32_1 : i32, i32, i32
  }
  func.func @transform_2(%arg0: i32) -> (i32, i32) {
    %c0_i32 = arith.constant 0 : i32
    %c0_i32_0 = arith.constant 0 : i32
    %c0_i32_1 = arith.constant 0 : i32
    return %c0_i32, %c0_i32_0 : i32, i32
  }
  func.func @transform_3(%arg0: i32) -> (i32, i32, i32, i32) {
    %c0_i32 = arith.constant 0 : i32
    %c0_i32_0 = arith.constant 0 : i32
    %c0_i32_1 = arith.constant 0 : i32
    %c0_i32_2 = arith.constant 0 : i32
    return %arg0, %c0_i32, %c0_i32_0, %c0_i32_1 : i32, i32, i32, i32
  }
}

module attributes {stable_mosaic.version = 11 : i64} {
  func.func @bn_stats_kernel(%arg0: i32, %arg1: memref<128x32xf32, #tpu.memory_space<vmem>>, %arg2: memref<1x32xf32, #tpu.memory_space<vmem>>, %arg3: memref<1x32xf32, #tpu.memory_space<vmem>>) attributes {dimension_semantics = [#tpu.dimension_semantics<arbitrary>], iteration_bounds = array<i64: 1>, scalar_prefetch = 0 : i64, scratch_operands = 0 : i64, tpu.core_type = #tpu.core_type<tc>, window_params = [{transform_indices = @transform_0, window_bounds = array<i64: 128, 32>}, {pipeline_mode = #tpu.pipeline_mode<synchronous>, transform_indices = @transform_1, window_bounds = array<i64: 1, 32>}, {pipeline_mode = #tpu.pipeline_mode<synchronous>, transform_indices = @transform_2, window_bounds = array<i64: 1, 32>}]} {
    %c0_i32 = arith.constant 0 : i32
    %0 = arith.cmpi eq, %arg0, %c0_i32 : i32
    %1 = arith.extui %0 : i1 to i32
    %c0_i32_0 = arith.constant 0 : i32
    %2 = arith.cmpi ne, %1, %c0_i32_0 : i32
    scf.if %2 {
      %cst_11 = arith.constant 0.000000e+00 : f32
      %15 = vector.broadcast %cst_11 : f32 to vector<1x32xf32>
      %c0_12 = arith.constant 0 : index
      %c0_13 = arith.constant 0 : index
      %16 = vector.load %arg2[%c0_12, %c0_13] : memref<1x32xf32, #tpu.memory_space<vmem>>, vector<1x32xf32>
      tpu.vector_store %arg2[%c0_12, %c0_13], %15 {strides = array<i32>} : memref<1x32xf32, #tpu.memory_space<vmem>>, vector<1x32xf32>,
      %cst_14 = arith.constant 0.000000e+00 : f32
      %17 = vector.broadcast %cst_14 : f32 to vector<1x32xf32>
      %c0_15 = arith.constant 0 : index
      %c0_16 = arith.constant 0 : index
      %18 = vector.load %arg3[%c0_15, %c0_16] : memref<1x32xf32, #tpu.memory_space<vmem>>, vector<1x32xf32>
      tpu.vector_store %arg3[%c0_15, %c0_16], %17 {strides = array<i32>} : memref<1x32xf32, #tpu.memory_space<vmem>>, vector<1x32xf32>,
    } else {
    }
    %c0 = arith.constant 0 : index
    %c0_1 = arith.constant 0 : index
    %3 = vector.load %arg1[%c0, %c0_1] : memref<128x32xf32, #tpu.memory_space<vmem>>, vector<128x32xf32>
    %c0_2 = arith.constant 0 : index
    %c0_3 = arith.constant 0 : index
    %4 = vector.load %arg2[%c0_2, %c0_3] : memref<1x32xf32, #tpu.memory_space<vmem>>, vector<1x32xf32>
    %cst = arith.constant dense<0.000000e+00> : vector<32xf32>
    %5 = vector.multi_reduction <add>, %3, %cst [0] : vector<128x32xf32> to vector<32xf32>
    %6 = vector.shape_cast %5 : vector<32xf32> to vector<1x32xf32>
    %7 = arith.addf %4, %6 : vector<1x32xf32>
    %c0_4 = arith.constant 0 : index
    %c0_5 = arith.constant 0 : index
    %8 = vector.load %arg2[%c0_4, %c0_5] : memref<1x32xf32, #tpu.memory_space<vmem>>, vector<1x32xf32>
    tpu.vector_store %arg2[%c0_4, %c0_5], %7 {strides = array<i32>} : memref<1x32xf32, #tpu.memory_space<vmem>>, vector<1x32xf32>,
    %c0_6 = arith.constant 0 : index
    %c0_7 = arith.constant 0 : index
    %9 = vector.load %arg3[%c0_6, %c0_7] : memref<1x32xf32, #tpu.memory_space<vmem>>, vector<1x32xf32>
    %10 = arith.mulf %3, %3 : vector<128x32xf32>
    %cst_8 = arith.constant dense<0.000000e+00> : vector<32xf32>
    %11 = vector.multi_reduction <add>, %10, %cst_8 [0] : vector<128x32xf32> to vector<32xf32>
    %12 = vector.shape_cast %11 : vector<32xf32> to vector<1x32xf32>
    %13 = arith.addf %9, %12 : vector<1x32xf32>
    %c0_9 = arith.constant 0 : index
    %c0_10 = arith.constant 0 : index
    %14 = vector.load %arg3[%c0_9, %c0_10] : memref<1x32xf32, #tpu.memory_space<vmem>>, vector<1x32xf32>
    tpu.vector_store %arg3[%c0_9, %c0_10], %13 {strides = array<i32>} : memref<1x32xf32, #tpu.memory_space<vmem>>, vector<1x32xf32>,
    return
  }
  func.func @transform_0(%arg0: i32) -> (i32, i32) {
    %c0_i32 = arith.constant 0 : i32
    %c0_i32_0 = arith.constant 0 : i32
    return %arg0, %c0_i32 : i32, i32
  }
  func.func @transform_1(%arg0: i32) -> (i32, i32) {
    %c0_i32 = arith.constant 0 : i32
    %c0_i32_0 = arith.constant 0 : i32
    %c0_i32_1 = arith.constant 0 : i32
    return %c0_i32, %c0_i32_0 : i32, i32
  }
  func.func @transform_2(%arg0: i32) -> (i32, i32) {
    %c0_i32 = arith.constant 0 : i32
    %c0_i32_0 = arith.constant 0 : i32
    %c0_i32_1 = arith.constant 0 : i32
    return %c0_i32, %c0_i32_0 : i32, i32
  }
}

module attributes {stable_mosaic.version = 11 : i64} {
  func.func @bn_apply_kernel(%arg0: i32, %arg1: memref<128x32xf32, #tpu.memory_space<vmem>>, %arg2: memref<1x32xf32, #tpu.memory_space<vmem>>, %arg3: memref<1x32xf32, #tpu.memory_space<vmem>>, %arg4: memref<1x32xf32, #tpu.memory_space<vmem>>, %arg5: memref<1x32xf32, #tpu.memory_space<vmem>>, %arg6: memref<128x32xf32, #tpu.memory_space<vmem>>) attributes {dimension_semantics = [#tpu.dimension_semantics<parallel>], iteration_bounds = array<i64: 1>, scalar_prefetch = 0 : i64, scratch_operands = 0 : i64, tpu.core_type = #tpu.core_type<tc>, window_params = [{transform_indices = @transform_0, window_bounds = array<i64: 128, 32>}, {pipeline_mode = #tpu.pipeline_mode<synchronous>, transform_indices = @transform_1, window_bounds = array<i64: 1, 32>}, {pipeline_mode = #tpu.pipeline_mode<synchronous>, transform_indices = @transform_2, window_bounds = array<i64: 1, 32>}, {pipeline_mode = #tpu.pipeline_mode<synchronous>, transform_indices = @transform_3, window_bounds = array<i64: 1, 32>}, {pipeline_mode = #tpu.pipeline_mode<synchronous>, transform_indices = @transform_4, window_bounds = array<i64: 1, 32>}, {transform_indices = @transform_5, window_bounds = array<i64: 128, 32>}]} {
    %c0 = arith.constant 0 : index
    %c0_0 = arith.constant 0 : index
    %0 = vector.load %arg1[%c0, %c0_0] : memref<128x32xf32, #tpu.memory_space<vmem>>, vector<128x32xf32>
    %c0_1 = arith.constant 0 : index
    %c0_2 = arith.constant 0 : index
    %1 = vector.load %arg2[%c0_1, %c0_2] : memref<1x32xf32, #tpu.memory_space<vmem>>, vector<1x32xf32>
    %cst = arith.constant 7.812500e-03 : f32
    %2 = vector.broadcast %cst : f32 to vector<1x32xf32>
    %3 = arith.mulf %1, %2 : vector<1x32xf32>
    %c0_3 = arith.constant 0 : index
    %c0_4 = arith.constant 0 : index
    %4 = vector.load %arg3[%c0_3, %c0_4] : memref<1x32xf32, #tpu.memory_space<vmem>>, vector<1x32xf32>
    %cst_5 = arith.constant 7.812500e-03 : f32
    %5 = vector.broadcast %cst_5 : f32 to vector<1x32xf32>
    %6 = arith.mulf %4, %5 : vector<1x32xf32>
    %7 = arith.mulf %3, %3 : vector<1x32xf32>
    %8 = arith.subf %6, %7 : vector<1x32xf32>
    %cst_6 = arith.constant 0.000000e+00 : f32
    %9 = vector.broadcast %cst_6 : f32 to vector<1x32xf32>
    %10 = arith.maximumf %8, %9 : vector<1x32xf32>
    %cst_7 = arith.constant 9.99999974E-6 : f32
    %11 = vector.broadcast %cst_7 : f32 to vector<1x32xf32>
    %12 = arith.addf %10, %11 : vector<1x32xf32>
    %13 = math.rsqrt %12 : vector<1x32xf32>
    %14 = vector.broadcast %3 : vector<1x32xf32> to vector<128x32xf32>
    %15 = arith.subf %0, %14 : vector<128x32xf32>
    %c0_8 = arith.constant 0 : index
    %c0_9 = arith.constant 0 : index
    %16 = vector.load %arg4[%c0_8, %c0_9] : memref<1x32xf32, #tpu.memory_space<vmem>>, vector<1x32xf32>
    %17 = arith.mulf %13, %16 : vector<1x32xf32>
    %18 = vector.broadcast %17 : vector<1x32xf32> to vector<128x32xf32>
    %19 = arith.mulf %15, %18 : vector<128x32xf32>
    %c0_10 = arith.constant 0 : index
    %c0_11 = arith.constant 0 : index
    %20 = vector.load %arg5[%c0_10, %c0_11] : memref<1x32xf32, #tpu.memory_space<vmem>>, vector<1x32xf32>
    %21 = vector.broadcast %20 : vector<1x32xf32> to vector<128x32xf32>
    %22 = arith.addf %19, %21 : vector<128x32xf32>
    %cst_12 = arith.constant 0.000000e+00 : f32
    %23 = vector.broadcast %cst_12 : f32 to vector<128x32xf32>
    %24 = arith.maximumf %22, %23 : vector<128x32xf32>
    %c0_13 = arith.constant 0 : index
    %c0_14 = arith.constant 0 : index
    %25 = vector.load %arg6[%c0_13, %c0_14] : memref<128x32xf32, #tpu.memory_space<vmem>>, vector<128x32xf32>
    tpu.vector_store %arg6[%c0_13, %c0_14], %24 {strides = array<i32>} : memref<128x32xf32, #tpu.memory_space<vmem>>, vector<128x32xf32>,
    return
  }
  func.func @transform_0(%arg0: i32) -> (i32, i32) {
    %c0_i32 = arith.constant 0 : i32
    %c0_i32_0 = arith.constant 0 : i32
    return %arg0, %c0_i32 : i32, i32
  }
  func.func @transform_1(%arg0: i32) -> (i32, i32) {
    %c0_i32 = arith.constant 0 : i32
    %c0_i32_0 = arith.constant 0 : i32
    %c0_i32_1 = arith.constant 0 : i32
    return %c0_i32, %c0_i32_0 : i32, i32
  }
  func.func @transform_2(%arg0: i32) -> (i32, i32) {
    %c0_i32 = arith.constant 0 : i32
    %c0_i32_0 = arith.constant 0 : i32
    %c0_i32_1 = arith.constant 0 : i32
    return %c0_i32, %c0_i32_0 : i32, i32
  }
  func.func @transform_3(%arg0: i32) -> (i32, i32) {
    %c0_i32 = arith.constant 0 : i32
    %c0_i32_0 = arith.constant 0 : i32
    %c0_i32_1 = arith.constant 0 : i32
    return %c0_i32, %c0_i32_0 : i32, i32
  }
  func.func @transform_4(%arg0: i32) -> (i32, i32) {
    %c0_i32 = arith.constant 0 : i32
    %c0_i32_0 = arith.constant 0 : i32
    %c0_i32_1 = arith.constant 0 : i32
    return %c0_i32, %c0_i32_0 : i32, i32
  }
  func.func @transform_5(%arg0: i32) -> (i32, i32) {
    %c0_i32 = arith.constant 0 : i32
    %c0_i32_0 = arith.constant 0 : i32
    return %arg0, %c0_i32 : i32, i32
  }
}

</mosaic_0001>

<bundles_post_ra>
// kernel: cnn_forward.14
= control target key start
LH: loop header
LB: loop body
LE: loop exit
PB: predicated region body
PF: predicated region fallthrough
CT: control target
= control target key end

     0   :  { %vm14_vm0 = vcmask 122880   ;;  %vm34_vm1 = vcmask 130048   ;;  %v140_v0 = vmov 0.0   ;;  %s258_s0 = inlined_call_operand.vmem [shape: f32[128,16], index: 0, kind: input, shape index: {}]   ;;  %s259_s1 = inlined_call_operand.vmem [shape: f32[1,16], index: 1, kind: output, shape index: {0}]   ;;  %s260_s2 = inlined_call_operand.vmem [shape: f32[1,16], index: 2, kind: output, shape index: {1}]  }
   0x1   :  { %15 = vst.msk [vmem:[%s259_s1] sm:$0x1] %vm14_vm0, %v140_v0  ;;  %v17_v1 = vld [vmem:[%s258_s0] sm:$0xff]  ;;  %v18_v2 = vld [vmem:[%s258_s0 + $0x8] sm:$0xff]  ;;  %v19_v3 = vld [vmem:[%s258_s0 + $0x10] sm:$0xff] }
   0x2   :  { %16 = vst.msk [vmem:[%s260_s2] sm:$0x1] %vm14_vm0, %v140_v0  ;;  %v35_v4 = vsel %vm34_vm1, %v17_v1, 0.0  ;;  %v36_v5 = vsel %vm34_vm1, %v18_v2, 0.0  ;;  %v38_v6 = vsel %vm34_vm1, %v19_v3, 0.0  ;;  %v20_v7 = vld [vmem:[%s258_s0 + $0x18] sm:$0xff]  ;;  %v76_v15 = vmul.f32 %v17_v1, %v17_v1 }
   0x3   :  { %v37_v8 = vadd.f32 %v36_v5, %v35_v4  ;;  %v40_v9 = vsel %vm34_vm1, %v20_v7, 0.0  ;;  %v21_v10 = vld [vmem:[%s258_s0 + $0x20] sm:$0xff]  ;;  %v22_v13 = vld [vmem:[%s258_s0 + $0x28] sm:$0xff]  ;;  %v77_v16 = vmul.f32 %v18_v2, %v18_v2  ;;  %v78_v17 = vmul.f32 %v19_v3, %v19_v3  ;;  %v23_v19 = vld [vmem:[%s258_s0 + $0x30] sm:$0xff] }
   0x4   :  { %v42_v12 = vsel %vm34_vm1, %v21_v10, 0.0  ;;  %v44_v18 = vsel %vm34_vm1, %v22_v13, 0.0  ;;  %v79_v21 = vmul.f32 %v20_v7, %v20_v7  ;;  %v46_v22 = vsel %vm34_vm1, %v23_v19, 0.0  ;;  %v24_v24 = vld [vmem:[%s258_s0 + $0x38] sm:$0xff]  ;;  %v25_v31 = vld [vmem:[%s258_s0 + $0x40] sm:$0xff]  ;;  %v26_v37 = vld [vmem:[%s258_s0 + $0x48] sm:$0xff] }
   0x5   :  { %v39_v11 = vadd.f32 %v38_v6, %v37_v8  ;;  %v80_v23 = vmul.f32 %v21_v10, %v21_v10  ;;  %v92_v26 = vsel %vm34_vm1, %v76_v15, 0.0  ;;  %v93_v27 = vsel %vm34_vm1, %v77_v16, 0.0  ;;  %v27_v43 = vld [vmem:[%s258_s0 + $0x50] sm:$0xff]  ;;  %v28_v49 = vld [vmem:[%s258_s0 + $0x58] sm:$0xff]  ;;  %v29_v55 = vld [vmem:[%s258_s0 + $0x60] sm:$0xff] }
   0x6   :  { %v95_v28 = vsel %vm34_vm1, %v78_v17, 0.0  ;;  %v48_v29 = vsel %vm34_vm1, %v24_v24, 0.0  ;;  %v94_v30 = vadd.f32 %v93_v27, %v92_v26  ;;  %v81_v33 = vmul.f32 %v22_v13, %v22_v13  ;;  %v30_v61 = vld [vmem:[%s258_s0 + $0x68] sm:$0xff]  ;;  %v31_v3 = vld [vmem:[%s258_s0 + $0x70] sm:$0xff] }
   0x7   :  { %v41_v14 = vadd.f32 %v40_v9, %v39_v11  ;;  %v97_v34 = vsel %vm34_vm1, %v79_v21, 0.0  ;;  %v50_v35 = vsel %vm34_vm1, %v25_v31, 0.0  ;;  %v82_v39 = vmul.f32 %v23_v19, %v23_v19  ;;  %v32_v9 = vld [vmem:[%s258_s0 + $0x78] sm:$0xff] }
   0x8   :  { %v96_v36 = vadd.f32 %v95_v28, %v94_v30  ;;  %v99_v40 = vsel %vm34_vm1, %v80_v23, 0.0  ;;  %v52_v41 = vsel %vm34_vm1, %v26_v37, 0.0  ;;  %v83_v45 = vmul.f32 %v24_v24, %v24_v24 }
   0x9   :  { %v43_v20 = vadd.f32 %v42_v12, %v41_v14  ;;  %v101_v46 = vsel %vm34_vm1, %v81_v33, 0.0  ;;  %v54_v47 = vsel %vm34_vm1, %v27_v43, 0.0  ;;  %v84_v51 = vmul.f32 %v25_v31, %v25_v31 }
   0xa   :  { %v98_v42 = vadd.f32 %v97_v34, %v96_v36  ;;  %v103_v52 = vsel %vm34_vm1, %v82_v39, 0.0  ;;  %v56_v53 = vsel %vm34_vm1, %v28_v49, 0.0  ;;  %v85_v57 = vmul.f32 %v26_v37, %v26_v37  ;;  %v33_v36 = vld [vmem:[%s259_s1] sm:$0x1] }
   0xb   :  { %v45_v25 = vadd.f32 %v44_v18, %v43_v20  ;;  %v105_v58 = vsel %vm34_vm1, %v83_v45, 0.0  ;;  %v58_v59 = vsel %vm34_vm1, %v29_v55, 0.0  ;;  %v86_v63 = vmul.f32 %v27_v43, %v27_v43 }
   0xc   :  { %v100_v48 = vadd.f32 %v99_v40, %v98_v42  ;;  %v107_v0 = vsel %vm34_vm1, %v84_v51, 0.0  ;;  %v60_v1 = vsel %vm34_vm1, %v30_v61, 0.0  ;;  %v87_v5 = vmul.f32 %v28_v49, %v28_v49 }
   0xd   :  { %v47_v32 = vadd.f32 %v46_v22, %v45_v25  ;;  %v109_v6 = vsel %vm34_vm1, %v85_v57, 0.0  ;;  %v62_v7 = vsel %vm34_vm1, %v31_v3, 0.0  ;;  %v88_v11 = vmul.f32 %v29_v55, %v29_v55 }
   0xe   :  { %v102_v54 = vadd.f32 %v101_v46, %v100_v48  ;;  %v111_v12 = vsel %vm34_vm1, %v86_v63, 0.0  ;;  %v64_v13 = vsel %vm34_vm1, %v32_v9, 0.0  ;;  %v89_v16 = vmul.f32 %v30_v61, %v30_v61 }
   0xf   :  { %v49_v38 = vadd.f32 %v48_v29, %v47_v32  ;;  %v113_v17 = vsel %vm34_vm1, %v87_v5, 0.0  ;;  %v90_v20 = vmul.f32 %v31_v3, %v31_v3  ;;  %v115_v21 = vsel %vm34_vm1, %v88_v11, 0.0 }
  0x10   :  { %v104_v60 = vadd.f32 %v103_v52, %v102_v54  ;;  %v91_v24 = vmul.f32 %v32_v9, %v32_v9  ;;  %v117_v25 = vsel %vm34_vm1, %v89_v16, 0.0 }
  0x11   :  { %v51_v44 = vadd.f32 %v50_v35, %v49_v38  ;;  %v119_v28 = vsel %vm34_vm1, %v90_v20, 0.0 }
  0x12   :  { %v106_v2 = vadd.f32 %v105_v58, %v104_v60  ;;  %v121_v31 = vsel %vm34_vm1, %v91_v24, 0.0 }
  0x13   :  { %v53_v50 = vadd.f32 %v52_v41, %v51_v44  ;;  %v75_v44 = vld [vmem:[%s260_s2] sm:$0x1] }
  0x14   :  { %v108_v8 = vadd.f32 %v107_v0, %v106_v2 }
  0x15   :  { %v55_v56 = vadd.f32 %v54_v47, %v53_v50 }
  0x16   :  { %v110_v14 = vadd.f32 %v109_v6, %v108_v8 }
  0x17   :  { %v57_v62 = vadd.f32 %v56_v53, %v55_v56 }
  0x18   :  { %v112_v18 = vadd.f32 %v111_v12, %v110_v14 }
  0x19   :  { %v59_v4 = vadd.f32 %v58_v59, %v57_v62 }
  0x1a   :  { %v114_v22 = vadd.f32 %v113_v17, %v112_v18 }
  0x1b   :  { %v61_v10 = vadd.f32 %v60_v1, %v59_v4 }
  0x1c   :  { %v116_v26 = vadd.f32 %v115_v21, %v114_v22 }
  0x1d   :  { %v63_v15 = vadd.f32 %v62_v7, %v61_v10 }
  0x1e   :  { %v118_v29 = vadd.f32 %v117_v25, %v116_v26 }
  0x1f   :  { %v65_v19 = vadd.f32 %v64_v13, %v63_v15 }
  0x20   :  { %v120_v32 = vadd.f32 %v119_v28, %v118_v29 }
  0x21   :  { %v66_v23 = vrot.slane %v65_v19, 4 }
  0x22   :  { %v122_v34 = vadd.f32 %v121_v31, %v120_v32 }
  0x23   :  { %v67_v27 = vadd.f32 %v66_v23, %v65_v19 }
  0x24   :  { %v123_v37 = vrot.slane %v122_v34, 4 }
  0x25   :  { %v68_v30 = vrot.slane %v67_v27, 2 }
  0x26   :  { %v124_v39 = vadd.f32 %v123_v37, %v122_v34 }
  0x27   :  { %v69_v33 = vadd.f32 %v68_v30, %v67_v27 }
  0x28   :  { %v125_v41 = vrot.slane %v124_v39, 2 }
  0x29   :  { %v70_v35 = vrot.slane %v69_v33, 1 }
  0x2a   :  { %v126_v42 = vadd.f32 %v125_v41, %v124_v39 }
  0x2b   :  { %v71_v38 = vadd.f32 %v70_v35, %v69_v33 }
  0x2c   :  { %v127_v43 = vrot.slane %v126_v42, 1 }
  0x2d   :  { %v72_v40 = vadd.f32 %v71_v38, %v33_v36 }
  0x2e   :  { %v128_v45 = vadd.f32 %v127_v43, %v126_v42 }
  0x2f   :  { %74 = vst.msk [vmem:[%s259_s1] sm:$0x1] %vm14_vm0, %v72_v40 }
  0x30   :  { %v129_v46 = vadd.f32 %v128_v45, %v75_v44 }
  0x32   :  { %130 = vst.msk [vmem:[%s260_s2] sm:$0x1] %vm14_vm0, %v129_v46 }

// kernel: cnn_forward.15
= control target key start
LH: loop header
LB: loop body
LE: loop exit
PB: predicated region body
PF: predicated region fallthrough
CT: control target
= control target key end

     0   :  { %v46_v6 = vlaneseq  ;;  %vm130_vm0 = vcmask 130048   ;;  %s326_s1 = inlined_call_operand.vmem [shape: f32[1,16], index: 1, kind: input, shape index: {}]   ;;  %s327_s2 = inlined_call_operand.vmem [shape: f32[1,16], index: 2, kind: input, shape index: {}]   ;;  %s328_s0 = inlined_call_operand.vmem [shape: f32[128,16], index: 0, kind: input, shape index: {}]   ;;  %s329_s3 = inlined_call_operand.vmem [shape: f32[1,16], index: 3, kind: input, shape index: {}]   ;;  %s330_s4 = inlined_call_operand.vmem [shape: f32[1,16], index: 4, kind: input, shape index: {}]   ;;  %s331_s5 = inlined_call_operand.vmem [shape: f32[128,16], index: 5, kind: output, shape index: {}]  }
   0x1   :  { %v36_v0 = vld [vmem:[%s326_s1] sm:$0x1]  ;;  %v21_v14 = vld [vmem:[%s328_s0 + $0x8] sm:$0xff]  ;;  %v22_v15 = vld [vmem:[%s328_s0 + $0x10] sm:$0xff] }
   0x2   :  { %v38_v1 = vld [vmem:[%s327_s2] sm:$0x1]  ;;  %v37_v2 = vmul.f32 0.0078125, %v36_v0  ;;  %v47_v9 = vshrl.u32 %v46_v6, 7  ;;  %v23_v16 = vld [vmem:[%s328_s0 + $0x18] sm:$0xff]  ;;  %v25_v18 = vld [vmem:[%s328_s0 + $0x28] sm:$0xff] }
   0x3   :  { %v39_v3 = vmul.f32 0.0078125, %v38_v1  ;;  %v20_v11 = vld [vmem:[%s328_s0] sm:$0xff]  ;;  %v26_v19 = vld [vmem:[%s328_s0 + $0x30] sm:$0xff]  ;;  %v27_v20 = vld [vmem:[%s328_s0 + $0x38] sm:$0xff] }
   0x4   :  { %v40_v4 = vmul.f32 %v37_v2, %v37_v2  ;;  %v48_v10 = vsub.s32 0, %v47_v9  ;;  %v67_v13 = vld [vmem:[%s329_s3] sm:$0x1]  ;;  %v29_v22 = vld [vmem:[%s328_s0 + $0x48] sm:$0xff]  ;;  %v30_v26 = vld [vmem:[%s328_s0 + $0x50] sm:$0xff] }
   0x5   :  { %v24_v17 = vld [vmem:[%s328_s0 + $0x20] sm:$0xff]  ;;  %v31_v27 = vld [vmem:[%s328_s0 + $0x58] sm:$0xff]  ;;  %v33_v33 = vld [vmem:[%s328_s0 + $0x68] sm:$0xff] }
   0x6   :  { %v41_v5 = vsub.f32 %v39_v3, %v40_v4  ;;  %v193_v12 = vrot.slane %v37_v2, %v48_v10  ;;  %v28_v21 = vld [vmem:[%s328_s0 + $0x40] sm:$0xff]  ;;  %v34_v34 = vld [vmem:[%s328_s0 + $0x70] sm:$0xff]  ;;  %v35_v35 = vld [vmem:[%s328_s0 + $0x78] sm:$0xff] }
   0x7   :  { %v32_v28 = vld [vmem:[%s328_s0 + $0x60] sm:$0xff] }
   0x8   :  { %v42_v7 = vmax.f32 %v41_v5, 0.0  ;;  %v51_v24 = vsub.f32 %v20_v11, %v193_v12  ;;  %v52_v25 = vsub.f32 %v21_v14, %v193_v12  ;;  %v53_v30 = vsub.f32 %v22_v15, %v193_v12  ;;  %v151_v44 = vld [vmem:[%s330_s4] ss:$0 sm:$0xff] }
   0x9   :  { %v54_v31 = vsub.f32 %v23_v16, %v193_v12  ;;  %v55_v32 = vsub.f32 %v24_v17, %v193_v12  ;;  %v56_v36 = vsub.f32 %v25_v18, %v193_v12  ;;  %v57_v37 = vsub.f32 %v26_v19, %v193_v12 }
   0xa   :  { %v43_v8 = vadd.f32 1e-05, %v42_v7  ;;  %v58_v38 = vsub.f32 %v27_v20, %v193_v12  ;;  %v59_v39 = vsub.f32 %v28_v21, %v193_v12  ;;  %v60_v41 = vsub.f32 %v29_v22, %v193_v12 }
   0xb   :  { %v61_v42 = vsub.f32 %v30_v26, %v193_v12  ;;  %v62_v43 = vsub.f32 %v31_v27, %v193_v12  ;;  %v63_v45 = vsub.f32 %v32_v28, %v193_v12  ;;  %v64_v46 = vsub.f32 %v33_v33, %v193_v12 }
   0xc   :  { %152 = vrsqrt.f32 %v43_v8  ;;  %v65_v47 = vsub.f32 %v34_v34, %v193_v12  ;;  %v66_v48 = vsub.f32 %v35_v35, %v193_v12 }
  0x16   :  { %v153_v23 = vpop.eup %152 }
  0x17   :  { %v68_v29 = vmul.f32 %v153_v23, %v67_v13 }
  0x19   :  { %v73_v40 = vrot.slane %v68_v29, %v48_v10 }
  0x1b   :  { %v75_v49 = vmul.f32 %v73_v40, %v51_v24  ;;  %v76_v50 = vmul.f32 %v73_v40, %v52_v25  ;;  %v77_v51 = vmul.f32 %v73_v40, %v53_v30  ;;  %v78_v52 = vmul.f32 %v73_v40, %v54_v31 }
  0x1c   :  { %v79_v53 = vmul.f32 %v73_v40, %v55_v32  ;;  %v80_v54 = vmul.f32 %v73_v40, %v56_v36  ;;  %v81_v55 = vmul.f32 %v73_v40, %v57_v37  ;;  %v82_v56 = vmul.f32 %v73_v40, %v58_v38 }
  0x1d   :  { %v98_v57 = vadd.f32 %v151_v44, %v75_v49  ;;  %v99_v58 = vadd.f32 %v151_v44, %v76_v50  ;;  %v100_v59 = vadd.f32 %v151_v44, %v77_v51  ;;  %v101_v60 = vadd.f32 %v151_v44, %v78_v52 }
  0x1e   :  { %v102_v61 = vadd.f32 %v151_v44, %v79_v53  ;;  %v103_v62 = vadd.f32 %v151_v44, %v80_v54  ;;  %v104_v63 = vadd.f32 %v151_v44, %v81_v55  ;;  %v105_v0 = vadd.f32 %v151_v44, %v82_v56 }
  0x1f   :  { %v114_v1 = vmax.f32 %v98_v57, 0.0  ;;  %v115_v2 = vmax.f32 %v99_v58, 0.0  ;;  %v116_v3 = vmax.f32 %v100_v59, 0.0  ;;  %v117_v4 = vmax.f32 %v101_v60, 0.0 }
  0x20   :  { %v118_v5 = vmax.f32 %v102_v61, 0.0  ;;  %v119_v6 = vmax.f32 %v103_v62, 0.0  ;;  %v120_v7 = vmax.f32 %v104_v63, 0.0  ;;  %v121_v8 = vmax.f32 %v105_v0, 0.0 }
  0x21   :  { %131 = vst.msk [vmem:[%s331_s5] sm:$0xff] %vm130_vm0, %v114_v1  ;;  %132 = vst.msk [vmem:[%s331_s5 + $0x8] sm:$0xff] %vm130_vm0, %v115_v2  ;;  %v83_v9 = vmul.f32 %v73_v40, %v59_v39  ;;  %v84_v10 = vmul.f32 %v73_v40, %v60_v41  ;;  %v85_v11 = vmul.f32 %v73_v40, %v61_v42 }
  0x22   :  { %133 = vst.msk [vmem:[%s331_s5 + $0x10] sm:$0xff] %vm130_vm0, %v116_v3  ;;  %134 = vst.msk [vmem:[%s331_s5 + $0x18] sm:$0xff] %vm130_vm0, %v117_v4  ;;  %v86_v12 = vmul.f32 %v73_v40, %v62_v43  ;;  %v87_v13 = vmul.f32 %v73_v40, %v63_v45  ;;  %v88_v14 = vmul.f32 %v73_v40, %v64_v46 }
  0x23   :  { %135 = vst.msk [vmem:[%s331_s5 + $0x20] sm:$0xff] %vm130_vm0, %v118_v5  ;;  %136 = vst.msk [vmem:[%s331_s5 + $0x28] sm:$0xff] %vm130_vm0, %v119_v6  ;;  %v89_v15 = vmul.f32 %v73_v40, %v65_v47  ;;  %v90_v16 = vmul.f32 %v73_v40, %v66_v48  ;;  %v106_v17 = vadd.f32 %v151_v44, %v83_v9 }
  0x24   :  { %137 = vst.msk [vmem:[%s331_s5 + $0x30] sm:$0xff] %vm130_vm0, %v120_v7  ;;  %138 = vst.msk [vmem:[%s331_s5 + $0x38] sm:$0xff] %vm130_vm0, %v121_v8  ;;  %v107_v18 = vadd.f32 %v151_v44, %v84_v10  ;;  %v108_v19 = vadd.f32 %v151_v44, %v85_v11  ;;  %v109_v20 = vadd.f32 %v151_v44, %v86_v12 }
  0x25   :  { %v110_v21 = vadd.f32 %v151_v44, %v87_v13  ;;  %v111_v22 = vadd.f32 %v151_v44, %v88_v14  ;;  %v112_v23 = vadd.f32 %v151_v44, %v89_v15  ;;  %v113_v24 = vadd.f32 %v151_v44, %v90_v16 }
  0x26   :  { %v122_v25 = vmax.f32 %v106_v17, 0.0  ;;  %v123_v26 = vmax.f32 %v107_v18, 0.0  ;;  %v124_v27 = vmax.f32 %v108_v19, 0.0  ;;  %v125_v28 = vmax.f32 %v109_v20, 0.0 }
  0x27   :  { %v126_v29 = vmax.f32 %v110_v21, 0.0  ;;  %v127_v30 = vmax.f32 %v111_v22, 0.0  ;;  %v128_v31 = vmax.f32 %v112_v23, 0.0  ;;  %v129_v32 = vmax.f32 %v113_v24, 0.0 }
  0x28   :  { %139 = vst.msk [vmem:[%s331_s5 + $0x40] sm:$0xff] %vm130_vm0, %v122_v25  ;;  %140 = vst.msk [vmem:[%s331_s5 + $0x48] sm:$0xff] %vm130_vm0, %v123_v26 }
  0x29   :  { %141 = vst.msk [vmem:[%s331_s5 + $0x50] sm:$0xff] %vm130_vm0, %v124_v27  ;;  %142 = vst.msk [vmem:[%s331_s5 + $0x58] sm:$0xff] %vm130_vm0, %v125_v28 }
  0x2a   :  { %143 = vst.msk [vmem:[%s331_s5 + $0x60] sm:$0xff] %vm130_vm0, %v126_v29  ;;  %144 = vst.msk [vmem:[%s331_s5 + $0x68] sm:$0xff] %vm130_vm0, %v127_v30 }
  0x2b   :  { %145 = vst.msk [vmem:[%s331_s5 + $0x70] sm:$0xff] %vm130_vm0, %v128_v31  ;;  %146 = vst.msk [vmem:[%s331_s5 + $0x78] sm:$0xff] %vm130_vm0, %v129_v32 }

// kernel: cnn_forward.16
= control target key start
LH: loop header
LB: loop body
LE: loop exit
PB: predicated region body
PF: predicated region fallthrough
CT: control target
= control target key end

     0   :  { %vm49_vm0 = vcmask 130048   ;;  %vm171_vm1 = vcmask 162816   ;;  %s379_s1 = inlined_call_operand.vmem [shape: f32[16,20], index: 1, kind: input, shape index: {}]   ;;  %s380_s0 = inlined_call_operand.vmem [shape: f32[128,16], index: 0, kind: input, shape index: {}]   ;;  %s381_s2 = inlined_call_operand.vmem [shape: f32[1,20], index: 2, kind: input, shape index: {}]   ;;  %s382_s3 = inlined_call_operand.vmem [shape: f32[128,20], index: 3, kind: output, shape index: {}]  }
   0x1   :  { %v39_v0 = vld [vmem:[%s379_s1] sm:$0xff]  ;;  %v40_v1 = vld [vmem:[%s379_s1 + $0x8] sm:$0xff]  ;;  %v17_v9 = vld [vmem:[%s380_s0 + $0x10] sm:$0xff] }
   0x2   :  { %v15_v2 = vld [vmem:[%s380_s0] sm:$0xff]  ;;  %v41_v3 = vpack.c.bf16 %v40_v1, %v39_v0  ;;  %v16_v4 = vld [vmem:[%s380_s0 + $0x8] sm:$0xff]  ;;  %v18_v10 = vld [vmem:[%s380_s0 + $0x18] sm:$0xff] }
   0x3   :  { %v23_v5 = vld [vmem:[%s380_s0 + $0x40] sm:$0xff]  ;;  %v24_v6 = vld [vmem:[%s380_s0 + $0x48] sm:$0xff]  ;;  %v31_v7 = vpack.c.bf16 %v16_v4, %v15_v2  ;;  %v25_v11 = vld [vmem:[%s380_s0 + $0x50] sm:$0xff]  ;;  %v32_v12 = vpack.c.bf16 %v18_v10, %v17_v9 }
   0x4   :  { %v35_v8 = vpack.c.bf16 %v24_v6, %v23_v5  ;;  %210 = vmatprep.subr.bf16.mxu0 %v41_v3  ;;  %228 = vmatprep.subr.bf16.mxu1 %v41_v3  ;;  %v26_v13 = vld [vmem:[%s380_s0 + $0x58] sm:$0xff]  ;;  %v19_v14 = vld [vmem:[%s380_s0 + $0x20] sm:$0xff]  ;;  %v20_v15 = vld [vmem:[%s380_s0 + $0x28] sm:$0xff] }
   0x5   :  { %211 = vmatpush3.bf16.msra.mxu0 %v41_v3  ;;  %229 = vmatpush3.bf16.msra.mxu1 %v41_v3  ;;  %v36_v16 = vpack.c.bf16 %v26_v13, %v25_v11  ;;  %v33_v17 = vpack.c.bf16 %v20_v15, %v19_v14  ;;  %v27_v18 = vld [vmem:[%s380_s0 + $0x60] sm:$0xff]  ;;  %v28_v19 = vld [vmem:[%s380_s0 + $0x68] sm:$0xff]  ;;  %v21_v21 = vld [vmem:[%s380_s0 + $0x30] sm:$0xff] }
   0x6   :  { %212 = vmatprep.mubr.msk.bf16.mxu0 %vm49_vm0, %v31_v7  ;;  %220 = vmatprep.mubr.msk.bf16.mxu1 %vm49_vm0, %v35_v8  ;;  %v37_v20 = vpack.c.bf16 %v28_v19, %v27_v18  ;;  %v22_v22 = vld [vmem:[%s380_s0 + $0x38] sm:$0xff]  ;;  %v29_v23 = vld [vmem:[%s380_s0 + $0x70] sm:$0xff]  ;;  %v192_v27 = vld [vmem:[%s381_s2] ss:$0 sm:$0xff] }
   0x7   :  { %v30_v24 = vld [vmem:[%s380_s0 + $0x78] sm:$0xff]  ;;  %v34_v25 = vpack.c.bf16 %v22_v22, %v21_v21 }
   0x8   :  { %213 = vmatmul.mubr.msk.bf16.vlgmr.msra.gmra.mrb[0].mxu0 %vm49_vm0, %v32_v12  ;;  %221 = vmatmul.mubr.msk.bf16.vlgmr.msra.gmra.mrb[0].mxu1 %vm49_vm0, %v36_v16  ;;  %v38_v26 = vpack.c.bf16 %v30_v24, %v29_v23 }
   0x9   :  { %216 = vmatprep.mubr.msk.bf16.mxu0 %vm49_vm0, %v33_v17  ;;  %224 = vmatprep.mubr.msk.bf16.mxu1 %vm49_vm0, %v37_v20 }
  0x10   :  { %217 = vmatmul.mubr.msk.bf16.gmra.mrb[4].mxu0 %vm49_vm0, %v34_v25  ;;  %225 = vmatmul.mubr.msk.bf16.gmra.mrb[4].mxu1 %vm49_vm0, %v38_v26 }
  0xdb   :  { %v214_v28 = vpop.f32.mrb[0].mxu0  ;;  %v222_v29 = vpop.f32.mrb[0].mxu1 }
  0xdc   :  { %v117_v30 = vadd.f32 %v214_v28, %v192_v27  ;;  %v149_v31 = vadd.f32 %v222_v29, %v192_v27  ;;  %v108_v32 = vpop.f32.mrb[1].mxu0  ;;  %v140_v33 = vpop.f32.mrb[1].mxu1 }
  0xdd   :  { %v109_v34 = vadd.f32 %v192_v27, %v108_v32  ;;  %v141_v35 = vadd.f32 %v192_v27, %v140_v33  ;;  %v215_v36 = vpop.f32.mrb[2].mxu0  ;;  %v223_v37 = vpop.f32.mrb[2].mxu1 }
  0xde   :  { %174 = vst.msk [vmem:[%s382_s3 + $0x10] sm:$0xff] %vm171_vm1, %v117_v30  ;;  %182 = vst.msk [vmem:[%s382_s3 + $0x50] sm:$0xff] %vm171_vm1, %v149_v31  ;;  %v120_v38 = vadd.f32 %v215_v36, %v192_v27  ;;  %v152_v39 = vadd.f32 %v223_v37, %v192_v27  ;;  %v111_v40 = vpop.f32.mrb[3].mxu0  ;;  %v143_v41 = vpop.f32.mrb[3].mxu1 }
  0xdf   :  { %172 = vst.msk [vmem:[%s382_s3] sm:$0xff] %vm171_vm1, %v109_v34  ;;  %180 = vst.msk [vmem:[%s382_s3 + $0x40] sm:$0xff] %vm171_vm1, %v141_v35  ;;  %v112_v42 = vadd.f32 %v192_v27, %v111_v40  ;;  %v144_v43 = vadd.f32 %v192_v27, %v143_v41 }
  0xe0   :  { %175 = vst.msk [vmem:[%s382_s3 + $0x18] sm:$0xff] %vm171_vm1, %v120_v38  ;;  %183 = vst.msk [vmem:[%s382_s3 + $0x58] sm:$0xff] %vm171_vm1, %v152_v39 }
  0xe1   :  { %173 = vst.msk [vmem:[%s382_s3 + $0x8] sm:$0xff] %vm171_vm1, %v112_v42  ;;  %181 = vst.msk [vmem:[%s382_s3 + $0x48] sm:$0xff] %vm171_vm1, %v144_v43 }
  0xe3   :  { %v218_v44 = vpop.f32.mrb[4].mxu0  ;;  %v226_v45 = vpop.f32.mrb[4].mxu1 }
  0xe4   :  { %v133_v46 = vadd.f32 %v218_v44, %v192_v27  ;;  %v165_v47 = vadd.f32 %v226_v45, %v192_v27  ;;  %v124_v48 = vpop.f32.mrb[5].mxu0  ;;  %v156_v49 = vpop.f32.mrb[5].mxu1 }
  0xe5   :  { %v125_v50 = vadd.f32 %v192_v27, %v124_v48  ;;  %v157_v51 = vadd.f32 %v192_v27, %v156_v49  ;;  %v219_v52 = vpop.f32.mrb[6].mxu0  ;;  %v227_v53 = vpop.f32.mrb[6].mxu1 }
  0xe6   :  { %178 = vst.msk [vmem:[%s382_s3 + $0x30] sm:$0xff] %vm171_vm1, %v133_v46  ;;  %186 = vst.msk [vmem:[%s382_s3 + $0x70] sm:$0xff] %vm171_vm1, %v165_v47  ;;  %v136_v54 = vadd.f32 %v219_v52, %v192_v27  ;;  %v168_v55 = vadd.f32 %v227_v53, %v192_v27  ;;  %v127_v56 = vpop.f32.mrb[7].mxu0  ;;  %v159_v57 = vpop.f32.mrb[7].mxu1 }
  0xe7   :  { %176 = vst.msk [vmem:[%s382_s3 + $0x20] sm:$0xff] %vm171_vm1, %v125_v50  ;;  %184 = vst.msk [vmem:[%s382_s3 + $0x60] sm:$0xff] %vm171_vm1, %v157_v51  ;;  %v128_v58 = vadd.f32 %v192_v27, %v127_v56  ;;  %v160_v59 = vadd.f32 %v192_v27, %v159_v57 }
  0xe8   :  { %179 = vst.msk [vmem:[%s382_s3 + $0x38] sm:$0xff] %vm171_vm1, %v136_v54  ;;  %187 = vst.msk [vmem:[%s382_s3 + $0x78] sm:$0xff] %vm171_vm1, %v168_v55 }
  0xe9   :  { %177 = vst.msk [vmem:[%s382_s3 + $0x28] sm:$0xff] %vm171_vm1, %v128_v58  ;;  %185 = vst.msk [vmem:[%s382_s3 + $0x68] sm:$0xff] %vm171_vm1, %v160_v59 }

// kernel: cnn_forward.13
= control target key start
LH: loop header
LB: loop body
LE: loop exit
PB: predicated region body
PF: predicated region fallthrough
CT: control target
= control target key end

     0   :  { %s3990_s12 = smov 0   ;;  %s5234_s0 = inlined_call_operand.vmem [shape: f32[2,12,12,32], index: 0, kind: input, shape index: {}]   ;;  %s5235_s1 = inlined_call_operand.vmem [shape: f32[5,160,16], index: 1, kind: input, shape index: {}]   ;;  %s5236_s2 = inlined_call_operand.vmem [shape: f32[1,16], index: 2, kind: input, shape index: {}]   ;;  %s5237_s3 = inlined_call_operand.vmem [shape: f32[2,8,8,16], index: 3, kind: output, shape index: {}]  }
   0x1 LB: > { %s2975_s13 = sadd.s32 4294967295, %s3968_s12   ;;  %p2979_p0 = scmp.ge.s32.totalorder %s3968_s12, 1  ;;  %s3968_s12 = sphi %s3990_s12, %s13_s12  }
   0x2   : > { %p137_p1 = scmp.lt.s32.totalorder %s3968_s12, 3 }
   0x4   : > { %p138_p2 = pnand %p2979_p0, %p137_p1 }
   0x6   : > { %141 = sbr.rel (%p138_p2) target bundleno = 474 (0x1da), region = 32 }
   0xd   : > { %v3127_v0 = vld [vmem:[%s5235_s1 + $0x180] sm:$0xff]  ;;  %v3128_v1 = vld [vmem:[%s5235_s1 + $0x188] sm:$0xff]  ;;  %v3129_v2 = vld [vmem:[%s5235_s1 + $0x190] sm:$0xff]  ;;  %p161_p3 = scmp.lt.s32.totalorder %s2975_s13, 1  ;;  %vm564_vm0 = vcmask 1042432   ;;  %vm565_vm1 = vcmask 1046532  }
   0xe   : > { %v4007_v3 = vpack.c.bf16 %v3128_v1, %v3127_v0  ;;  %v3130_v4 = vld [vmem:[%s5235_s1 + $0x198] sm:$0xff]  ;;  %v212_v5 = vld [vmem:[%s5235_s1 + $0x20] sm:$0xff]  ;;  %v213_v6 = vld [vmem:[%s5235_s1 + $0x28] sm:$0xff]  ;;  %vm405_vm2 = vcmask 261120   ;;  %vm278_vm4 = vsmask.f32 3328 }
   0xf   : > { %v4018_v7 = vpack.c.bf16 %v3130_v4, %v3129_v2  ;;  %v230_v8 = vpack.c.bf16 %v213_v6, %v212_v5  ;;  %s5366_s13 = smov (!%p161_p3, %s2975_s13), 1  ;;  %v214_v9 = vld [vmem:[%s5235_s1 + $0x30] sm:$0xff]  ;;  %v215_v10 = vld [vmem:[%s5235_s1 + $0x38] sm:$0xff]  ;;  %v3131_v12 = vld [vmem:[%s5235_s1 + $0x1a0] sm:$0xff]  ;;  %vm279_vm5 = vsmask.f32 7440 }
  0x10   : > { %5283 = vst [vmem:[#allocation2_spill] sm:$0xff] %v4007_v3  ;;  %3599 = vmatprep.subr.bf16.mxu0 %v4007_v3  ;;  %v231_v11 = vpack.c.bf16 %v215_v10, %v214_v9  ;;  %v3132_v13 = vld [vmem:[%s5235_s1 + $0x1a8] sm:$0xff]  ;;  %s3951_s7 = smul.u32 192, %s5366_s13  ;;  %v208_v14 = vld [vmem:[%s5235_s1] sm:$0xff]  ;;  %vm4112_vm3 = vmor %vm564_vm0, %vm565_vm1  ;;  %vm696_vm6 = vsmask.f32 2304 }
  0x11   : > { %5284 = vst [vmem:[#allocation3_spill] sm:$0xff] %v4018_v7  ;;  %3600 = vmatpush3.bf16.msra.mxu0 %v4007_v3  ;;  %3455 = vmatprep.subr.bf16.mxu1 %v230_v8  ;;  %v209_v15 = vld [vmem:[%s5235_s1 + $0x8] sm:$0xff]  ;;  %v4044_v16 = vpack.c.bf16 %v3132_v13, %v3131_v12  ;;  %v3133_v54 = vld [vmem:[%s5235_s1 + $0x1b0] sm:$0xff]  ;;  %v3134_v55 = vld [vmem:[%s5235_s1 + $0x1b8] sm:$0xff]  ;;  %vm697_vm7 = vsmask.f32 6416 }
  0x12   : > { %3601 = vmatprep.subr.bf16.mxu0 %v4018_v7  ;;  %3456 = vmatpush3.bf16.msra.mxu1 %v230_v8  ;;  %s4049_s16 = scalar_lea.vmem %s5234_s0, %s3951_s7  ;;  %v4051_v17 = vpack.c.bf16 %v209_v15, %v208_v14  ;;  %v3135_v59 = vld [vmem:[%s5235_s1 + $0x1c0] sm:$0xff]  ;;  %v3136_v60 = vld [vmem:[%s5235_s1 + $0x1c8] sm:$0xff]  ;;  %v1553_v5 = vpack.c.bf16 %v3134_v55, %v3133_v54  ;;  %vm4206_vm8 = vmor %vm278_vm4, %vm279_vm5  ;;  %vm876_vm10 = vcmask 1041408   ;;  %vm877_vm11 = vcmask 1045508   ;;  %s3269_s21 = sshll.u32 %s5366_s13, 6 }
  0x13   : > { %3457 = vmatprep.subr.bf16.mxu1 %v231_v11  ;;  %v4054_v18 = vld [vmem:[%s4049_s16 + $0x10] sm:$0xff]  ;;  %v175_v19 = vld [vmem:[%s4049_s16 + $0x18] sm:$0xf]  ;;  %v4059_v20 = vld [vmem:[%s4049_s16 + $0x20] sm:$0xff]  ;;  %v4177_v10 = vpack.c.bf16 %v3136_v60, %v3135_v59  ;;  %s5213_s26 = scalar_lea.vmem %s5237_s3, %s3269_s21  ;;  %vm2911_vm13 = vcmask 130048  }
  0x14   : > { %v177_v21 = vld [vmem:[%s4049_s16 + $0x28] sm:$0xf]  ;;  %v4063_v22 = vld [vmem:[%s4049_s16 + $0x30] sm:$0xff]  ;;  %v179_v23 = vld [vmem:[%s4049_s16 + $0x38] sm:$0xf]  ;;  %v4071_v25 = vpack.c.bf16 %v4054_v18, %v4054_v18  ;;  %v4075_v26 = vpack.c.bf16 %v4059_v20, %v4059_v20  ;;  %v4085_v31 = vpack.c.bf16 %v175_v19, %v175_v19 }
  0x15   : > { %3602 = vmatpush3.bf16.msra.mxu0 %v4018_v7  ;;  %v4067_v24 = vld [vmem:[%s4049_s16 + $0x40] sm:$0xff]  ;;  %v4077_v27 = vpack.c.bf16 %v177_v21, %v177_v21  ;;  %v181_v28 = vld [vmem:[%s4049_s16 + $0x48] sm:$0xf]  ;;  %v4082_v29 = vld [vmem:[%s4049_s16 + $0x50] sm:$0xff]  ;;  %v4089_v32 = vpack.c.bf16 %v4063_v22, %v4063_v22  ;;  %v4091_v33 = vpack.c.bf16 %v179_v23, %v179_v23 }
  0x16   : > { %3458 = vmatpush3.bf16.msra.mxu1 %v231_v11  ;;  %3611 = vmatprep.subr.bf16.mxu0 %v4044_v16  ;;  %v183_v30 = vld [vmem:[%s4049_s16 + $0x58] sm:$0xf]  ;;  %v4095_v34 = vpack.c.bf16 %v4067_v24, %v4067_v24  ;;  %v4099_v35 = vld [vmem:[%s4049_s16] sm:$0xff]  ;;  %v4101_v36 = vpack.c.bf16 %v181_v28, %v181_v28  ;;  %v4105_v37 = vpack.c.bf16 %v4082_v29, %v4082_v29  ;;  %v173_v39 = vld [vmem:[%s4049_s16 + $0x8] sm:$0xf]  ;;  %v3016_v41 = vrot.slane %v4071_v25, 9 }
  0x17   : > { %3467 = vmatprep.subr.bf16.mxu1 %v4051_v17  ;;  %v4107_v38 = vpack.c.bf16 %v183_v30, %v183_v30  ;;  %v573_v42 = vrot.slane %v4085_v31, 5  ;;  %v3017_v43 = vrot.slane %v4075_v26, 9  ;;  %v577_v44 = vrot.slane %v4077_v27, 5  ;;  %v210_v28 = vld [vmem:[%s5235_s1 + $0x10] sm:$0xff]  ;;  %v211_v30 = vld [vmem:[%s5235_s1 + $0x18] sm:$0xff]  ;;  %v4216_v55 = vld [vmem:[%s4049_s16 + $0x60] sm:$0xff] }
  0x18   : > { %v3018_v45 = vrot.slane %v4089_v32, 9  ;;  %v4123_v46 = vpack.c.bf16 %v4099_v35, %v4099_v35  ;;  %v581_v47 = vrot.slane %v4091_v33, 5  ;;  %v3019_v48 = vrot.slane %v4095_v34, 9  ;;  %vm4257_vm9 = vmor %vm696_vm6, %vm697_vm7  ;;  %v4285_v7 = vld [vmem:[%s4049_s16 + $0x70] sm:$0xff] }
  0x19   : > { %v585_v49 = vrot.slane %v4101_v36, 5  ;;  %v4128_v50 = vpack.c.bf16 %v173_v39, %v173_v39  ;;  %v4132_v51 = vsel %vm4112_vm3, %v3017_v43, %v577_v44  ;;  %v3020_v52 = vrot.slane %v4105_v37, 9  ;;  %vm4428_vm12 = vmor %vm876_vm10, %vm877_vm11 }
  0x1a   : > { %5287 = vst [vmem:[#allocation4_spill] sm:$0xff] %v4132_v51  ;;  %v589_v53 = vrot.slane %v4107_v38, 5  ;;  %v4144_v56 = vsel %vm4112_vm3, %v3016_v41, %v573_v42  ;;  %v582_v57 = vsel %vm4112_vm3, %v3018_v45, %v581_v47  ;;  %v5243_v2 = vshrl.u32 %v4123_v46, 16 }
  0x1b   : > { %5288 = vst [vmem:[#allocation5_spill] sm:$0xff] %v4144_v56  ;;  %v586_v58 = vsel %vm4112_vm3, %v3019_v48, %v585_v49  ;;  %v4161_v62 = vcombine.low %v4132_v51, %v582_v57  ;;  %v5242_v4 = vshll.u32 %v4123_v46, 16  ;;  %v5239_v6 = vshll.u32 %v4128_v50, 16 }
  0x1c   : > { %v4158_v61 = vsel %vm4112_vm3, %v3020_v52, %v589_v53  ;;  %v4165_v0 = vcombine.low %v582_v57, %v586_v58  ;;  %v5241_v8 = vshrl.u32 %v4071_v25, 16  ;;  %v5240_v9 = vshll.u32 %v4071_v25, 16  ;;  %v185_v57 = vld [vmem:[%s4049_s16 + $0x68] sm:$0xf] }
  0x1d   : > { %5289 = vst [vmem:[#allocation6_spill] sm:$0xff] %v4158_v61  ;;  %v4168_v1 = vcombine.low %v586_v58, %v4158_v61  ;;  %3603 = vmatprep.mubr.msk.bf16.mxu0 %vm405_vm2, %v4161_v62  ;;  %v284_v11 = vrot.slane %v5243_v2, 4  ;;  %v287_v12 = vrot.slane %v5242_v4, 5  ;;  %v5238_v13 = vshll.u32 %v4085_v31, 16 }
  0x1e   : > { %5290 = vst [vmem:[#allocation7_spill] sm:$0xff] %v4165_v0  ;;  %v310_v14 = vshrl.u32 %v4075_v26, 16  ;;  %v293_v15 = vrot.slane %v5239_v6, 5  ;;  %v298_v19 = vrot.slane %v5241_v8, 4  ;;  %v301_v21 = vrot.slane %v5240_v9, 5 }
  0x1f   : > { %3604 = vmatmul.mubr.msk.bf16.vlgmr.msra.gmra.mrb[0].mxu0 %vm405_vm2, %v4168_v1  ;;  %v313_v23 = vshll.u32 %v4075_v26, 16  ;;  %v288_v39 = vor.u32 %v287_v12, %v284_v11  ;;  %v307_v41 = vrot.slane %v5238_v13, 5  ;;  %v319_v43 = vshll.u32 %v4077_v27, 16 }
  0x20   : > { %3612 = vmatpush3.bf16.msra.mxu0 %v4044_v16  ;;  %v312_v42 = vrot.slane %v310_v14, 4  ;;  %v302_v44 = vor.u32 %v301_v21, %v298_v19  ;;  %v324_v47 = vshrl.u32 %v4089_v32, 16  ;;  %v327_v48 = vshll.u32 %v4089_v32, 16  ;;  %v3060_v16 = vld [vmem:[%s5235_s1 + $0xc8] sm:$0xff] }
  0x21   : > { %3613 = vmatprep.subr.bf16.mxu0 %v1553_v5  ;;  %v315_v45 = vrot.slane %v313_v23, 5  ;;  %v289_v49 = vrot.slane %v288_v39, 4  ;;  %v321_v52 = vrot.slane %v319_v43, 5  ;;  %v333_v53 = vshll.u32 %v4091_v33, 16 }
  0x22   : > { %v4213_v54 = vpack.c.bf16 %v211_v30, %v210_v28  ;;  %v303_v58 = vrot.slane %v302_v44, 4  ;;  %v326_v60 = vrot.slane %v324_v47, 4  ;;  %v329_v11 = vrot.slane %v327_v48, 5 }
  0x23   : > { %v316_v59 = vor.u32 %v315_v45, %v312_v42  ;;  %v294_v21 = vsel %vm4206_vm8, %v289_v49, %v293_v15  ;;  %v335_v44 = vrot.slane %v333_v53, 5  ;;  %v4234_v45 = vpack.c.bf16 %v185_v57, %v185_v57 }
  0x24   : > { %3614 = vmatpush3.bf16.msra.mxu0 %v1553_v5  ;;  %v4228_v30 = vsel %vm4206_vm8, %v303_v58, %v307_v41  ;;  %v330_v42 = vor.u32 %v329_v11, %v326_v60  ;;  %v4232_v5 = vpack.c.bf16 %v4216_v55, %v4216_v55  ;;  %v726_v49 = vrot.slane %v319_v43, 6 }
  0x25   : > { %3623 = vmatprep.subr.bf16.mxu0 %v4177_v10  ;;  %5293 = vst [vmem:[#allocation8_spill] sm:$0xff] %v4228_v30  ;;  %v317_v39 = vrot.slane %v316_v59, 4  ;;  %v2999_v15 = vcombine.low %v294_v21, %v4228_v30  ;;  %v719_v6 = vrot.slane %v310_v14, 5  ;;  %v720_v41 = vrot.slane %v313_v23, 6 }
  0x26   : > { %v331_v13 = vrot.slane %v330_v42, 4  ;;  %v723_v59 = vshrl.u32 %v4077_v27, 16  ;;  %v729_v60 = vrot.slane %v324_v47, 5  ;;  %v730_v57 = vrot.slane %v327_v48, 6 }
  0x27   : > { %v4239_v63 = vsel %vm4206_vm8, %v317_v39, %v321_v52  ;;  %3459 = vmatprep.mubr.msk.bf16.mxu1 %vm405_vm2, %v2999_v15  ;;  %v721_v43 = vor.u32 %v720_v41, %v719_v6  ;;  %v733_v52 = vshrl.u32 %v4091_v33, 16  ;;  %v736_v21 = vrot.slane %v333_v53, 6 }
  0x28   : > { %5294 = vst [vmem:[#allocation9_spill] sm:$0xff] %v4239_v63  ;;  %v4247_v11 = vsel %vm4206_vm8, %v331_v13, %v335_v44  ;;  %v725_v23 = vrot.slane %v723_v59, 5  ;;  %v731_v39 = vor.u32 %v730_v57, %v729_v60  ;;  %v338_v42 = vshrl.u32 %v4095_v34, 16 }
  0x29   : > { %v4252_v14 = vcombine.low %v4239_v63, %v4247_v11  ;;  %v722_v13 = vrot.slane %v721_v43, 4  ;;  %v735_v48 = vrot.slane %v733_v52, 5  ;;  %v341_v6 = vshll.u32 %v4095_v34, 16 }
  0x2a   : > { %v347_v53 = vshll.u32 %v4101_v36, 16  ;;  %v727_v44 = vor.u32 %v726_v49, %v725_v23  ;;  %v732_v15 = vrot.slane %v731_v39, 4  ;;  %v352_v41 = vshrl.u32 %v4105_v37, 16 }
  0x2b   : > { %5295 = vst [vmem:[#allocation10_spill] sm:$0xff] %v4252_v14  ;;  %3460 = vmatmul.mubr.msk.bf16.vlgmr.msra.gmra.mrb[0].mxu1 %vm405_vm2, %v4252_v14  ;;  %v355_v59 = vshll.u32 %v4105_v37, 16  ;;  %v737_v60 = vor.u32 %v736_v21, %v735_v48  ;;  %v361_v57 = vshll.u32 %v4107_v38, 16  ;;  %v739_v43 = vrot.slane %v338_v42, 5  ;;  %v187_v14 = vld [vmem:[%s4049_s16 + $0x78] sm:$0xf] }
  0x2c   : > { %3468 = vmatpush3.bf16.msra.mxu1 %v4051_v17  ;;  %v740_v52 = vrot.slane %v341_v6, 6  ;;  %v4271_v58 = vsel %vm4257_vm9, %v722_v13, %v727_v44  ;;  %v743_v9 = vshrl.u32 %v4101_v36, 16  ;;  %v746_v49 = vrot.slane %v347_v53, 6 }
  0x2d   : > { %v749_v23 = vrot.slane %v352_v41, 5  ;;  %3469 = vmatprep.subr.bf16.mxu1 %v4213_v54  ;;  %v4277_v17 = vsel %vm4257_vm9, %v732_v15, %v737_v60  ;;  %v750_v39 = vrot.slane %v355_v59, 6  ;;  %v753_v48 = vshrl.u32 %v4107_v38, 16 }
  0x2e   : > { %v741_v21 = vor.u32 %v740_v52, %v739_v43  ;;  %v4282_v13 = vcombine.low %v4271_v58, %v4277_v17  ;;  %v745_v44 = vrot.slane %v743_v9, 5  ;;  %v756_v8 = vrot.slane %v361_v57, 6 }
  0x2f   : > { %v340_v4 = vrot.slane %v338_v42, 4  ;;  %v751_v28 = vor.u32 %v750_v39, %v749_v23  ;;  %v755_v12 = vrot.slane %v753_v48, 5  ;;  %v343_v19 = vrot.slane %v341_v6, 5 }
  0x30   : > { %v742_v2 = vrot.slane %v741_v21, 4  ;;  %3470 = vmatpush3.bf16.msra.mxu1 %v4213_v54  ;;  %3615 = vmatprep.mubr.msk.bf16.mxu0 %vm405_vm2, %v4282_v13  ;;  %v747_v15 = vor.u32 %v746_v49, %v745_v44  ;;  %v349_v60 = vrot.slane %v347_v53, 5  ;;  %v354_v43 = vrot.slane %v352_v41, 4 }
  0x31   : > { %v357_v52 = vrot.slane %v355_v59, 5  ;;  %v752_v3 = vrot.slane %v751_v28, 4  ;;  %v757_v9 = vor.u32 %v756_v8, %v755_v12  ;;  %v344_v51 = vor.u32 %v343_v19, %v340_v4 }
  0x32   : > { %v363_v42 = vrot.slane %v361_v57, 5  ;;  %v4293_v23 = vsel %vm4257_vm9, %v742_v2, %v747_v15  ;;  %v4297_v21 = vpack.c.bf16 %v4285_v7, %v4285_v7  ;;  %v4299_v54 = vpack.c.bf16 %v187_v14, %v187_v14 }
  0x33   : > { %v358_v6 = vor.u32 %v357_v52, %v354_v43  ;;  %v758_v53 = vsel %vm4257_vm9, %v752_v3, %v757_v9  ;;  %v345_v41 = vrot.slane %v344_v51, 4  ;;  %v366_v28 = vshrl.u32 %v4232_v5, 16 }
  0x34   : > { %v369_v4 = vshll.u32 %v4232_v5, 16  ;;  %v4306_v8 = vcombine.low %v4293_v23, %v758_v53  ;;  %v375_v12 = vshll.u32 %v4234_v45, 16  ;;  %v380_v19 = vshrl.u32 %v4297_v21, 16 }
  0x35   : > { %v359_v2 = vrot.slane %v358_v6, 4  ;;  %v4312_v14 = vsel %vm4206_vm8, %v345_v41, %v349_v60  ;;  %v368_v59 = vrot.slane %v366_v28, 4  ;;  %v383_v3 = vshll.u32 %v4297_v21, 16  ;;  %v4329_v41 = vld [vmem:[%s4049_s16 + $0x80] sm:$0xff] }
  0x36   : > { %v371_v57 = vrot.slane %v369_v4, 5  ;;  %3616 = vmatmul.mubr.msk.bf16.vlgmr.msra.gmra.mrb[0].mxu0 %vm405_vm2, %v4306_v8  ;;  %v377_v49 = vrot.slane %v375_v12, 5  ;;  %v382_v39 = vrot.slane %v380_v19, 4  ;;  %v389_v48 = vshll.u32 %v4299_v54, 16 }
  0x37   : > { %v4319_v51 = vsel %vm4206_vm8, %v359_v2, %v363_v42  ;;  %v385_v60 = vrot.slane %v383_v3, 5  ;;  %3624 = vmatpush3.bf16.msra.mxu0 %v4177_v10  ;;  %v759_v43 = vrot.slane %v366_v28, 5  ;;  %v760_v9 = vrot.slane %v369_v4, 6 }
  0x38   : > { %5298 = vst [vmem:[#allocation11_spill] sm:$0xff] %v4319_v51  ;;  %v4324_v44 = vcombine.low %v4312_v14, %v4319_v51  ;;  %v372_v15 = vor.u32 %v371_v57, %v368_v59  ;;  %v391_v52 = vrot.slane %v389_v48, 5  ;;  %v763_v6 = vshrl.u32 %v4234_v45, 16  ;;  %v189_v57 = vld [vmem:[%s4049_s16 + $0x88] sm:$0xf] }
  0x39   : > { %v766_v42 = vrot.slane %v375_v12, 6  ;;  %v386_v63 = vor.u32 %v385_v60, %v382_v39  ;;  %v769_v30 = vrot.slane %v380_v19, 5  ;;  %v770_v61 = vrot.slane %v383_v3, 6 }
  0x3a   : > { %5299 = vst [vmem:[#allocation12_spill] sm:$0xff] %v4324_v44  ;;  %3463 = vmatprep.mubr.msk.bf16.mxu1 %vm405_vm2, %v4324_v44  ;;  %v373_v2 = vrot.slane %v372_v15, 4  ;;  %v761_v10 = vor.u32 %v760_v9, %v759_v43  ;;  %v765_v28 = vrot.slane %v763_v6, 5  ;;  %v773_v4 = vshrl.u32 %v4299_v54, 16 }
  0x3b   : > { %v776_v59 = vrot.slane %v389_v48, 6  ;;  %v387_v0 = vrot.slane %v386_v63, 4  ;;  %v771_v44 = vor.u32 %v770_v61, %v769_v30  ;;  %v4341_v19 = vpack.c.bf16 %v4329_v41, %v4329_v41  ;;  %v4356_v63 = vld [vmem:[%s4049_s16 + $0x90] sm:$0xff]  ;;  %v191_v30 = vld [vmem:[%s4049_s16 + $0x98] sm:$0xf] }
  0x3c   : > { %v4337_v12 = vsel %vm4206_vm8, %v373_v2, %v377_v49  ;;  %v5301_v3 = vrot.slane %v4128_v50, 5  ;;  %v5302_v39 = vrot.slane %v4123_v46, 9  ;;  %v762_v48 = vrot.slane %v761_v10, 4 }
  0x3d   : > { %5300 = vst [vmem:[#allocation13_spill] sm:$0xff] %v4337_v12  ;;  %v767_v60 = vor.u32 %v766_v42, %v765_v28  ;;  %v775_v43 = vrot.slane %v773_v4, 5  ;;  %v4353_v49 = vsel %vm4206_vm8, %v387_v0, %v391_v52  ;;  %v772_v61 = vrot.slane %v771_v44, 4  ;;  %v216_v0 = vld [vmem:[%s5235_s1 + $0x40] sm:$0xff]  ;;  %v217_v44 = vld [vmem:[%s5235_s1 + $0x48] sm:$0xff] }
  0x3e   : > { %v4349_v15 = vsel %vm4112_vm3, %v5302_v39, %v5301_v3  ;;  %5303 = vst [vmem:[#allocation14_spill] sm:$0xff] %v4353_v49  ;;  %v4359_v9 = vpack.c.bf16 %v189_v57, %v189_v57  ;;  %v5257_v6 = vshrl.u32 %v4341_v19, 16  ;;  %v4364_v2 = vcombine.low %v4337_v12, %v4353_v49 }
  0x3f   : > { %v768_v42 = vsel %vm4257_vm9, %v762_v48, %v767_v60  ;;  %v777_v10 = vor.u32 %v776_v59, %v775_v43  ;;  %v5256_v28 = vshll.u32 %v4341_v19, 16  ;;  %v4393_v48 = vpack.c.bf16 %v191_v30, %v191_v30  ;;  %v3137_v60 = vld [vmem:[%s5235_s1 + $0x1d0] sm:$0xff]  ;;  %v3138_v43 = vld [vmem:[%s5235_s1 + $0x1d8] sm:$0xff] }
  0x40   : > { %5304 = vst [vmem:[#allocation15_spill] sm:$0xff] %v4364_v2  ;;  %v4375_v52 = vcombine.low %v758_v53, %v768_v42  ;;  %v5264_v4 = vshll.u32 %v4359_v9, 16  ;;  %v1331_v57 = vrot.slane %v5257_v6, 5  ;;  %v1335_v3 = vshrl.u32 %v4359_v9, 16  ;;  %3464 = vmatmul.mubr.msk.bf16.gmra.mrb[4].mxu1 %vm405_vm2, %v4364_v2 }
  0x41   : > { %v4385_v59 = vsel %vm4257_vm9, %v772_v61, %v777_v10  ;;  %v1332_v39 = vrot.slane %v5256_v28, 6  ;;  %v4391_v53 = vpack.c.bf16 %v4356_v63, %v4356_v63  ;;  %v5307_v6 = vpack.c.bf16 %v4054_v18, %v4099_v35 }
  0x42   : > { %5305 = vst [vmem:[#allocation16_spill] sm:$0xff] %v4375_v52  ;;  %v4402_v61 = vcombine.low %v768_v42, %v4385_v59  ;;  %v1337_v10 = vrot.slane %v1335_v3, 5  ;;  %v1338_v28 = vrot.slane %v5264_v4, 6  ;;  %v232_v30 = vpack.c.bf16 %v217_v44, %v216_v0  ;;  %v219_v4 = vld [vmem:[%s5235_s1 + $0x58] sm:$0xff] }
  0x43   : > { %3471 = vmatprep.mubr.msk.bf16.mxu1 %vm405_vm2, %v5307_v6  ;;  %v1333_v2 = vor.u32 %v1332_v39, %v1331_v57  ;;  %v5266_v52 = vshrl.u32 %v4391_v53, 16  ;;  %v5265_v49 = vshll.u32 %v4391_v53, 16  ;;  %v5263_v51 = vshll.u32 %v4393_v48, 16 }
  0x44   : > { %5306 = vst [vmem:[#allocation17_spill] sm:$0xff] %v4402_v61  ;;  %3619 = vmatprep.mubr.msk.bf16.mxu0 %vm405_vm2, %v4402_v61  ;;  %v1339_v42 = vor.u32 %v1338_v28, %v1337_v10  ;;  %v1816_v3 = vshrl.u32 %v4393_v48, 16  ;;  %3479 = vmatprep.subr.bf16.mxu1 %v232_v30  ;;  %v4418_v18 = vpack.c.bf16 %v4063_v22, %v4059_v20  ;;  %v3041_v20 = vrot.slane %v4075_v26, 10  ;;  %v3182_v28 = vld [vmem:[%s5235_s1 + $0x250] sm:$0xff] }
  0x45   : > { %v1555_v35 = vpack.c.bf16 %v3138_v43, %v3137_v60  ;;  %v1334_v6 = vrot.slane %v1333_v2, 4  ;;  %v1812_v0 = vrot.slane %v5266_v52, 5  ;;  %v1813_v44 = vrot.slane %v5265_v49, 6 }
  0x46   : > { %5308 = vst [vmem:[#allocation18_spill] sm:$0xff] %v4418_v18  ;;  %v1819_v57 = vrot.slane %v5263_v51, 6  ;;  %v1818_v39 = vrot.slane %v1816_v3, 5  ;;  %v889_v2 = vrot.slane %v4077_v27, 6  ;;  %v3042_v60 = vrot.slane %v4089_v32, 10  ;;  %v218_v51 = vld [vmem:[%s5235_s1 + $0x50] sm:$0xff] }
  0x47   : > { %3625 = vmatprep.subr.bf16.mxu0 %v1555_v35  ;;  %v1814_v43 = vor.u32 %v1813_v44, %v1812_v0  ;;  %v893_v10 = vrot.slane %v4091_v33, 6  ;;  %v3023_v3 = vcombine.low %v4349_v15, %v4144_v56  ;;  %v4446_v26 = vsel %vm4257_vm9, %v1334_v6, %v1339_v42  ;;  %v3168_v33 = vld [vmem:[%s5235_s1 + $0x1e0] sm:$0xff] }
  0x48   : > { %3626 = vmatpush3.bf16.msra.mxu0 %v1555_v35  ;;  %v1820_v27 = vor.u32 %v1819_v57, %v1818_v39  ;;  %v4450_v32 = vsel %vm4428_vm12, %v3041_v20, %v889_v2  ;;  %v3169_v35 = vld [vmem:[%s5235_s1 + $0x1e8] sm:$0xff]  ;;  %3472 = vmatmul.mubr.msk.bf16.vlgmr.msra.gmra.mrb[0].mxu1 %vm405_vm2, %v4418_v18  ;;  %v3043_v42 = vrot.slane %v4095_v34, 10  ;;  %v4467_v6 = vpack.c.bf16 %v4082_v29, %v4067_v24 }
  0x49   : > { %5311 = vst [vmem:[#allocation19_spill] sm:$0xff] %v4450_v32  ;;  %v1815_v0 = vrot.slane %v1814_v43, 4  ;;  %v4462_v15 = vsel %vm4428_vm12, %v3042_v60, %v893_v10  ;;  %3480 = vmatpush3.bf16.msra.mxu1 %v232_v30  ;;  %v897_v44 = vrot.slane %v4101_v36, 6  ;;  %v3044_v57 = vrot.slane %v4105_v37, 10  ;;  %v220_v36 = vld [vmem:[%s5235_s1 + $0x60] sm:$0xff]  ;;  %v221_v37 = vld [vmem:[%s5235_s1 + $0x68] sm:$0xff] }
  0x4a   : > { %5312 = vst [vmem:[#allocation20_spill] sm:$0xff] %v4467_v6  ;;  %v901_v39 = vrot.slane %v4107_v38, 6  ;;  %v233_v20 = vpack.c.bf16 %v219_v4, %v218_v51  ;;  %v4478_v60 = vcombine.low %v4450_v32, %v4462_v15  ;;  %3475 = vmatprep.mubr.msk.bf16.mxu1 %vm405_vm2, %v4467_v6  ;;  %v2003_v34 = vpack.c.bf16 %v3169_v35, %v3168_v33  ;;  %v3172_v32 = vld [vmem:[%s5235_s1 + $0x200] sm:$0xff] }
  0x4b   : > { %v4474_v2 = vsel %vm4257_vm9, %v1815_v0, %v1820_v27  ;;  %v3045_v30 = vrot.slane %v4232_v5, 10  ;;  %v5314_v38 = vshrl.u32 %v4123_v46, 16  ;;  %v905_v43 = vrot.slane %v4234_v45, 6 }
  0x4c   : > { %5313 = vst [vmem:[#allocation21_spill] sm:$0xff] %v4478_v60  ;;  %v4493_v4 = vcombine.low %v4446_v26, %v4474_v2  ;;  %3481 = vmatprep.subr.bf16.mxu1 %v233_v20  ;;  %v3046_v10 = vrot.slane %v4297_v21, 10  ;;  %v5316_v27 = vshll.u32 %v4123_v46, 16  ;;  %v5317_v35 = vshrl.u32 %v4071_v25, 16  ;;  %3635 = vmatprep.subr.bf16.mxu0 %v2003_v34 }
  0x4d   : > { %v699_v51 = vrot.slane %v5314_v38, 5  ;;  %v4503_v49 = vpack.c.bf16 %v4285_v7, %v4216_v55  ;;  %v909_v38 = vrot.slane %v4299_v54, 6  ;;  %v5319_v52 = vshll.u32 %v4071_v25, 16  ;;  %3482 = vmatpush3.bf16.msra.mxu1 %v233_v20 }
  0x4e   : > { %5315 = vst [vmem:[#allocation22_spill] sm:$0xff] %v4493_v4  ;;  %v700_v33 = vrot.slane %v5316_v27, 6  ;;  %v709_v0 = vrot.slane %v5317_v35, 5  ;;  %3620 = vmatmul.mubr.msk.bf16.gmra.mrb[4].mxu0 %vm405_vm2, %v4493_v4  ;;  %v902_v6 = vsel %vm4428_vm12, %v3044_v57, %v901_v39  ;;  %v906_v27 = vsel %vm4428_vm12, %v3045_v30, %v905_v43 }
  0x4f   : > { %5318 = vst [vmem:[#allocation23_spill] sm:$0xff] %v4503_v49  ;;  %v710_v18 = vrot.slane %v5319_v52, 6  ;;  %v234_v35 = vpack.c.bf16 %v221_v37, %v220_v36  ;;  %3627 = vmatprep.mubr.msk.bf16.mxu0 %vm405_vm2, %v4478_v60  ;;  %v4518_v56 = vsel %vm4428_vm12, %v3043_v42, %v897_v44  ;;  %v4522_v52 = vsel %vm4428_vm12, %v3046_v10, %v909_v38  ;;  %v3170_v37 = vld [vmem:[%s5235_s1 + $0x1f0] sm:$0xff] }
  0x50   : > { %v4524_v4 = vcombine.low %v902_v6, %v906_v27  ;;  %v4528_v57 = vpack.c.bf16 %v4067_v24, %v4063_v22  ;;  %v5321_v39 = vshll.u32 %v4128_v50, 16  ;;  %v5322_v30 = vshll.u32 %v4085_v31, 16  ;;  %3476 = vmatmul.mubr.msk.bf16.gmra.mrb[4].mxu1 %vm405_vm2, %v4503_v49  ;;  %v3171_v22 = vld [vmem:[%s5235_s1 + $0x1f8] sm:$0xff] }
  0x51   : > { %3491 = vmatprep.subr.bf16.mxu1 %v234_v35  ;;  %v3110_v42 = vrot.slane %v4341_v19, 10  ;;  %v1433_v44 = vrot.slane %v4359_v9, 6  ;;  %v4545_v24 = vcombine.low %v4518_v56, %v902_v6  ;;  %v4548_v43 = vcombine.low %v906_v27, %v4522_v52  ;;  %3483 = vmatprep.mubr.msk.bf16.mxu1 %vm405_vm2, %v3023_v3 }
  0x52   : > { %5320 = vst [vmem:[#allocation24_spill] sm:$0xff] %v4524_v4  ;;  %v706_v20 = vrot.slane %v5321_v39, 6  ;;  %v716_v36 = vrot.slane %v5322_v30, 6  ;;  %v3162_v10 = vrot.slane %v4391_v53, 10  ;;  %v1902_v38 = vrot.slane %v4393_v48, 6  ;;  %v222_v39 = vld [vmem:[%s5235_s1 + $0x70] sm:$0xff] }
  0x53   : > { %v223_v30 = vld [vmem:[%s5235_s1 + $0x78] sm:$0xff]  ;;  %v701_v49 = vor.u32 %v700_v33, %v699_v51  ;;  %v703_v6 = vshrl.u32 %v4128_v50, 16  ;;  %v711_v4 = vor.u32 %v710_v18, %v709_v0  ;;  %v713_v27 = vshrl.u32 %v4085_v31, 16  ;;  %v3173_v51 = vld [vmem:[%s5235_s1 + $0x208] sm:$0xff] }
  0x54   : > { %v3021_v60 = vrot.slane %v4232_v5, 9  ;;  %v2004_v61 = vpack.c.bf16 %v3171_v22, %v3170_v37  ;;  %v593_v12 = vrot.slane %v4234_v45, 5  ;;  %v4565_v3 = vsel %vm4428_vm12, %v3110_v42, %v1433_v44 }
  0x55   : > { %v705_v18 = vrot.slane %v703_v6, 5  ;;  %v715_v33 = vrot.slane %v713_v27, 5  ;;  %v4577_v5 = vsel %vm4428_vm12, %v3162_v10, %v1902_v38  ;;  %v235_v45 = vpack.c.bf16 %v223_v30, %v222_v39  ;;  %v224_v10 = vld [vmem:[%s5235_s1 + $0x80] sm:$0xff]  ;;  %v3175_v38 = vld [vmem:[%s5235_s1 + $0x218] sm:$0xff]  ;;  %v226_v39 = vld [vmem:[%s5235_s1 + $0x90] sm:$0xff] }
  0x56   : > { %3628 = vmatmul.mubr.msk.bf16.vlgmr.msra.gmra.mrb[0].mxu0 %vm405_vm2, %v4545_v24  ;;  %v3022_v0 = vrot.slane %v4297_v21, 9  ;;  %v597_v42 = vrot.slane %v4299_v54, 5  ;;  %v702_v44 = vrot.slane %v701_v49, 4  ;;  %v712_v22 = vrot.slane %v711_v4, 4  ;;  %v225_v21 = vld [vmem:[%s5235_s1 + $0x88] sm:$0xff]  ;;  %v4594_v54 = vld [vmem:[%s4049_s16 + $0xa0] sm:$0xff] }
  0x57   : > { %3636 = vmatpush3.bf16.msra.mxu0 %v2003_v34  ;;  %3631 = vmatprep.mubr.msk.bf16.mxu0 %vm405_vm2, %v4548_v43  ;;  %v707_v37 = vor.u32 %v706_v20, %v705_v18  ;;  %v717_v6 = vor.u32 %v716_v36, %v715_v33  ;;  %v4583_v27 = vpack.c.bf16 %v3173_v51, %v3172_v32  ;;  %v3174_v4 = vld [vmem:[%s5235_s1 + $0x210] sm:$0xff]  ;;  %v3176_v30 = vld [vmem:[%s5235_s1 + $0x220] sm:$0xff]  ;;  %v3177_v51 = vld [vmem:[%s5235_s1 + $0x228] sm:$0xff]  ;;  %v5324_v18 = vshrl.u32 %v4341_v19, 16 }
  0x58   : > { %3637 = vmatprep.subr.bf16.mxu0 %v2004_v61  ;;  %3484 = vmatmul.mubr.msk.bf16.vlgmr.msra.gmra.mrb[0].mxu1 %vm405_vm2, %v4161_v62  ;;  %v4598_v49 = vsel %vm4112_vm3, %v3021_v60, %v593_v12  ;;  %v4602_v32 = vcombine.low %v4565_v3, %v4577_v5  ;;  %v4608_v34 = vsel %vm4112_vm3, %v3022_v0, %v597_v42  ;;  %v5325_v0 = vshll.u32 %v4341_v19, 16 }
  0x59   : > { %3492 = vmatpush3.bf16.msra.mxu1 %v234_v35  ;;  %3487 = vmatprep.mubr.msk.bf16.mxu1 %vm405_vm2, %v4168_v1  ;;  %v708_v62 = vsel %vm4257_vm9, %v702_v44, %v707_v37  ;;  %v4614_v12 = vsel %vm4257_vm9, %v712_v22, %v717_v6  ;;  %v4616_v60 = vpack.c.bf16 %v225_v21, %v224_v10  ;;  %v193_v35 = vld [vmem:[%s4049_s16 + $0xa8] sm:$0xf]  ;;  %v1136_v33 = vrot.slane %v5324_v18, 4 }
  0x5a   : > { %5323 = vst [vmem:[#allocation25_spill] sm:$0xff] %v4602_v32  ;;  %3493 = vmatprep.subr.bf16.mxu1 %v235_v45  ;;  %v4624_v20 = vpack.c.bf16 %v4216_v55, %v4082_v29  ;;  %v227_v29 = vld [vmem:[%s5235_s1 + $0x98] sm:$0xff]  ;;  %v4644_v55 = vcombine.low %v4598_v49, %v4608_v34  ;;  %v1139_v42 = vrot.slane %v5325_v0, 5  ;;  %v3031_v44 = vcombine.low %v708_v62, %v4614_v12 }
  0x5b   : > { %3638 = vmatpush3.bf16.msra.mxu0 %v2004_v61  ;;  %v4629_v61 = vpack.c.bf16 %v4329_v41, %v4285_v7  ;;  %v4648_v7 = vpack.c.bf16 %v4594_v54, %v4594_v54  ;;  %v5326_v37 = vshrl.u32 %v4391_v53, 16  ;;  %v5327_v6 = vshll.u32 %v4391_v53, 16 }
  0x5c   : > { %3647 = vmatprep.subr.bf16.mxu0 %v4583_v27  ;;  %v4667_v21 = vpack.c.bf16 %v193_v35, %v193_v35  ;;  %v2006_v18 = vpack.c.bf16 %v3175_v38, %v3174_v4  ;;  %v4674_v0 = vcombine.low %v4247_v11, %v4312_v14  ;;  %v4678_v62 = vpack.c.bf16 %v3177_v51, %v3176_v30 }
  0x5d   : > { %3494 = vmatpush3.bf16.msra.mxu1 %v235_v45  ;;  %v1641_v22 = vrot.slane %v5326_v37, 4  ;;  %v1644_v10 = vrot.slane %v5327_v6, 5  ;;  %v4676_v45 = vpack.c.bf16 %v227_v29, %v226_v39  ;;  %v5328_v37 = vshll.u32 %v4359_v9, 16 }
  0x5e   : > { %3632 = vmatmul.mubr.msk.bf16.gmra.mrb[4].mxu0 %vm405_vm2, %v4602_v32  ;;  %3503 = vmatprep.subr.bf16.mxu1 %v4616_v60  ;;  %v3151_v35 = vrot.slane %v4391_v53, 9  ;;  %v1732_v6 = vrot.slane %v4393_v48, 5  ;;  %v1140_v4 = vor.u32 %v1139_v42, %v1136_v33  ;;  %v2096_v38 = vshrl.u32 %v4648_v7, 16 }
  0x5f   : > { %3639 = vmatprep.mubr.msk.bf16.mxu0 %vm405_vm2, %v4528_v57  ;;  %v4682_v36 = vrot.slane %v5328_v37, 5  ;;  %v3200_v11 = vrot.slane %v4648_v7, 9  ;;  %v2189_v14 = vrot.slane %v4667_v21, 5  ;;  %v1645_v39 = vor.u32 %v1644_v10, %v1641_v22  ;;  %v4743_v37 = vld [vmem:[%s4049_s16 + $0xb0] sm:$0xff] }
  0x60   : > { %3488 = vmatmul.mubr.msk.bf16.gmra.mrb[4].mxu1 %vm405_vm2, %v4644_v55  ;;  %v2099_v29 = vshll.u32 %v4648_v7, 16  ;;  %v5281_v30 = vshll.u32 %v4667_v21, 16  ;;  %v4696_v53 = vsel %vm4112_vm3, %v3151_v35, %v1732_v6  ;;  %v3039_v51 = vrot.slane %v4123_v46, 10 }
  0x61   : > { %3495 = vmatprep.mubr.msk.bf16.mxu1 %vm405_vm2, %v3031_v44  ;;  %v881_v33 = vrot.slane %v4128_v50, 6  ;;  %v4702_v42 = vsel %vm4112_vm3, %v3200_v11, %v2189_v14  ;;  %v4706_v44 = vcombine.low %v4277_v17, %v4293_v23  ;;  %v3040_v22 = vrot.slane %v4071_v25, 10 }
  0x62   : > { %v885_v10 = vrot.slane %v4085_v31, 6  ;;  %v4714_v46 = vcombine.low %v4385_v59, %v4446_v26  ;;  %v2269_v50 = vrot.slane %v2096_v38, 5  ;;  %v2270_v35 = vrot.slane %v2099_v29, 6  ;;  %v3055_v59 = vld [vmem:[%s5235_s1 + $0xa0] sm:$0xff]  ;;  %v3056_v26 = vld [vmem:[%s5235_s1 + $0xa8] sm:$0xff] }
  0x63   : > { %v2273_v6 = vshrl.u32 %v4667_v21, 16  ;;  %v2276_v17 = vrot.slane %v5281_v30, 6  ;;  %v1141_v25 = vrot.slane %v1140_v4, 4  ;;  %v5329_v31 = vshll.u32 %v4393_v48, 16 }
  0x64   : > { %v4723_v11 = vrot.slane %v2096_v38, 4  ;;  %v4733_v14 = vcombine.low %v4462_v15, %v4518_v56  ;;  %v2101_v48 = vrot.slane %v2099_v29, 5  ;;  %v2271_v4 = vor.u32 %v2270_v35, %v2269_v50 }
  0x65   : > { %v1650_v23 = vrot.slane %v5329_v31, 5  ;;  %v2275_v38 = vrot.slane %v2273_v6, 5  ;;  %v4740_v31 = vcombine.low %v4522_v52, %v4565_v3  ;;  %v1646_v30 = vrot.slane %v1645_v39, 4 }
  0x66   : > { %3640 = vmatmul.mubr.msk.bf16.vlgmr.msra.gmra.mrb[0].mxu0 %vm405_vm2, %v4624_v20  ;;  %v882_v56 = vsel %vm4428_vm12, %v3039_v51, %v881_v33  ;;  %v3211_v15 = vrot.slane %v4648_v7, 10  ;;  %v4753_v29 = vsel %vm4428_vm12, %v3040_v22, %v885_v10  ;;  %v4755_v52 = vpack.c.bf16 %v3056_v26, %v3055_v59  ;;  %v195_v33 = vld [vmem:[%s4049_s16 + $0xb8] sm:$0xf]  ;;  %v5331_v26 = vld [vmem:[#allocation19_spill] sm:$0xff] }
  0x67   : > { %3648 = vmatpush3.bf16.msra.mxu0 %v4583_v27  ;;  %3643 = vmatprep.mubr.msk.bf16.mxu0 %vm405_vm2, %v4629_v61  ;;  %v2359_v27 = vrot.slane %v4667_v21, 6  ;;  %v2272_v3 = vrot.slane %v2271_v4, 4  ;;  %v2277_v50 = vor.u32 %v2276_v17, %v2275_v38  ;;  %v3093_v7 = vrot.slane %v4341_v19, 9  ;;  %v3179_v51 = vld [vmem:[%s5235_s1 + $0x238] sm:$0xff] }
  0x68   : > { %3649 = vmatprep.subr.bf16.mxu0 %v2006_v18  ;;  %3496 = vmatmul.mubr.msk.bf16.vlgmr.msra.gmra.mrb[0].mxu1 %vm405_vm2, %v4282_v13  ;;  %v4767_v13 = vpack.c.bf16 %v4356_v63, %v4329_v41  ;;  %v4782_v41 = vpack.c.bf16 %v4743_v37, %v4743_v37  ;;  %v2102_v6 = vor.u32 %v2101_v48, %v4723_v11  ;;  %v3178_v11 = vld [vmem:[%s5235_s1 + $0x230] sm:$0xff] }
  0x69   : > { %3504 = vmatpush3.bf16.msra.mxu1 %v4616_v60  ;;  %3499 = vmatprep.mubr.msk.bf16.mxu1 %vm405_vm2, %v4306_v8  ;;  %v4763_v39 = vsel %vm4428_vm12, %v3211_v15, %v2359_v27  ;;  %v1239_v60 = vrot.slane %v4359_v9, 5  ;;  %v4776_v19 = vsel %vm4257_vm9, %v2272_v3, %v2277_v50  ;;  %v4790_v9 = vsel %vm4206_vm8, %v1646_v30, %v1650_v23  ;;  %v5332_v15 = vld [vmem:[#allocation13_spill] sm:$0xff]  ;;  %v5333_v27 = vld [vmem:[#allocation11_spill] sm:$0xff] }
  0x6a   : > { %3505 = vmatprep.subr.bf16.mxu1 %v4676_v45  ;;  %v4800_v59 = vpack.c.bf16 %v195_v33, %v195_v33  ;;  %v3047_v30 = vcombine.low %v882_v56, %v4753_v29  ;;  %v2556_v23 = vshll.u32 %v4782_v41, 16  ;;  %v3249_v56 = vrot.slane %v4782_v41, 9  ;;  %v5334_v50 = vld [vmem:[#allocation17_spill] sm:$0xff]  ;;  %v5335_v33 = vld [vmem:[#allocation14_spill] sm:$0xff] }
  0x6b   : > { %3650 = vmatpush3.bf16.msra.mxu0 %v2006_v18  ;;  %v1146_v18 = vsel %vm4206_vm8, %v1141_v25, %v4682_v36  ;;  %v5330_v36 = vpack.c.bf16 %v4594_v54, %v4356_v63  ;;  %v2553_v25 = vshrl.u32 %v4782_v41, 16  ;;  %v4817_v63 = vsel %vm4112_vm3, %v3093_v7, %v1239_v60 }
  0x6c   : > { %3659 = vmatprep.subr.bf16.mxu0 %v4678_v62  ;;  %v4798_v17 = vcombine.low %v1146_v18, %v4790_v9  ;;  %v2558_v4 = vrot.slane %v2556_v23, 5  ;;  %v4822_v38 = vcombine.low %v4817_v63, %v4696_v53  ;;  %v4827_v3 = vcombine.low %v5333_v27, %v5332_v15 }
  0x6d   : > { %3506 = vmatpush3.bf16.msra.mxu1 %v4676_v45  ;;  %v2562_v45 = vshll.u32 %v4800_v59, 16  ;;  %v2555_v48 = vrot.slane %v2553_v25, 4  ;;  %v4832_v7 = vcombine.low %v5335_v33, %v1146_v18  ;;  %v5336_v60 = vshll.u32 %v4667_v21, 16  ;;  %v3057_v21 = vld [vmem:[%s5235_s1 + $0xb0] sm:$0xff]  ;;  %v3058_v33 = vld [vmem:[%s5235_s1 + $0xb8] sm:$0xff] }
  0x6e   : > { %3644 = vmatmul.mubr.msk.bf16.gmra.mrb[4].mxu0 %vm405_vm2, %v5330_v36  ;;  %3515 = vmatprep.subr.bf16.mxu1 %v4755_v52  ;;  %v2646_v15 = vrot.slane %v4800_v59, 5  ;;  %v2103_v27 = vrot.slane %v2102_v6, 4  ;;  %v2726_v18 = vrot.slane %v2553_v25, 5  ;;  %v2727_v10 = vrot.slane %v2556_v23, 6 }
  0x6f   : > { %3651 = vmatprep.mubr.msk.bf16.mxu0 %vm405_vm2, %v4674_v0  ;;  %v2107_v36 = vrot.slane %v5336_v60, 5  ;;  %v2559_v35 = vor.u32 %v2558_v4, %v2555_v48  ;;  %v2564_v22 = vrot.slane %v2562_v45, 5  ;;  %v2730_v6 = vshrl.u32 %v4800_v59, 16  ;;  %v3180_v4 = vld [vmem:[%s5235_s1 + $0x240] sm:$0xff] }
  0x70   : > { %3500 = vmatmul.mubr.msk.bf16.gmra.mrb[4].mxu1 %vm405_vm2, %v5334_v50  ;;  %v4852_v60 = vsel %vm4112_vm3, %v3249_v56, %v2646_v15  ;;  %v2733_v32 = vrot.slane %v2562_v45, 6  ;;  %v3181_v50 = vld [vmem:[%s5235_s1 + $0x248] sm:$0xff]  ;;  %v2728_v40 = vor.u32 %v2727_v10, %v2726_v18  ;;  %v3260_v15 = vrot.slane %v4782_v41, 10 }
  0x71   : > { %3507 = vmatprep.mubr.msk.bf16.mxu1 %vm405_vm2, %v3047_v30  ;;  %v2008_v30 = vpack.c.bf16 %v3179_v51, %v3178_v11  ;;  %v2560_v48 = vrot.slane %v2559_v35, 4  ;;  %v3250_v25 = vcombine.low %v4702_v42, %v4852_v60  ;;  %v2732_v56 = vrot.slane %v2730_v6, 5  ;;  %v3183_v6 = vld [vmem:[%s5235_s1 + $0x258] sm:$0xff] }
  0x72   : > { %v2108_v51 = vsel %vm4206_vm8, %v2103_v27, %v2107_v36  ;;  %v1030_v35 = vpack.c.bf16 %v3058_v33, %v3057_v21  ;;  %v2729_v45 = vrot.slane %v2728_v40, 4  ;;  %v2009_v18 = vpack.c.bf16 %v3181_v50, %v3180_v4  ;;  %v3059_v36 = vld [vmem:[%s5235_s1 + $0xc0] sm:$0xff]  ;;  %v5338_v33 = vld [vmem:[#allocation7_spill] sm:$0xff] }
  0x73   : > { %v2565_v23 = vsel %vm4206_vm8, %v2560_v48, %v2564_v22  ;;  %v2734_v10 = vor.u32 %v2733_v32, %v2732_v56  ;;  %v5337_v22 = vld [vmem:[#allocation21_spill] sm:$0xff]  ;;  %v3195_v41 = vcombine.low %v4790_v9, %v2108_v51  ;;  %v1031_v27 = vpack.c.bf16 %v3060_v16, %v3059_v36  ;;  %v3961_v9 = vld [vmem:[%s4049_s16 + $0x20] sm:$0xff]  ;;  %v3061_v56 = vld [vmem:[%s5235_s1 + $0xd0] sm:$0xff] }
  0x74   : > { %v4872_v11 = vcombine.low %v2108_v51, %v2565_v23  ;;  %v4920_v4 = vcombine.low %v4608_v34, %v4817_v63  ;;  %v2010_v40 = vpack.c.bf16 %v3183_v6, %v3182_v28  ;;  %v3062_v51 = vld [vmem:[%s5235_s1 + $0xd8] sm:$0xff]  ;;  %v3063_v23 = vld [vmem:[%s5235_s1 + $0xe0] sm:$0xff]  ;;  %v3068_v28 = vld [vmem:[%s5235_s1 + $0x108] sm:$0xff] }
  0x75   : > { %v4886_v32 = vsel %vm4257_vm9, %v2729_v45, %v2734_v10  ;;  %v1032_v34 = vpack.c.bf16 %v3062_v51, %v3061_v56  ;;  %v3064_v45 = vld [vmem:[%s5235_s1 + $0xe8] sm:$0xff] }
  0x76   : > { %3652 = vmatmul.mubr.msk.bf16.vlgmr.msra.gmra.mrb[0].mxu0 %vm405_vm2, %v4827_v3  ;;  %v3255_v50 = vcombine.low %v4776_v19, %v4886_v32  ;;  %v1033_v10 = vpack.c.bf16 %v3064_v45, %v3063_v23 }
  0x77   : > { %3660 = vmatpush3.bf16.msra.mxu0 %v4678_v62  ;;  %3655 = vmatprep.mubr.msk.bf16.mxu0 %vm405_vm2, %v4832_v7  ;;  %v2816_v62 = vrot.slane %v4800_v59, 6 }
  0x78   : > { %3661 = vmatprep.subr.bf16.mxu0 %v2008_v30  ;;  %3508 = vmatmul.mubr.msk.bf16.vlgmr.msra.gmra.mrb[0].mxu1 %vm405_vm2, %v5337_v22  ;;  %v3217_v22 = vld [vmem:[%s5235_s1 + $0x280] sm:$0xff] }
  0x79   : > { %3516 = vmatpush3.bf16.msra.mxu1 %v4755_v52  ;;  %3511 = vmatprep.mubr.msk.bf16.mxu1 %vm405_vm2, %v4545_v24  ;;  %v4896_v59 = vsel %vm4428_vm12, %v3260_v15, %v2816_v62  ;;  %v3960_v52 = vld [vmem:[%s4049_s16 + $0x10] sm:$0xff]  ;;  %v5340_v15 = vcombine.low %v4696_v53, %v4702_v42  ;;  %v5342_v53 = vld [vmem:[#allocation9_spill] sm:$0xff]  ;;  %v5360_v42 = vld [vmem:[#allocation10_spill] sm:$0xff] }
  0x7a   : > { %3517 = vmatprep.subr.bf16.mxu1 %v1030_v35  ;;  %v3261_v47 = vcombine.low %v4763_v39, %v4896_v59  ;;  %v3290_v21 = vpack.c.bf16 %v3961_v9, %v3960_v52  ;;  %v3065_v62 = vld [vmem:[%s5235_s1 + $0xf0] sm:$0xff] }
  0x7b   : > { %3662 = vmatpush3.bf16.msra.mxu0 %v2008_v30  ;;  %v5339_v30 = vld [vmem:[#allocation6_spill] sm:$0xff] }
  0x7c   : > { %3671 = vmatprep.subr.bf16.mxu0 %v2009_v18  ;;  %v4915_v48 = vcombine.low %v5339_v30, %v4598_v49  ;;  %v3184_v49 = vld [vmem:[%s5235_s1 + $0x260] sm:$0xff]  ;;  %v5345_v30 = vcombine.low %v4474_v2, %v4776_v19  ;;  %v5347_v2 = vld [vmem:[#allocation4_spill] sm:$0xff] }
  0x7d   : > { %3518 = vmatpush3.bf16.msra.mxu1 %v1030_v35  ;;  %v3185_v35 = vld [vmem:[%s5235_s1 + $0x268] sm:$0xff] }
  0x7e   : > { %3656 = vmatmul.mubr.msk.bf16.gmra.mrb[4].mxu0 %vm405_vm2, %v3195_v41  ;;  %3527 = vmatprep.subr.bf16.mxu1 %v1031_v27  ;;  %v2011_v63 = vpack.c.bf16 %v3185_v35, %v3184_v49  ;;  %v3218_v41 = vld [vmem:[%s5235_s1 + $0x288] sm:$0xff]  ;;  %v3069_v49 = vld [vmem:[%s5235_s1 + $0x110] sm:$0xff]  ;;  %v3221_v35 = vld [vmem:[%s5235_s1 + $0x2a0] sm:$0xff] }
  0x7f   : > { %3663 = vmatprep.mubr.msk.bf16.mxu0 %vm405_vm2, %v5338_v33  ;;  %v2460_v9 = vpack.c.bf16 %v3218_v41, %v3217_v22  ;;  %v3119_v22 = vld [vmem:[%s5235_s1 + $0x140] sm:$0xff]  ;;  %v3120_v41 = vld [vmem:[%s5235_s1 + $0x148] sm:$0xff] }
  0x80   : > { %3512 = vmatmul.mubr.msk.bf16.gmra.mrb[4].mxu1 %vm405_vm2, %v4548_v43 }
  0x81   : > { %3519 = vmatprep.mubr.msk.bf16.mxu1 %vm405_vm2, %v3290_v21  ;;  %v3067_v21 = vld [vmem:[%s5235_s1 + $0x100] sm:$0xff] }
  0x82   : > { %v1035_v6 = vpack.c.bf16 %v3068_v28, %v3067_v21  ;;  %v5355_v21 = vld [vmem:[#allocation12_spill] sm:$0xff] }
  0x83   : > { %v3121_v28 = vld [vmem:[%s5235_s1 + $0x150] sm:$0xff] }
  0x86   : > { %3664 = vmatmul.mubr.msk.bf16.vlgmr.msra.gmra.mrb[0].mxu0 %vm405_vm2, %v4915_v48 }
  0x87   : > { %3672 = vmatpush3.bf16.msra.mxu0 %v2009_v18  ;;  %3667 = vmatprep.mubr.msk.bf16.mxu0 %vm405_vm2, %v4920_v4  ;;  %v5341_v18 = vld [vmem:[#allocation8_spill] sm:$0xff] }
  0x88   : > { %3673 = vmatprep.subr.bf16.mxu0 %v2010_v40  ;;  %3520 = vmatmul.mubr.msk.bf16.vlgmr.msra.gmra.mrb[0].mxu1 %vm405_vm2, %v4528_v57  ;;  %v3186_v57 = vld [vmem:[%s5235_s1 + $0x270] sm:$0xff]  ;;  %v5343_v36 = vcombine.low %v5341_v18, %v5342_v53 }
  0x89   : > { %3528 = vmatpush3.bf16.msra.mxu1 %v1031_v27  ;;  %3523 = vmatprep.mubr.msk.bf16.mxu1 %vm405_vm2, %v4624_v20  ;;  %v3187_v20 = vld [vmem:[%s5235_s1 + $0x278] sm:$0xff]  ;;  %v5344_v27 = vld [vmem:[#allocation16_spill] sm:$0xff] }
  0x8a   : > { %3529 = vmatprep.subr.bf16.mxu1 %v1032_v34  ;;  %v2012_v16 = vpack.c.bf16 %v3187_v20, %v3186_v57  ;;  %v5350_v20 = vcombine.low %v4577_v5, %v4763_v39  ;;  %v5351_v18 = vld [vmem:[#allocation20_spill] sm:$0xff]  ;;  %v5352_v5 = vcombine.low %v4614_v12, %v4271_v58  ;;  %v5353_v58 = vld [vmem:[#allocation23_spill] sm:$0xff] }
  0x8b   : > { %3674 = vmatpush3.bf16.msra.mxu0 %v2010_v40  ;;  %v5346_v40 = vld [vmem:[#allocation5_spill] sm:$0xff] }
  0x8c   : > { %3683 = vmatprep.subr.bf16.mxu0 %v2011_v63  ;;  %v5348_v56 = vcombine.low %v5346_v40, %v5347_v2  ;;  %v3124_v40 = vld [vmem:[%s5235_s1 + $0x168] sm:$0xff] }
  0x8d   : > { %3530 = vmatpush3.bf16.msra.mxu1 %v1032_v34  ;;  %v3222_v34 = vld [vmem:[%s5235_s1 + $0x2a8] sm:$0xff] }
  0x8e   : > { %3668 = vmatmul.mubr.msk.bf16.gmra.mrb[4].mxu0 %vm405_vm2, %v5340_v15  ;;  %3539 = vmatprep.subr.bf16.mxu1 %v1033_v10  ;;  %v2462_v45 = vpack.c.bf16 %v3222_v34, %v3221_v35  ;;  %v3072_v15 = vld [vmem:[%s5235_s1 + $0x128] sm:$0xff] }
  0x8f   : > { %3675 = vmatprep.mubr.msk.bf16.mxu0 %vm405_vm2, %v4706_v44 }
  0x90   : > { %3524 = vmatmul.mubr.msk.bf16.gmra.mrb[4].mxu1 %vm405_vm2, %v4629_v61  ;;  %v3066_v61 = vld [vmem:[%s5235_s1 + $0xf8] sm:$0xff] }
  0x91   : > { %3531 = vmatprep.mubr.msk.bf16.mxu1 %vm405_vm2, %v5343_v36  ;;  %v1034_v52 = vpack.c.bf16 %v3066_v61, %v3065_v62  ;;  %v3073_v36 = vld [vmem:[%s5235_s1 + $0x130] sm:$0xff]  ;;  %v3226_v62 = vld [vmem:[%s5235_s1 + $0x2c8] sm:$0xff] }
  0x96   : > { %3676 = vmatmul.mubr.msk.bf16.vlgmr.msra.gmra.mrb[0].mxu0 %vm405_vm2, %v5344_v27 }
  0x97   : > { %3684 = vmatpush3.bf16.msra.mxu0 %v2011_v63  ;;  %3679 = vmatprep.mubr.msk.bf16.mxu0 %vm405_vm2, %v4714_v46  ;;  %v5349_v63 = vld [vmem:[#allocation24_spill] sm:$0xff] }
  0x98   : > { %3685 = vmatprep.subr.bf16.mxu0 %v2012_v16  ;;  %3532 = vmatmul.mubr.msk.bf16.vlgmr.msra.gmra.mrb[0].mxu1 %vm405_vm2, %v4674_v0  ;;  %v3219_v0 = vld [vmem:[%s5235_s1 + $0x290] sm:$0xff] }
  0x99   : > { %3540 = vmatpush3.bf16.msra.mxu1 %v1033_v10  ;;  %3535 = vmatprep.mubr.msk.bf16.mxu1 %vm405_vm2, %v4827_v3  ;;  %v3220_v3 = vld [vmem:[%s5235_s1 + $0x298] sm:$0xff]  ;;  %v3071_v10 = vld [vmem:[%s5235_s1 + $0x120] sm:$0xff] }
  0x9a   : > { %3541 = vmatprep.subr.bf16.mxu1 %v1034_v52  ;;  %v2461_v51 = vpack.c.bf16 %v3220_v3, %v3219_v0  ;;  %v1037_v57 = vpack.c.bf16 %v3072_v15, %v3071_v10  ;;  %v3123_v3 = vld [vmem:[%s5235_s1 + $0x160] sm:$0xff]  ;;  %v5364_v10 = vld [vmem:[#allocation25_spill] sm:$0xff] }
  0x9b   : > { %3686 = vmatpush3.bf16.msra.mxu0 %v2012_v16  ;;  %v3225_v16 = vld [vmem:[%s5235_s1 + $0x2c0] sm:$0xff]  ;;  %v1548_v2 = vpack.c.bf16 %v3124_v40, %v3123_v3 }
  0x9c   : > { %3695 = vmatprep.subr.bf16.mxu0 %v2460_v9  ;;  %v2464_v61 = vpack.c.bf16 %v3226_v62, %v3225_v16 }
  0x9d   : > { %3542 = vmatpush3.bf16.msra.mxu1 %v1034_v52  ;;  %v1546_v52 = vpack.c.bf16 %v3120_v41, %v3119_v22 }
  0x9e   : > { %3680 = vmatmul.mubr.msk.bf16.gmra.mrb[4].mxu0 %vm405_vm2, %v5345_v30  ;;  %3551 = vmatprep.subr.bf16.mxu1 %v1035_v6  ;;  %v3230_v30 = vld [vmem:[%s5235_s1 + $0x2e8] sm:$0xff] }
  0x9f   : > { %3687 = vmatprep.mubr.msk.bf16.mxu0 %vm405_vm2, %v4733_v14 }
  0xa0   : > { %3536 = vmatmul.mubr.msk.bf16.gmra.mrb[4].mxu1 %vm405_vm2, %v4832_v7  ;;  %v3070_v7 = vld [vmem:[%s5235_s1 + $0x118] sm:$0xff] }
  0xa1   : > { %3543 = vmatprep.mubr.msk.bf16.mxu1 %vm405_vm2, %v5348_v56  ;;  %v1036_v23 = vpack.c.bf16 %v3070_v7, %v3069_v49  ;;  %v3232_v56 = vld [vmem:[%s5235_s1 + $0x2f8] sm:$0xff]  ;;  %v3233_v49 = vld [vmem:[%s5235_s1 + $0x300] sm:$0xff]  ;;  %v3234_v7 = vld [vmem:[%s5235_s1 + $0x308] sm:$0xff] }
  0xa2   : > { %v2468_v34 = vpack.c.bf16 %v3234_v7, %v3233_v49 }
  0xa6   : > { %3688 = vmatmul.mubr.msk.bf16.vlgmr.msra.gmra.mrb[0].mxu0 %vm405_vm2, %v5349_v63 }
  0xa7   : > { %3696 = vmatpush3.bf16.msra.mxu0 %v2460_v9  ;;  %3691 = vmatprep.mubr.msk.bf16.mxu0 %vm405_vm2, %v4740_v31  ;;  %v5354_v9 = vpack.c.bf16 %v4743_v37, %v4594_v54  ;;  %v5356_v54 = vcombine.low %v4753_v29, %v5331_v26  ;;  %v5357_v29 = vld [vmem:[#allocation15_spill] sm:$0xff] }
  0xa8   : > { %3697 = vmatprep.subr.bf16.mxu0 %v2461_v51  ;;  %3544 = vmatmul.mubr.msk.bf16.vlgmr.msra.gmra.mrb[0].mxu1 %vm405_vm2, %v5338_v33  ;;  %v3223_v33 = vld [vmem:[%s5235_s1 + $0x2b0] sm:$0xff] }
  0xa9   : > { %3552 = vmatpush3.bf16.msra.mxu1 %v1035_v6  ;;  %3547 = vmatprep.mubr.msk.bf16.mxu1 %vm405_vm2, %v4915_v48  ;;  %v3224_v48 = vld [vmem:[%s5235_s1 + $0x2b8] sm:$0xff]  ;;  %v3229_v6 = vld [vmem:[%s5235_s1 + $0x2e0] sm:$0xff] }
  0xaa   : > { %3553 = vmatprep.subr.bf16.mxu1 %v1036_v23  ;;  %v2463_v53 = vpack.c.bf16 %v3224_v48, %v3223_v33  ;;  %v2466_v0 = vpack.c.bf16 %v3230_v30, %v3229_v6 }
  0xab   : > { %3698 = vmatpush3.bf16.msra.mxu0 %v2461_v51  ;;  %v5358_v51 = vld [vmem:[#allocation18_spill] sm:$0xff] }
  0xac   : > { %3707 = vmatprep.subr.bf16.mxu0 %v2462_v45 }
  0xad   : > { %3554 = vmatpush3.bf16.msra.mxu1 %v1036_v23  ;;  %v3235_v23 = vld [vmem:[%s5235_s1 + $0x310] sm:$0xff] }
  0xae   : > { %3692 = vmatmul.mubr.msk.bf16.gmra.mrb[4].mxu0 %vm405_vm2, %v5350_v20  ;;  %3563 = vmatprep.subr.bf16.mxu1 %v1037_v57 }
  0xaf   : > { %3699 = vmatprep.mubr.msk.bf16.mxu0 %vm405_vm2, %v5351_v18 }
  0xb0   : > { %3548 = vmatmul.mubr.msk.bf16.gmra.mrb[4].mxu1 %vm405_vm2, %v4920_v4  ;;  %v3074_v4 = vld [vmem:[%s5235_s1 + $0x138] sm:$0xff] }
  0xb1   : > { %3555 = vmatprep.mubr.msk.bf16.mxu1 %vm405_vm2, %v5352_v5  ;;  %v1038_v12 = vpack.c.bf16 %v3074_v4, %v3073_v36 }
  0xb6   : > { %3700 = vmatmul.mubr.msk.bf16.vlgmr.msra.gmra.mrb[0].mxu0 %vm405_vm2, %v5353_v58 }
  0xb7   : > { %3708 = vmatpush3.bf16.msra.mxu0 %v2462_v45  ;;  %3703 = vmatprep.mubr.msk.bf16.mxu0 %vm405_vm2, %v4767_v13  ;;  %v3236_v45 = vld [vmem:[%s5235_s1 + $0x318] sm:$0xff] }
  0xb8   : > { %3709 = vmatprep.subr.bf16.mxu0 %v2463_v53  ;;  %3556 = vmatmul.mubr.msk.bf16.vlgmr.msra.gmra.mrb[0].mxu1 %vm405_vm2, %v4706_v44  ;;  %v3227_v44 = vld [vmem:[%s5235_s1 + $0x2d0] sm:$0xff]  ;;  %v2469_v60 = vpack.c.bf16 %v3236_v45, %v3235_v23 }
  0xb9   : > { %3564 = vmatpush3.bf16.msra.mxu1 %v1037_v57  ;;  %3559 = vmatprep.mubr.msk.bf16.mxu1 %vm405_vm2, %v5344_v27  ;;  %v3228_v27 = vld [vmem:[%s5235_s1 + $0x2d8] sm:$0xff] }
  0xba   : > { %3565 = vmatprep.subr.bf16.mxu1 %v1038_v12  ;;  %v2465_v37 = vpack.c.bf16 %v3228_v27, %v3227_v44 }
  0xbb   : > { %3710 = vmatpush3.bf16.msra.mxu0 %v2463_v53 }
  0xbc   : > { %3719 = vmatprep.subr.bf16.mxu0 %v2464_v61 }
  0xbd   : > { %3566 = vmatpush3.bf16.msra.mxu1 %v1038_v12 }
  0xbe   : > { %3704 = vmatmul.mubr.msk.bf16.gmra.mrb[4].mxu0 %vm405_vm2, %v5354_v9  ;;  %3575 = vmatprep.subr.bf16.mxu1 %v1546_v52 }
  0xbf   : > { %3711 = vmatprep.mubr.msk.bf16.mxu0 %vm405_vm2, %v5355_v21 }
  0xc0   : > { %3560 = vmatmul.mubr.msk.bf16.gmra.mrb[4].mxu1 %vm405_vm2, %v4714_v46  ;;  %v3122_v46 = vld [vmem:[%s5235_s1 + $0x158] sm:$0xff] }
  0xc1   : > { %3567 = vmatprep.mubr.msk.bf16.mxu1 %vm405_vm2, %v5356_v54  ;;  %v1547_v26 = vpack.c.bf16 %v3122_v46, %v3121_v28 }
  0xc6   : > { %3712 = vmatmul.mubr.msk.bf16.vlgmr.msra.gmra.mrb[0].mxu0 %vm405_vm2, %v5357_v29 }
  0xc7   : > { %3720 = vmatpush3.bf16.msra.mxu0 %v2464_v61  ;;  %3715 = vmatprep.mubr.msk.bf16.mxu0 %vm405_vm2, %v4798_v17 }
  0xc8   : > { %3721 = vmatprep.subr.bf16.mxu0 %v2465_v37  ;;  %3568 = vmatmul.mubr.msk.bf16.vlgmr.msra.gmra.mrb[0].mxu1 %vm405_vm2, %v4733_v14  ;;  %v3231_v14 = vld [vmem:[%s5235_s1 + $0x2f0] sm:$0xff] }
  0xc9   : > { %3576 = vmatpush3.bf16.msra.mxu1 %v1546_v52  ;;  %3571 = vmatprep.mubr.msk.bf16.mxu1 %vm405_vm2, %v5349_v63  ;;  %v5359_v63 = vld [vmem:[#allocation2_spill] sm:$0xff] }
  0xca   : > { %3577 = vmatprep.subr.bf16.mxu1 %v1547_v26 }
  0xcb   : > { %3722 = vmatpush3.bf16.msra.mxu0 %v2465_v37 }
  0xcc   : > { %3731 = vmatprep.subr.bf16.mxu0 %v2466_v0 }
  0xcd   : > { %3578 = vmatpush3.bf16.msra.mxu1 %v1547_v26 }
  0xce   : > { %3716 = vmatmul.mubr.msk.bf16.gmra.mrb[4].mxu0 %vm405_vm2, %v4872_v11  ;;  %3587 = vmatprep.subr.bf16.mxu1 %v1548_v2  ;;  %v2467_v11 = vpack.c.bf16 %v3232_v56, %v3231_v14 }
  0xcf   : > { %3723 = vmatprep.mubr.msk.bf16.mxu0 %vm405_vm2, %v4168_v1  ;;  %v3125_v1 = vld [vmem:[%s5235_s1 + $0x170] sm:$0xff] }
  0xd0   : > { %3572 = vmatmul.mubr.msk.bf16.gmra.mrb[4].mxu1 %vm405_vm2, %v4740_v31  ;;  %v3126_v31 = vld [vmem:[%s5235_s1 + $0x178] sm:$0xff] }
  0xd1   : > { %3579 = vmatprep.mubr.msk.bf16.mxu1 %vm405_vm2, %v5358_v51  ;;  %v1549_v35 = vpack.c.bf16 %v3126_v31, %v3125_v1 }
  0xd6   : > { %3724 = vmatmul.mubr.msk.bf16.vlgmr.msra.gmra.mrb[0].mxu0 %vm405_vm2, %v4644_v55 }
  0xd7   : > { %3732 = vmatpush3.bf16.msra.mxu0 %v2466_v0  ;;  %3727 = vmatprep.mubr.msk.bf16.mxu0 %vm405_vm2, %v4822_v38 }
  0xd8   : > { %3733 = vmatprep.subr.bf16.mxu0 %v2467_v11  ;;  %3580 = vmatmul.mubr.msk.bf16.vlgmr.msra.gmra.mrb[0].mxu1 %vm405_vm2, %v5351_v18 }
  0xd9   : > { %3588 = vmatpush3.bf16.msra.mxu1 %v1548_v2  ;;  %3583 = vmatprep.mubr.msk.bf16.mxu1 %vm405_vm2, %v5353_v58 }
  0xda   : > { %3589 = vmatprep.subr.bf16.mxu1 %v1549_v35 }
  0xdb   : > { %3734 = vmatpush3.bf16.msra.mxu0 %v2467_v11 }
  0xdc   : > { %3743 = vmatprep.subr.bf16.mxu0 %v2468_v34 }
  0xdd   : > { %3590 = vmatpush3.bf16.msra.mxu1 %v1549_v35 }
  0xde   : > { %3728 = vmatmul.mubr.msk.bf16.gmra.mrb[4].mxu0 %vm405_vm2, %v3250_v25  ;;  %3755 = vmatprep.subr.bf16.mxu1 %v5359_v63  ;;  %v5361_v25 = vld [vmem:[#allocation17_spill] sm:$0xff] }
  0xdf   : > { %3735 = vmatprep.mubr.msk.bf16.mxu0 %vm405_vm2, %v4306_v8  ;;  %v5362_v8 = vld [vmem:[#allocation22_spill] sm:$0xff] }
  0xe0   : > { %3584 = vmatmul.mubr.msk.bf16.gmra.mrb[4].mxu1 %vm405_vm2, %v4767_v13  ;;  %v5363_v13 = vld [vmem:[#allocation3_spill] sm:$0xff] }
  0xe1   : > { %3591 = vmatprep.mubr.msk.bf16.mxu1 %vm405_vm2, %v5360_v42 }
  0xe6   : > { %3736 = vmatmul.mubr.msk.bf16.vlgmr.msra.gmra.mrb[0].mxu0 %vm405_vm2, %v5361_v25 }
  0xe7   : > { %3744 = vmatpush3.bf16.msra.mxu0 %v2468_v34  ;;  %3739 = vmatprep.mubr.msk.bf16.mxu0 %vm405_vm2, %v5362_v8 }
  0xe8   : > { %3745 = vmatprep.subr.bf16.mxu0 %v2469_v60  ;;  %3592 = vmatmul.mubr.msk.bf16.vlgmr.msra.gmra.mrb[0].mxu1 %vm405_vm2, %v5355_v21 }
  0xe9   : > { %3757 = vmatpush3.bf16.msra.mxu1 %v5359_v63  ;;  %3595 = vmatprep.mubr.msk.bf16.mxu1 %vm405_vm2, %v5357_v29 }
  0xea   : > { %3756 = vmatprep.subr.bf16.mxu1 %v5363_v13 }
  0xeb   : > { %3746 = vmatpush3.bf16.msra.mxu0 %v2469_v60 }
  0xed   : > { %3758 = vmatpush3.bf16.msra.mxu1 %v5363_v13 }
  0xee   : > { %3740 = vmatmul.mubr.msk.bf16.gmra.mrb[4].mxu0 %vm405_vm2, %v3255_v50 }
  0xef   : > { %3747 = vmatprep.mubr.msk.bf16.mxu0 %vm405_vm2, %v4545_v24 }
  0xf0   : > { %3596 = vmatmul.mubr.msk.bf16.gmra.mrb[4].mxu1 %vm405_vm2, %v4798_v17 }
  0xf1   : > { %3607 = vmatprep.mubr.msk.bf16.mxu1 %vm405_vm2, %v4644_v55 }
  0xf6   : > { %3748 = vmatmul.mubr.msk.bf16.vlgmr.msra.gmra.mrb[0].mxu0 %vm405_vm2, %v4548_v43  ;;  %v3266_v43 = vld [vmem:[%s5236_s2] ss:$0 sm:$0xff] }
  0xf7   : > { %3751 = vmatprep.mubr.msk.bf16.mxu0 %vm405_vm2, %v5364_v10 }
  0xfc   : > { %3608 = vmatmul.mubr.msk.bf16.vlgmr.msra.gmra.mrb[4].mxu1 %vm405_vm2, %v4822_v38 }
  0xfe   : > { %3752 = vmatmul.mubr.msk.bf16.gmra.mrb[4].mxu0 %vm405_vm2, %v3261_v47 }
 0x1bb   : > { %v3593_v24 = vpop.f32.mrb[0].mxu1 }
 0x1bc   : > { %v1691_v19 = vpop.f32.mrb[1].mxu1 }
 0x1bd   : > { %v3594_v17 = vpop.f32.mrb[2].mxu1 }
 0x1be   : > { %v1694_v32 = vpop.f32.mrb[3].mxu1 }
 0x1c9   : > { %v3749_v55 = vpop.f32.mrb[0].mxu0 }
 0x1ca   : > { %v3759_v50 = vadd.f32 %v3749_v55, %v3593_v24  ;;  %v2857_v15 = vpop.f32.mrb[1].mxu0 }
 0x1cb   : > { %v3760_v39 = vadd.f32 %v2857_v15, %v1691_v19  ;;  %v3750_v38 = vpop.f32.mrb[2].mxu0 }
 0x1cc   : > { %v2905_v59 = vadd.f32 %v3759_v50, %v3266_v43  ;;  %v3761_v47 = vadd.f32 %v3750_v38, %v3594_v17  ;;  %v2860_v57 = vpop.f32.mrb[3].mxu0 }
 0x1cd   : > { %v2903_v20 = vadd.f32 %v3760_v39, %v3266_v43  ;;  %v3762_v18 = vadd.f32 %v2860_v57, %v1694_v32 }
 0x1ce   : > { %2914 = vst.msk [vmem:[%s5213_s26 + $0x10] sm:$0xff] %vm2911_vm13, %v2905_v59  ;;  %v2906_v33 = vadd.f32 %v3761_v47, %v3266_v43 }
 0x1cf   : > { %2912 = vst.msk [vmem:[%s5213_s26] sm:$0xff] %vm2911_vm13, %v2903_v20  ;;  %v2904_v48 = vadd.f32 %v3762_v18, %v3266_v43  ;;  %v3609_v5 = vpop.f32.mrb[4].mxu1 }
 0x1d0   : > { %2915 = vst.msk [vmem:[%s5213_s26 + $0x18] sm:$0xff] %vm2911_vm13, %v2906_v33  ;;  %v1789_v36 = vpop.f32.mrb[5].mxu1 }
 0x1d1   : > { %2913 = vst.msk [vmem:[%s5213_s26 + $0x8] sm:$0xff] %vm2911_vm13, %v2904_v48  ;;  %v3753_v53 = vpop.f32.mrb[4].mxu0  ;;  %v3610_v62 = vpop.f32.mrb[6].mxu1 }
 0x1d2   : > { %v2873_v4 = vpop.f32.mrb[5].mxu0  ;;  %v3763_v16 = vadd.f32 %v3753_v53, %v3609_v5  ;;  %v1792_v61 = vpop.f32.mrb[7].mxu1 }
 0x1d3   : > { %v3754_v58 = vpop.f32.mrb[6].mxu0  ;;  %v3764_v12 = vadd.f32 %v2873_v4, %v1789_v36 }
 0x1d4   : > { %v2876_v22 = vpop.f32.mrb[7].mxu0  ;;  %v2909_v41 = vadd.f32 %v3763_v16, %v3266_v43  ;;  %v3765_v52 = vadd.f32 %v3754_v58, %v3610_v62 }
 0x1d5   : > { %v2907_v9 = vadd.f32 %v3764_v12, %v3266_v43  ;;  %v3766_v21 = vadd.f32 %v2876_v22, %v1792_v61 }
 0x1d6   : > { %2918 = vst.msk [vmem:[%s5213_s26 + $0x30] sm:$0xff] %vm2911_vm13, %v2909_v41  ;;  %v2910_v44 = vadd.f32 %v3765_v52, %v3266_v43 }
 0x1d7   : > { %2916 = vst.msk [vmem:[%s5213_s26 + $0x20] sm:$0xff] %vm2911_vm13, %v2907_v9  ;;  %v2908_v27 = vadd.f32 %v3766_v21, %v3266_v43 }
 0x1d8   : > { %2919 = vst.msk [vmem:[%s5213_s26 + $0x38] sm:$0xff] %vm2911_vm13, %v2910_v44 }
 0x1d9   : > { %2917 = vst.msk [vmem:[%s5213_s26 + $0x28] sm:$0xff] %vm2911_vm13, %v2908_v27 }
 0x1da PF: > { %s13_s12 = sadd.s32 1, %s3968_s12  }
 0x1db   : > { %p10_p4 = scmp.ge.s32.totalorder %s13_s12, 4  }
 0x1dd   :  { %12 = sbr.rel (!%p10_p4) target bundleno = 1 (0x1), region = 66 }

// kernel: cnn_forward.17
= control target key start
LH: loop header
LB: loop body
LE: loop exit
PB: predicated region body
PF: predicated region fallthrough
CT: control target
= control target key end

     0   :  { %s3428_s11 = smov 0   ;;  %s4067_s0 = inlined_call_operand.vmem [shape: f32[2,8,8,2], index: 0, kind: input, shape index: {}]   ;;  %s4068_s1 = inlined_call_operand.vmem [shape: f32[2,8,8,2], index: 1, kind: input, shape index: {}]   ;;  %s4069_s2 = inlined_call_operand.vmem [shape: f32[2,8,8,16], index: 2, kind: input, shape index: {}]   ;;  %s4070_s3 = inlined_call_operand.vmem [shape: f32[2,8,8,2], index: 3, kind: input, shape index: {}]   ;;  %s4071_s4 = inlined_call_operand.vmem [shape: f32[2,8,8,2], index: 4, kind: input, shape index: {}]   ;;  %s4072_s5 = inlined_call_operand.vmem [shape: f32[2,8,8,16], index: 5, kind: input, shape index: {}]   ;;  %s4073_s6 = inlined_call_operand.vmem [shape: f32[2,8,8,16], index: 6, kind: input, shape index: {}]   ;;  %s4074_s7 = inlined_call_operand.<no memory space> [shape: f32[1,1], index: 7, kind: input, shape index: {}]   ;;  %s4075_s8 = inlined_call_operand.vmem [shape: f32[2,8,8,16], index: 8, kind: output, shape index: {0}]   ;;  %s4076_s9 = inlined_call_operand.vmem [shape: f32[2,8,8,16], index: 9, kind: output, shape index: {1}]  }
   0x1   :  { %v15_v0 = vstv %s4074_s7 }
   0x2   :  { %16 = vst [vmem:[#allocation2] sm:$0x1] %v15_v0 }
   0x3 LB: > { %s2997_s12 = sadd.s32 4294967295, %s3371_s11   ;;  %p3001_p0 = scmp.ge.s32.totalorder %s3371_s11, 1  ;;  %s3371_s11 = sphi %s3428_s11, %s22_s11  }
   0x4   : > { %p352_p1 = scmp.lt.s32.totalorder %s3371_s11, 3 }
   0x6   : > { %p353_p2 = pnand %p3001_p0, %p352_p1 }
   0x7   : > { %p423_p3 = scmp.lt.s32.totalorder (!%p353_p2), %s2997_s12, 1  ;;  %v3373_v1 = vmov (!%p353_p2), 0.0   ;;  %vm3374_vm0 = vmmov (!%p353_p2), 0   ;;  %vm575_vm1 = vcmask (!%p353_p2), 15360   ;;  %vm1327_vm3 = vcmask (!%p353_p2), 64512  }
   0x8   : > { %356 = sbr.rel (%p353_p2) target bundleno = 1634 (0x662), region = 52  ;;  %3127 = vmatprep.subr.bf16.mxu0 (!%p353_p2), %v3373_v1  ;;  %3133 = vmatprep.subr.bf16.mxu1 (!%p353_p2), %v3373_v1  ;;  %vm1416_vm4 = vcmask (!%p353_p2), 1041409   ;;  %vm1418_vm5 = vcmask (!%p353_p2), 1042434   ;;  %vm1420_vm6 = vcmask (!%p353_p2), 1043459   ;;  %vm1422_vm7 = vcmask (!%p353_p2), 1044484  }
   0x9   : > { %3129 = vmatprep.mubr.msk.bf16.mxu0 (!%p353_p2), %vm3374_vm0, %v3373_v1  ;;  %3135 = vmatprep.mubr.msk.bf16.mxu1 (!%p353_p2), %vm3374_vm0, %v3373_v1  ;;  %vm1424_vm8 = vcmask (!%p353_p2), 1045509   ;;  %vm1426_vm9 = vcmask (!%p353_p2), 1046534   ;;  %vm1428_vm10 = vcmask (!%p353_p2), 1047559   ;;  %vm2061_vm11 = vcmask (!%p353_p2), 1043456  }
   0xa   : > { %vm2812_vm12 = vcmask (!%p353_p2), 130048  }
   0xf   : > { %s4080_s12 = smov (!%p423_p3, %s2997_s12), 1 }
  0x10   : > { %s3442_s7 = sshll.u32 %s4080_s12, 6 }
  0x11   : > { %s3448_s15 = scalar_lea.vmem %s4071_s4, %s3442_s7  ;;  %s3456_s18 = scalar_lea.vmem %s4070_s3, %s3442_s7 }
  0x12   : > { %v533_v2 = vld [vmem:[%s3448_s15] sm:$0xff]  ;;  %v534_v3 = vld [vmem:[%s3448_s15 + $0x8] sm:$0xff]  ;;  %v535_v6 = vld [vmem:[%s3448_s15 + $0x10] sm:$0xff]  ;;  %s3498_s21 = scalar_lea.vmem %s4068_s1, %s3442_s7  ;;  %s3520_s24 = scalar_lea.vmem %s4067_s0, %s3442_s7 }
  0x13   : > { %v541_v4 = vpack.c.bf16 %v533_v2, %v533_v2  ;;  %v542_v5 = vpack.c.bf16 %v534_v3, %v534_v3  ;;  %v536_v7 = vld [vmem:[%s3448_s15 + $0x18] sm:$0xff]  ;;  %v517_v10 = vld [vmem:[%s3456_s18] sm:$0xff]  ;;  %v518_v11 = vld [vmem:[%s3456_s18 + $0x8] sm:$0xff]  ;;  %v543_v12 = vpack.c.bf16 %v535_v6, %v535_v6  ;;  %s3858_s27 = scalar_lea.vmem %s4072_s5, %s3442_s7  ;;  %s3918_s30 = scalar_lea.vmem %s4069_s2, %s3442_s7 }
  0x14   : > { %v544_v13 = vpack.c.bf16 %v536_v7, %v536_v7  ;;  %v525_v14 = vpack.c.bf16 %v517_v10, %v517_v10  ;;  %v526_v15 = vpack.c.bf16 %v518_v11, %v518_v11  ;;  %v537_v18 = vld [vmem:[%s3448_s15 + $0x20] sm:$0xff]  ;;  %v538_v19 = vld [vmem:[%s3448_s15 + $0x28] sm:$0xff]  ;;  %v519_v20 = vld [vmem:[%s3456_s18 + $0x10] sm:$0xff]  ;;  %s3994_s14 = scalar_lea.vmem %s4076_s9, %s3442_s7  ;;  %s4024_s17 = scalar_lea.vmem %s4073_s6, %s3442_s7 }
  0x15   : > { %v580_v8 = vsel %vm575_vm1, %v541_v4, 0  ;;  %v626_v9 = vsel %vm575_vm1, %v542_v5, 0  ;;  %v672_v16 = vsel %vm575_vm1, %v543_v12, 0  ;;  %v520_v21 = vld [vmem:[%s3456_s18 + $0x18] sm:$0xff]  ;;  %v545_v22 = vpack.c.bf16 %v537_v18, %v537_v18  ;;  %v539_v28 = vld [vmem:[%s3448_s15 + $0x30] sm:$0xff]  ;;  %v521_v30 = vld [vmem:[%s3456_s18 + $0x20] sm:$0xff]  ;;  %s4034_s20 = scalar_lea.vmem %s4075_s8, %s3442_s7 }
  0x16   : > { %3128 = vmatpush3.bf16.xpose.msra.mxu0 %v580_v8  ;;  %3134 = vmatpush3.bf16.xpose.msra.mxu1 %v626_v9  ;;  %v718_v17 = vsel %vm575_vm1, %v544_v13, 0  ;;  %v546_v23 = vpack.c.bf16 %v538_v19, %v538_v19  ;;  %v527_v24 = vpack.c.bf16 %v519_v20, %v519_v20  ;;  %v528_v25 = vpack.c.bf16 %v520_v21, %v520_v21  ;;  %v540_v29 = vld [vmem:[%s3448_s15 + $0x38] sm:$0xff]  ;;  %v522_v31 = vld [vmem:[%s3456_s18 + $0x28] sm:$0xff]  ;;  %v485_v38 = vld [vmem:[%s3498_s21] sm:$0xff] }
  0x17   : > { %3139 = vmatprep.subr.bf16.mxu0 %v3373_v1  ;;  %3145 = vmatprep.subr.bf16.mxu1 %v3373_v1  ;;  %v764_v26 = vsel %vm575_vm1, %v545_v22, 0  ;;  %v547_v32 = vpack.c.bf16 %v539_v28, %v539_v28  ;;  %v548_v33 = vpack.c.bf16 %v540_v29, %v540_v29  ;;  %v529_v34 = vpack.c.bf16 %v521_v30, %v521_v30  ;;  %v486_v39 = vld [vmem:[%s3498_s21 + $0x8] sm:$0xff]  ;;  %v523_v40 = vld [vmem:[%s3456_s18 + $0x30] sm:$0xff]  ;;  %v524_v41 = vld [vmem:[%s3456_s18 + $0x38] sm:$0xff] }
  0x18   : > { %v810_v27 = vsel %vm575_vm1, %v546_v23, 0  ;;  %v530_v35 = vpack.c.bf16 %v522_v31, %v522_v31  ;;  %v493_v42 = vpack.c.bf16 %v485_v38, %v485_v38  ;;  %v494_v43 = vpack.c.bf16 %v486_v39, %v486_v39  ;;  %v487_v48 = vld [vmem:[%s3498_s21 + $0x10] sm:$0xff]  ;;  %v488_v49 = vld [vmem:[%s3498_s21 + $0x18] sm:$0xff]  ;;  %v469_v50 = vld [vmem:[%s3520_s24] sm:$0xff] }
  0x19   : > { %v856_v36 = vsel %vm575_vm1, %v547_v32, 0  ;;  %v902_v37 = vsel %vm575_vm1, %v548_v33, 0  ;;  %v531_v44 = vpack.c.bf16 %v523_v40, %v523_v40  ;;  %v532_v45 = vpack.c.bf16 %v524_v41, %v524_v41  ;;  %v470_v51 = vld [vmem:[%s3520_s24 + $0x8] sm:$0xff]  ;;  %v489_v58 = vld [vmem:[%s3498_s21 + $0x20] sm:$0xff]  ;;  %v471_v60 = vld [vmem:[%s3520_s24 + $0x10] sm:$0xff] }
  0x1a   : > { %v963_v46 = vsel %vm575_vm1, %v493_v42, 0  ;;  %v1009_v47 = vsel %vm575_vm1, %v494_v43, 0  ;;  %v495_v52 = vpack.c.bf16 %v487_v48, %v487_v48  ;;  %v496_v53 = vpack.c.bf16 %v488_v49, %v488_v49  ;;  %v490_v59 = vld [vmem:[%s3498_s21 + $0x28] sm:$0xff]  ;;  %v472_v61 = vld [vmem:[%s3520_s24 + $0x18] sm:$0xff]  ;;  %v491_v5 = vld [vmem:[%s3498_s21 + $0x30] sm:$0xff] }
  0x1b   : > { %v477_v54 = vpack.c.bf16 %v469_v50, %v469_v50  ;;  %v478_v55 = vpack.c.bf16 %v470_v51, %v470_v51  ;;  %v497_v62 = vpack.c.bf16 %v489_v58, %v489_v58  ;;  %v498_v63 = vpack.c.bf16 %v490_v59, %v490_v59  ;;  %v492_v6 = vld [vmem:[%s3498_s21 + $0x38] sm:$0xff]  ;;  %v473_v7 = vld [vmem:[%s3520_s24 + $0x20] sm:$0xff]  ;;  %v474_v8 = vld [vmem:[%s3520_s24 + $0x28] sm:$0xff] }
  0x1c   : > { %v1055_v56 = vsel %vm575_vm1, %v495_v52, 0  ;;  %v1101_v57 = vsel %vm575_vm1, %v496_v53, 0  ;;  %v479_v0 = vpack.c.bf16 %v471_v60, %v471_v60  ;;  %v480_v2 = vpack.c.bf16 %v472_v61, %v472_v61 }
  0x1d   : > { %3130 = vmatmul.mubr.msk.bf16.vlgmr.msra.gmra.mrb[0].mxu0 %vm575_vm1, %v525_v14  ;;  %3136 = vmatmul.mubr.msk.bf16.vlgmr.msra.gmra.mrb[0].mxu1 %vm575_vm1, %v526_v15  ;;  %v1147_v3 = vsel %vm575_vm1, %v497_v62, 0  ;;  %v1193_v4 = vsel %vm575_vm1, %v498_v63, 0  ;;  %v499_v9 = vpack.c.bf16 %v491_v5, %v491_v5  ;;  %v500_v10 = vpack.c.bf16 %v492_v6, %v492_v6  ;;  %v475_v15 = vld [vmem:[%s3520_s24 + $0x30] sm:$0xff] }
  0x1e   : > { %3140 = vmatpush3.bf16.xpose.msra.mxu0 %v672_v16  ;;  %3146 = vmatpush3.bf16.xpose.msra.mxu1 %v718_v17  ;;  %v481_v11 = vpack.c.bf16 %v473_v7, %v473_v7  ;;  %v482_v12 = vpack.c.bf16 %v474_v8, %v474_v8  ;;  %v476_v16 = vld [vmem:[%s3520_s24 + $0x38] sm:$0xff]  ;;  %v483_v17 = vpack.c.bf16 %v475_v15, %v475_v15  ;;  %v944_v19 = vlaneseq }
  0x1f   : > { %3141 = vmatprep.mubr.msk.bf16.mxu0 %vm3374_vm0, %v3373_v1  ;;  %3147 = vmatprep.mubr.msk.bf16.mxu1 %vm3374_vm0, %v3373_v1  ;;  %v1239_v13 = vsel %vm575_vm1, %v499_v9, 0  ;;  %v1285_v14 = vsel %vm575_vm1, %v500_v10, 0  ;;  %v484_v18 = vpack.c.bf16 %v476_v16, %v476_v16 }
  0x20   : > { %3151 = vmatprep.subr.bf16.mxu0 %v3373_v1  ;;  %3157 = vmatprep.subr.bf16.mxu1 %v3373_v1  ;;  %v3580_v20 = vshrl.u32 %v944_v19, 7  ;;  %v3582_v21 = vand.u32 127, %v944_v19 }
  0x22   : > { %vm3586_vm2 = vcmp.eq.s32.totalorder %v3580_v20, %v3582_v21 }
  0x25   : > { %3142 = vmatmul.mubr.msk.bf16.vlgmr.msra.gmra.mrb[4].mxu0 %vm575_vm1, %v527_v24  ;;  %3148 = vmatmul.mubr.msk.bf16.vlgmr.msra.gmra.mrb[4].mxu1 %vm575_vm1, %v528_v25 }
  0x26   : > { %3152 = vmatpush3.bf16.xpose.msra.mxu0 %v764_v26  ;;  %3158 = vmatpush3.bf16.xpose.msra.mxu1 %v810_v27 }
  0x27   : > { %3153 = vmatprep.mubr.msk.bf16.mxu0 %vm3374_vm0, %v3373_v1  ;;  %3159 = vmatprep.mubr.msk.bf16.mxu1 %vm3374_vm0, %v3373_v1 }
  0x28   : > { %3163 = vmatprep.subr.bf16.mxu0 %v3373_v1  ;;  %3169 = vmatprep.subr.bf16.mxu1 %v3373_v1 }
  0x2d   : > { %3154 = vmatmul.mubr.msk.bf16.vlgmr.msra.gmra.mrb[8].mxu0 %vm575_vm1, %v529_v34  ;;  %3160 = vmatmul.mubr.msk.bf16.vlgmr.msra.gmra.mrb[8].mxu1 %vm575_vm1, %v530_v35 }
  0x2e   : > { %3164 = vmatpush3.bf16.xpose.msra.mxu0 %v856_v36  ;;  %3170 = vmatpush3.bf16.xpose.msra.mxu1 %v902_v37 }
  0x2f   : > { %3165 = vmatprep.mubr.msk.bf16.mxu0 %vm3374_vm0, %v3373_v1  ;;  %3171 = vmatprep.mubr.msk.bf16.mxu1 %vm3374_vm0, %v3373_v1 }
  0x30   : > { %3175 = vmatprep.subr.bf16.mxu0 %v3373_v1  ;;  %3181 = vmatprep.subr.bf16.mxu1 %v3373_v1 }
  0x35   : > { %3166 = vmatmul.mubr.msk.bf16.vlgmr.msra.gmra.mrb[12].mxu0 %vm575_vm1, %v531_v44  ;;  %3172 = vmatmul.mubr.msk.bf16.vlgmr.msra.gmra.mrb[12].mxu1 %vm575_vm1, %v532_v45 }
  0x36   : > { %3176 = vmatpush3.bf16.xpose.msra.mxu0 %v963_v46  ;;  %3182 = vmatpush3.bf16.xpose.msra.mxu1 %v1009_v47 }
  0x37   : > { %3177 = vmatprep.mubr.msk.bf16.mxu0 %vm3374_vm0, %v3373_v1  ;;  %3183 = vmatprep.mubr.msk.bf16.mxu1 %vm3374_vm0, %v3373_v1 }
  0x38   : > { %3187 = vmatprep.subr.bf16.mxu0 %v3373_v1  ;;  %3193 = vmatprep.subr.bf16.mxu1 %v3373_v1 }
  0x3d   : > { %3178 = vmatmul.mubr.msk.bf16.vlgmr.msra.gmra.mrb[16].mxu0 %vm575_vm1, %v477_v54  ;;  %3184 = vmatmul.mubr.msk.bf16.vlgmr.msra.gmra.mrb[16].mxu1 %vm575_vm1, %v478_v55 }
  0x3e   : > { %3188 = vmatpush3.bf16.xpose.msra.mxu0 %v1055_v56  ;;  %3194 = vmatpush3.bf16.xpose.msra.mxu1 %v1101_v57 }
  0x3f   : > { %3189 = vmatprep.mubr.msk.bf16.mxu0 %vm3374_vm0, %v3373_v1  ;;  %3195 = vmatprep.mubr.msk.bf16.mxu1 %vm3374_vm0, %v3373_v1 }
  0x40   : > { %3199 = vmatprep.subr.bf16.mxu0 %v3373_v1  ;;  %3205 = vmatprep.subr.bf16.mxu1 %v3373_v1 }
  0x45   : > { %3190 = vmatmul.mubr.msk.bf16.vlgmr.msra.gmra.mrb[20].mxu0 %vm575_vm1, %v479_v0  ;;  %3196 = vmatmul.mubr.msk.bf16.vlgmr.msra.gmra.mrb[20].mxu1 %vm575_vm1, %v480_v2 }
  0x46   : > { %3200 = vmatpush3.bf16.xpose.msra.mxu0 %v1147_v3  ;;  %3206 = vmatpush3.bf16.xpose.msra.mxu1 %v1193_v4 }
  0x47   : > { %3201 = vmatprep.mubr.msk.bf16.mxu0 %vm3374_vm0, %v3373_v1  ;;  %3207 = vmatprep.mubr.msk.bf16.mxu1 %vm3374_vm0, %v3373_v1 }
  0x48   : > { %3211 = vmatprep.subr.bf16.mxu0 %v3373_v1  ;;  %3217 = vmatprep.subr.bf16.mxu1 %v3373_v1 }
  0x4d   : > { %3202 = vmatmul.mubr.msk.bf16.vlgmr.msra.gmra.mrb[24].mxu0 %vm575_vm1, %v481_v11  ;;  %3208 = vmatmul.mubr.msk.bf16.vlgmr.msra.gmra.mrb[24].mxu1 %vm575_vm1, %v482_v12 }
  0x4e   : > { %3212 = vmatpush3.bf16.xpose.msra.mxu0 %v1239_v13  ;;  %3218 = vmatpush3.bf16.xpose.msra.mxu1 %v1285_v14 }
  0x4f   : > { %3213 = vmatprep.mubr.msk.bf16.mxu0 %vm3374_vm0, %v3373_v1  ;;  %3219 = vmatprep.mubr.msk.bf16.mxu1 %vm3374_vm0, %v3373_v1 }
  0x50   : > { %3223 = vmatprep.subr.bf16.mxu0 %v3373_v1  ;;  %3229 = vmatprep.subr.bf16.mxu1 %v3373_v1 }
  0x55   : > { %3214 = vmatmul.mubr.msk.bf16.vlgmr.msra.gmra.mrb[28].mxu0 %vm575_vm1, %v483_v17  ;;  %3220 = vmatmul.mubr.msk.bf16.vlgmr.msra.gmra.mrb[28].mxu1 %vm575_vm1, %v484_v18 }
  0x56   : > { %3225 = vmatprep.mubr.msk.bf16.mxu0 %vm3374_vm0, %v3373_v1  ;;  %3231 = vmatprep.mubr.msk.bf16.mxu1 %vm3374_vm0, %v3373_v1 }
  0xf0   : > { %v616_v23 = vpop.f32.mrb[0].mxu0  ;;  %v662_v24 = vpop.f32.mrb[0].mxu1 }
  0xf1   : > { %v3592_v25 = vsel %vm3586_vm2, -1e+30, %v616_v23  ;;  %v3131_v26 = vpop.f32.mrb[1].mxu0  ;;  %v3137_v27 = vpop.f32.mrb[1].mxu1  ;;  %v3598_v31 = vsel %vm3586_vm2, -1e+30, %v662_v24 }
  0xf2   : > { %v619_v28 = vpop.f32.mrb[2].mxu0  ;;  %v665_v29 = vpop.f32.mrb[2].mxu1  ;;  %v1328_v30 = vsel %vm1327_vm3, %v3592_v25, -inf  ;;  %v1331_v34 = vsel %vm1327_vm3, %v3598_v31, -inf }
  0xf3   : > { %v3138_v32 = vpop.f32.mrb[3].mxu1  ;;  %1329 = vmax.xlane.f32.xlu0 %v1328_v30  ;;  %v3132_v33 = vpop.f32.mrb[3].mxu0 }
  0xf7   : > { %1332 = vmax.xlane.f32.xlu0 %v1331_v34 }
  0xf8   : > { %v708_v35 = vpop.f32.mrb[4].mxu0  ;;  %v754_v36 = vpop.f32.mrb[4].mxu1 }
  0xf9   : > { %v3604_v37 = vsel %vm3586_vm2, -1e+30, %v708_v35  ;;  %v3143_v38 = vpop.f32.mrb[5].mxu0  ;;  %v3149_v39 = vpop.f32.mrb[5].mxu1  ;;  %v3610_v43 = vsel %vm3586_vm2, -1e+30, %v754_v36 }
  0xfa   : > { %v711_v40 = vpop.f32.mrb[6].mxu0  ;;  %v757_v41 = vpop.f32.mrb[6].mxu1  ;;  %v1334_v42 = vsel %vm1327_vm3, %v3604_v37, -inf  ;;  %v1337_v46 = vsel %vm1327_vm3, %v3610_v43, -inf }
  0xfb   : > { %v3150_v44 = vpop.f32.mrb[7].mxu1  ;;  %1335 = vmax.xlane.f32.xlu1 %v1334_v42  ;;  %v3144_v45 = vpop.f32.mrb[7].mxu0 }
  0xff   : > { %1338 = vmax.xlane.f32.xlu1 %v1337_v46 }
 0x100   : > { %v800_v47 = vpop.f32.mrb[8].mxu0  ;;  %v846_v48 = vpop.f32.mrb[8].mxu1 }
 0x101   : > { %v3616_v49 = vsel %vm3586_vm2, -1e+30, %v800_v47  ;;  %v3620_v50 = vsel %vm3586_vm2, -1e+30, %v846_v48  ;;  %v3155_v51 = vpop.f32.mrb[9].mxu0  ;;  %v3161_v52 = vpop.f32.mrb[9].mxu1 }
 0x102   : > { %v803_v53 = vpop.f32.mrb[10].mxu0  ;;  %v849_v54 = vpop.f32.mrb[10].mxu1  ;;  %v1340_v55 = vsel %vm1327_vm3, %v3616_v49, -inf  ;;  %v1343_v56 = vsel %vm1327_vm3, %v3620_v50, -inf }
 0x103   : > { %v3162_v57 = vpop.f32.mrb[11].mxu1  ;;  %1341 = vmax.xlane.f32.xlu0 %v1340_v55  ;;  %v3156_v58 = vpop.f32.mrb[11].mxu0  ;;  %1344 = vmax.xlane.f32.xlu1 %v1343_v56 }
 0x108   : > { %v892_v59 = vpop.f32.mrb[12].mxu0  ;;  %v938_v60 = vpop.f32.mrb[12].mxu1 }
 0x109   : > { %v3628_v61 = vsel %vm3586_vm2, -1e+30, %v892_v59  ;;  %v3632_v62 = vsel %vm3586_vm2, -1e+30, %v938_v60  ;;  %v3167_v63 = vpop.f32.mrb[13].mxu0  ;;  %v3173_v0 = vpop.f32.mrb[13].mxu1  ;;  %v3672_v60 = vsub.s32 %v3582_v21, %v3580_v20 }
 0x10a   : > { %v895_v2 = vpop.f32.mrb[14].mxu0  ;;  %v941_v3 = vpop.f32.mrb[14].mxu1  ;;  %v1346_v4 = vsel %vm1327_vm3, %v3628_v61, -inf  ;;  %v1349_v5 = vsel %vm1327_vm3, %v3632_v62, -inf }
 0x10b   : > { %v3174_v6 = vpop.f32.mrb[15].mxu1  ;;  %1347 = vmax.xlane.f32.xlu0 %v1346_v4  ;;  %v3168_v7 = vpop.f32.mrb[15].mxu0  ;;  %1350 = vmax.xlane.f32.xlu1 %v1349_v5 }
 0x110   : > { %v3638_v8 = vpop.f32.mrb[16].mxu0  ;;  %v3640_v9 = vpop.f32.mrb[16].mxu1 }
 0x111   : > { %v3179_v10 = vpop.f32.mrb[17].mxu0  ;;  %v3185_v11 = vpop.f32.mrb[17].mxu1  ;;  %v1352_v12 = vsel %vm1327_vm3, %v3638_v8, -inf  ;;  %v1355_v13 = vsel %vm1327_vm3, %v3640_v9, -inf }
 0x112   : > { %1353 = vmax.xlane.f32.xlu0 %v1352_v12  ;;  %v1002_v14 = vpop.f32.mrb[18].mxu0  ;;  %1356 = vmax.xlane.f32.xlu1 %v1355_v13  ;;  %v1048_v15 = vpop.f32.mrb[18].mxu1 }
 0x113   : > { %v3180_v16 = vpop.f32.mrb[19].mxu0  ;;  %v3186_v17 = vpop.f32.mrb[19].mxu1 }
 0x118   : > { %v3646_v18 = vpop.f32.mrb[20].mxu0  ;;  %v3648_v19 = vpop.f32.mrb[20].mxu1 }
 0x119   : > { %v3191_v22 = vpop.f32.mrb[21].mxu0  ;;  %v3197_v23 = vpop.f32.mrb[21].mxu1  ;;  %v1358_v24 = vsel %vm1327_vm3, %v3646_v18, -inf  ;;  %v1361_v26 = vsel %vm1327_vm3, %v3648_v19, -inf }
 0x11a   : > { %1359 = vmax.xlane.f32.xlu0 %v1358_v24  ;;  %v1094_v27 = vpop.f32.mrb[22].mxu0  ;;  %1362 = vmax.xlane.f32.xlu1 %v1361_v26  ;;  %v1140_v28 = vpop.f32.mrb[22].mxu1 }
 0x11b   : > { %v3192_v29 = vpop.f32.mrb[23].mxu0  ;;  %v3198_v30 = vpop.f32.mrb[23].mxu1 }
 0x120   : > { %v3654_v32 = vpop.f32.mrb[24].mxu0  ;;  %v3656_v33 = vpop.f32.mrb[24].mxu1 }
 0x121   : > { %v3203_v34 = vpop.f32.mrb[25].mxu0  ;;  %v3209_v35 = vpop.f32.mrb[25].mxu1  ;;  %v1364_v36 = vsel %vm1327_vm3, %v3654_v32, -inf  ;;  %v1367_v38 = vsel %vm1327_vm3, %v3656_v33, -inf }
 0x122   : > { %1365 = vmax.xlane.f32.xlu0 %v1364_v36  ;;  %v1186_v39 = vpop.f32.mrb[26].mxu0  ;;  %1368 = vmax.xlane.f32.xlu1 %v1367_v38  ;;  %v1232_v40 = vpop.f32.mrb[26].mxu1 }
 0x123   : > { %v3204_v41 = vpop.f32.mrb[27].mxu0  ;;  %v3210_v42 = vpop.f32.mrb[27].mxu1 }
 0x128   : > { %v3662_v44 = vpop.f32.mrb[28].mxu0  ;;  %v3664_v45 = vpop.f32.mrb[28].mxu1 }
 0x129   : > { %v1370_v46 = vsel %vm1327_vm3, %v3662_v44, -inf  ;;  %v1373_v47 = vsel %vm1327_vm3, %v3664_v45, -inf  ;;  %v3215_v48 = vpop.f32.mrb[29].mxu0  ;;  %v3221_v51 = vpop.f32.mrb[29].mxu1 }
 0x12a   : > { %1371 = vmax.xlane.f32.xlu0 %v1370_v46  ;;  %1374 = vmax.xlane.f32.xlu1 %v1373_v47  ;;  %v1278_v52 = vpop.f32.mrb[30].mxu0  ;;  %v1324_v53 = vpop.f32.mrb[30].mxu1 }
 0x12b   : > { %v3216_v54 = vpop.f32.mrb[31].mxu0  ;;  %v3222_v55 = vpop.f32.mrb[31].mxu1 }
 0x180   : > { %v1330_v56 = vpop.xlane.xlu0 %1329 }
 0x181   : > { %v1387_v3 = vrot.slane %v1330_v56, %v3672_v60 }
 0x184   : > { %v1333_v58 = vpop.xlane.xlu0 %1332 }
 0x185   : > { %v1391_v63 = vrot.slane %v1333_v58, %v3672_v60 }
 0x187   : > { %v1417_v7 = vsel %vm1416_vm4, %v1391_v63, %v1387_v3  ;;  %v3708_v63 = vsub.s32 0, %v3580_v20 }
 0x188   : > { %v1336_v57 = vpop.xlane.xlu1 %1335 }
 0x189   : > { %v1395_v2 = vrot.slane %v1336_v57, %v3672_v60 }
 0x18b   : > { %v1419_v21 = vsel %vm1418_vm5, %v1395_v2, %v1417_v7 }
 0x18c   : > { %v1339_v59 = vpop.xlane.xlu1 %1338 }
 0x18d   : > { %v1399_v4 = vrot.slane %v1339_v59, %v3672_v60  ;;  %v3705_v59 = vsub.s32 1, %v3580_v20 }
 0x18f   : > { %v1421_v10 = vsel %vm1420_vm6, %v1399_v4, %v1419_v21  ;;  %v3713_v4 = vsub.s32 2, %v3580_v20  ;;  %v3721_v21 = vsub.s32 3, %v3580_v20 }
 0x190   : > { %v1342_v0 = vpop.xlane.xlu0 %1341  ;;  %v1345_v6 = vpop.xlane.xlu1 %1344 }
 0x191   : > { %v1403_v5 = vrot.slane %v1342_v0, %v3672_v60  ;;  %v1407_v11 = vrot.slane %v1345_v6, %v3672_v60 }
 0x193   : > { %v1423_v12 = vsel %vm1422_vm7, %v1403_v5, %v1421_v10  ;;  %v3716_v5 = vsub.s32 4, %v3580_v20  ;;  %v3724_v10 = vsub.s32 6, %v3580_v20 }
 0x194   : > { %v1425_v17 = vsel %vm1424_vm8, %v1407_v11, %v1423_v12 }
 0x198   : > { %v1348_v13 = vpop.xlane.xlu0 %1347  ;;  %v1351_v14 = vpop.xlane.xlu1 %1350 }
 0x199   : > { %v1411_v15 = vrot.slane %v1348_v13, %v3672_v60  ;;  %v1415_v16 = vrot.slane %v1351_v14, %v3672_v60  ;;  %v3729_v13 = vsub.s32 5, %v3580_v20 }
 0x19b   : > { %v1427_v22 = vsel %vm1426_vm9, %v1411_v15, %v1425_v17 }
 0x19c   : > { %v1429_v23 = vsel %vm1428_vm10, %v1415_v16, %v1427_v22  ;;  %v3734_v16 = vsub.s32 7, %v3580_v20 }
 0x19d   : > { %1431 = vxpose.xlu0.b32.start.end [1/1] (short) (narrow) %v1429_v23, 8 }
 0x19f   : > { %v1354_v24 = vpop.xlane.xlu0 %1353  ;;  %v1357_v26 = vpop.xlane.xlu1 %1356 }
 0x1a0   : > { %v1474_v27 = vrot.slane %v1354_v24, %v3672_v60  ;;  %v1478_v28 = vrot.slane %v1357_v26, %v3672_v60 }
 0x1a2   : > { %v1503_v35 = vsel %vm1416_vm4, %v1478_v28, %v1474_v27 }
 0x1a7   : > { %v1360_v29 = vpop.xlane.xlu0 %1359  ;;  %v1363_v34 = vpop.xlane.xlu1 %1362 }
 0x1a8   : > { %v1482_v30 = vrot.slane %v1360_v29, %v3672_v60  ;;  %v1486_v36 = vrot.slane %v1363_v34, %v3672_v60 }
 0x1aa   : > { %v1504_v39 = vsel %vm1418_vm5, %v1482_v30, %v1503_v35 }
 0x1ab   : > { %v1505_v42 = vsel %vm1420_vm6, %v1486_v36, %v1504_v39 }
 0x1af   : > { %v1366_v38 = vpop.xlane.xlu0 %1365  ;;  %v1369_v41 = vpop.xlane.xlu1 %1368 }
 0x1b0   : > { %v1490_v40 = vrot.slane %v1366_v38, %v3672_v60  ;;  %v1494_v46 = vrot.slane %v1369_v41, %v3672_v60 }
 0x1b2   : > { %v1506_v48 = vsel %vm1422_vm7, %v1490_v40, %v1505_v42 }
 0x1b3   : > { %v1507_v53 = vsel %vm1424_vm8, %v1494_v46, %v1506_v48 }
 0x1b7   : > { %v1372_v47 = vpop.xlane.xlu0 %1371  ;;  %v1375_v52 = vpop.xlane.xlu1 %1374 }
 0x1b8   : > { %v1498_v51 = vrot.slane %v1372_v47, %v3672_v60  ;;  %v1502_v54 = vrot.slane %v1375_v52, %v3672_v60 }
 0x1ba   : > { %v1508_v55 = vsel %vm1426_vm9, %v1498_v51, %v1507_v53 }
 0x1bb   : > { %v1509_v56 = vsel %vm1428_vm10, %v1502_v54, %v1508_v55 }
 0x21d   : > { %v1447_v57 = vpop.trf.xlu0 }
 0x21e   : > { %v1511_v58 = vmax.f32 %v1447_v57, %v1509_v56 }
 0x220   : > { %1512 = vxpose.xlu1.b32.start.end [1/1] (short) (narrow) %v1511_v58, 8  ;;  %v1627_v15 = vrot.slane %v1511_v58, %v3708_v63  ;;  %v1641_v22 = vrot.slane %v1511_v58, %v3713_v4  ;;  %v1634_v23 = vrot.slane %v1511_v58, %v3705_v59  ;;  %v1655_v24 = vrot.slane %v1511_v58, %v3716_v5 }
 0x221   : > { %v1648_v26 = vrot.slane %v1511_v58, %v3721_v21  ;;  %v1669_v27 = vrot.slane %v1511_v58, %v3724_v10  ;;  %v1662_v20 = vrot.slane %v1511_v58, %v3729_v13  ;;  %v1676_v28 = vrot.slane %v1511_v58, %v3734_v16 }
 0x2a0   : > { %v1528_v0 = vpop.trf.xlu1 }
 0x2a1   : > { %v1554_v2 = vrot.slane %v1528_v0, %v3705_v59  ;;  %v1547_v3 = vrot.slane %v1528_v0, %v3708_v63  ;;  %v1561_v6 = vrot.slane %v1528_v0, %v3713_v4  ;;  %v1575_v7 = vrot.slane %v1528_v0, %v3716_v5 }
 0x2a2   : > { %v1568_v11 = vrot.slane %v1528_v0, %v3721_v21  ;;  %v1589_v12 = vrot.slane %v1528_v0, %v3724_v10  ;;  %v1582_v14 = vrot.slane %v1528_v0, %v3729_v13  ;;  %v1596_v17 = vrot.slane %v1528_v0, %v3734_v16 }
 0x2a3   : > { %1556 = vbcast.lane.b32.xlu1 %v1554_v2, 256  ;;  %1549 = vbcast.lane.b32.xlu0 %v1547_v3, 256 }
 0x2a7   : > { %1563 = vbcast.lane.b32.xlu1 %v1561_v6, 256  ;;  %1577 = vbcast.lane.b32.xlu0 %v1575_v7, 256 }
 0x2ab   : > { %1570 = vbcast.lane.b32.xlu1 %v1568_v11, 256  ;;  %1591 = vbcast.lane.b32.xlu0 %v1589_v12, 256 }
 0x2af   : > { %1584 = vbcast.lane.b32.xlu1 %v1582_v14, 256  ;;  %1629 = vbcast.lane.b32.xlu0 %v1627_v15, 256 }
 0x2b3   : > { %1598 = vbcast.lane.b32.xlu1 %v1596_v17, 256  ;;  %1643 = vbcast.lane.b32.xlu0 %v1641_v22, 256 }
 0x2b7   : > { %1636 = vbcast.lane.b32.xlu1 %v1634_v23, 256  ;;  %1657 = vbcast.lane.b32.xlu0 %v1655_v24, 256 }
 0x2bb   : > { %1650 = vbcast.lane.b32.xlu1 %v1648_v26, 256  ;;  %1671 = vbcast.lane.b32.xlu0 %v1669_v27, 256 }
 0x2bf   : > { %1664 = vbcast.lane.b32.xlu1 %v1662_v20, 256 }
 0x2c3   : > { %1678 = vbcast.lane.b32.xlu1 %v1676_v28, 256 }
 0x315   : > { %v1557_v29 = vpop.permute.xlu1 %1556  ;;  %v1550_v30 = vpop.permute.xlu0 %1549 }
 0x316   : > { %v1601_v34 = vsub.f32 %v3598_v31, %v1557_v29  ;;  %v1600_v35 = vsub.f32 %v3592_v25, %v1550_v30 }
 0x318   : > { %v1610_v36 = vmul.f32 1.442695, %v1601_v34  ;;  %v1608_v38 = vmul.f32 1.442695, %v1600_v35 }
 0x319   : > { %v1564_v39 = vpop.permute.xlu1 %1563  ;;  %v1578_v40 = vpop.permute.xlu0 %1577 }
 0x31a   : > { %3331 = vpow2.f32 %v1610_v36  ;;  %v1602_v41 = vsub.f32 %v3604_v37, %v1564_v39  ;;  %v1604_v46 = vsub.f32 %v3616_v49, %v1578_v40 }
 0x31b   : > { %3333 = vpow2.f32 %v1608_v38 }
 0x31c   : > { %v1612_v42 = vmul.f32 1.442695, %v1602_v41  ;;  %v1616_v31 = vmul.f32 1.442695, %v1604_v46 }
 0x31d   : > { %v1571_v47 = vpop.permute.xlu1 %1570  ;;  %v1592_v48 = vpop.permute.xlu0 %1591 }
 0x31e   : > { %3335 = vpow2.f32 %v1612_v42  ;;  %v1603_v51 = vsub.f32 %v3610_v43, %v1571_v47  ;;  %v1606_v25 = vsub.f32 %v3628_v61, %v1592_v48 }
 0x320   : > { %v1614_v52 = vmul.f32 1.442695, %v1603_v51  ;;  %v1620_v49 = vmul.f32 1.442695, %v1606_v25 }
 0x321   : > { %v1585_v53 = vpop.permute.xlu1 %1584  ;;  %v1630_v54 = vpop.permute.xlu0 %1629 }
 0x322   : > { %3337 = vpow2.f32 %v1614_v52  ;;  %v1605_v55 = vsub.f32 %v3620_v50, %v1585_v53  ;;  %v1680_v58 = vsub.f32 %v3638_v8, %v1630_v54 }
 0x323   : > { %3339 = vpow2.f32 %v1616_v31 }
 0x324   : > { %v3751_v56 = vpop.eup %3331  ;;  %v1618_v37 = vmul.f32 1.442695, %v1605_v55  ;;  %v1688_v7 = vmul.f32 1.442695, %v1680_v58 }
 0x325   : > { %v3753_v57 = vpop.eup %3333  ;;  %v1599_v0 = vpop.permute.xlu1 %1598  ;;  %v1707_v2 = vsel %vm1327_vm3, %v3751_v56, 0.0 }
 0x326   : > { %v1644_v43 = vpop.permute.xlu0 %1643  ;;  %3341 = vpow2.f32 %v1618_v37  ;;  %v1607_v61 = vsub.f32 %v3632_v62, %v1599_v0  ;;  %1708 = vadd.xlane.f32.xlu1 %v1707_v2  ;;  %v1704_v50 = vsel %vm1327_vm3, %v3753_v57, 0.0 }
 0x327   : > { %1705 = vadd.xlane.f32.xlu0 %v1704_v50  ;;  %3343 = vpow2.f32 %v1620_v49  ;;  %v1682_v8 = vsub.f32 %v3646_v18, %v1644_v43 }
 0x328   : > { %v3761_v3 = vpop.eup %3335  ;;  %v1622_v6 = vmul.f32 1.442695, %v1607_v61 }
 0x329   : > { %v1637_v11 = vpop.permute.xlu1 %1636  ;;  %v1710_v14 = vsel %vm1327_vm3, %v3761_v3, 0.0  ;;  %v1692_v22 = vmul.f32 1.442695, %v1682_v8 }
 0x32a   : > { %v1658_v12 = vpop.permute.xlu0 %1657  ;;  %3345 = vpow2.f32 %v1622_v6  ;;  %v1681_v62 = vsub.f32 %v3640_v9, %v1637_v11 }
 0x32b   : > { %1711 = vadd.xlane.f32.xlu0 %v1710_v14  ;;  %3347 = vpow2.f32 %v1688_v7  ;;  %v1684_v23 = vsub.f32 %v3654_v32, %v1658_v12 }
 0x32c   : > { %v3767_v15 = vpop.eup %3337  ;;  %v1690_v17 = vmul.f32 1.442695, %v1681_v62 }
 0x32d   : > { %v1651_v24 = vpop.permute.xlu1 %1650  ;;  %v1713_v18 = vsel %vm1327_vm3, %v3767_v15, 0.0  ;;  %v3773_v20 = vpop.eup %3339  ;;  %v1696_v29 = vmul.f32 1.442695, %v1684_v23 }
 0x32e   : > { %3349 = vpow2.f32 %v1690_v17  ;;  %v1683_v26 = vsub.f32 %v3648_v19, %v1651_v24  ;;  %v1672_v27 = vpop.permute.xlu0 %1671  ;;  %v1716_v19 = vsel %vm1327_vm3, %v3773_v20, 0.0 }
 0x32f   : > { %1714 = vadd.xlane.f32.xlu0 %v1713_v18  ;;  %3351 = vpow2.f32 %v1692_v22  ;;  %v1686_v30 = vsub.f32 %v3662_v44, %v1672_v27 }
 0x330   : > { %v3775_v9 = vpop.eup %3341  ;;  %v1694_v28 = vmul.f32 1.442695, %v1683_v26 }
 0x331   : > { %v1665_v34 = vpop.permute.xlu1 %1664  ;;  %v1719_v32 = vsel %vm1327_vm3, %v3775_v9, 0.0  ;;  %v3783_v36 = vpop.eup %3343  ;;  %v1700_v40 = vmul.f32 1.442695, %v1686_v30 }
 0x332   : > { %3353 = vpow2.f32 %v1694_v28  ;;  %v1685_v35 = vsub.f32 %v3656_v33, %v1665_v34  ;;  %1720 = vadd.xlane.f32.xlu1 %v1719_v32  ;;  %v1722_v33 = vsel %vm1327_vm3, %v3783_v36, 0.0 }
 0x333   : > { %1717 = vadd.xlane.f32.xlu0 %v1716_v19  ;;  %3355 = vpow2.f32 %v1696_v29 }
 0x334   : > { %v3785_v38 = vpop.eup %3345  ;;  %v1698_v39 = vmul.f32 1.442695, %v1685_v35 }
 0x335   : > { %v1679_v44 = vpop.permute.xlu1 %1678  ;;  %v1725_v41 = vsel %vm1327_vm3, %v3785_v38, 0.0  ;;  %v3792_v46 = vpop.eup %3347 }
 0x336   : > { %3357 = vpow2.f32 %v1698_v39  ;;  %v1687_v42 = vsub.f32 %v3664_v45, %v1679_v44  ;;  %1726 = vadd.xlane.f32.xlu1 %v1725_v41  ;;  %v1808_v52 = vsel %vm1327_vm3, %v3792_v46, 0.0 }
 0x337   : > { %1723 = vadd.xlane.f32.xlu0 %v1722_v33  ;;  %3359 = vpow2.f32 %v1700_v40 }
 0x338   : > { %v3794_v47 = vpop.eup %3349  ;;  %v1702_v48 = vmul.f32 1.442695, %v1687_v42 }
 0x339   : > { %v1811_v51 = vsel %vm1327_vm3, %v3794_v47, 0.0  ;;  %v3800_v45 = vpop.eup %3351 }
 0x33a   : > { %3361 = vpow2.f32 %v1702_v48  ;;  %1812 = vadd.xlane.f32.xlu1 %v1811_v51  ;;  %v1814_v53 = vsel %vm1327_vm3, %v3800_v45, 0.0 }
 0x33b   : > { %1809 = vadd.xlane.f32.xlu0 %v1808_v52 }
 0x33c   : > { %v3802_v31 = vpop.eup %3353 }
 0x33d   : > { %v1817_v25 = vsel %vm1327_vm3, %v3802_v31, 0.0  ;;  %v3808_v54 = vpop.eup %3355 }
 0x33e   : > { %1818 = vadd.xlane.f32.xlu1 %v1817_v25  ;;  %v1820_v49 = vsel %vm1327_vm3, %v3808_v54, 0.0 }
 0x33f   : > { %1815 = vadd.xlane.f32.xlu0 %v1814_v53 }
 0x340   : > { %v3810_v55 = vpop.eup %3357 }
 0x341   : > { %v1823_v37 = vsel %vm1327_vm3, %v3810_v55, 0.0  ;;  %v3816_v58 = vpop.eup %3359 }
 0x342   : > { %1824 = vadd.xlane.f32.xlu1 %v1823_v37  ;;  %v1826_v2 = vsel %vm1327_vm3, %v3816_v58, 0.0 }
 0x343   : > { %1821 = vadd.xlane.f32.xlu0 %v1820_v49 }
 0x344   : > { %v3818_v0 = vpop.eup %3361 }
 0x345   : > { %v1829_v43 = vsel %vm1327_vm3, %v3818_v0, 0.0 }
 0x346   : > { %1830 = vadd.xlane.f32.xlu1 %v1829_v43 }
 0x347   : > { %1827 = vadd.xlane.f32.xlu0 %v1826_v2 }
 0x3b3   : > { %v1709_v6 = vpop.xlane.xlu1 %1708 }
 0x3b4   : > { %v1706_v61 = vpop.xlane.xlu0 %1705  ;;  %v1743_v7 = vrot.slane %v1709_v6, %v3672_v60 }
 0x3b5   : > { %v1739_v8 = vrot.slane %v1706_v61, %v3672_v60 }
 0x3b7   : > { %v1768_v17 = vsel %vm1416_vm4, %v1743_v7, %v1739_v8 }
 0x3b8   : > { %v1712_v50 = vpop.xlane.xlu0 %1711 }
 0x3b9   : > { %v1747_v12 = vrot.slane %v1712_v50, %v3672_v60 }
 0x3bb   : > { %v1769_v23 = vsel %vm1418_vm5, %v1747_v12, %v1768_v17 }
 0x3bc   : > { %v1715_v11 = vpop.xlane.xlu0 %1714 }
 0x3bd   : > { %v1751_v14 = vrot.slane %v1715_v11, %v3672_v60 }
 0x3bf   : > { %v1721_v62 = vpop.xlane.xlu1 %1720  ;;  %v1770_v18 = vsel %vm1420_vm6, %v1751_v14, %v1769_v23  ;;  %v549_v23 = vld [vmem:[%s3858_s27] sm:$0xff] }
 0x3c0   : > { %v1718_v22 = vpop.xlane.xlu0 %1717  ;;  %v1759_v26 = vrot.slane %v1721_v62, %v3672_v60 }
 0x3c1   : > { %v1755_v24 = vrot.slane %v1718_v22, %v3672_v60 }
 0x3c3   : > { %v1771_v27 = vsel %vm1422_vm7, %v1755_v24, %v1770_v18  ;;  %v1727_v28 = vpop.xlane.xlu1 %1726  ;;  %v557_v24 = vpack.c.bf16 %v549_v23, %v549_v23 }
 0x3c4   : > { %v1767_v29 = vrot.slane %v1727_v28, %v3672_v60  ;;  %v1724_v30 = vpop.xlane.xlu0 %1723  ;;  %v1772_v32 = vsel %vm1424_vm8, %v1759_v26, %v1771_v27 }
 0x3c5   : > { %v1763_v34 = vrot.slane %v1724_v30, %v3672_v60  ;;  %v2063_v26 = vsel %vm2061_vm11, %v557_v24, 0 }
 0x3c6   : > { %3224 = vmatpush3.bf16.msra.mxu0 %v2063_v26 }
 0x3c7   : > { %v1773_v35 = vsel %vm1426_vm9, %v1763_v34, %v1772_v32  ;;  %v1813_v40 = vpop.xlane.xlu1 %1812  ;;  %3235 = vmatprep.subr.bf16.mxu0 %v3373_v1 }
 0x3c8   : > { %v1774_v19 = vsel %vm1428_vm10, %v1767_v29, %v1773_v35  ;;  %v1810_v39 = vpop.xlane.xlu0 %1809  ;;  %v1847_v42 = vrot.slane %v1813_v40, %v3672_v60 }
 0x3c9   : > { %1776 = vxpose.xlu0.b32.start.end [1/1] (short) (narrow) %v1774_v19, 8  ;;  %v1843_v33 = vrot.slane %v1810_v39, %v3672_v60 }
 0x3cb   : > { %v1819_v41 = vpop.xlane.xlu1 %1818  ;;  %v1872_v25 = vsel %vm1416_vm4, %v1847_v42, %v1843_v33 }
 0x3cc   : > { %v1816_v44 = vpop.xlane.xlu0 %1815  ;;  %v1855_v53 = vrot.slane %v1819_v41, %v3672_v60 }
 0x3cd   : > { %v1851_v51 = vrot.slane %v1816_v44, %v3672_v60 }
 0x3cf   : > { %v1825_v52 = vpop.xlane.xlu1 %1824  ;;  %v1873_v37 = vsel %vm1418_vm5, %v1851_v51, %v1872_v25 }
 0x3d0   : > { %v1822_v48 = vpop.xlane.xlu0 %1821  ;;  %v1863_v2 = vrot.slane %v1825_v52, %v3672_v60  ;;  %v1874_v61 = vsel %vm1420_vm6, %v1855_v53, %v1873_v37  ;;  %v573_v52 = vld [vmem:[#allocation2] sm:$0x1] }
 0x3d1   : > { %v1859_v49 = vrot.slane %v1822_v48, %v3672_v60  ;;  %3319 = vpush %v573_v52 }
 0x3d3   : > { %v1875_v50 = vsel %vm1422_vm7, %v1859_v49, %v1874_v61  ;;  %v1831_v6 = vpop.xlane.xlu1 %1830 }
 0x3d4   : > { %v1828_v43 = vpop.xlane.xlu0 %1827  ;;  %v1871_v8 = vrot.slane %v1831_v6, %v3672_v60  ;;  %v1876_v11 = vsel %vm1424_vm8, %v1863_v2, %v1875_v50  ;;  %v553_v50 = vld [vmem:[%s3858_s27 + $0x20] sm:$0xff]  ;;  %v554_v6 = vld [vmem:[%s3858_s27 + $0x28] sm:$0xff] }
 0x3d5   : > { %v1867_v7 = vrot.slane %v1828_v43, %v3672_v60  ;;  %v550_v60 = vld [vmem:[%s3858_s27 + $0x8] sm:$0xff] }
 0x3d6   : > { %v558_v18 = vpack.c.bf16 %v550_v60, %v550_v60  ;;  %v556_v60 = vld [vmem:[%s3858_s27 + $0x38] sm:$0xff] }
 0x3d7   : > { %v1877_v12 = vsel %vm1426_vm9, %v1867_v7, %v1876_v11  ;;  %v562_v7 = vpack.c.bf16 %v554_v6, %v554_v6  ;;  %v564_v26 = vpack.c.bf16 %v556_v60, %v556_v60 }
 0x3d8   : > { %v1878_v14 = vsel %vm1428_vm10, %v1871_v8, %v1877_v12  ;;  %v2109_v27 = vsel %vm2061_vm11, %v558_v18, 0 }
 0x3d9   : > { %3230 = vmatpush3.bf16.msra.mxu1 %v2109_v27 }
 0x3da   : > { %3241 = vmatprep.subr.bf16.mxu1 %v3373_v1 }
 0x402   : > { %s3320_s10 = spop %3319 }
 0x449   : > { %v1792_v62 = vpop.trf.xlu0 }
 0x44a   : > { %v1880_v17 = vadd.f32 %v1878_v14, %v1792_v62  ;;  %v2293_v62 = vsel %vm2061_vm11, %v562_v7, 0 }
 0x44c   : > { %3363 = vrcp.f32 %v1880_v17  ;;  %v555_v17 = vld [vmem:[%s3858_s27 + $0x30] sm:$0xff] }
 0x44d   : > { %v563_v24 = vpack.c.bf16 %v555_v17, %v555_v17 }
 0x44f   : > { %v2339_v27 = vsel %vm2061_vm11, %v563_v24, 0 }
 0x456   : > { %v3364_v22 = vpop.eup %3363 }
 0x457   : > { %1882 = vxpose.xlu1.b32.start.end [1/1] (short) (narrow) %v3364_v22, 8  ;;  %v1989_v40 = vrot.slane %v3364_v22, %v3708_v63  ;;  %v2003_v41 = vrot.slane %v3364_v22, %v3713_v4  ;;  %v1996_v42 = vrot.slane %v3364_v22, %v3705_v59  ;;  %v2017_v33 = vrot.slane %v3364_v22, %v3716_v5 }
 0x458   : > { %v2010_v48 = vrot.slane %v3364_v22, %v3721_v21  ;;  %v2024_v51 = vrot.slane %v3364_v22, %v3729_v13 }
 0x4d7   : > { %v1898_v28 = vpop.trf.xlu1 }
 0x4d8   : > { %v1924_v29 = vrot.slane %v1898_v28, %v3705_v59  ;;  %v1917_v30 = vrot.slane %v1898_v28, %v3708_v63  ;;  %v1931_v34 = vrot.slane %v1898_v28, %v3713_v4  ;;  %v1945_v32 = vrot.slane %v1898_v28, %v3716_v5  ;;  %v551_v59 = vld [vmem:[%s3858_s27 + $0x10] sm:$0xff]  ;;  %v552_v5 = vld [vmem:[%s3858_s27 + $0x18] sm:$0xff] }
 0x4d9   : > { %v1938_v35 = vrot.slane %v1898_v28, %v3721_v21  ;;  %v1959_v19 = vrot.slane %v1898_v28, %v3724_v10  ;;  %v1952_v39 = vrot.slane %v1898_v28, %v3729_v13  ;;  %v1966_v44 = vrot.slane %v1898_v28, %v3734_v16 }
 0x4da   : > { %1926 = vbcast.lane.b32.xlu1 %v1924_v29, 256  ;;  %1919 = vbcast.lane.b32.xlu0 %v1917_v30, 256  ;;  %v2031_v63 = vrot.slane %v3364_v22, %v3724_v10  ;;  %v2038_v4 = vrot.slane %v3364_v22, %v3734_v16  ;;  %v559_v25 = vpack.c.bf16 %v551_v59, %v551_v59  ;;  %v2385_v28 = vsel %vm2061_vm11, %v564_v26, 0  ;;  %v501_v29 = vld [vmem:[%s3918_s30] sm:$0xff] }
 0x4db   : > { %v560_v53 = vpack.c.bf16 %v552_v5, %v552_v5 }
 0x4dc   : > { %v2155_v2 = vsel %vm2061_vm11, %v559_v25, 0 }
 0x4dd   : > { %v2201_v16 = vsel %vm2061_vm11, %v560_v53, 0 }
 0x4de   : > { %1933 = vbcast.lane.b32.xlu1 %v1931_v34, 256  ;;  %1947 = vbcast.lane.b32.xlu0 %v1945_v32, 256  ;;  %v502_v32 = vld [vmem:[%s3918_s30 + $0x8] sm:$0xff] }
 0x4e2   : > { %1940 = vbcast.lane.b32.xlu1 %v1938_v35, 256  ;;  %1961 = vbcast.lane.b32.xlu0 %v1959_v19, 256  ;;  %v509_v35 = vpack.c.bf16 %v501_v29, %v501_v29 }
 0x4e6   : > { %1954 = vbcast.lane.b32.xlu1 %v1952_v39, 256  ;;  %1991 = vbcast.lane.b32.xlu0 %v1989_v40, 256  ;;  %v510_v40 = vpack.c.bf16 %v502_v32, %v502_v32 }
 0x4ea   : > { %1968 = vbcast.lane.b32.xlu1 %v1966_v44, 256  ;;  %2005 = vbcast.lane.b32.xlu0 %v2003_v41, 256 }
 0x4ee   : > { %1998 = vbcast.lane.b32.xlu1 %v1996_v42, 256  ;;  %2019 = vbcast.lane.b32.xlu0 %v2017_v33, 256  ;;  %v2431_v42 = vsel %vm2061_vm11, %v509_v35, 0  ;;  %v2477_v33 = vsel %vm2061_vm11, %v510_v40, 0 }
 0x4f2   : > { %2012 = vbcast.lane.b32.xlu1 %v2010_v48, 256  ;;  %2033 = vbcast.lane.b32.xlu0 %v2031_v63, 256  ;;  %v504_v63 = vld [vmem:[%s3918_s30 + $0x18] sm:$0xff] }
 0x4f3   : > { %v512_v59 = vpack.c.bf16 %v504_v63, %v504_v63 }
 0x4f6   : > { %2026 = vbcast.lane.b32.xlu1 %v2024_v51, 256 }
 0x4fa   : > { %2040 = vbcast.lane.b32.xlu1 %v2038_v4, 256 }
 0x54c   : > { %v1927_v37 = vpop.permute.xlu1 %1926  ;;  %v1920_v21 = vpop.permute.xlu0 %1919 }
 0x54d   : > { %v1971_v10 = vmul.f32 %v3751_v56, %v1927_v37  ;;  %v1970_v49 = vmul.f32 %v3753_v57, %v1920_v21  ;;  %v561_v57 = vpack.c.bf16 %v553_v50, %v553_v50  ;;  %v2569_v37 = vsel %vm2061_vm11, %v512_v59, 0 }
 0x54f   : > { %v1979_v43 = vpack.c.bf16 %v1971_v10, %v1971_v10  ;;  %v1978_v13 = vpack.c.bf16 %v1970_v49, %v1970_v49  ;;  %v506_v10 = vld [vmem:[%s3918_s30 + $0x28] sm:$0xff] }
 0x550   : > { %v1934_v61 = vpop.permute.xlu1 %1933  ;;  %v1948_v22 = vpop.permute.xlu0 %1947 }
 0x551   : > { %3226 = vmatmul.mubr.msk.bf16.vlgmr.msra.gmra.mrb[32].mxu0 %vm1327_vm3, %v1978_v13  ;;  %3232 = vmatmul.mubr.msk.bf16.vlgmr.msra.gmra.mrb[32].mxu1 %vm1327_vm3, %v1979_v43  ;;  %v1972_v56 = vmul.f32 %v3761_v3, %v1934_v61  ;;  %v2247_v3 = vsel %vm2061_vm11, %v561_v57, 0  ;;  %v508_v57 = vld [vmem:[%s3918_s30 + $0x38] sm:$0xff] }
 0x552   : > { %3236 = vmatpush3.bf16.msra.mxu0 %v2155_v2  ;;  %3242 = vmatpush3.bf16.msra.mxu1 %v2201_v16  ;;  %v514_v2 = vpack.c.bf16 %v506_v10, %v506_v10 }
 0x553   : > { %3243 = vmatprep.mubr.msk.bf16.mxu1 %vm3374_vm0, %v3373_v1  ;;  %3237 = vmatprep.mubr.msk.bf16.mxu0 %vm3374_vm0, %v3373_v1  ;;  %v1980_v12 = vpack.c.bf16 %v1972_v56, %v1972_v56 }
 0x554   : > { %v1941_v8 = vpop.permute.xlu1 %1940  ;;  %3247 = vmatprep.subr.bf16.mxu0 %v3373_v1  ;;  %3253 = vmatprep.subr.bf16.mxu1 %v3373_v1  ;;  %v1962_v30 = vpop.permute.xlu0 %1961  ;;  %v2661_v6 = vsel %vm2061_vm11, %v514_v2, 0  ;;  %v565_v2 = vld [vmem:[%s4024_s17] sm:$0xff] }
 0x555   : > { %v1973_v11 = vmul.f32 %v3767_v15, %v1941_v8  ;;  %v1974_v15 = vmul.f32 %v3773_v20, %v1948_v22  ;;  %v1976_v19 = vmul.f32 %v3783_v36, %v1962_v30  ;;  %v503_v36 = vld [vmem:[%s3918_s30 + $0x10] sm:$0xff] }
 0x556   : > { %v511_v51 = vpack.c.bf16 %v503_v36, %v503_v36 }
 0x557   : > { %v1981_v14 = vpack.c.bf16 %v1973_v11, %v1973_v11  ;;  %v1982_v20 = vpack.c.bf16 %v1974_v15, %v1974_v15  ;;  %v1984_v44 = vpack.c.bf16 %v1976_v19, %v1976_v19  ;;  %v3988_v15 = vstv %s3320_s10 }
 0x558   : > { %v1955_v23 = vpop.permute.xlu1 %1954  ;;  %v1992_v48 = vpop.permute.xlu0 %1991  ;;  %v2523_v53 = vsel %vm2061_vm11, %v511_v51, 0 }
 0x559   : > { %3238 = vmatmul.mubr.msk.bf16.vlgmr.msra.gmra.mrb[36].mxu0 %vm1327_vm3, %v1980_v12  ;;  %3244 = vmatmul.mubr.msk.bf16.vlgmr.msra.gmra.mrb[36].mxu1 %vm1327_vm3, %v1981_v14  ;;  %v1975_v18 = vmul.f32 %v3775_v9, %v1955_v23  ;;  %v2042_v4 = vmul.f32 %v3792_v46, %v1992_v48  ;;  %v505_v46 = vld [vmem:[%s3918_s30 + $0x20] sm:$0xff]  ;;  %v516_v12 = vpack.c.bf16 %v508_v57, %v508_v57 }
 0x55a   : > { %3248 = vmatpush3.bf16.msra.mxu0 %v2247_v3  ;;  %3254 = vmatpush3.bf16.msra.mxu1 %v2293_v62  ;;  %v513_v49 = vpack.c.bf16 %v505_v46, %v505_v46 }
 0x55b   : > { %3249 = vmatprep.mubr.msk.bf16.mxu0 %vm3374_vm0, %v3373_v1  ;;  %3255 = vmatprep.mubr.msk.bf16.mxu1 %vm3374_vm0, %v3373_v1  ;;  %v1983_v9 = vpack.c.bf16 %v1975_v18, %v1975_v18  ;;  %v2050_v5 = vpack.c.bf16 %v2042_v4, %v2042_v4  ;;  %v2753_v17 = vsel %vm2061_vm11, %v516_v12, 0 }
 0x55c   : > { %3259 = vmatprep.subr.bf16.mxu0 %v3373_v1  ;;  %3265 = vmatprep.subr.bf16.mxu1 %v3373_v1  ;;  %v1969_v34 = vpop.permute.xlu1 %1968  ;;  %v2006_v21 = vpop.permute.xlu0 %2005  ;;  %v2615_v50 = vsel %vm2061_vm11, %v513_v49, 0 }
 0x55d   : > { %v1977_v39 = vmul.f32 %v3785_v38, %v1969_v34  ;;  %v2044_v43 = vmul.f32 %v3800_v45, %v2006_v21  ;;  %v507_v45 = vld [vmem:[%s3918_s30 + $0x30] sm:$0xff] }
 0x55e   : > { %v515_v7 = vpack.c.bf16 %v507_v45, %v507_v45 }
 0x55f   : > { %v1985_v41 = vpack.c.bf16 %v1977_v39, %v1977_v39  ;;  %v2052_v16 = vpack.c.bf16 %v2044_v43, %v2044_v43 }
 0x560   : > { %v1999_v38 = vpop.permute.xlu1 %1998  ;;  %v2020_v56 = vpop.permute.xlu0 %2019  ;;  %v2707_v62 = vsel %vm2061_vm11, %v515_v7, 0 }
 0x561   : > { %3250 = vmatmul.mubr.msk.bf16.vlgmr.msra.gmra.mrb[40].mxu0 %vm1327_vm3, %v1982_v20  ;;  %3256 = vmatmul.mubr.msk.bf16.vlgmr.msra.gmra.mrb[40].mxu1 %vm1327_vm3, %v1983_v9  ;;  %v2043_v52 = vmul.f32 %v3794_v47, %v1999_v38  ;;  %v2046_v8 = vmul.f32 %v3808_v54, %v2020_v56 }
 0x562   : > { %3260 = vmatpush3.bf16.msra.mxu0 %v2339_v27  ;;  %3266 = vmatpush3.bf16.msra.mxu1 %v2385_v28 }
 0x563   : > { %3261 = vmatprep.mubr.msk.bf16.mxu0 %vm3374_vm0, %v3373_v1  ;;  %3267 = vmatprep.mubr.msk.bf16.mxu1 %vm3374_vm0, %v3373_v1  ;;  %v2051_v25 = vpack.c.bf16 %v2043_v52, %v2043_v52  ;;  %v2054_v14 = vpack.c.bf16 %v2046_v8, %v2046_v8 }
 0x564   : > { %3271 = vmatprep.subr.bf16.mxu0 %v3373_v1  ;;  %3277 = vmatprep.subr.bf16.mxu1 %v3373_v1  ;;  %v2013_v47 = vpop.permute.xlu1 %2012  ;;  %v2034_v54 = vpop.permute.xlu0 %2033 }
 0x565   : > { %v2045_v13 = vmul.f32 %v3802_v31, %v2013_v47  ;;  %v2048_v22 = vmul.f32 %v3816_v58, %v2034_v54 }
 0x567   : > { %v2053_v61 = vpack.c.bf16 %v2045_v13, %v2045_v13  ;;  %v2056_v60 = vpack.c.bf16 %v2048_v22, %v2048_v22 }
 0x568   : > { %v2027_v31 = vpop.permute.xlu1 %2026 }
 0x569   : > { %3262 = vmatmul.mubr.msk.bf16.vlgmr.msra.gmra.mrb[44].mxu0 %vm1327_vm3, %v1984_v44  ;;  %3268 = vmatmul.mubr.msk.bf16.vlgmr.msra.gmra.mrb[44].mxu1 %vm1327_vm3, %v1985_v41  ;;  %v2047_v11 = vmul.f32 %v3810_v55, %v2027_v31 }
 0x56a   : > { %3272 = vmatpush3.bf16.msra.mxu0 %v2431_v42  ;;  %3278 = vmatpush3.bf16.msra.mxu1 %v2477_v33 }
 0x56b   : > { %3273 = vmatprep.mubr.msk.bf16.mxu0 %vm3374_vm0, %v3373_v1  ;;  %3279 = vmatprep.mubr.msk.bf16.mxu1 %vm3374_vm0, %v3373_v1  ;;  %v2055_v3 = vpack.c.bf16 %v2047_v11, %v2047_v11 }
 0x56c   : > { %3283 = vmatprep.subr.bf16.mxu0 %v3373_v1  ;;  %3289 = vmatprep.subr.bf16.mxu1 %v3373_v1  ;;  %v2041_v55 = vpop.permute.xlu1 %2040 }
 0x56d   : > { %v2049_v23 = vmul.f32 %v3818_v0, %v2041_v55 }
 0x56f   : > { %v2057_v24 = vpack.c.bf16 %v2049_v23, %v2049_v23 }
 0x571   : > { %3274 = vmatmul.mubr.msk.bf16.vlgmr.msra.gmra.mrb[48].mxu0 %vm1327_vm3, %v2050_v5  ;;  %3280 = vmatmul.mubr.msk.bf16.vlgmr.msra.gmra.mrb[48].mxu1 %vm1327_vm3, %v2051_v25 }
 0x572   : > { %3284 = vmatpush3.bf16.msra.mxu0 %v2523_v53  ;;  %3290 = vmatpush3.bf16.msra.mxu1 %v2569_v37 }
 0x573   : > { %3285 = vmatprep.mubr.msk.bf16.mxu0 %vm3374_vm0, %v3373_v1  ;;  %3291 = vmatprep.mubr.msk.bf16.mxu1 %vm3374_vm0, %v3373_v1 }
 0x574   : > { %3295 = vmatprep.subr.bf16.mxu0 %v3373_v1  ;;  %3301 = vmatprep.subr.bf16.mxu1 %v3373_v1 }
 0x579   : > { %3286 = vmatmul.mubr.msk.bf16.vlgmr.msra.gmra.mrb[52].mxu0 %vm1327_vm3, %v2052_v16  ;;  %3292 = vmatmul.mubr.msk.bf16.vlgmr.msra.gmra.mrb[52].mxu1 %vm1327_vm3, %v2053_v61  ;;  %v566_v61 = vld [vmem:[%s4024_s17 + $0x8] sm:$0xff] }
 0x57a   : > { %3296 = vmatpush3.bf16.msra.mxu0 %v2615_v50  ;;  %3302 = vmatpush3.bf16.msra.mxu1 %v2661_v6 }
 0x57b   : > { %3297 = vmatprep.mubr.msk.bf16.mxu0 %vm3374_vm0, %v3373_v1  ;;  %3303 = vmatprep.mubr.msk.bf16.mxu1 %vm3374_vm0, %v3373_v1 }
 0x57c   : > { %3307 = vmatprep.subr.bf16.mxu0 %v3373_v1  ;;  %3313 = vmatprep.subr.bf16.mxu1 %v3373_v1 }
 0x581   : > { %3298 = vmatmul.mubr.msk.bf16.vlgmr.msra.gmra.mrb[56].mxu0 %vm1327_vm3, %v2054_v14  ;;  %3304 = vmatmul.mubr.msk.bf16.vlgmr.msra.gmra.mrb[56].mxu1 %vm1327_vm3, %v2055_v3  ;;  %v567_v3 = vld [vmem:[%s4024_s17 + $0x10] sm:$0xff] }
 0x582   : > { %3308 = vmatpush3.bf16.msra.mxu0 %v2707_v62  ;;  %3314 = vmatpush3.bf16.msra.mxu1 %v2753_v17  ;;  %v568_v17 = vld [vmem:[%s4024_s17 + $0x18] sm:$0xff] }
 0x583   : > { %3309 = vmatprep.mubr.msk.bf16.mxu0 %vm3374_vm0, %v3373_v1  ;;  %3315 = vmatprep.mubr.msk.bf16.mxu1 %vm3374_vm0, %v3373_v1 }
 0x589   : > { %3310 = vmatmul.mubr.msk.bf16.vlgmr.msra.gmra.mrb[60].mxu0 %vm1327_vm3, %v2056_v60  ;;  %3316 = vmatmul.mubr.msk.bf16.vlgmr.msra.gmra.mrb[60].mxu1 %vm1327_vm3, %v2057_v24 }
 0x624   : > { %v2099_v58 = vpop.f32.mrb[32].mxu0  ;;  %v2145_v0 = vpop.f32.mrb[32].mxu1 }
 0x625   : > { %v2821_v1 = vmul.f32 %v3988_v15, %v2099_v58  ;;  %v2822_v18 = vmul.f32 %v3988_v15, %v2145_v0  ;;  %v3227_v26 = vpop.f32.mrb[33].mxu0  ;;  %v3233_v20 = vpop.f32.mrb[33].mxu1 }
 0x626   : > { %v2102_v9 = vpop.f32.mrb[34].mxu0  ;;  %v2148_v27 = vpop.f32.mrb[34].mxu1  ;;  %v569_v20 = vld [vmem:[%s4024_s17 + $0x20] sm:$0xff] }
 0x627   : > { %2829 = vst.msk [vmem:[%s3994_s14] sm:$0xff] %vm2812_vm12, %v2821_v1  ;;  %2830 = vst.msk [vmem:[%s3994_s14 + $0x8] sm:$0xff] %vm2812_vm12, %v2822_v18  ;;  %v3228_v28 = vpop.f32.mrb[35].mxu0  ;;  %v3234_v29 = vpop.f32.mrb[35].mxu1  ;;  %v570_v27 = vld [vmem:[%s4024_s17 + $0x28] sm:$0xff] }
 0x62c   : > { %v2191_v30 = vpop.f32.mrb[36].mxu0  ;;  %v2237_v34 = vpop.f32.mrb[36].mxu1 }
 0x62d   : > { %v2823_v32 = vmul.f32 %v3988_v15, %v2191_v30  ;;  %v2824_v35 = vmul.f32 %v3988_v15, %v2237_v34  ;;  %v3239_v19 = vpop.f32.mrb[37].mxu0  ;;  %v3245_v39 = vpop.f32.mrb[37].mxu1 }
 0x62e   : > { %v2194_v40 = vpop.f32.mrb[38].mxu0  ;;  %v2240_v44 = vpop.f32.mrb[38].mxu1 }
 0x62f   : > { %2831 = vst.msk [vmem:[%s3994_s14 + $0x10] sm:$0xff] %vm2812_vm12, %v2823_v32  ;;  %2832 = vst.msk [vmem:[%s3994_s14 + $0x18] sm:$0xff] %vm2812_vm12, %v2824_v35  ;;  %v3240_v41 = vpop.f32.mrb[39].mxu0  ;;  %v3246_v42 = vpop.f32.mrb[39].mxu1 }
 0x630   : > { %v571_v42 = vld [vmem:[%s4024_s17 + $0x30] sm:$0xff] }
 0x634   : > { %v2283_v33 = vpop.f32.mrb[40].mxu0  ;;  %v2329_v36 = vpop.f32.mrb[40].mxu1 }
 0x635   : > { %v2825_v48 = vmul.f32 %v3988_v15, %v2283_v33  ;;  %v2826_v38 = vmul.f32 %v3988_v15, %v2329_v36  ;;  %v3251_v63 = vpop.f32.mrb[41].mxu0  ;;  %v3257_v51 = vpop.f32.mrb[41].mxu1  ;;  %v572_v36 = vld [vmem:[%s4024_s17 + $0x38] sm:$0xff] }
 0x636   : > { %v2286_v4 = vpop.f32.mrb[42].mxu0  ;;  %v2332_v52 = vpop.f32.mrb[42].mxu1 }
 0x637   : > { %2833 = vst.msk [vmem:[%s3994_s14 + $0x20] sm:$0xff] %vm2812_vm12, %v2825_v48  ;;  %2834 = vst.msk [vmem:[%s3994_s14 + $0x28] sm:$0xff] %vm2812_vm12, %v2826_v38  ;;  %v3252_v59 = vpop.f32.mrb[43].mxu0  ;;  %v3258_v5 = vpop.f32.mrb[43].mxu1 }
 0x63c   : > { %v2375_v25 = vpop.f32.mrb[44].mxu0  ;;  %v2421_v53 = vpop.f32.mrb[44].mxu1 }
 0x63d   : > { %v2827_v37 = vmul.f32 %v3988_v15, %v2375_v25  ;;  %v2828_v46 = vmul.f32 %v3988_v15, %v2421_v53  ;;  %v3263_v21 = vpop.f32.mrb[45].mxu0  ;;  %v3269_v47 = vpop.f32.mrb[45].mxu1 }
 0x63e   : > { %v2378_v10 = vpop.f32.mrb[46].mxu0  ;;  %v2424_v49 = vpop.f32.mrb[46].mxu1 }
 0x63f   : > { %2835 = vst.msk [vmem:[%s3994_s14 + $0x30] sm:$0xff] %vm2812_vm12, %v2827_v37  ;;  %2836 = vst.msk [vmem:[%s3994_s14 + $0x38] sm:$0xff] %vm2812_vm12, %v2828_v46  ;;  %v3264_v43 = vpop.f32.mrb[47].mxu0  ;;  %v3270_v13 = vpop.f32.mrb[47].mxu1 }
 0x644   : > { %v2467_v16 = vpop.f32.mrb[48].mxu0  ;;  %v2513_v50 = vpop.f32.mrb[48].mxu1 }
 0x645   : > { %v2796_v6 = vmul.f32 %v3988_v15, %v2467_v16  ;;  %v2797_v45 = vmul.f32 %v3988_v15, %v2513_v50  ;;  %v3275_v56 = vpop.f32.mrb[49].mxu0  ;;  %v3281_v31 = vpop.f32.mrb[49].mxu1 }
 0x646   : > { %v2470_v57 = vpop.f32.mrb[50].mxu0  ;;  %v2516_v7 = vpop.f32.mrb[50].mxu1 }
 0x647   : > { %v2804_v8 = vadd.f32 %v2796_v6, %v565_v2  ;;  %v2805_v11 = vadd.f32 %v2797_v45, %v566_v61  ;;  %v3276_v12 = vpop.f32.mrb[51].mxu0  ;;  %v3282_v14 = vpop.f32.mrb[51].mxu1 }
 0x649   : > { %2813 = vst.msk [vmem:[%s4034_s20] sm:$0xff] %vm2812_vm12, %v2804_v8  ;;  %2814 = vst.msk [vmem:[%s4034_s20 + $0x8] sm:$0xff] %vm2812_vm12, %v2805_v11 }
 0x64c   : > { %v2559_v62 = vpop.f32.mrb[52].mxu0  ;;  %v2605_v54 = vpop.f32.mrb[52].mxu1 }
 0x64d   : > { %v2798_v55 = vmul.f32 %v3988_v15, %v2559_v62  ;;  %v2799_v22 = vmul.f32 %v3988_v15, %v2605_v54  ;;  %v3287_v23 = vpop.f32.mrb[53].mxu0  ;;  %v3293_v60 = vpop.f32.mrb[53].mxu1 }
 0x64e   : > { %v2562_v24 = vpop.f32.mrb[54].mxu0  ;;  %v2608_v58 = vpop.f32.mrb[54].mxu1 }
 0x64f   : > { %v2806_v0 = vadd.f32 %v2798_v55, %v567_v3  ;;  %v2807_v1 = vadd.f32 %v2799_v22, %v568_v17  ;;  %v3288_v18 = vpop.f32.mrb[55].mxu0  ;;  %v3294_v26 = vpop.f32.mrb[55].mxu1 }
 0x651   : > { %2815 = vst.msk [vmem:[%s4034_s20 + $0x10] sm:$0xff] %vm2812_vm12, %v2806_v0  ;;  %2816 = vst.msk [vmem:[%s4034_s20 + $0x18] sm:$0xff] %vm2812_vm12, %v2807_v1 }
 0x654   : > { %v2651_v9 = vpop.f32.mrb[56].mxu0  ;;  %v2697_v28 = vpop.f32.mrb[56].mxu1 }
 0x655   : > { %v2800_v29 = vmul.f32 %v3988_v15, %v2651_v9  ;;  %v2801_v30 = vmul.f32 %v3988_v15, %v2697_v28  ;;  %v3299_v34 = vpop.f32.mrb[57].mxu0  ;;  %v3305_v32 = vpop.f32.mrb[57].mxu1 }
 0x656   : > { %v2654_v35 = vpop.f32.mrb[58].mxu0  ;;  %v2700_v19 = vpop.f32.mrb[58].mxu1 }
 0x657   : > { %v2808_v39 = vadd.f32 %v2800_v29, %v569_v20  ;;  %v2809_v40 = vadd.f32 %v2801_v30, %v570_v27  ;;  %v3300_v44 = vpop.f32.mrb[59].mxu0  ;;  %v3306_v41 = vpop.f32.mrb[59].mxu1 }
 0x659   : > { %2817 = vst.msk [vmem:[%s4034_s20 + $0x20] sm:$0xff] %vm2812_vm12, %v2808_v39  ;;  %2818 = vst.msk [vmem:[%s4034_s20 + $0x28] sm:$0xff] %vm2812_vm12, %v2809_v40 }
 0x65c   : > { %v2743_v33 = vpop.f32.mrb[60].mxu0  ;;  %v2789_v48 = vpop.f32.mrb[60].mxu1 }
 0x65d   : > { %v2802_v38 = vmul.f32 %v3988_v15, %v2743_v33  ;;  %v2803_v63 = vmul.f32 %v3988_v15, %v2789_v48  ;;  %v3311_v51 = vpop.f32.mrb[61].mxu0  ;;  %v3317_v4 = vpop.f32.mrb[61].mxu1 }
 0x65e   : > { %v2746_v52 = vpop.f32.mrb[62].mxu0  ;;  %v2792_v59 = vpop.f32.mrb[62].mxu1 }
 0x65f   : > { %v2810_v5 = vadd.f32 %v2802_v38, %v571_v42  ;;  %v2811_v25 = vadd.f32 %v2803_v63, %v572_v36  ;;  %v3312_v53 = vpop.f32.mrb[63].mxu0  ;;  %v3318_v37 = vpop.f32.mrb[63].mxu1 }
 0x661   : > { %2819 = vst.msk [vmem:[%s4034_s20 + $0x30] sm:$0xff] %vm2812_vm12, %v2810_v5  ;;  %2820 = vst.msk [vmem:[%s4034_s20 + $0x38] sm:$0xff] %vm2812_vm12, %v2811_v25 }
 0x662 PF: > { %s22_s11 = sadd.s32 1, %s3371_s11  }
 0x663   : > { %p19_p4 = scmp.ge.s32.totalorder %s22_s11, 4  }
 0x665   :  { %21 = sbr.rel (!%p19_p4) target bundleno = 3 (0x3), region = 112 }

// kernel: cnn_forward.24
= control target key start
LH: loop header
LB: loop body
LE: loop exit
PB: predicated region body
PF: predicated region fallthrough
CT: control target
= control target key end

     0   :  { %vm14_vm0 = vcmask 253952   ;;  %vm34_vm1 = vcmask 261120   ;;  %v140_v0 = vmov 0.0   ;;  %s258_s0 = inlined_call_operand.vmem [shape: f32[128,32], index: 0, kind: input, shape index: {}]   ;;  %s259_s1 = inlined_call_operand.vmem [shape: f32[1,32], index: 1, kind: output, shape index: {0}]   ;;  %s260_s2 = inlined_call_operand.vmem [shape: f32[1,32], index: 2, kind: output, shape index: {1}]  }
   0x1   :  { %15 = vst.msk [vmem:[%s259_s1] sm:$0x1] %vm14_vm0, %v140_v0  ;;  %v17_v1 = vld [vmem:[%s258_s0] sm:$0xff]  ;;  %v18_v2 = vld [vmem:[%s258_s0 + $0x8] sm:$0xff]  ;;  %v19_v3 = vld [vmem:[%s258_s0 + $0x10] sm:$0xff] }
   0x2   :  { %16 = vst.msk [vmem:[%s260_s2] sm:$0x1] %vm14_vm0, %v140_v0  ;;  %v35_v4 = vsel %vm34_vm1, %v17_v1, 0.0  ;;  %v36_v5 = vsel %vm34_vm1, %v18_v2, 0.0  ;;  %v38_v6 = vsel %vm34_vm1, %v19_v3, 0.0  ;;  %v20_v7 = vld [vmem:[%s258_s0 + $0x18] sm:$0xff]  ;;  %v76_v15 = vmul.f32 %v17_v1, %v17_v1 }
   0x3   :  { %v37_v8 = vadd.f32 %v36_v5, %v35_v4  ;;  %v40_v9 = vsel %vm34_vm1, %v20_v7, 0.0  ;;  %v21_v10 = vld [vmem:[%s258_s0 + $0x20] sm:$0xff]  ;;  %v22_v13 = vld [vmem:[%s258_s0 + $0x28] sm:$0xff]  ;;  %v77_v16 = vmul.f32 %v18_v2, %v18_v2  ;;  %v78_v17 = vmul.f32 %v19_v3, %v19_v3  ;;  %v23_v19 = vld [vmem:[%s258_s0 + $0x30] sm:$0xff] }
   0x4   :  { %v42_v12 = vsel %vm34_vm1, %v21_v10, 0.0  ;;  %v44_v18 = vsel %vm34_vm1, %v22_v13, 0.0  ;;  %v79_v21 = vmul.f32 %v20_v7, %v20_v7  ;;  %v46_v22 = vsel %vm34_vm1, %v23_v19, 0.0  ;;  %v24_v24 = vld [vmem:[%s258_s0 + $0x38] sm:$0xff]  ;;  %v25_v31 = vld [vmem:[%s258_s0 + $0x40] sm:$0xff]  ;;  %v26_v37 = vld [vmem:[%s258_s0 + $0x48] sm:$0xff] }
   0x5   :  { %v39_v11 = vadd.f32 %v38_v6, %v37_v8  ;;  %v80_v23 = vmul.f32 %v21_v10, %v21_v10  ;;  %v92_v26 = vsel %vm34_vm1, %v76_v15, 0.0  ;;  %v93_v27 = vsel %vm34_vm1, %v77_v16, 0.0  ;;  %v27_v43 = vld [vmem:[%s258_s0 + $0x50] sm:$0xff]  ;;  %v28_v49 = vld [vmem:[%s258_s0 + $0x58] sm:$0xff]  ;;  %v29_v55 = vld [vmem:[%s258_s0 + $0x60] sm:$0xff] }
   0x6   :  { %v95_v28 = vsel %vm34_vm1, %v78_v17, 0.0  ;;  %v48_v29 = vsel %vm34_vm1, %v24_v24, 0.0  ;;  %v94_v30 = vadd.f32 %v93_v27, %v92_v26  ;;  %v81_v33 = vmul.f32 %v22_v13, %v22_v13  ;;  %v30_v61 = vld [vmem:[%s258_s0 + $0x68] sm:$0xff]  ;;  %v31_v3 = vld [vmem:[%s258_s0 + $0x70] sm:$0xff] }
   0x7   :  { %v41_v14 = vadd.f32 %v40_v9, %v39_v11  ;;  %v97_v34 = vsel %vm34_vm1, %v79_v21, 0.0  ;;  %v50_v35 = vsel %vm34_vm1, %v25_v31, 0.0  ;;  %v82_v39 = vmul.f32 %v23_v19, %v23_v19  ;;  %v32_v9 = vld [vmem:[%s258_s0 + $0x78] sm:$0xff] }
   0x8   :  { %v96_v36 = vadd.f32 %v95_v28, %v94_v30  ;;  %v99_v40 = vsel %vm34_vm1, %v80_v23, 0.0  ;;  %v52_v41 = vsel %vm34_vm1, %v26_v37, 0.0  ;;  %v83_v45 = vmul.f32 %v24_v24, %v24_v24 }
   0x9   :  { %v43_v20 = vadd.f32 %v42_v12, %v41_v14  ;;  %v101_v46 = vsel %vm34_vm1, %v81_v33, 0.0  ;;  %v54_v47 = vsel %vm34_vm1, %v27_v43, 0.0  ;;  %v84_v51 = vmul.f32 %v25_v31, %v25_v31 }
   0xa   :  { %v98_v42 = vadd.f32 %v97_v34, %v96_v36  ;;  %v103_v52 = vsel %vm34_vm1, %v82_v39, 0.0  ;;  %v56_v53 = vsel %vm34_vm1, %v28_v49, 0.0  ;;  %v85_v57 = vmul.f32 %v26_v37, %v26_v37  ;;  %v33_v36 = vld [vmem:[%s259_s1] sm:$0x1] }
   0xb   :  { %v45_v25 = vadd.f32 %v44_v18, %v43_v20  ;;  %v105_v58 = vsel %vm34_vm1, %v83_v45, 0.0  ;;  %v58_v59 = vsel %vm34_vm1, %v29_v55, 0.0  ;;  %v86_v63 = vmul.f32 %v27_v43, %v27_v43 }
   0xc   :  { %v100_v48 = vadd.f32 %v99_v40, %v98_v42  ;;  %v107_v0 = vsel %vm34_vm1, %v84_v51, 0.0  ;;  %v60_v1 = vsel %vm34_vm1, %v30_v61, 0.0  ;;  %v87_v5 = vmul.f32 %v28_v49, %v28_v49 }
   0xd   :  { %v47_v32 = vadd.f32 %v46_v22, %v45_v25  ;;  %v109_v6 = vsel %vm34_vm1, %v85_v57, 0.0  ;;  %v62_v7 = vsel %vm34_vm1, %v31_v3, 0.0  ;;  %v88_v11 = vmul.f32 %v29_v55, %v29_v55 }
   0xe   :  { %v102_v54 = vadd.f32 %v101_v46, %v100_v48  ;;  %v111_v12 = vsel %vm34_vm1, %v86_v63, 0.0  ;;  %v64_v13 = vsel %vm34_vm1, %v32_v9, 0.0  ;;  %v89_v16 = vmul.f32 %v30_v61, %v30_v61 }
   0xf   :  { %v49_v38 = vadd.f32 %v48_v29, %v47_v32  ;;  %v113_v17 = vsel %vm34_vm1, %v87_v5, 0.0  ;;  %v90_v20 = vmul.f32 %v31_v3, %v31_v3  ;;  %v115_v21 = vsel %vm34_vm1, %v88_v11, 0.0 }
  0x10   :  { %v104_v60 = vadd.f32 %v103_v52, %v102_v54  ;;  %v91_v24 = vmul.f32 %v32_v9, %v32_v9  ;;  %v117_v25 = vsel %vm34_vm1, %v89_v16, 0.0 }
  0x11   :  { %v51_v44 = vadd.f32 %v50_v35, %v49_v38  ;;  %v119_v28 = vsel %vm34_vm1, %v90_v20, 0.0 }
  0x12   :  { %v106_v2 = vadd.f32 %v105_v58, %v104_v60  ;;  %v121_v31 = vsel %vm34_vm1, %v91_v24, 0.0 }
  0x13   :  { %v53_v50 = vadd.f32 %v52_v41, %v51_v44  ;;  %v75_v44 = vld [vmem:[%s260_s2] sm:$0x1] }
  0x14   :  { %v108_v8 = vadd.f32 %v107_v0, %v106_v2 }
  0x15   :  { %v55_v56 = vadd.f32 %v54_v47, %v53_v50 }
  0x16   :  { %v110_v14 = vadd.f32 %v109_v6, %v108_v8 }
  0x17   :  { %v57_v62 = vadd.f32 %v56_v53, %v55_v56 }
  0x18   :  { %v112_v18 = vadd.f32 %v111_v12, %v110_v14 }
  0x19   :  { %v59_v4 = vadd.f32 %v58_v59, %v57_v62 }
  0x1a   :  { %v114_v22 = vadd.f32 %v113_v17, %v112_v18 }
  0x1b   :  { %v61_v10 = vadd.f32 %v60_v1, %v59_v4 }
  0x1c   :  { %v116_v26 = vadd.f32 %v115_v21, %v114_v22 }
  0x1d   :  { %v63_v15 = vadd.f32 %v62_v7, %v61_v10 }
  0x1e   :  { %v118_v29 = vadd.f32 %v117_v25, %v116_v26 }
  0x1f   :  { %v65_v19 = vadd.f32 %v64_v13, %v63_v15 }
  0x20   :  { %v120_v32 = vadd.f32 %v119_v28, %v118_v29 }
  0x21   :  { %v66_v23 = vrot.slane %v65_v19, 4 }
  0x22   :  { %v122_v34 = vadd.f32 %v121_v31, %v120_v32 }
  0x23   :  { %v67_v27 = vadd.f32 %v66_v23, %v65_v19 }
  0x24   :  { %v123_v37 = vrot.slane %v122_v34, 4 }
  0x25   :  { %v68_v30 = vrot.slane %v67_v27, 2 }
  0x26   :  { %v124_v39 = vadd.f32 %v123_v37, %v122_v34 }
  0x27   :  { %v69_v33 = vadd.f32 %v68_v30, %v67_v27 }
  0x28   :  { %v125_v41 = vrot.slane %v124_v39, 2 }
  0x29   :  { %v70_v35 = vrot.slane %v69_v33, 1 }
  0x2a   :  { %v126_v42 = vadd.f32 %v125_v41, %v124_v39 }
  0x2b   :  { %v71_v38 = vadd.f32 %v70_v35, %v69_v33 }
  0x2c   :  { %v127_v43 = vrot.slane %v126_v42, 1 }
  0x2d   :  { %v72_v40 = vadd.f32 %v71_v38, %v33_v36 }
  0x2e   :  { %v128_v45 = vadd.f32 %v127_v43, %v126_v42 }
  0x2f   :  { %74 = vst.msk [vmem:[%s259_s1] sm:$0x1] %vm14_vm0, %v72_v40 }
  0x30   :  { %v129_v46 = vadd.f32 %v128_v45, %v75_v44 }
  0x32   :  { %130 = vst.msk [vmem:[%s260_s2] sm:$0x1] %vm14_vm0, %v129_v46 }

// kernel: cnn_forward.18
= control target key start
LH: loop header
LB: loop body
LE: loop exit
PB: predicated region body
PF: predicated region fallthrough
CT: control target
= control target key end

     0   :  { %s3795_s12 = smov 0   ;;  %s4866_s0 = inlined_call_operand.vmem [shape: f32[2,12,12,16], index: 0, kind: input, shape index: {}]   ;;  %s4867_s1 = inlined_call_operand.vmem [shape: f32[5,80,16], index: 1, kind: input, shape index: {}]   ;;  %s4868_s2 = inlined_call_operand.vmem [shape: f32[1,16], index: 2, kind: input, shape index: {}]   ;;  %s4869_s3 = inlined_call_operand.vmem [shape: f32[2,8,8,16], index: 3, kind: output, shape index: {}]  }
   0x1 LB: > { %s2899_s13 = sadd.s32 4294967295, %s3773_s12   ;;  %p2903_p0 = scmp.ge.s32.totalorder %s3773_s12, 1  ;;  %s3773_s12 = sphi %s3795_s12, %s13_s12  }
   0x2   : > { %p137_p1 = scmp.lt.s32.totalorder %s3773_s12, 3 }
   0x4   : > { %p138_p2 = pnand %p2903_p0, %p137_p1 }
   0x6   : > { %141 = sbr.rel (%p138_p2) target bundleno = 476 (0x1dc), region = 32 }
   0xd   : > { %v3037_v0 = vld [vmem:[%s4867_s1 + $0xc0] sm:$0xff]  ;;  %v3038_v1 = vld [vmem:[%s4867_s1 + $0xc8] sm:$0xff]  ;;  %p161_p3 = scmp.lt.s32.totalorder %s2899_s13, 1  ;;  %v210_v3 = vld [vmem:[%s4867_s1 + $0x10] sm:$0xff]  ;;  %vm549_vm0 = vcmask 1042432   ;;  %vm550_vm1 = vcmask 1046532  }
   0xe   : > { %v3809_v2 = vpack.c.bf16 %v3038_v1, %v3037_v0  ;;  %v211_v4 = vld [vmem:[%s4867_s1 + $0x18] sm:$0xff]  ;;  %v208_v6 = vld [vmem:[%s4867_s1] sm:$0xff]  ;;  %v209_v7 = vld [vmem:[%s4867_s1 + $0x8] sm:$0xff]  ;;  %vm390_vm3 = vcmask 130048   ;;  %vm263_vm4 = vsmask.f32 3328 }
   0xf   : > { %s5005_s13 = smov (!%p161_p3, %s2899_s13), 1  ;;  %v219_v5 = vpack.c.bf16 %v211_v4, %v210_v3  ;;  %v3826_v8 = vpack.c.bf16 %v209_v7, %v208_v6  ;;  %v3039_v9 = vld [vmem:[%s4867_s1 + $0xd0] sm:$0xff]  ;;  %v3040_v10 = vld [vmem:[%s4867_s1 + $0xd8] sm:$0xff]  ;;  %vm3903_vm2 = vmor %vm549_vm0, %vm550_vm1  ;;  %vm264_vm5 = vsmask.f32 7440  ;;  %vm861_vm10 = vcmask 1041408  }
  0x10   : > { %4917 = vst [vmem:[#allocation2_spill] sm:$0xff] %v3809_v2  ;;  %3434 = vmatprep.subr.bf16.mxu0 %v3809_v2  ;;  %s3758_s30 = smul.u32 192, %s5005_s13  ;;  %v3836_v11 = vpack.c.bf16 %v3040_v10, %v3039_v9  ;;  %v3041_v49 = vld [vmem:[%s4867_s1 + $0xe0] sm:$0xff]  ;;  %v3042_v50 = vld [vmem:[%s4867_s1 + $0xe8] sm:$0xff]  ;;  %vm681_vm6 = vsmask.f32 2304  ;;  %vm3992_vm8 = vmor %vm263_vm4, %vm264_vm5 }
  0x11   : > { %3435 = vmatpush3.bf16.msra.mxu0 %v3809_v2  ;;  %3314 = vmatprep.subr.bf16.mxu1 %v219_v5  ;;  %v3957_v61 = vpack.c.bf16 %v3042_v50, %v3041_v49  ;;  %vm682_vm7 = vsmask.f32 6416  ;;  %vm862_vm11 = vcmask 1045508   ;;  %s3153_s18 = sshll.u32 %s5005_s13, 6 }
  0x12   : > { %3315 = vmatpush3.bf16.msra.mxu1 %v219_v5  ;;  %s3841_s6 = scalar_lea.vmem %s4866_s0, %s3758_s30  ;;  %3444 = vmatprep.subr.bf16.mxu0 %v3836_v11  ;;  %vm4049_vm9 = vmor %vm681_vm6, %vm682_vm7  ;;  %s4845_s23 = scalar_lea.vmem %s4869_s3, %s3153_s18 }
  0x13   : > { %3324 = vmatprep.subr.bf16.mxu1 %v3826_v8  ;;  %v3846_v12 = vld [vmem:[%s3841_s6 + $0x10] sm:$0xff]  ;;  %v175_v13 = vld [vmem:[%s3841_s6 + $0x18] sm:$0xf]  ;;  %v3850_v14 = vld [vmem:[%s3841_s6 + $0x20] sm:$0xff] }
  0x14   : > { %4918 = vst [vmem:[#allocation3_spill] sm:$0xff] %v3846_v12  ;;  %4919 = vst [vmem:[#allocation4_spill] sm:$0xff] %v3850_v14  ;;  %v177_v15 = vld [vmem:[%s3841_s6 + $0x28] sm:$0xf]  ;;  %v3854_v16 = vld [vmem:[%s3841_s6 + $0x30] sm:$0xff]  ;;  %v3862_v19 = vpack.c.bf16 %v3846_v12, %v3846_v12  ;;  %v3866_v20 = vpack.c.bf16 %v3850_v14, %v3850_v14  ;;  %v3877_v26 = vpack.c.bf16 %v175_v13, %v175_v13 }
  0x15   : > { %v179_v17 = vld [vmem:[%s3841_s6 + $0x38] sm:$0xf]  ;;  %v3858_v18 = vld [vmem:[%s3841_s6 + $0x40] sm:$0xff]  ;;  %v3868_v21 = vpack.c.bf16 %v177_v15, %v177_v15  ;;  %v181_v23 = vld [vmem:[%s3841_s6 + $0x48] sm:$0xf]  ;;  %v3881_v27 = vpack.c.bf16 %v3854_v16, %v3854_v16 }
  0x16   : > { %v3874_v24 = vld [vmem:[%s3841_s6 + $0x50] sm:$0xff]  ;;  %v183_v25 = vld [vmem:[%s3841_s6 + $0x58] sm:$0xf]  ;;  %v3883_v28 = vpack.c.bf16 %v179_v17, %v179_v17  ;;  %v3887_v29 = vpack.c.bf16 %v3858_v18, %v3858_v18  ;;  %v3890_v30 = vld [vmem:[%s3841_s6] sm:$0xff]  ;;  %v3892_v31 = vpack.c.bf16 %v181_v23, %v181_v23  ;;  %v2940_v36 = vrot.slane %v3862_v19, 9 }
  0x17   : > { %v3896_v32 = vpack.c.bf16 %v3874_v24, %v3874_v24  ;;  %v3898_v33 = vpack.c.bf16 %v183_v25, %v183_v25  ;;  %v173_v34 = vld [vmem:[%s3841_s6 + $0x8] sm:$0xf]  ;;  %v558_v37 = vrot.slane %v3877_v26, 5  ;;  %v2941_v38 = vrot.slane %v3866_v20, 9  ;;  %v212_v13 = vld [vmem:[%s4867_s1 + $0x20] sm:$0xff]  ;;  %vm4195_vm12 = vmor %vm861_vm10, %vm862_vm11 }
  0x18   : > { %v562_v39 = vrot.slane %v3868_v21, 5  ;;  %v2942_v40 = vrot.slane %v3881_v27, 9  ;;  %v3914_v41 = vpack.c.bf16 %v3890_v30, %v3890_v30  ;;  %v566_v42 = vrot.slane %v3883_v28, 5  ;;  %v213_v15 = vld [vmem:[%s4867_s1 + $0x28] sm:$0xff]  ;;  %v4008_v49 = vld [vmem:[%s3841_s6 + $0x60] sm:$0xff] }
  0x19   : > { %v2943_v43 = vrot.slane %v3887_v29, 9  ;;  %v570_v44 = vrot.slane %v3892_v31, 5  ;;  %v3919_v45 = vpack.c.bf16 %v173_v34, %v173_v34  ;;  %v2944_v47 = vrot.slane %v3896_v32, 9  ;;  %v185_v50 = vld [vmem:[%s3841_s6 + $0x68] sm:$0xf] }
  0x1a   : > { %v3923_v46 = vsel %vm3903_vm2, %v2941_v38, %v562_v39  ;;  %v574_v48 = vrot.slane %v3898_v33, 5  ;;  %v3935_v51 = vsel %vm3903_vm2, %v2940_v36, %v558_v37  ;;  %v567_v52 = vsel %vm3903_vm2, %v2942_v40, %v566_v42  ;;  %v3072_v40 = vld [vmem:[%s4867_s1 + $0xf0] sm:$0xff]  ;;  %v3073_v42 = vld [vmem:[%s4867_s1 + $0xf8] sm:$0xff] }
  0x1b   : > { %4922 = vst [vmem:[#allocation5_spill] sm:$0xff] %v3923_v46  ;;  %4923 = vst [vmem:[#allocation6_spill] sm:$0xff] %v3935_v51  ;;  %v571_v53 = vsel %vm3903_vm2, %v2943_v43, %v570_v44  ;;  %v3946_v55 = vcombine.low %v3923_v46, %v567_v52  ;;  %v4875_v59 = vshrl.u32 %v3914_v41, 16  ;;  %v4874_v60 = vshll.u32 %v3914_v41, 16  ;;  %v187_v2 = vld [vmem:[%s3841_s6 + $0x78] sm:$0xf] }
  0x1c   : > { %v3943_v54 = vsel %vm3903_vm2, %v2944_v47, %v574_v48  ;;  %v3950_v57 = vcombine.low %v567_v52, %v571_v53  ;;  %v4871_v62 = vshll.u32 %v3919_v45, 16  ;;  %v4873_v63 = vshrl.u32 %v3862_v19, 16 }
  0x1d   : > { %4924 = vst [vmem:[#allocation7_spill] sm:$0xff] %v3943_v54  ;;  %v3953_v58 = vcombine.low %v571_v53, %v3943_v54  ;;  %3436 = vmatprep.mubr.msk.bf16.mxu0 %vm390_vm3, %v3946_v55  ;;  %v4872_v0 = vshll.u32 %v3862_v19, 16  ;;  %v269_v1 = vrot.slane %v4875_v59, 4  ;;  %v272_v3 = vrot.slane %v4874_v60, 5 }
  0x1e   : > { %4925 = vst [vmem:[#allocation8_spill] sm:$0xff] %v3950_v57  ;;  %v4870_v4 = vshll.u32 %v3877_v26, 16  ;;  %v295_v5 = vshrl.u32 %v3866_v20, 16  ;;  %v278_v6 = vrot.slane %v4871_v62, 5  ;;  %v283_v7 = vrot.slane %v4873_v63, 4 }
  0x1f   : > { %3437 = vmatmul.mubr.msk.bf16.vlgmr.msra.gmra.mrb[0].mxu0 %vm390_vm3, %v3953_v58  ;;  %v286_v9 = vrot.slane %v4872_v0, 5  ;;  %v298_v10 = vshll.u32 %v3866_v20, 16  ;;  %v273_v17 = vor.u32 %v272_v3, %v269_v1  ;;  %v304_v34 = vshll.u32 %v3868_v21, 16  ;;  %v189_v57 = vld [vmem:[%s3841_s6 + $0x88] sm:$0xf] }
  0x20   : > { %3445 = vmatpush3.bf16.msra.mxu0 %v3836_v11  ;;  %v292_v23 = vrot.slane %v4870_v4, 5  ;;  %v297_v25 = vrot.slane %v295_v5, 4  ;;  %v309_v38 = vshrl.u32 %v3881_v27, 16  ;;  %v312_v39 = vshll.u32 %v3881_v27, 16 }
  0x21   : > { %3454 = vmatprep.subr.bf16.mxu0 %v3957_v61  ;;  %v287_v36 = vor.u32 %v286_v9, %v283_v7  ;;  %v300_v37 = vrot.slane %v298_v10, 5  ;;  %v274_v43 = vrot.slane %v273_v17, 4  ;;  %v306_v44 = vrot.slane %v304_v34, 5 }
  0x22   : > { %v318_v47 = vshll.u32 %v3883_v28, 16  ;;  %v4005_v48 = vpack.c.bf16 %v213_v15, %v212_v13  ;;  %v311_v1 = vrot.slane %v309_v38, 4  ;;  %v314_v3 = vrot.slane %v312_v39, 5 }
  0x23   : > { %v288_v52 = vrot.slane %v287_v36, 4  ;;  %v301_v53 = vor.u32 %v300_v37, %v297_v25  ;;  %v279_v9 = vsel %vm3992_vm8, %v274_v43, %v278_v6  ;;  %v4016_v56 = vpack.c.bf16 %v3073_v42, %v3072_v40 }
  0x24   : > { %v315_v22 = vor.u32 %v314_v3, %v311_v1  ;;  %v320_v36 = vrot.slane %v318_v47, 5  ;;  %v4024_v25 = vpack.c.bf16 %v4008_v49, %v4008_v49  ;;  %v4026_v37 = vpack.c.bf16 %v185_v50, %v185_v50 }
  0x25   : > { %v4020_v13 = vsel %vm3992_vm8, %v288_v52, %v292_v23  ;;  %v302_v15 = vrot.slane %v301_v53, 4  ;;  %v711_v43 = vrot.slane %v304_v34, 6  ;;  %v704_v4 = vrot.slane %v295_v5, 5 }
  0x26   : > { %4928 = vst [vmem:[#allocation9_spill] sm:$0xff] %v4020_v13  ;;  %v2923_v6 = vcombine.low %v279_v9, %v4020_v13  ;;  %v316_v42 = vrot.slane %v315_v22, 4  ;;  %v705_v23 = vrot.slane %v298_v10, 6  ;;  %v708_v53 = vshrl.u32 %v3868_v21, 16 }
  0x27   : > { %v4031_v40 = vsel %vm3992_vm8, %v302_v15, %v306_v44  ;;  %v714_v1 = vrot.slane %v309_v38, 5  ;;  %v715_v50 = vrot.slane %v312_v39, 6  ;;  %v718_v44 = vshrl.u32 %v3883_v28, 16 }
  0x28   : > { %4929 = vst [vmem:[#allocation10_spill] sm:$0xff] %v4031_v40  ;;  %3316 = vmatprep.mubr.msk.bf16.mxu1 %vm390_vm3, %v2923_v6  ;;  %v4039_v3 = vsel %vm3992_vm8, %v316_v42, %v320_v36  ;;  %v706_v34 = vor.u32 %v705_v23, %v704_v4  ;;  %v721_v9 = vrot.slane %v318_v47, 6  ;;  %v710_v5 = vrot.slane %v708_v53, 5 }
  0x29   : > { %v4044_v22 = vcombine.low %v4031_v40, %v4039_v3  ;;  %v716_v10 = vor.u32 %v715_v50, %v714_v1  ;;  %v323_v15 = vshrl.u32 %v3887_v29, 16  ;;  %v720_v36 = vrot.slane %v718_v44, 5 }
  0x2a   : > { %v707_v39 = vrot.slane %v706_v34, 4  ;;  %v326_v4 = vshll.u32 %v3887_v29, 16  ;;  %v332_v47 = vshll.u32 %v3892_v31, 16  ;;  %v712_v6 = vor.u32 %v711_v43, %v710_v5 }
  0x2b   : > { %4930 = vst [vmem:[#allocation11_spill] sm:$0xff] %v4044_v22  ;;  %3317 = vmatmul.mubr.msk.bf16.vlgmr.msra.gmra.mrb[0].mxu1 %vm390_vm3, %v4044_v22  ;;  %v717_v42 = vrot.slane %v716_v10, 4  ;;  %v337_v23 = vshrl.u32 %v3896_v32, 16  ;;  %v340_v53 = vshll.u32 %v3896_v32, 16  ;;  %v722_v1 = vor.u32 %v721_v9, %v720_v36  ;;  %v4077_v22 = vld [vmem:[%s3841_s6 + $0x70] sm:$0xff] }
  0x2c   : > { %3325 = vmatpush3.bf16.msra.mxu1 %v3826_v8  ;;  %v346_v50 = vshll.u32 %v3898_v33, 16  ;;  %v724_v34 = vrot.slane %v323_v15, 5  ;;  %v725_v44 = vrot.slane %v326_v4, 6  ;;  %v4063_v52 = vsel %vm4049_vm9, %v707_v39, %v712_v6 }
  0x2d   : > { %v728_v62 = vshrl.u32 %v3892_v31, 16  ;;  %v731_v43 = vrot.slane %v332_v47, 6  ;;  %v734_v5 = vrot.slane %v337_v23, 5  ;;  %3334 = vmatprep.subr.bf16.mxu1 %v4005_v48  ;;  %v4069_v8 = vsel %vm4049_vm9, %v717_v42, %v722_v1 }
  0x2e   : > { %v726_v9 = vor.u32 %v725_v44, %v724_v34  ;;  %v735_v10 = vrot.slane %v340_v53, 6  ;;  %v738_v36 = vshrl.u32 %v3898_v33, 16  ;;  %v4074_v39 = vcombine.low %v4063_v52, %v4069_v8 }
  0x2f   : > { %v730_v6 = vrot.slane %v728_v62, 5  ;;  %v741_v0 = vrot.slane %v346_v50, 6  ;;  %v325_v63 = vrot.slane %v323_v15, 4  ;;  %v328_v17 = vrot.slane %v326_v4, 5 }
  0x30   : > { %4933 = vst [vmem:[#allocation12_spill] sm:$0xff] %v4074_v39  ;;  %v727_v60 = vrot.slane %v726_v9, 4  ;;  %v736_v59 = vor.u32 %v735_v10, %v734_v5  ;;  %v740_v7 = vrot.slane %v738_v36, 5  ;;  %3446 = vmatprep.mubr.msk.bf16.mxu0 %vm390_vm3, %v4074_v39  ;;  %v334_v1 = vrot.slane %v332_v47, 5 }
  0x31   : > { %v732_v42 = vor.u32 %v731_v43, %v730_v6  ;;  %v339_v34 = vrot.slane %v337_v23, 4  ;;  %v342_v44 = vrot.slane %v340_v53, 5  ;;  %v329_v13 = vor.u32 %v328_v17, %v325_v63 }
  0x32   : > { %v737_v46 = vrot.slane %v736_v59, 4  ;;  %v742_v40 = vor.u32 %v741_v0, %v740_v7  ;;  %v348_v62 = vrot.slane %v346_v50, 5  ;;  %v4088_v4 = vpack.c.bf16 %v4077_v22, %v4077_v22 }
  0x33   : > { %v4084_v15 = vsel %vm4049_vm9, %v727_v60, %v732_v42  ;;  %v343_v5 = vor.u32 %v342_v44, %v339_v34  ;;  %v4090_v9 = vpack.c.bf16 %v187_v2, %v187_v2  ;;  %v330_v23 = vrot.slane %v329_v13, 4 }
  0x34   : > { %v743_v47 = vsel %vm4049_vm9, %v737_v46, %v742_v40  ;;  %v351_v59 = vshrl.u32 %v4024_v25, 16  ;;  %v354_v63 = vshll.u32 %v4024_v25, 16  ;;  %v360_v7 = vshll.u32 %v4026_v37, 16 }
  0x35   : > { %v4097_v0 = vcombine.low %v4084_v15, %v743_v47  ;;  %v344_v60 = vrot.slane %v343_v5, 4  ;;  %v365_v17 = vshrl.u32 %v4088_v4, 16  ;;  %v4103_v2 = vsel %vm3992_vm8, %v330_v23, %v334_v1  ;;  %v4120_v23 = vld [vmem:[%s3841_s6 + $0x80] sm:$0xff] }
  0x36   : > { %v353_v53 = vrot.slane %v351_v59, 4  ;;  %v356_v50 = vrot.slane %v354_v63, 5  ;;  %v368_v46 = vshll.u32 %v4088_v4, 16  ;;  %v362_v40 = vrot.slane %v360_v7, 5 }
  0x37   : > { %4934 = vst [vmem:[#allocation13_spill] sm:$0xff] %v4097_v0  ;;  %3447 = vmatmul.mubr.msk.bf16.vlgmr.msra.gmra.mrb[0].mxu0 %vm390_vm3, %v4097_v0  ;;  %v4110_v13 = vsel %vm3992_vm8, %v344_v60, %v348_v62  ;;  %v367_v43 = vrot.slane %v365_v17, 4  ;;  %v374_v10 = vshll.u32 %v4090_v9, 16  ;;  %v744_v1 = vrot.slane %v351_v59, 5 }
  0x38   : > { %4935 = vst [vmem:[#allocation14_spill] sm:$0xff] %v4110_v13  ;;  %v4115_v36 = vcombine.low %v4103_v2, %v4110_v13  ;;  %v357_v6 = vor.u32 %v356_v50, %v353_v53  ;;  %v370_v42 = vrot.slane %v368_v46, 5  ;;  %3455 = vmatpush3.bf16.msra.mxu0 %v3957_v61  ;;  %v745_v44 = vrot.slane %v354_v63, 6 }
  0x39   : > { %v376_v34 = vrot.slane %v374_v10, 5  ;;  %v748_v5 = vshrl.u32 %v4026_v37, 16  ;;  %v751_v62 = vrot.slane %v360_v7, 6  ;;  %3464 = vmatprep.subr.bf16.mxu0 %v4016_v56  ;;  %v754_v50 = vrot.slane %v365_v17, 5 }
  0x3a   : > { %4936 = vst [vmem:[#allocation15_spill] sm:$0xff] %v4115_v36  ;;  %3320 = vmatprep.mubr.msk.bf16.mxu1 %vm390_vm3, %v4115_v36  ;;  %v358_v60 = vrot.slane %v357_v6, 4  ;;  %v371_v53 = vor.u32 %v370_v42, %v367_v43  ;;  %v755_v61 = vrot.slane %v368_v46, 6  ;;  %v746_v59 = vor.u32 %v745_v44, %v744_v1  ;;  %v4141_v44 = vld [vmem:[%s3841_s6 + $0x90] sm:$0xff] }
  0x3b   : > { %v750_v63 = vrot.slane %v748_v5, 5  ;;  %v758_v54 = vshrl.u32 %v4090_v9, 16  ;;  %v761_v7 = vrot.slane %v374_v10, 6  ;;  %v4133_v6 = vpack.c.bf16 %v4120_v23, %v4120_v23 }
  0x3c   : > { %v4129_v13 = vsel %vm3992_vm8, %v358_v60, %v362_v40  ;;  %v372_v0 = vrot.slane %v371_v53, 4  ;;  %v756_v39 = vor.u32 %v755_v61, %v754_v50  ;;  %v554_v17 = vrot.slane %v3919_v45, 5  ;;  %v191_v40 = vld [vmem:[%s3841_s6 + $0x98] sm:$0xf] }
  0x3d   : > { %4937 = vst [vmem:[#allocation16_spill] sm:$0xff] %v4129_v13  ;;  %v747_v46 = vrot.slane %v746_v59, 4  ;;  %v752_v43 = vor.u32 %v751_v62, %v750_v63  ;;  %v760_v42 = vrot.slane %v758_v54, 5  ;;  %v4144_v5 = vpack.c.bf16 %v189_v57, %v189_v57 }
  0x3e   : > { %v4138_v1 = vsel %vm3992_vm8, %v372_v0, %v376_v34  ;;  %v757_v10 = vrot.slane %v756_v39, 4  ;;  %v4890_v60 = vshrl.u32 %v4133_v6, 16  ;;  %v4888_v50 = vshll.u32 %v4133_v6, 16 }
  0x3f   : > { %4938 = vst [vmem:[#allocation17_spill] sm:$0xff] %v4138_v1  ;;  %v4149_v53 = vcombine.low %v4129_v13, %v4138_v1  ;;  %v753_v62 = vsel %vm4049_vm9, %v747_v46, %v752_v43  ;;  %v762_v54 = vor.u32 %v761_v7, %v760_v42  ;;  %v4889_v39 = vshll.u32 %v4144_v5, 16 }
  0x40   : > { %v4154_v0 = vcombine.low %v743_v47, %v753_v62  ;;  %v1301_v57 = vrot.slane %v4890_v60, 5  ;;  %v1305_v34 = vshrl.u32 %v4144_v5, 16  ;;  %v1302_v59 = vrot.slane %v4888_v50, 6 }
  0x41   : > { %4939 = vst [vmem:[#allocation18_spill] sm:$0xff] %v4149_v53  ;;  %3321 = vmatmul.mubr.msk.bf16.gmra.mrb[4].mxu1 %vm390_vm3, %v4149_v53  ;;  %v4164_v61 = vsel %vm4049_vm9, %v757_v10, %v762_v54  ;;  %v4170_v47 = vpack.c.bf16 %v4141_v44, %v4141_v44  ;;  %v4172_v63 = vpack.c.bf16 %v191_v40, %v191_v40  ;;  %v1308_v43 = vrot.slane %v4889_v39, 6 }
  0x42   : > { %4940 = vst [vmem:[#allocation19_spill] sm:$0xff] %v4154_v0  ;;  %v4175_v7 = vcombine.low %v753_v62, %v4164_v61  ;;  %v1307_v46 = vrot.slane %v1305_v34, 5  ;;  %v4942_v42 = vpack.c.bf16 %v3846_v12, %v3890_v30  ;;  %v4185_v10 = vpack.c.bf16 %v3854_v16, %v3850_v14  ;;  %v3080_v30 = vld [vmem:[%s4867_s1 + $0x130] sm:$0xff] }
  0x43   : > { %v1303_v54 = vor.u32 %v1302_v59, %v1301_v57  ;;  %v4898_v40 = vshrl.u32 %v4170_v47, 16  ;;  %v4900_v50 = vshll.u32 %v4170_v47, 16  ;;  %v1771_v39 = vshrl.u32 %v4172_v63, 16 }
  0x44   : > { %4941 = vst [vmem:[#allocation20_spill] sm:$0xff] %v4175_v7  ;;  %3326 = vmatprep.mubr.msk.bf16.mxu1 %vm390_vm3, %v4942_v42  ;;  %4943 = vst [vmem:[#allocation21_spill] sm:$0xff] %v4185_v10  ;;  %3450 = vmatprep.mubr.msk.bf16.mxu0 %vm390_vm3, %v4175_v7  ;;  %v1309_v34 = vor.u32 %v1308_v43, %v1307_v46  ;;  %v2965_v57 = vrot.slane %v3866_v20, 10  ;;  %v874_v59 = vrot.slane %v3868_v21, 6  ;;  %v214_v42 = vld [vmem:[%s4867_s1 + $0x30] sm:$0xff]  ;;  %v215_v46 = vld [vmem:[%s4867_s1 + $0x38] sm:$0xff] }
  0x45   : > { %v1304_v43 = vrot.slane %v1303_v54, 4  ;;  %v1767_v60 = vrot.slane %v4898_v40, 5  ;;  %v1768_v62 = vrot.slane %v4900_v50, 6  ;;  %v4946_v53 = vshll.u32 %v4172_v63, 16  ;;  %v193_v7 = vld [vmem:[%s3841_s6 + $0xa8] sm:$0xf] }
  0x46   : > { %v1773_v36 = vrot.slane %v1771_v39, 5  ;;  %v2966_v21 = vrot.slane %v3881_v27, 10  ;;  %v878_v0 = vrot.slane %v3883_v28, 6  ;;  %v4947_v12 = vrot.slane %v3914_v41, 9 }
  0x47   : > { %v1774_v20 = vrot.slane %v4946_v53, 6  ;;  %v1769_v54 = vor.u32 %v1768_v62, %v1767_v60  ;;  %v4221_v40 = vsel %vm4195_vm12, %v2965_v57, %v874_v59  ;;  %v4223_v1 = vpack.c.bf16 %v215_v46, %v214_v42 }
  0x48   : > { %v555_v14 = vsel %vm3903_vm2, %v4947_v12, %v554_v17  ;;  %4948 = vst [vmem:[#allocation22_spill] sm:$0xff] %v4221_v40  ;;  %v4227_v53 = vsel %vm4195_vm12, %v2966_v21, %v878_v0  ;;  %v2968_v27 = vrot.slane %v3896_v32, 10  ;;  %v886_v28 = vrot.slane %v3898_v33, 6 }
  0x49   : > { %v1775_v50 = vor.u32 %v1774_v20, %v1773_v36  ;;  %v4949_v39 = vshrl.u32 %v3914_v41, 16  ;;  %v4235_v12 = vsel %vm4049_vm9, %v1304_v43, %v1309_v34  ;;  %v1770_v17 = vrot.slane %v1769_v54, 4  ;;  %3327 = vmatmul.mubr.msk.bf16.vlgmr.msra.gmra.mrb[0].mxu1 %vm390_vm3, %v4185_v10 }
  0x4a   : > { %v4241_v36 = vpack.c.bf16 %v3874_v24, %v3858_v18  ;;  %3335 = vmatpush3.bf16.msra.mxu1 %v4005_v48  ;;  %v2967_v32 = vrot.slane %v3887_v29, 10  ;;  %v882_v33 = vrot.slane %v3892_v31, 6  ;;  %v2969_v60 = vrot.slane %v4024_v25, 10 }
  0x4b   : > { %v684_v13 = vrot.slane %v4949_v39, 5  ;;  %v890_v0 = vrot.slane %v4026_v37, 6  ;;  %v4250_v62 = vsel %vm4049_vm9, %v1770_v17, %v1775_v50  ;;  %v4254_v34 = vcombine.low %v4221_v40, %v4227_v53  ;;  %3344 = vmatprep.subr.bf16.mxu1 %v4223_v1 }
  0x4c   : > { %4950 = vst [vmem:[#allocation23_spill] sm:$0xff] %v4241_v36  ;;  %4951 = vst [vmem:[#allocation24_spill] sm:$0xff] %v4250_v62  ;;  %3330 = vmatprep.mubr.msk.bf16.mxu1 %vm390_vm3, %v4241_v36  ;;  %v2970_v48 = vrot.slane %v4088_v4, 10  ;;  %v894_v29 = vrot.slane %v4090_v9, 6  ;;  %v4953_v31 = vshll.u32 %v3914_v41, 16  ;;  %v4265_v50 = vcombine.low %v4235_v12, %v4250_v62 }
  0x4d   : > { %4952 = vst [vmem:[#allocation25_spill] sm:$0xff] %v4254_v34  ;;  %v887_v59 = vsel %vm4195_vm12, %v2968_v27, %v886_v28  ;;  %v891_v42 = vsel %vm4195_vm12, %v2969_v60, %v890_v0  ;;  %v4955_v46 = vshrl.u32 %v3862_v19, 16  ;;  %v4956_v20 = vshll.u32 %v3862_v19, 16 }
  0x4e   : > { %v685_v57 = vrot.slane %v4953_v31, 6  ;;  %4954 = vst [vmem:[#allocation26_spill] sm:$0xff] %v4265_v50  ;;  %v4277_v54 = vpack.c.bf16 %v4077_v22, %v4008_v49  ;;  %v4279_v39 = vcombine.low %v887_v59, %v891_v42  ;;  %v2947_v17 = vcombine.low %v555_v14, %v3935_v51  ;;  %3451 = vmatmul.mubr.msk.bf16.gmra.mrb[4].mxu0 %vm390_vm3, %v4265_v50 }
  0x4f   : > { %v694_v43 = vrot.slane %v4955_v46, 5  ;;  %v695_v21 = vrot.slane %v4956_v20, 6  ;;  %v4286_v27 = vpack.c.bf16 %v3858_v18, %v3854_v16  ;;  %3456 = vmatprep.mubr.msk.bf16.mxu0 %vm390_vm3, %v4254_v34  ;;  %v4292_v28 = vsel %vm4195_vm12, %v2967_v32, %v882_v33  ;;  %v3074_v33 = vld [vmem:[%s4867_s1 + $0x100] sm:$0xff] }
  0x50   : > { %4957 = vst [vmem:[#allocation27_spill] sm:$0xff] %v4277_v54  ;;  %4958 = vst [vmem:[#allocation28_spill] sm:$0xff] %v4279_v39  ;;  %v4296_v60 = vsel %vm4195_vm12, %v2970_v48, %v894_v29  ;;  %v3024_v14 = vrot.slane %v4133_v6, 10  ;;  %v1403_v0 = vrot.slane %v4144_v5, 6  ;;  %v2945_v31 = vrot.slane %v4024_v25, 9  ;;  %v3075_v25 = vld [vmem:[%s4867_s1 + $0x108] sm:$0xff] }
  0x51   : > { %v578_v16 = vrot.slane %v4026_v37, 5  ;;  %v4959_v18 = vshll.u32 %v3919_v45, 16  ;;  %v3066_v20 = vrot.slane %v4170_v47, 10  ;;  %3331 = vmatmul.mubr.msk.bf16.gmra.mrb[4].mxu1 %vm390_vm3, %v4277_v54  ;;  %v1857_v32 = vrot.slane %v4172_v63, 6 }
  0x52   : > { %v686_v37 = vor.u32 %v685_v57, %v684_v13  ;;  %v688_v48 = vshrl.u32 %v3919_v45, 16  ;;  %v696_v29 = vor.u32 %v695_v21, %v694_v43  ;;  %v4318_v10 = vcombine.low %v4292_v28, %v887_v59  ;;  %3336 = vmatprep.mubr.msk.bf16.mxu1 %vm390_vm3, %v2947_v17  ;;  %v4334_v59 = vld [vmem:[%s3841_s6 + $0xa0] sm:$0xff] }
  0x53   : > { %v691_v46 = vrot.slane %v4959_v18, 6  ;;  %v4960_v18 = vshll.u32 %v3877_v26, 16  ;;  %v4321_v54 = vcombine.low %v891_v42, %v4296_v60  ;;  %v698_v36 = vshrl.u32 %v3877_v26, 16  ;;  %v216_v17 = vld [vmem:[%s4867_s1 + $0x40] sm:$0xff] }
  0x54   : > { %v4327_v39 = vsel %vm4195_vm12, %v3024_v14, %v1403_v0  ;;  %v2946_v13 = vrot.slane %v4088_v4, 9  ;;  %v582_v57 = vrot.slane %v4090_v9, 5  ;;  %v690_v43 = vrot.slane %v688_v48, 5  ;;  %v217_v14 = vld [vmem:[%s4867_s1 + $0x48] sm:$0xff] }
  0x55   : > { %v701_v50 = vrot.slane %v4960_v18, 6  ;;  %v4331_v21 = vpack.c.bf16 %v3075_v25, %v3074_v33  ;;  %v700_v42 = vrot.slane %v698_v36, 5  ;;  %v4961_v0 = vshrl.u32 %v4133_v6, 16 }
  0x56   : > { %v4962_v9 = vshll.u32 %v4133_v6, 16  ;;  %v4348_v33 = vsel %vm4195_vm12, %v3066_v20, %v1857_v32  ;;  %v4352_v36 = vpack.c.bf16 %v4334_v59, %v4334_v59  ;;  %v687_v25 = vrot.slane %v686_v37, 4  ;;  %3457 = vmatmul.mubr.msk.bf16.vlgmr.msra.gmra.mrb[0].mxu0 %vm390_vm3, %v4318_v10 }
  0x57   : > { %v1106_v4 = vrot.slane %v4961_v0, 4  ;;  %v697_v48 = vrot.slane %v696_v29, 4  ;;  %v692_v51 = vor.u32 %v691_v46, %v690_v43  ;;  %v702_v34 = vor.u32 %v701_v50, %v700_v42  ;;  %3465 = vmatpush3.bf16.msra.mxu0 %v4016_v56  ;;  %3460 = vmatprep.mubr.msk.bf16.mxu0 %vm390_vm3, %v4321_v54 }
  0x58   : > { %v1109_v18 = vrot.slane %v4962_v9, 5  ;;  %v4963_v0 = vshrl.u32 %v4170_v47, 16  ;;  %v4964_v9 = vshll.u32 %v4170_v47, 16  ;;  %v4364_v20 = vpack.c.bf16 %v217_v14, %v216_v17  ;;  %3474 = vmatprep.subr.bf16.mxu0 %v4331_v21 }
  0x59   : > { %v4368_v37 = vsel %vm3903_vm2, %v2945_v31, %v578_v16  ;;  %v4372_v50 = vcombine.low %v4327_v39, %v4348_v33  ;;  %v4376_v46 = vpack.c.bf16 %v4008_v49, %v3874_v24  ;;  %v4380_v56 = vsel %vm3903_vm2, %v2946_v13, %v582_v57  ;;  %3337 = vmatmul.mubr.msk.bf16.vlgmr.msra.gmra.mrb[0].mxu1 %vm390_vm3, %v3946_v55  ;;  %v3076_v24 = vld [vmem:[%s4867_s1 + $0x110] sm:$0xff]  ;;  %v3077_v49 = vld [vmem:[%s4867_s1 + $0x118] sm:$0xff] }
  0x5a   : > { %v1596_v62 = vrot.slane %v4963_v0, 4  ;;  %v1599_v40 = vrot.slane %v4964_v9, 5  ;;  %v1110_v32 = vor.u32 %v1109_v18, %v1106_v4  ;;  %v4387_v31 = vpack.c.bf16 %v4120_v23, %v4077_v22  ;;  %3345 = vmatpush3.bf16.msra.mxu1 %v4223_v1  ;;  %3340 = vmatprep.mubr.msk.bf16.mxu1 %vm390_vm3, %v3953_v58 }
  0x5b   : > { %v4397_v29 = vpack.c.bf16 %v193_v7, %v193_v7  ;;  %v2036_v13 = vshrl.u32 %v4352_v36, 16  ;;  %v693_v55 = vsel %vm4049_vm9, %v687_v25, %v692_v51  ;;  %v4407_v22 = vsel %vm4049_vm9, %v697_v48, %v702_v34  ;;  %3354 = vmatprep.subr.bf16.mxu1 %v4364_v20 }
  0x5c   : > { %v1600_v57 = vor.u32 %v1599_v40, %v1596_v62  ;;  %v4411_v43 = vcombine.low %v4368_v37, %v4380_v56  ;;  %v1111_v7 = vrot.slane %v1110_v32, 4  ;;  %v4965_v1 = vshll.u32 %v4144_v5, 16 }
  0x5d   : > { %v2039_v17 = vshll.u32 %v4352_v36, 16  ;;  %v4419_v51 = vcombine.low %v4039_v3, %v4103_v2  ;;  %v4421_v14 = vpack.c.bf16 %v3077_v49, %v3076_v24  ;;  %v4966_v40 = vshll.u32 %v4172_v63, 16 }
  0x5e   : > { %v1115_v42 = vrot.slane %v4965_v1, 5  ;;  %v2963_v34 = vrot.slane %v3914_v41, 10  ;;  %v2955_v4 = vcombine.low %v693_v55, %v4407_v22  ;;  %v4427_v18 = vrot.slane %v2036_v13, 4  ;;  %3461 = vmatmul.mubr.msk.bf16.gmra.mrb[4].mxu0 %vm390_vm3, %v4372_v50 }
  0x5f   : > { %v1605_v62 = vrot.slane %v4966_v40, 5  ;;  %v2045_v25 = vshll.u32 %v4397_v29, 16  ;;  %v3055_v48 = vrot.slane %v4170_v47, 9  ;;  %v1601_v3 = vrot.slane %v1600_v57, 4  ;;  %3466 = vmatprep.mubr.msk.bf16.mxu0 %vm390_vm3, %v4286_v27 }
  0x60   : > { %v1687_v2 = vrot.slane %v4172_v63, 5  ;;  %v3094_v0 = vrot.slane %v4352_v36, 9  ;;  %v2129_v9 = vrot.slane %v4397_v29, 5  ;;  %v4440_v32 = vsel %vm3992_vm8, %v1111_v7, %v1115_v42 }
  0x61   : > { %v2041_v24 = vrot.slane %v2039_v17, 5  ;;  %v866_v47 = vrot.slane %v3919_v45, 6  ;;  %v4445_v49 = vcombine.low %v4069_v8, %v4084_v15  ;;  %v2964_v63 = vrot.slane %v3862_v19, 10  ;;  %3341 = vmatmul.mubr.msk.bf16.gmra.mrb[4].mxu1 %vm390_vm3, %v4411_v43 }
  0x62   : > { %v870_v55 = vrot.slane %v3877_v26, 6  ;;  %v4451_v57 = vsel %vm3903_vm2, %v3055_v48, %v1687_v2  ;;  %v4455_v7 = vsel %vm3903_vm2, %v3094_v0, %v2129_v9  ;;  %v4463_v8 = vcombine.low %v4164_v61, %v4235_v12  ;;  %3346 = vmatprep.mubr.msk.bf16.mxu1 %vm390_vm3, %v2955_v4  ;;  %v4478_v61 = vld [vmem:[%s3841_s6 + $0xb0] sm:$0xff]  ;;  %v195_v0 = vld [vmem:[%s3841_s6 + $0xb8] sm:$0xf] }
  0x63   : > { %v2209_v19 = vrot.slane %v2036_v13, 5  ;;  %v2210_v26 = vrot.slane %v2039_v17, 6  ;;  %v4468_v15 = vsel %vm3992_vm8, %v1601_v3, %v1605_v62  ;;  %v2213_v1 = vshrl.u32 %v4397_v29, 16  ;;  %v2979_v4 = vld [vmem:[%s4867_s1 + $0x50] sm:$0xff] }
  0x64   : > { %v2216_v42 = vrot.slane %v2045_v25, 6  ;;  %v4475_v40 = vcombine.low %v4227_v53, %v4292_v28  ;;  %v2042_v12 = vor.u32 %v2041_v24, %v4427_v18  ;;  %v4483_v17 = vcombine.low %v4296_v60, %v4327_v39  ;;  %v2980_v53 = vld [vmem:[%s4867_s1 + $0x58] sm:$0xff] }
  0x65   : > { %v2211_v13 = vor.u32 %v2210_v26, %v2209_v19  ;;  %v3105_v62 = vrot.slane %v4352_v36, 10  ;;  %v3007_v28 = vrot.slane %v4133_v6, 9  ;;  %v1209_v48 = vrot.slane %v4144_v5, 5 }
  0x66   : > { %v2215_v18 = vrot.slane %v2213_v1, 5  ;;  %v2299_v3 = vrot.slane %v4397_v29, 6  ;;  %v4497_v39 = vpack.c.bf16 %v4141_v44, %v4120_v23  ;;  %v4503_v36 = vpack.c.bf16 %v4478_v61, %v4478_v61  ;;  %3467 = vmatmul.mubr.msk.bf16.vlgmr.msra.gmra.mrb[0].mxu0 %vm390_vm3, %v4376_v46 }
  0x67   : > { %v2212_v2 = vrot.slane %v2211_v13, 4  ;;  %v4510_v6 = vsel %vm4195_vm12, %v2964_v63, %v870_v55  ;;  %3475 = vmatpush3.bf16.msra.mxu0 %v4331_v21  ;;  %3470 = vmatprep.mubr.msk.bf16.mxu0 %vm390_vm3, %v4387_v31  ;;  %v4521_v24 = vpack.c.bf16 %v2980_v53, %v2979_v4  ;;  %v4527_v63 = vcombine.low %v4440_v32, %v4468_v15 }
  0x68   : > { %v2217_v5 = vor.u32 %v2216_v42, %v2215_v18  ;;  %v4514_v23 = vsel %vm4195_vm12, %v3105_v62, %v2299_v3  ;;  %v2478_v55 = vshrl.u32 %v4503_v36, 16  ;;  %3484 = vmatprep.subr.bf16.mxu0 %v4421_v14  ;;  %v3188_v21 = vpack.c.bf16 %v195_v0, %v195_v0  ;;  %v4967_v42 = vld [vmem:[#allocation22_spill] sm:$0xff]  ;;  %v4968_v62 = vld [vmem:[#allocation12_spill] sm:$0xff]  ;;  %v4970_v0 = vld [vmem:[#allocation13_spill] sm:$0xff] }
  0x69   : > { %v2481_v1 = vshll.u32 %v4503_v36, 16  ;;  %3347 = vmatmul.mubr.msk.bf16.vlgmr.msra.gmra.mrb[0].mxu1 %vm390_vm3, %v4968_v62  ;;  %v867_v4 = vsel %vm4195_vm12, %v2963_v34, %v866_v47  ;;  %v4546_v53 = vsel %vm3903_vm2, %v3007_v28, %v1209_v48  ;;  %v4969_v18 = vld [vmem:[#allocation24_spill] sm:$0xff]  ;;  %v3133_v34 = vrot.slane %v4503_v36, 9 }
  0x6a   : > { %v4533_v26 = vsel %vm4049_vm9, %v2212_v2, %v2217_v5  ;;  %v2480_v2 = vrot.slane %v2478_v55, 4  ;;  %3355 = vmatpush3.bf16.msra.mxu1 %v4364_v20  ;;  %3350 = vmatprep.mubr.msk.bf16.mxu1 %vm390_vm3, %v4970_v0  ;;  %v2487_v62 = vshll.u32 %v3188_v21, 16  ;;  %v4555_v41 = vcombine.low %v4546_v53, %v4451_v57 }
  0x6b   : > { %v2483_v5 = vrot.slane %v2481_v1, 5  ;;  %v2043_v47 = vrot.slane %v2042_v12, 4  ;;  %v2047_v28 = vrot.slane %v2045_v25, 5  ;;  %3364 = vmatprep.subr.bf16.mxu1 %v4521_v24  ;;  %v2571_v48 = vrot.slane %v3188_v21, 5 }
  0x6c   : > { %v2651_v13 = vrot.slane %v2478_v55, 5  ;;  %v2489_v60 = vrot.slane %v2487_v62, 5  ;;  %v2652_v9 = vrot.slane %v2481_v1, 6  ;;  %v2655_v19 = vshrl.u32 %v3188_v21, 16 }
  0x6d   : > { %v2484_v20 = vor.u32 %v2483_v5, %v2480_v2  ;;  %v2971_v3 = vcombine.low %v867_v4, %v4510_v6  ;;  %v4564_v45 = vsel %vm3903_vm2, %v3133_v34, %v2571_v48  ;;  %v2658_v16 = vrot.slane %v2487_v62, 6  ;;  %v3078_v62 = vld [vmem:[%s4867_s1 + $0x120] sm:$0xff] }
  0x6e   : > { %v4971_v12 = vpack.c.bf16 %v4334_v59, %v4141_v44  ;;  %v3134_v25 = vcombine.low %v4455_v7, %v4564_v45  ;;  %v2653_v55 = vor.u32 %v2652_v9, %v2651_v13  ;;  %v2657_v2 = vrot.slane %v2655_v19, 5  ;;  %v4972_v44 = vld [vmem:[#allocation20_spill] sm:$0xff]  ;;  %v3079_v9 = vld [vmem:[%s4867_s1 + $0x128] sm:$0xff]  ;;  %v4974_v34 = vld [vmem:[#allocation14_spill] sm:$0xff] }
  0x6f   : > { %v2485_v29 = vrot.slane %v2484_v20, 4  ;;  %v2048_v35 = vsel %vm3992_vm8, %v2043_v47, %v2047_v28  ;;  %v4973_v13 = vld [vmem:[#allocation16_spill] sm:$0xff]  ;;  %v1951_v48 = vpack.c.bf16 %v3079_v9, %v3078_v62  ;;  %v2981_v20 = vld [vmem:[%s4867_s1 + $0x60] sm:$0xff] }
  0x70   : > { %3471 = vmatmul.mubr.msk.bf16.gmra.mrb[4].mxu0 %vm390_vm3, %v4971_v12  ;;  %v2654_v4 = vrot.slane %v2653_v55, 4  ;;  %v2659_v5 = vor.u32 %v2658_v16, %v2657_v2  ;;  %v3001_v47 = vcombine.low %v4974_v34, %v4973_v13  ;;  %v4975_v16 = vld [vmem:[#allocation17_spill] sm:$0xff]  ;;  %v2982_v12 = vld [vmem:[%s4867_s1 + $0x68] sm:$0xff]  ;;  %v3089_v2 = vcombine.low %v4468_v15, %v2048_v35  ;;  %v2983_v9 = vld [vmem:[%s4867_s1 + $0x70] sm:$0xff] }
  0x71   : > { %3476 = vmatprep.mubr.msk.bf16.mxu0 %vm390_vm3, %v4419_v51  ;;  %v2490_v1 = vsel %vm3992_vm8, %v2485_v29, %v2489_v60  ;;  %3351 = vmatmul.mubr.msk.bf16.gmra.mrb[4].mxu1 %vm390_vm3, %v4972_v44  ;;  %v3002_v60 = vcombine.low %v4975_v16, %v4440_v32  ;;  %v1005_v38 = vpack.c.bf16 %v2982_v12, %v2981_v20  ;;  %v3144_v32 = vrot.slane %v4503_v36, 10  ;;  %v4976_v29 = vld [vmem:[#allocation25_spill] sm:$0xff]  ;;  %v4977_v36 = vld [vmem:[#allocation8_spill] sm:$0xff]  ;;  %v4984_v34 = vld [vmem:[#allocation10_spill] sm:$0xff] }
  0x72   : > { %v4586_v19 = vcombine.low %v2048_v35, %v2490_v1  ;;  %3356 = vmatprep.mubr.msk.bf16.mxu1 %vm390_vm3, %v2971_v3  ;;  %v4593_v11 = vsel %vm4049_vm9, %v2654_v4, %v2659_v5  ;;  %v2741_v3 = vrot.slane %v3188_v21, 6  ;;  %v3081_v15 = vld [vmem:[%s4867_s1 + $0x138] sm:$0xff]  ;;  %v4979_v35 = vld [vmem:[#allocation4_spill] sm:$0xff]  ;;  %v4980_v1 = vld [vmem:[#allocation3_spill] sm:$0xff]  ;;  %v3011_v5 = vcombine.low %v4380_v56, %v4546_v53 }
  0x73   : > { %v3139_v28 = vcombine.low %v4533_v26, %v4593_v11  ;;  %v4981_v4 = vpack.c.bf16 %v4979_v35, %v4980_v1  ;;  %v1952_v62 = vpack.c.bf16 %v3081_v15, %v3080_v30  ;;  %v2984_v13 = vld [vmem:[%s4867_s1 + $0x78] sm:$0xff]  ;;  %v4982_v56 = vcombine.low %v4451_v57, %v4455_v7  ;;  %v4986_v20 = vld [vmem:[#allocation19_spill] sm:$0xff]  ;;  %v4991_v30 = vld [vmem:[#allocation28_spill] sm:$0xff] }
  0x74   : > { %v4613_v55 = vsel %vm4195_vm12, %v3144_v32, %v2741_v3  ;;  %v4983_v53 = vld [vmem:[#allocation9_spill] sm:$0xff]  ;;  %v3113_v32 = vld [vmem:[%s4867_s1 + $0x150] sm:$0xff]  ;;  %v4993_v35 = vld [vmem:[#allocation23_spill] sm:$0xff] }
  0x75   : > { %v4985_v16 = vcombine.low %v4983_v53, %v4984_v34  ;;  %v4989_v3 = vld [vmem:[#allocation5_spill] sm:$0xff]  ;;  %v3115_v1 = vld [vmem:[%s4867_s1 + $0x160] sm:$0xff] }
  0x78   : > { %3477 = vmatmul.mubr.msk.bf16.vlgmr.msra.gmra.mrb[0].mxu0 %vm390_vm3, %v3001_v47 }
  0x79   : > { %3485 = vmatpush3.bf16.msra.mxu0 %v4421_v14  ;;  %3480 = vmatprep.mubr.msk.bf16.mxu0 %vm390_vm3, %v3002_v60  ;;  %v3145_v14 = vcombine.low %v4514_v23, %v4613_v55 }
  0x7a   : > { %3494 = vmatprep.subr.bf16.mxu0 %v1951_v48  ;;  %3357 = vmatmul.mubr.msk.bf16.vlgmr.msra.gmra.mrb[0].mxu1 %vm390_vm3, %v4976_v29 }
  0x7b   : > { %3365 = vmatpush3.bf16.msra.mxu1 %v4521_v24  ;;  %3360 = vmatprep.mubr.msk.bf16.mxu1 %vm390_vm3, %v4318_v10  ;;  %v4978_v24 = vld [vmem:[#allocation7_spill] sm:$0xff] }
  0x7c   : > { %3374 = vmatprep.subr.bf16.mxu1 %v1005_v38  ;;  %v3010_v21 = vcombine.low %v4978_v24, %v4368_v37  ;;  %v1006_v37 = vpack.c.bf16 %v2984_v13, %v2983_v9  ;;  %v4992_v24 = vcombine.low %v4348_v33, %v4514_v23  ;;  %v3118_v13 = vld [vmem:[%s4867_s1 + $0x178] sm:$0xff] }
  0x80   : > { %3481 = vmatmul.mubr.msk.bf16.gmra.mrb[4].mxu0 %vm390_vm3, %v3089_v2  ;;  %v2987_v2 = vld [vmem:[%s4867_s1 + $0x90] sm:$0xff] }
  0x81   : > { %3486 = vmatprep.mubr.msk.bf16.mxu0 %vm390_vm3, %v4977_v36 }
  0x82   : > { %3361 = vmatmul.mubr.msk.bf16.gmra.mrb[4].mxu1 %vm390_vm3, %v4321_v54 }
  0x83   : > { %3366 = vmatprep.mubr.msk.bf16.mxu1 %vm390_vm3, %v4981_v4  ;;  %v3033_v4 = vld [vmem:[%s4867_s1 + $0xa0] sm:$0xff] }
  0x88   : > { %3487 = vmatmul.mubr.msk.bf16.vlgmr.msra.gmra.mrb[0].mxu0 %vm390_vm3, %v3010_v21 }
  0x89   : > { %3495 = vmatpush3.bf16.msra.mxu0 %v1951_v48  ;;  %3490 = vmatprep.mubr.msk.bf16.mxu0 %vm390_vm3, %v3011_v5  ;;  %v2985_v48 = vld [vmem:[%s4867_s1 + $0x80] sm:$0xff] }
  0x8a   : > { %3504 = vmatprep.subr.bf16.mxu0 %v1952_v62  ;;  %3367 = vmatmul.mubr.msk.bf16.vlgmr.msra.gmra.mrb[0].mxu1 %vm390_vm3, %v4286_v27  ;;  %v3111_v27 = vld [vmem:[%s4867_s1 + $0x140] sm:$0xff] }
  0x8b   : > { %3375 = vmatpush3.bf16.msra.mxu1 %v1005_v38  ;;  %3370 = vmatprep.mubr.msk.bf16.mxu1 %vm390_vm3, %v4376_v46  ;;  %v3112_v46 = vld [vmem:[%s4867_s1 + $0x148] sm:$0xff]  ;;  %v4987_v38 = vcombine.low %v4969_v18, %v4533_v26 }
  0x8c   : > { %3384 = vmatprep.subr.bf16.mxu1 %v1006_v37  ;;  %v2390_v57 = vpack.c.bf16 %v3112_v46, %v3111_v27 }
  0x90   : > { %3491 = vmatmul.mubr.msk.bf16.gmra.mrb[4].mxu0 %vm390_vm3, %v4982_v56  ;;  %v4999_v56 = vld [vmem:[#allocation18_spill] sm:$0xff] }
  0x91   : > { %3496 = vmatprep.mubr.msk.bf16.mxu0 %vm390_vm3, %v4445_v49 }
  0x92   : > { %3371 = vmatmul.mubr.msk.bf16.gmra.mrb[4].mxu1 %vm390_vm3, %v4387_v31  ;;  %v2986_v31 = vld [vmem:[%s4867_s1 + $0x88] sm:$0xff] }
  0x93   : > { %3376 = vmatprep.mubr.msk.bf16.mxu1 %vm390_vm3, %v4985_v16  ;;  %v1007_v12 = vpack.c.bf16 %v2986_v31, %v2985_v48 }
  0x98   : > { %3497 = vmatmul.mubr.msk.bf16.vlgmr.msra.gmra.mrb[0].mxu0 %vm390_vm3, %v4986_v20 }
  0x99   : > { %3505 = vmatpush3.bf16.msra.mxu0 %v1952_v62  ;;  %3500 = vmatprep.mubr.msk.bf16.mxu0 %vm390_vm3, %v4463_v8  ;;  %v4995_v62 = vld [vmem:[#allocation27_spill] sm:$0xff] }
  0x9a   : > { %3514 = vmatprep.subr.bf16.mxu0 %v2390_v57  ;;  %3377 = vmatmul.mubr.msk.bf16.vlgmr.msra.gmra.mrb[0].mxu1 %vm390_vm3, %v4419_v51  ;;  %v3114_v51 = vld [vmem:[%s4867_s1 + $0x158] sm:$0xff] }
  0x9b   : > { %3385 = vmatpush3.bf16.msra.mxu1 %v1006_v37  ;;  %3380 = vmatprep.mubr.msk.bf16.mxu1 %vm390_vm3, %v3001_v47  ;;  %v4988_v47 = vld [vmem:[#allocation6_spill] sm:$0xff]  ;;  %v2391_v18 = vpack.c.bf16 %v3114_v51, %v3113_v32  ;;  %v4998_v37 = vcombine.low %v4510_v6, %v4967_v42  ;;  %v5000_v42 = vld [vmem:[#allocation21_spill] sm:$0xff] }
  0x9c   : > { %3394 = vmatprep.subr.bf16.mxu1 %v1007_v12  ;;  %v4990_v29 = vcombine.low %v4988_v47, %v4989_v3  ;;  %v3119_v6 = vld [vmem:[%s4867_s1 + $0x180] sm:$0xff] }
  0xa0   : > { %3501 = vmatmul.mubr.msk.bf16.gmra.mrb[4].mxu0 %vm390_vm3, %v4987_v38 }
  0xa1   : > { %3506 = vmatprep.mubr.msk.bf16.mxu0 %vm390_vm3, %v4475_v40 }
  0xa2   : > { %3381 = vmatmul.mubr.msk.bf16.gmra.mrb[4].mxu1 %vm390_vm3, %v3002_v60  ;;  %v2988_v60 = vld [vmem:[%s4867_s1 + $0x98] sm:$0xff] }
  0xa3   : > { %3386 = vmatprep.mubr.msk.bf16.mxu1 %vm390_vm3, %v4990_v29  ;;  %v1008_v15 = vpack.c.bf16 %v2988_v60, %v2987_v2 }
  0xa8   : > { %3507 = vmatmul.mubr.msk.bf16.vlgmr.msra.gmra.mrb[0].mxu0 %vm390_vm3, %v4991_v30 }
  0xa9   : > { %3515 = vmatpush3.bf16.msra.mxu0 %v2390_v57  ;;  %3510 = vmatprep.mubr.msk.bf16.mxu0 %vm390_vm3, %v4483_v17 }
  0xaa   : > { %3524 = vmatprep.subr.bf16.mxu0 %v2391_v18  ;;  %3387 = vmatmul.mubr.msk.bf16.vlgmr.msra.gmra.mrb[0].mxu1 %vm390_vm3, %v4977_v36  ;;  %v3116_v36 = vld [vmem:[%s4867_s1 + $0x168] sm:$0xff] }
  0xab   : > { %3395 = vmatpush3.bf16.msra.mxu1 %v1007_v12  ;;  %3390 = vmatprep.mubr.msk.bf16.mxu1 %vm390_vm3, %v3010_v21  ;;  %v4994_v21 = vcombine.low %v4407_v22, %v4063_v52  ;;  %v2392_v33 = vpack.c.bf16 %v3116_v36, %v3115_v1  ;;  %v4996_v52 = vpack.c.bf16 %v4478_v61, %v4334_v59  ;;  %v4997_v22 = vld [vmem:[#allocation15_spill] sm:$0xff]  ;;  %v3035_v61 = vld [vmem:[%s4867_s1 + $0xb0] sm:$0xff] }
  0xac   : > { %3404 = vmatprep.subr.bf16.mxu1 %v1008_v15 }
  0xb0   : > { %3511 = vmatmul.mubr.msk.bf16.gmra.mrb[4].mxu0 %vm390_vm3, %v4992_v24 }
  0xb1   : > { %3516 = vmatprep.mubr.msk.bf16.mxu0 %vm390_vm3, %v4993_v35 }
  0xb2   : > { %3391 = vmatmul.mubr.msk.bf16.gmra.mrb[4].mxu1 %vm390_vm3, %v3011_v5  ;;  %v3034_v5 = vld [vmem:[%s4867_s1 + $0xa8] sm:$0xff] }
  0xb3   : > { %3396 = vmatprep.mubr.msk.bf16.mxu1 %vm390_vm3, %v4994_v21  ;;  %v1506_v9 = vpack.c.bf16 %v3034_v5, %v3033_v4 }
  0xb8   : > { %3517 = vmatmul.mubr.msk.bf16.vlgmr.msra.gmra.mrb[0].mxu0 %vm390_vm3, %v4995_v62 }
  0xb9   : > { %3525 = vmatpush3.bf16.msra.mxu0 %v2391_v18  ;;  %3520 = vmatprep.mubr.msk.bf16.mxu0 %vm390_vm3, %v4497_v39 }
  0xba   : > { %3534 = vmatprep.subr.bf16.mxu0 %v2392_v33  ;;  %3397 = vmatmul.mubr.msk.bf16.vlgmr.msra.gmra.mrb[0].mxu1 %vm390_vm3, %v4445_v49  ;;  %v3117_v49 = vld [vmem:[%s4867_s1 + $0x170] sm:$0xff] }
  0xbb   : > { %3405 = vmatpush3.bf16.msra.mxu1 %v1008_v15  ;;  %3400 = vmatprep.mubr.msk.bf16.mxu1 %vm390_vm3, %v4986_v20  ;;  %v2393_v59 = vpack.c.bf16 %v3118_v13, %v3117_v49 }
  0xbc   : > { %3414 = vmatprep.subr.bf16.mxu1 %v1506_v9 }
  0xc0   : > { %3521 = vmatmul.mubr.msk.bf16.gmra.mrb[4].mxu0 %vm390_vm3, %v4996_v52 }
  0xc1   : > { %3526 = vmatprep.mubr.msk.bf16.mxu0 %vm390_vm3, %v4997_v22 }
  0xc2   : > { %3401 = vmatmul.mubr.msk.bf16.gmra.mrb[4].mxu1 %vm390_vm3, %v4463_v8  ;;  %v3036_v8 = vld [vmem:[%s4867_s1 + $0xb8] sm:$0xff] }
  0xc3   : > { %3406 = vmatprep.mubr.msk.bf16.mxu1 %vm390_vm3, %v4998_v37  ;;  %v1507_v27 = vpack.c.bf16 %v3036_v8, %v3035_v61 }
  0xc8   : > { %3527 = vmatmul.mubr.msk.bf16.vlgmr.msra.gmra.mrb[0].mxu0 %vm390_vm3, %v4999_v56 }
  0xc9   : > { %3535 = vmatpush3.bf16.msra.mxu0 %v2392_v33  ;;  %3530 = vmatprep.mubr.msk.bf16.mxu0 %vm390_vm3, %v4527_v63 }
  0xca   : > { %3544 = vmatprep.subr.bf16.mxu0 %v2393_v59  ;;  %3407 = vmatmul.mubr.msk.bf16.vlgmr.msra.gmra.mrb[0].mxu1 %vm390_vm3, %v4475_v40  ;;  %v3120_v40 = vld [vmem:[%s4867_s1 + $0x188] sm:$0xff] }
  0xcb   : > { %3415 = vmatpush3.bf16.msra.mxu1 %v1506_v9  ;;  %3410 = vmatprep.mubr.msk.bf16.mxu1 %vm390_vm3, %v4991_v30  ;;  %v2394_v46 = vpack.c.bf16 %v3120_v40, %v3119_v6 }
  0xcc   : > { %3424 = vmatprep.subr.bf16.mxu1 %v1507_v27 }
  0xd0   : > { %3531 = vmatmul.mubr.msk.bf16.gmra.mrb[4].mxu0 %vm390_vm3, %v4586_v19  ;;  %v5003_v19 = vld [vmem:[#allocation26_spill] sm:$0xff] }
  0xd1   : > { %3536 = vmatprep.mubr.msk.bf16.mxu0 %vm390_vm3, %v3953_v58  ;;  %v5001_v58 = vld [vmem:[#allocation2_spill] sm:$0xff] }
  0xd2   : > { %3411 = vmatmul.mubr.msk.bf16.gmra.mrb[4].mxu1 %vm390_vm3, %v4483_v17  ;;  %v5002_v17 = vld [vmem:[#allocation11_spill] sm:$0xff] }
  0xd3   : > { %3416 = vmatprep.mubr.msk.bf16.mxu1 %vm390_vm3, %v5000_v42 }
  0xd8   : > { %3537 = vmatmul.mubr.msk.bf16.vlgmr.msra.gmra.mrb[0].mxu0 %vm390_vm3, %v4411_v43 }
  0xd9   : > { %3545 = vmatpush3.bf16.msra.mxu0 %v2393_v59  ;;  %3540 = vmatprep.mubr.msk.bf16.mxu0 %vm390_vm3, %v4555_v41 }
  0xda   : > { %3554 = vmatprep.subr.bf16.mxu0 %v2394_v46  ;;  %3417 = vmatmul.mubr.msk.bf16.vlgmr.msra.gmra.mrb[0].mxu1 %vm390_vm3, %v4993_v35 }
  0xdb   : > { %3425 = vmatpush3.bf16.msra.mxu1 %v1507_v27  ;;  %3420 = vmatprep.mubr.msk.bf16.mxu1 %vm390_vm3, %v4995_v62 }
  0xdc   : > { %3564 = vmatprep.subr.bf16.mxu1 %v5001_v58 }
  0xe0   : > { %3541 = vmatmul.mubr.msk.bf16.gmra.mrb[4].mxu0 %vm390_vm3, %v3134_v25 }
  0xe1   : > { %3546 = vmatprep.mubr.msk.bf16.mxu0 %vm390_vm3, %v4970_v0 }
  0xe2   : > { %3421 = vmatmul.mubr.msk.bf16.gmra.mrb[4].mxu1 %vm390_vm3, %v4497_v39 }
  0xe3   : > { %3426 = vmatprep.mubr.msk.bf16.mxu1 %vm390_vm3, %v5002_v17 }
  0xe8   : > { %3547 = vmatmul.mubr.msk.bf16.vlgmr.msra.gmra.mrb[0].mxu0 %vm390_vm3, %v4972_v44 }
  0xe9   : > { %3555 = vmatpush3.bf16.msra.mxu0 %v2394_v46  ;;  %3550 = vmatprep.mubr.msk.bf16.mxu0 %vm390_vm3, %v5003_v19 }
  0xea   : > { %3427 = vmatmul.mubr.msk.bf16.vlgmr.msra.gmra.mrb[0].mxu1 %vm390_vm3, %v4997_v22 }
  0xeb   : > { %3565 = vmatpush3.bf16.msra.mxu1 %v5001_v58  ;;  %3430 = vmatprep.mubr.msk.bf16.mxu1 %vm390_vm3, %v4999_v56 }
  0xf0   : > { %3551 = vmatmul.mubr.msk.bf16.gmra.mrb[4].mxu0 %vm390_vm3, %v3139_v28 }
  0xf1   : > { %3556 = vmatprep.mubr.msk.bf16.mxu0 %vm390_vm3, %v4318_v10 }
  0xf2   : > { %3431 = vmatmul.mubr.msk.bf16.gmra.mrb[4].mxu1 %vm390_vm3, %v4527_v63 }
  0xf3   : > { %3440 = vmatprep.mubr.msk.bf16.mxu1 %vm390_vm3, %v4411_v43 }
  0xf8   : > { %3557 = vmatmul.mubr.msk.bf16.vlgmr.msra.gmra.mrb[0].mxu0 %vm390_vm3, %v4321_v54  ;;  %v3150_v54 = vld [vmem:[%s4868_s2] ss:$0 sm:$0xff] }
  0xf9   : > { %3560 = vmatprep.mubr.msk.bf16.mxu0 %vm390_vm3, %v4372_v50 }
  0xfe   : > { %3441 = vmatmul.mubr.msk.bf16.vlgmr.msra.gmra.mrb[4].mxu1 %vm390_vm3, %v4555_v41 }
 0x100   : > { %3561 = vmatmul.mubr.msk.bf16.gmra.mrb[4].mxu0 %vm390_vm3, %v3145_v14 }
 0x1bd   : > { %v3428_v10 = vpop.f32.mrb[0].mxu1 }
 0x1be   : > { %v1646_v7 = vpop.f32.mrb[1].mxu1 }
 0x1bf   : > { %v3429_v45 = vpop.f32.mrb[2].mxu1 }
 0x1c0   : > { %v1649_v39 = vpop.f32.mrb[3].mxu1 }
 0x1cb   : > { %v3558_v43 = vpop.f32.mrb[0].mxu0 }
 0x1cc   : > { %v3566_v63 = vadd.f32 %v3558_v43, %v3428_v10  ;;  %v2782_v50 = vpop.f32.mrb[1].mxu0 }
 0x1cd   : > { %v3567_v23 = vadd.f32 %v2782_v50, %v1646_v7  ;;  %v3559_v26 = vpop.f32.mrb[2].mxu0 }
 0x1ce   : > { %v2830_v0 = vadd.f32 %v3566_v63, %v3150_v54  ;;  %v3568_v41 = vadd.f32 %v3559_v26, %v3429_v45  ;;  %v2785_v25 = vpop.f32.mrb[3].mxu0 }
 0x1cf   : > { %v2828_v44 = vadd.f32 %v3567_v23, %v3150_v54  ;;  %v3569_v11 = vadd.f32 %v2785_v25, %v1649_v39 }
 0x1d0   : > { %2838 = vst.msk [vmem:[%s4845_s23 + $0x10] sm:$0xff] %vm390_vm3, %v2830_v0  ;;  %v2831_v28 = vadd.f32 %v3568_v41, %v3150_v54 }
 0x1d1   : > { %2836 = vst.msk [vmem:[%s4845_s23] sm:$0xff] %vm390_vm3, %v2828_v44  ;;  %v2829_v55 = vadd.f32 %v3569_v11, %v3150_v54  ;;  %v3442_v14 = vpop.f32.mrb[4].mxu1 }
 0x1d2   : > { %2839 = vst.msk [vmem:[%s4845_s23 + $0x18] sm:$0xff] %vm390_vm3, %v2831_v28  ;;  %v1744_v34 = vpop.f32.mrb[5].mxu1 }
 0x1d3   : > { %2837 = vst.msk [vmem:[%s4845_s23 + $0x8] sm:$0xff] %vm390_vm3, %v2829_v55  ;;  %v3562_v53 = vpop.f32.mrb[4].mxu0  ;;  %v3443_v48 = vpop.f32.mrb[6].mxu1 }
 0x1d4   : > { %v2798_v16 = vpop.f32.mrb[5].mxu0  ;;  %v3570_v57 = vadd.f32 %v3562_v53, %v3442_v14  ;;  %v1747_v12 = vpop.f32.mrb[7].mxu1 }
 0x1d5   : > { %v3563_v31 = vpop.f32.mrb[6].mxu0  ;;  %v3571_v20 = vadd.f32 %v2798_v16, %v1744_v34 }
 0x1d6   : > { %v2801_v38 = vpop.f32.mrb[7].mxu0  ;;  %v2834_v32 = vadd.f32 %v3570_v57, %v3150_v54  ;;  %v3572_v51 = vadd.f32 %v3563_v31, %v3443_v48 }
 0x1d7   : > { %v2832_v47 = vadd.f32 %v3571_v20, %v3150_v54  ;;  %v3573_v3 = vadd.f32 %v2801_v38, %v1747_v12 }
 0x1d8   : > { %2842 = vst.msk [vmem:[%s4845_s23 + $0x30] sm:$0xff] %vm390_vm3, %v2834_v32  ;;  %v2835_v29 = vadd.f32 %v3572_v51, %v3150_v54 }
 0x1d9   : > { %2840 = vst.msk [vmem:[%s4845_s23 + $0x20] sm:$0xff] %vm390_vm3, %v2832_v47  ;;  %v2833_v18 = vadd.f32 %v3573_v3, %v3150_v54 }
 0x1da   : > { %2843 = vst.msk [vmem:[%s4845_s23 + $0x38] sm:$0xff] %vm390_vm3, %v2835_v29 }
 0x1db   : > { %2841 = vst.msk [vmem:[%s4845_s23 + $0x28] sm:$0xff] %vm390_vm3, %v2833_v18 }
 0x1dc PF: > { %s13_s12 = sadd.s32 1, %s3773_s12  }
 0x1dd   : > { %p10_p4 = scmp.ge.s32.totalorder %s13_s12, 4  }
 0x1df   :  { %12 = sbr.rel (!%p10_p4) target bundleno = 1 (0x1), region = 66 }

// kernel: cnn_forward.23
= control target key start
LH: loop header
LB: loop body
LE: loop exit
PB: predicated region body
PF: predicated region fallthrough
CT: control target
= control target key end

     0   :  { %s3796_s12 = smov 0   ;;  %s4867_s0 = inlined_call_operand.vmem [shape: f32[2,12,12,16], index: 0, kind: input, shape index: {}]   ;;  %s4868_s1 = inlined_call_operand.vmem [shape: f32[5,80,32], index: 1, kind: input, shape index: {}]   ;;  %s4869_s2 = inlined_call_operand.vmem [shape: f32[1,32], index: 2, kind: input, shape index: {}]   ;;  %s4870_s3 = inlined_call_operand.vmem [shape: f32[2,8,8,32], index: 3, kind: output, shape index: {}]  }
   0x1 LB: > { %s2900_s13 = sadd.s32 4294967295, %s3774_s12   ;;  %p2904_p0 = scmp.ge.s32.totalorder %s3774_s12, 1  ;;  %s3774_s12 = sphi %s3796_s12, %s13_s12  }
   0x2   : > { %p137_p1 = scmp.lt.s32.totalorder %s3774_s12, 3 }
   0x4   : > { %p138_p2 = pnand %p2904_p0, %p137_p1 }
   0x6   : > { %141 = sbr.rel (%p138_p2) target bundleno = 476 (0x1dc), region = 32 }
   0xd   : > { %v3038_v0 = vld [vmem:[%s4868_s1 + $0xc0] sm:$0xff]  ;;  %v3039_v1 = vld [vmem:[%s4868_s1 + $0xc8] sm:$0xff]  ;;  %p161_p3 = scmp.lt.s32.totalorder %s2900_s13, 1  ;;  %v210_v3 = vld [vmem:[%s4868_s1 + $0x10] sm:$0xff]  ;;  %vm549_vm0 = vcmask 1042432   ;;  %vm550_vm1 = vcmask 1046532  }
   0xe   : > { %v3810_v2 = vpack.c.bf16 %v3039_v1, %v3038_v0  ;;  %v211_v4 = vld [vmem:[%s4868_s1 + $0x18] sm:$0xff]  ;;  %v208_v6 = vld [vmem:[%s4868_s1] sm:$0xff]  ;;  %v209_v7 = vld [vmem:[%s4868_s1 + $0x8] sm:$0xff]  ;;  %vm390_vm3 = vcmask 130048   ;;  %vm263_vm4 = vsmask.f32 3328 }
   0xf   : > { %s5006_s13 = smov (!%p161_p3, %s2900_s13), 1  ;;  %v219_v5 = vpack.c.bf16 %v211_v4, %v210_v3  ;;  %v3827_v8 = vpack.c.bf16 %v209_v7, %v208_v6  ;;  %v3040_v9 = vld [vmem:[%s4868_s1 + $0xd0] sm:$0xff]  ;;  %v3041_v10 = vld [vmem:[%s4868_s1 + $0xd8] sm:$0xff]  ;;  %vm3904_vm2 = vmor %vm549_vm0, %vm550_vm1  ;;  %vm264_vm5 = vsmask.f32 7440  ;;  %vm861_vm10 = vcmask 1041408  }
  0x10   : > { %4918 = vst [vmem:[#allocation2_spill] sm:$0xff] %v3810_v2  ;;  %3435 = vmatprep.subr.bf16.mxu0 %v3810_v2  ;;  %s3759_s30 = smul.u32 192, %s5006_s13  ;;  %v3837_v11 = vpack.c.bf16 %v3041_v10, %v3040_v9  ;;  %v3042_v49 = vld [vmem:[%s4868_s1 + $0xe0] sm:$0xff]  ;;  %v3043_v50 = vld [vmem:[%s4868_s1 + $0xe8] sm:$0xff]  ;;  %vm681_vm6 = vsmask.f32 2304  ;;  %vm3993_vm8 = vmor %vm263_vm4, %vm264_vm5 }
  0x11   : > { %3436 = vmatpush3.bf16.msra.mxu0 %v3810_v2  ;;  %3315 = vmatprep.subr.bf16.mxu1 %v219_v5  ;;  %v3958_v61 = vpack.c.bf16 %v3043_v50, %v3042_v49  ;;  %vm682_vm7 = vsmask.f32 6416  ;;  %vm862_vm11 = vcmask 1045508   ;;  %s3154_s18 = sshll.u32 %s5006_s13, 6  ;;  %vm2836_vm13 = vcmask 261120  }
  0x12   : > { %3316 = vmatpush3.bf16.msra.mxu1 %v219_v5  ;;  %s3842_s6 = scalar_lea.vmem %s4867_s0, %s3759_s30  ;;  %3445 = vmatprep.subr.bf16.mxu0 %v3837_v11  ;;  %vm4050_vm9 = vmor %vm681_vm6, %vm682_vm7  ;;  %s4846_s23 = scalar_lea.vmem %s4870_s3, %s3154_s18 }
  0x13   : > { %3325 = vmatprep.subr.bf16.mxu1 %v3827_v8  ;;  %v3847_v12 = vld [vmem:[%s3842_s6 + $0x10] sm:$0xff]  ;;  %v175_v13 = vld [vmem:[%s3842_s6 + $0x18] sm:$0xf]  ;;  %v3851_v14 = vld [vmem:[%s3842_s6 + $0x20] sm:$0xff] }
  0x14   : > { %4919 = vst [vmem:[#allocation3_spill] sm:$0xff] %v3847_v12  ;;  %4920 = vst [vmem:[#allocation4_spill] sm:$0xff] %v3851_v14  ;;  %v177_v15 = vld [vmem:[%s3842_s6 + $0x28] sm:$0xf]  ;;  %v3855_v16 = vld [vmem:[%s3842_s6 + $0x30] sm:$0xff]  ;;  %v3863_v19 = vpack.c.bf16 %v3847_v12, %v3847_v12  ;;  %v3867_v20 = vpack.c.bf16 %v3851_v14, %v3851_v14  ;;  %v3878_v26 = vpack.c.bf16 %v175_v13, %v175_v13 }
  0x15   : > { %v179_v17 = vld [vmem:[%s3842_s6 + $0x38] sm:$0xf]  ;;  %v3859_v18 = vld [vmem:[%s3842_s6 + $0x40] sm:$0xff]  ;;  %v3869_v21 = vpack.c.bf16 %v177_v15, %v177_v15  ;;  %v181_v23 = vld [vmem:[%s3842_s6 + $0x48] sm:$0xf]  ;;  %v3882_v27 = vpack.c.bf16 %v3855_v16, %v3855_v16 }
  0x16   : > { %v3875_v24 = vld [vmem:[%s3842_s6 + $0x50] sm:$0xff]  ;;  %v183_v25 = vld [vmem:[%s3842_s6 + $0x58] sm:$0xf]  ;;  %v3884_v28 = vpack.c.bf16 %v179_v17, %v179_v17  ;;  %v3888_v29 = vpack.c.bf16 %v3859_v18, %v3859_v18  ;;  %v3891_v30 = vld [vmem:[%s3842_s6] sm:$0xff]  ;;  %v3893_v31 = vpack.c.bf16 %v181_v23, %v181_v23  ;;  %v2941_v36 = vrot.slane %v3863_v19, 9 }
  0x17   : > { %v3897_v32 = vpack.c.bf16 %v3875_v24, %v3875_v24  ;;  %v3899_v33 = vpack.c.bf16 %v183_v25, %v183_v25  ;;  %v173_v34 = vld [vmem:[%s3842_s6 + $0x8] sm:$0xf]  ;;  %v558_v37 = vrot.slane %v3878_v26, 5  ;;  %v2942_v38 = vrot.slane %v3867_v20, 9  ;;  %v212_v13 = vld [vmem:[%s4868_s1 + $0x20] sm:$0xff]  ;;  %vm4196_vm12 = vmor %vm861_vm10, %vm862_vm11 }
  0x18   : > { %v562_v39 = vrot.slane %v3869_v21, 5  ;;  %v2943_v40 = vrot.slane %v3882_v27, 9  ;;  %v3915_v41 = vpack.c.bf16 %v3891_v30, %v3891_v30  ;;  %v566_v42 = vrot.slane %v3884_v28, 5  ;;  %v213_v15 = vld [vmem:[%s4868_s1 + $0x28] sm:$0xff]  ;;  %v4009_v49 = vld [vmem:[%s3842_s6 + $0x60] sm:$0xff] }
  0x19   : > { %v2944_v43 = vrot.slane %v3888_v29, 9  ;;  %v570_v44 = vrot.slane %v3893_v31, 5  ;;  %v3920_v45 = vpack.c.bf16 %v173_v34, %v173_v34  ;;  %v2945_v47 = vrot.slane %v3897_v32, 9  ;;  %v185_v50 = vld [vmem:[%s3842_s6 + $0x68] sm:$0xf] }
  0x1a   : > { %v3924_v46 = vsel %vm3904_vm2, %v2942_v38, %v562_v39  ;;  %v574_v48 = vrot.slane %v3899_v33, 5  ;;  %v3936_v51 = vsel %vm3904_vm2, %v2941_v36, %v558_v37  ;;  %v567_v52 = vsel %vm3904_vm2, %v2943_v40, %v566_v42  ;;  %v3073_v40 = vld [vmem:[%s4868_s1 + $0xf0] sm:$0xff]  ;;  %v3074_v42 = vld [vmem:[%s4868_s1 + $0xf8] sm:$0xff] }
  0x1b   : > { %4923 = vst [vmem:[#allocation5_spill] sm:$0xff] %v3924_v46  ;;  %4924 = vst [vmem:[#allocation6_spill] sm:$0xff] %v3936_v51  ;;  %v571_v53 = vsel %vm3904_vm2, %v2944_v43, %v570_v44  ;;  %v3947_v55 = vcombine.low %v3924_v46, %v567_v52  ;;  %v4876_v59 = vshrl.u32 %v3915_v41, 16  ;;  %v4875_v60 = vshll.u32 %v3915_v41, 16  ;;  %v187_v2 = vld [vmem:[%s3842_s6 + $0x78] sm:$0xf] }
  0x1c   : > { %v3944_v54 = vsel %vm3904_vm2, %v2945_v47, %v574_v48  ;;  %v3951_v57 = vcombine.low %v567_v52, %v571_v53  ;;  %v4872_v62 = vshll.u32 %v3920_v45, 16  ;;  %v4874_v63 = vshrl.u32 %v3863_v19, 16 }
  0x1d   : > { %4925 = vst [vmem:[#allocation7_spill] sm:$0xff] %v3944_v54  ;;  %v3954_v58 = vcombine.low %v571_v53, %v3944_v54  ;;  %3437 = vmatprep.mubr.msk.bf16.mxu0 %vm390_vm3, %v3947_v55  ;;  %v4873_v0 = vshll.u32 %v3863_v19, 16  ;;  %v269_v1 = vrot.slane %v4876_v59, 4  ;;  %v272_v3 = vrot.slane %v4875_v60, 5 }
  0x1e   : > { %4926 = vst [vmem:[#allocation8_spill] sm:$0xff] %v3951_v57  ;;  %v4871_v4 = vshll.u32 %v3878_v26, 16  ;;  %v295_v5 = vshrl.u32 %v3867_v20, 16  ;;  %v278_v6 = vrot.slane %v4872_v62, 5  ;;  %v283_v7 = vrot.slane %v4874_v63, 4 }
  0x1f   : > { %3438 = vmatmul.mubr.msk.bf16.vlgmr.msra.gmra.mrb[0].mxu0 %vm390_vm3, %v3954_v58  ;;  %v286_v9 = vrot.slane %v4873_v0, 5  ;;  %v298_v10 = vshll.u32 %v3867_v20, 16  ;;  %v273_v17 = vor.u32 %v272_v3, %v269_v1  ;;  %v304_v34 = vshll.u32 %v3869_v21, 16  ;;  %v189_v57 = vld [vmem:[%s3842_s6 + $0x88] sm:$0xf] }
  0x20   : > { %3446 = vmatpush3.bf16.msra.mxu0 %v3837_v11  ;;  %v292_v23 = vrot.slane %v4871_v4, 5  ;;  %v297_v25 = vrot.slane %v295_v5, 4  ;;  %v309_v38 = vshrl.u32 %v3882_v27, 16  ;;  %v312_v39 = vshll.u32 %v3882_v27, 16 }
  0x21   : > { %3455 = vmatprep.subr.bf16.mxu0 %v3958_v61  ;;  %v287_v36 = vor.u32 %v286_v9, %v283_v7  ;;  %v300_v37 = vrot.slane %v298_v10, 5  ;;  %v274_v43 = vrot.slane %v273_v17, 4  ;;  %v306_v44 = vrot.slane %v304_v34, 5 }
  0x22   : > { %v318_v47 = vshll.u32 %v3884_v28, 16  ;;  %v4006_v48 = vpack.c.bf16 %v213_v15, %v212_v13  ;;  %v311_v1 = vrot.slane %v309_v38, 4  ;;  %v314_v3 = vrot.slane %v312_v39, 5 }
  0x23   : > { %v288_v52 = vrot.slane %v287_v36, 4  ;;  %v301_v53 = vor.u32 %v300_v37, %v297_v25  ;;  %v279_v9 = vsel %vm3993_vm8, %v274_v43, %v278_v6  ;;  %v4017_v56 = vpack.c.bf16 %v3074_v42, %v3073_v40 }
  0x24   : > { %v315_v22 = vor.u32 %v314_v3, %v311_v1  ;;  %v320_v36 = vrot.slane %v318_v47, 5  ;;  %v4025_v25 = vpack.c.bf16 %v4009_v49, %v4009_v49  ;;  %v4027_v37 = vpack.c.bf16 %v185_v50, %v185_v50 }
  0x25   : > { %v4021_v13 = vsel %vm3993_vm8, %v288_v52, %v292_v23  ;;  %v302_v15 = vrot.slane %v301_v53, 4  ;;  %v711_v43 = vrot.slane %v304_v34, 6  ;;  %v704_v4 = vrot.slane %v295_v5, 5 }
  0x26   : > { %4929 = vst [vmem:[#allocation9_spill] sm:$0xff] %v4021_v13  ;;  %v2924_v6 = vcombine.low %v279_v9, %v4021_v13  ;;  %v316_v42 = vrot.slane %v315_v22, 4  ;;  %v705_v23 = vrot.slane %v298_v10, 6  ;;  %v708_v53 = vshrl.u32 %v3869_v21, 16 }
  0x27   : > { %v4032_v40 = vsel %vm3993_vm8, %v302_v15, %v306_v44  ;;  %v714_v1 = vrot.slane %v309_v38, 5  ;;  %v715_v50 = vrot.slane %v312_v39, 6  ;;  %v718_v44 = vshrl.u32 %v3884_v28, 16 }
  0x28   : > { %4930 = vst [vmem:[#allocation10_spill] sm:$0xff] %v4032_v40  ;;  %3317 = vmatprep.mubr.msk.bf16.mxu1 %vm390_vm3, %v2924_v6  ;;  %v4040_v3 = vsel %vm3993_vm8, %v316_v42, %v320_v36  ;;  %v706_v34 = vor.u32 %v705_v23, %v704_v4  ;;  %v721_v9 = vrot.slane %v318_v47, 6  ;;  %v710_v5 = vrot.slane %v708_v53, 5 }
  0x29   : > { %v4045_v22 = vcombine.low %v4032_v40, %v4040_v3  ;;  %v716_v10 = vor.u32 %v715_v50, %v714_v1  ;;  %v323_v15 = vshrl.u32 %v3888_v29, 16  ;;  %v720_v36 = vrot.slane %v718_v44, 5 }
  0x2a   : > { %v707_v39 = vrot.slane %v706_v34, 4  ;;  %v326_v4 = vshll.u32 %v3888_v29, 16  ;;  %v332_v47 = vshll.u32 %v3893_v31, 16  ;;  %v712_v6 = vor.u32 %v711_v43, %v710_v5 }
  0x2b   : > { %4931 = vst [vmem:[#allocation11_spill] sm:$0xff] %v4045_v22  ;;  %3318 = vmatmul.mubr.msk.bf16.vlgmr.msra.gmra.mrb[0].mxu1 %vm390_vm3, %v4045_v22  ;;  %v717_v42 = vrot.slane %v716_v10, 4  ;;  %v337_v23 = vshrl.u32 %v3897_v32, 16  ;;  %v340_v53 = vshll.u32 %v3897_v32, 16  ;;  %v722_v1 = vor.u32 %v721_v9, %v720_v36  ;;  %v4078_v22 = vld [vmem:[%s3842_s6 + $0x70] sm:$0xff] }
  0x2c   : > { %3326 = vmatpush3.bf16.msra.mxu1 %v3827_v8  ;;  %v346_v50 = vshll.u32 %v3899_v33, 16  ;;  %v724_v34 = vrot.slane %v323_v15, 5  ;;  %v725_v44 = vrot.slane %v326_v4, 6  ;;  %v4064_v52 = vsel %vm4050_vm9, %v707_v39, %v712_v6 }
  0x2d   : > { %v728_v62 = vshrl.u32 %v3893_v31, 16  ;;  %v731_v43 = vrot.slane %v332_v47, 6  ;;  %v734_v5 = vrot.slane %v337_v23, 5  ;;  %3335 = vmatprep.subr.bf16.mxu1 %v4006_v48  ;;  %v4070_v8 = vsel %vm4050_vm9, %v717_v42, %v722_v1 }
  0x2e   : > { %v726_v9 = vor.u32 %v725_v44, %v724_v34  ;;  %v735_v10 = vrot.slane %v340_v53, 6  ;;  %v738_v36 = vshrl.u32 %v3899_v33, 16  ;;  %v4075_v39 = vcombine.low %v4064_v52, %v4070_v8 }
  0x2f   : > { %v730_v6 = vrot.slane %v728_v62, 5  ;;  %v741_v0 = vrot.slane %v346_v50, 6  ;;  %v325_v63 = vrot.slane %v323_v15, 4  ;;  %v328_v17 = vrot.slane %v326_v4, 5 }
  0x30   : > { %4934 = vst [vmem:[#allocation12_spill] sm:$0xff] %v4075_v39  ;;  %v727_v60 = vrot.slane %v726_v9, 4  ;;  %v736_v59 = vor.u32 %v735_v10, %v734_v5  ;;  %v740_v7 = vrot.slane %v738_v36, 5  ;;  %3447 = vmatprep.mubr.msk.bf16.mxu0 %vm390_vm3, %v4075_v39  ;;  %v334_v1 = vrot.slane %v332_v47, 5 }
  0x31   : > { %v732_v42 = vor.u32 %v731_v43, %v730_v6  ;;  %v339_v34 = vrot.slane %v337_v23, 4  ;;  %v342_v44 = vrot.slane %v340_v53, 5  ;;  %v329_v13 = vor.u32 %v328_v17, %v325_v63 }
  0x32   : > { %v737_v46 = vrot.slane %v736_v59, 4  ;;  %v742_v40 = vor.u32 %v741_v0, %v740_v7  ;;  %v348_v62 = vrot.slane %v346_v50, 5  ;;  %v4089_v4 = vpack.c.bf16 %v4078_v22, %v4078_v22 }
  0x33   : > { %v4085_v15 = vsel %vm4050_vm9, %v727_v60, %v732_v42  ;;  %v343_v5 = vor.u32 %v342_v44, %v339_v34  ;;  %v4091_v9 = vpack.c.bf16 %v187_v2, %v187_v2  ;;  %v330_v23 = vrot.slane %v329_v13, 4 }
  0x34   : > { %v743_v47 = vsel %vm4050_vm9, %v737_v46, %v742_v40  ;;  %v351_v59 = vshrl.u32 %v4025_v25, 16  ;;  %v354_v63 = vshll.u32 %v4025_v25, 16  ;;  %v360_v7 = vshll.u32 %v4027_v37, 16 }
  0x35   : > { %v4098_v0 = vcombine.low %v4085_v15, %v743_v47  ;;  %v344_v60 = vrot.slane %v343_v5, 4  ;;  %v365_v17 = vshrl.u32 %v4089_v4, 16  ;;  %v4104_v2 = vsel %vm3993_vm8, %v330_v23, %v334_v1  ;;  %v4121_v23 = vld [vmem:[%s3842_s6 + $0x80] sm:$0xff] }
  0x36   : > { %v353_v53 = vrot.slane %v351_v59, 4  ;;  %v356_v50 = vrot.slane %v354_v63, 5  ;;  %v368_v46 = vshll.u32 %v4089_v4, 16  ;;  %v362_v40 = vrot.slane %v360_v7, 5 }
  0x37   : > { %4935 = vst [vmem:[#allocation13_spill] sm:$0xff] %v4098_v0  ;;  %3448 = vmatmul.mubr.msk.bf16.vlgmr.msra.gmra.mrb[0].mxu0 %vm390_vm3, %v4098_v0  ;;  %v4111_v13 = vsel %vm3993_vm8, %v344_v60, %v348_v62  ;;  %v367_v43 = vrot.slane %v365_v17, 4  ;;  %v374_v10 = vshll.u32 %v4091_v9, 16  ;;  %v744_v1 = vrot.slane %v351_v59, 5 }
  0x38   : > { %4936 = vst [vmem:[#allocation14_spill] sm:$0xff] %v4111_v13  ;;  %v4116_v36 = vcombine.low %v4104_v2, %v4111_v13  ;;  %v357_v6 = vor.u32 %v356_v50, %v353_v53  ;;  %v370_v42 = vrot.slane %v368_v46, 5  ;;  %3456 = vmatpush3.bf16.msra.mxu0 %v3958_v61  ;;  %v745_v44 = vrot.slane %v354_v63, 6 }
  0x39   : > { %v376_v34 = vrot.slane %v374_v10, 5  ;;  %v748_v5 = vshrl.u32 %v4027_v37, 16  ;;  %v751_v62 = vrot.slane %v360_v7, 6  ;;  %3465 = vmatprep.subr.bf16.mxu0 %v4017_v56  ;;  %v754_v50 = vrot.slane %v365_v17, 5 }
  0x3a   : > { %4937 = vst [vmem:[#allocation15_spill] sm:$0xff] %v4116_v36  ;;  %3321 = vmatprep.mubr.msk.bf16.mxu1 %vm390_vm3, %v4116_v36  ;;  %v358_v60 = vrot.slane %v357_v6, 4  ;;  %v371_v53 = vor.u32 %v370_v42, %v367_v43  ;;  %v755_v61 = vrot.slane %v368_v46, 6  ;;  %v746_v59 = vor.u32 %v745_v44, %v744_v1  ;;  %v4142_v44 = vld [vmem:[%s3842_s6 + $0x90] sm:$0xff] }
  0x3b   : > { %v750_v63 = vrot.slane %v748_v5, 5  ;;  %v758_v54 = vshrl.u32 %v4091_v9, 16  ;;  %v761_v7 = vrot.slane %v374_v10, 6  ;;  %v4134_v6 = vpack.c.bf16 %v4121_v23, %v4121_v23 }
  0x3c   : > { %v4130_v13 = vsel %vm3993_vm8, %v358_v60, %v362_v40  ;;  %v372_v0 = vrot.slane %v371_v53, 4  ;;  %v756_v39 = vor.u32 %v755_v61, %v754_v50  ;;  %v554_v17 = vrot.slane %v3920_v45, 5  ;;  %v191_v40 = vld [vmem:[%s3842_s6 + $0x98] sm:$0xf] }
  0x3d   : > { %4938 = vst [vmem:[#allocation16_spill] sm:$0xff] %v4130_v13  ;;  %v747_v46 = vrot.slane %v746_v59, 4  ;;  %v752_v43 = vor.u32 %v751_v62, %v750_v63  ;;  %v760_v42 = vrot.slane %v758_v54, 5  ;;  %v4145_v5 = vpack.c.bf16 %v189_v57, %v189_v57 }
  0x3e   : > { %v4139_v1 = vsel %vm3993_vm8, %v372_v0, %v376_v34  ;;  %v757_v10 = vrot.slane %v756_v39, 4  ;;  %v4891_v60 = vshrl.u32 %v4134_v6, 16  ;;  %v4889_v50 = vshll.u32 %v4134_v6, 16 }
  0x3f   : > { %4939 = vst [vmem:[#allocation17_spill] sm:$0xff] %v4139_v1  ;;  %v4150_v53 = vcombine.low %v4130_v13, %v4139_v1  ;;  %v753_v62 = vsel %vm4050_vm9, %v747_v46, %v752_v43  ;;  %v762_v54 = vor.u32 %v761_v7, %v760_v42  ;;  %v4890_v39 = vshll.u32 %v4145_v5, 16 }
  0x40   : > { %v4155_v0 = vcombine.low %v743_v47, %v753_v62  ;;  %v1301_v57 = vrot.slane %v4891_v60, 5  ;;  %v1305_v34 = vshrl.u32 %v4145_v5, 16  ;;  %v1302_v59 = vrot.slane %v4889_v50, 6 }
  0x41   : > { %4940 = vst [vmem:[#allocation18_spill] sm:$0xff] %v4150_v53  ;;  %3322 = vmatmul.mubr.msk.bf16.gmra.mrb[4].mxu1 %vm390_vm3, %v4150_v53  ;;  %v4165_v61 = vsel %vm4050_vm9, %v757_v10, %v762_v54  ;;  %v4171_v47 = vpack.c.bf16 %v4142_v44, %v4142_v44  ;;  %v4173_v63 = vpack.c.bf16 %v191_v40, %v191_v40  ;;  %v1308_v43 = vrot.slane %v4890_v39, 6 }
  0x42   : > { %4941 = vst [vmem:[#allocation19_spill] sm:$0xff] %v4155_v0  ;;  %v4176_v7 = vcombine.low %v753_v62, %v4165_v61  ;;  %v1307_v46 = vrot.slane %v1305_v34, 5  ;;  %v4943_v42 = vpack.c.bf16 %v3847_v12, %v3891_v30  ;;  %v4186_v10 = vpack.c.bf16 %v3855_v16, %v3851_v14  ;;  %v3081_v30 = vld [vmem:[%s4868_s1 + $0x130] sm:$0xff] }
  0x43   : > { %v1303_v54 = vor.u32 %v1302_v59, %v1301_v57  ;;  %v4899_v40 = vshrl.u32 %v4171_v47, 16  ;;  %v4901_v50 = vshll.u32 %v4171_v47, 16  ;;  %v1771_v39 = vshrl.u32 %v4173_v63, 16 }
  0x44   : > { %4942 = vst [vmem:[#allocation20_spill] sm:$0xff] %v4176_v7  ;;  %3327 = vmatprep.mubr.msk.bf16.mxu1 %vm390_vm3, %v4943_v42  ;;  %4944 = vst [vmem:[#allocation21_spill] sm:$0xff] %v4186_v10  ;;  %3451 = vmatprep.mubr.msk.bf16.mxu0 %vm390_vm3, %v4176_v7  ;;  %v1309_v34 = vor.u32 %v1308_v43, %v1307_v46  ;;  %v2966_v57 = vrot.slane %v3867_v20, 10  ;;  %v874_v59 = vrot.slane %v3869_v21, 6  ;;  %v214_v42 = vld [vmem:[%s4868_s1 + $0x30] sm:$0xff]  ;;  %v215_v46 = vld [vmem:[%s4868_s1 + $0x38] sm:$0xff] }
  0x45   : > { %v1304_v43 = vrot.slane %v1303_v54, 4  ;;  %v1767_v60 = vrot.slane %v4899_v40, 5  ;;  %v1768_v62 = vrot.slane %v4901_v50, 6  ;;  %v4947_v53 = vshll.u32 %v4173_v63, 16  ;;  %v193_v7 = vld [vmem:[%s3842_s6 + $0xa8] sm:$0xf] }
  0x46   : > { %v1773_v36 = vrot.slane %v1771_v39, 5  ;;  %v2967_v21 = vrot.slane %v3882_v27, 10  ;;  %v878_v0 = vrot.slane %v3884_v28, 6  ;;  %v4948_v12 = vrot.slane %v3915_v41, 9 }
  0x47   : > { %v1774_v20 = vrot.slane %v4947_v53, 6  ;;  %v1769_v54 = vor.u32 %v1768_v62, %v1767_v60  ;;  %v4222_v40 = vsel %vm4196_vm12, %v2966_v57, %v874_v59  ;;  %v4224_v1 = vpack.c.bf16 %v215_v46, %v214_v42 }
  0x48   : > { %v555_v14 = vsel %vm3904_vm2, %v4948_v12, %v554_v17  ;;  %4949 = vst [vmem:[#allocation22_spill] sm:$0xff] %v4222_v40  ;;  %v4228_v53 = vsel %vm4196_vm12, %v2967_v21, %v878_v0  ;;  %v2969_v27 = vrot.slane %v3897_v32, 10  ;;  %v886_v28 = vrot.slane %v3899_v33, 6 }
  0x49   : > { %v1775_v50 = vor.u32 %v1774_v20, %v1773_v36  ;;  %v4950_v39 = vshrl.u32 %v3915_v41, 16  ;;  %v4236_v12 = vsel %vm4050_vm9, %v1304_v43, %v1309_v34  ;;  %v1770_v17 = vrot.slane %v1769_v54, 4  ;;  %3328 = vmatmul.mubr.msk.bf16.vlgmr.msra.gmra.mrb[0].mxu1 %vm390_vm3, %v4186_v10 }
  0x4a   : > { %v4242_v36 = vpack.c.bf16 %v3875_v24, %v3859_v18  ;;  %3336 = vmatpush3.bf16.msra.mxu1 %v4006_v48  ;;  %v2968_v32 = vrot.slane %v3888_v29, 10  ;;  %v882_v33 = vrot.slane %v3893_v31, 6  ;;  %v2970_v60 = vrot.slane %v4025_v25, 10 }
  0x4b   : > { %v684_v13 = vrot.slane %v4950_v39, 5  ;;  %v890_v0 = vrot.slane %v4027_v37, 6  ;;  %v4251_v62 = vsel %vm4050_vm9, %v1770_v17, %v1775_v50  ;;  %v4255_v34 = vcombine.low %v4222_v40, %v4228_v53  ;;  %3345 = vmatprep.subr.bf16.mxu1 %v4224_v1 }
  0x4c   : > { %4951 = vst [vmem:[#allocation23_spill] sm:$0xff] %v4242_v36  ;;  %4952 = vst [vmem:[#allocation24_spill] sm:$0xff] %v4251_v62  ;;  %3331 = vmatprep.mubr.msk.bf16.mxu1 %vm390_vm3, %v4242_v36  ;;  %v2971_v48 = vrot.slane %v4089_v4, 10  ;;  %v894_v29 = vrot.slane %v4091_v9, 6  ;;  %v4954_v31 = vshll.u32 %v3915_v41, 16  ;;  %v4266_v50 = vcombine.low %v4236_v12, %v4251_v62 }
  0x4d   : > { %4953 = vst [vmem:[#allocation25_spill] sm:$0xff] %v4255_v34  ;;  %v887_v59 = vsel %vm4196_vm12, %v2969_v27, %v886_v28  ;;  %v891_v42 = vsel %vm4196_vm12, %v2970_v60, %v890_v0  ;;  %v4956_v46 = vshrl.u32 %v3863_v19, 16  ;;  %v4957_v20 = vshll.u32 %v3863_v19, 16 }
  0x4e   : > { %v685_v57 = vrot.slane %v4954_v31, 6  ;;  %4955 = vst [vmem:[#allocation26_spill] sm:$0xff] %v4266_v50  ;;  %v4278_v54 = vpack.c.bf16 %v4078_v22, %v4009_v49  ;;  %v4280_v39 = vcombine.low %v887_v59, %v891_v42  ;;  %v2948_v17 = vcombine.low %v555_v14, %v3936_v51  ;;  %3452 = vmatmul.mubr.msk.bf16.gmra.mrb[4].mxu0 %vm390_vm3, %v4266_v50 }
  0x4f   : > { %v694_v43 = vrot.slane %v4956_v46, 5  ;;  %v695_v21 = vrot.slane %v4957_v20, 6  ;;  %v4287_v27 = vpack.c.bf16 %v3859_v18, %v3855_v16  ;;  %3457 = vmatprep.mubr.msk.bf16.mxu0 %vm390_vm3, %v4255_v34  ;;  %v4293_v28 = vsel %vm4196_vm12, %v2968_v32, %v882_v33  ;;  %v3075_v33 = vld [vmem:[%s4868_s1 + $0x100] sm:$0xff] }
  0x50   : > { %4958 = vst [vmem:[#allocation27_spill] sm:$0xff] %v4278_v54  ;;  %4959 = vst [vmem:[#allocation28_spill] sm:$0xff] %v4280_v39  ;;  %v4297_v60 = vsel %vm4196_vm12, %v2971_v48, %v894_v29  ;;  %v3025_v14 = vrot.slane %v4134_v6, 10  ;;  %v1403_v0 = vrot.slane %v4145_v5, 6  ;;  %v2946_v31 = vrot.slane %v4025_v25, 9  ;;  %v3076_v25 = vld [vmem:[%s4868_s1 + $0x108] sm:$0xff] }
  0x51   : > { %v578_v16 = vrot.slane %v4027_v37, 5  ;;  %v4960_v18 = vshll.u32 %v3920_v45, 16  ;;  %v3067_v20 = vrot.slane %v4171_v47, 10  ;;  %3332 = vmatmul.mubr.msk.bf16.gmra.mrb[4].mxu1 %vm390_vm3, %v4278_v54  ;;  %v1857_v32 = vrot.slane %v4173_v63, 6 }
  0x52   : > { %v686_v37 = vor.u32 %v685_v57, %v684_v13  ;;  %v688_v48 = vshrl.u32 %v3920_v45, 16  ;;  %v696_v29 = vor.u32 %v695_v21, %v694_v43  ;;  %v4319_v10 = vcombine.low %v4293_v28, %v887_v59  ;;  %3337 = vmatprep.mubr.msk.bf16.mxu1 %vm390_vm3, %v2948_v17  ;;  %v4335_v59 = vld [vmem:[%s3842_s6 + $0xa0] sm:$0xff] }
  0x53   : > { %v691_v46 = vrot.slane %v4960_v18, 6  ;;  %v4961_v18 = vshll.u32 %v3878_v26, 16  ;;  %v4322_v54 = vcombine.low %v891_v42, %v4297_v60  ;;  %v698_v36 = vshrl.u32 %v3878_v26, 16  ;;  %v216_v17 = vld [vmem:[%s4868_s1 + $0x40] sm:$0xff] }
  0x54   : > { %v4328_v39 = vsel %vm4196_vm12, %v3025_v14, %v1403_v0  ;;  %v2947_v13 = vrot.slane %v4089_v4, 9  ;;  %v582_v57 = vrot.slane %v4091_v9, 5  ;;  %v690_v43 = vrot.slane %v688_v48, 5  ;;  %v217_v14 = vld [vmem:[%s4868_s1 + $0x48] sm:$0xff] }
  0x55   : > { %v701_v50 = vrot.slane %v4961_v18, 6  ;;  %v4332_v21 = vpack.c.bf16 %v3076_v25, %v3075_v33  ;;  %v700_v42 = vrot.slane %v698_v36, 5  ;;  %v4962_v0 = vshrl.u32 %v4134_v6, 16 }
  0x56   : > { %v4963_v9 = vshll.u32 %v4134_v6, 16  ;;  %v4349_v33 = vsel %vm4196_vm12, %v3067_v20, %v1857_v32  ;;  %v4353_v36 = vpack.c.bf16 %v4335_v59, %v4335_v59  ;;  %v687_v25 = vrot.slane %v686_v37, 4  ;;  %3458 = vmatmul.mubr.msk.bf16.vlgmr.msra.gmra.mrb[0].mxu0 %vm390_vm3, %v4319_v10 }
  0x57   : > { %v1106_v4 = vrot.slane %v4962_v0, 4  ;;  %v697_v48 = vrot.slane %v696_v29, 4  ;;  %v692_v51 = vor.u32 %v691_v46, %v690_v43  ;;  %v702_v34 = vor.u32 %v701_v50, %v700_v42  ;;  %3466 = vmatpush3.bf16.msra.mxu0 %v4017_v56  ;;  %3461 = vmatprep.mubr.msk.bf16.mxu0 %vm390_vm3, %v4322_v54 }
  0x58   : > { %v1109_v18 = vrot.slane %v4963_v9, 5  ;;  %v4964_v0 = vshrl.u32 %v4171_v47, 16  ;;  %v4965_v9 = vshll.u32 %v4171_v47, 16  ;;  %v4365_v20 = vpack.c.bf16 %v217_v14, %v216_v17  ;;  %3475 = vmatprep.subr.bf16.mxu0 %v4332_v21 }
  0x59   : > { %v4369_v37 = vsel %vm3904_vm2, %v2946_v31, %v578_v16  ;;  %v4373_v50 = vcombine.low %v4328_v39, %v4349_v33  ;;  %v4377_v46 = vpack.c.bf16 %v4009_v49, %v3875_v24  ;;  %v4381_v56 = vsel %vm3904_vm2, %v2947_v13, %v582_v57  ;;  %3338 = vmatmul.mubr.msk.bf16.vlgmr.msra.gmra.mrb[0].mxu1 %vm390_vm3, %v3947_v55  ;;  %v3077_v24 = vld [vmem:[%s4868_s1 + $0x110] sm:$0xff]  ;;  %v3078_v49 = vld [vmem:[%s4868_s1 + $0x118] sm:$0xff] }
  0x5a   : > { %v1596_v62 = vrot.slane %v4964_v0, 4  ;;  %v1599_v40 = vrot.slane %v4965_v9, 5  ;;  %v1110_v32 = vor.u32 %v1109_v18, %v1106_v4  ;;  %v4388_v31 = vpack.c.bf16 %v4121_v23, %v4078_v22  ;;  %3346 = vmatpush3.bf16.msra.mxu1 %v4224_v1  ;;  %3341 = vmatprep.mubr.msk.bf16.mxu1 %vm390_vm3, %v3954_v58 }
  0x5b   : > { %v4398_v29 = vpack.c.bf16 %v193_v7, %v193_v7  ;;  %v2036_v13 = vshrl.u32 %v4353_v36, 16  ;;  %v693_v55 = vsel %vm4050_vm9, %v687_v25, %v692_v51  ;;  %v4408_v22 = vsel %vm4050_vm9, %v697_v48, %v702_v34  ;;  %3355 = vmatprep.subr.bf16.mxu1 %v4365_v20 }
  0x5c   : > { %v1600_v57 = vor.u32 %v1599_v40, %v1596_v62  ;;  %v4412_v43 = vcombine.low %v4369_v37, %v4381_v56  ;;  %v1111_v7 = vrot.slane %v1110_v32, 4  ;;  %v4966_v1 = vshll.u32 %v4145_v5, 16 }
  0x5d   : > { %v2039_v17 = vshll.u32 %v4353_v36, 16  ;;  %v4420_v51 = vcombine.low %v4040_v3, %v4104_v2  ;;  %v4422_v14 = vpack.c.bf16 %v3078_v49, %v3077_v24  ;;  %v4967_v40 = vshll.u32 %v4173_v63, 16 }
  0x5e   : > { %v1115_v42 = vrot.slane %v4966_v1, 5  ;;  %v2964_v34 = vrot.slane %v3915_v41, 10  ;;  %v2956_v4 = vcombine.low %v693_v55, %v4408_v22  ;;  %v4428_v18 = vrot.slane %v2036_v13, 4  ;;  %3462 = vmatmul.mubr.msk.bf16.gmra.mrb[4].mxu0 %vm390_vm3, %v4373_v50 }
  0x5f   : > { %v1605_v62 = vrot.slane %v4967_v40, 5  ;;  %v2045_v25 = vshll.u32 %v4398_v29, 16  ;;  %v3056_v48 = vrot.slane %v4171_v47, 9  ;;  %v1601_v3 = vrot.slane %v1600_v57, 4  ;;  %3467 = vmatprep.mubr.msk.bf16.mxu0 %vm390_vm3, %v4287_v27 }
  0x60   : > { %v1687_v2 = vrot.slane %v4173_v63, 5  ;;  %v3095_v0 = vrot.slane %v4353_v36, 9  ;;  %v2129_v9 = vrot.slane %v4398_v29, 5  ;;  %v4441_v32 = vsel %vm3993_vm8, %v1111_v7, %v1115_v42 }
  0x61   : > { %v2041_v24 = vrot.slane %v2039_v17, 5  ;;  %v866_v47 = vrot.slane %v3920_v45, 6  ;;  %v4446_v49 = vcombine.low %v4070_v8, %v4085_v15  ;;  %v2965_v63 = vrot.slane %v3863_v19, 10  ;;  %3342 = vmatmul.mubr.msk.bf16.gmra.mrb[4].mxu1 %vm390_vm3, %v4412_v43 }
  0x62   : > { %v870_v55 = vrot.slane %v3878_v26, 6  ;;  %v4452_v57 = vsel %vm3904_vm2, %v3056_v48, %v1687_v2  ;;  %v4456_v7 = vsel %vm3904_vm2, %v3095_v0, %v2129_v9  ;;  %v4464_v8 = vcombine.low %v4165_v61, %v4236_v12  ;;  %3347 = vmatprep.mubr.msk.bf16.mxu1 %vm390_vm3, %v2956_v4  ;;  %v4479_v61 = vld [vmem:[%s3842_s6 + $0xb0] sm:$0xff]  ;;  %v195_v0 = vld [vmem:[%s3842_s6 + $0xb8] sm:$0xf] }
  0x63   : > { %v2209_v19 = vrot.slane %v2036_v13, 5  ;;  %v2210_v26 = vrot.slane %v2039_v17, 6  ;;  %v4469_v15 = vsel %vm3993_vm8, %v1601_v3, %v1605_v62  ;;  %v2213_v1 = vshrl.u32 %v4398_v29, 16  ;;  %v2980_v4 = vld [vmem:[%s4868_s1 + $0x50] sm:$0xff] }
  0x64   : > { %v2216_v42 = vrot.slane %v2045_v25, 6  ;;  %v4476_v40 = vcombine.low %v4228_v53, %v4293_v28  ;;  %v2042_v12 = vor.u32 %v2041_v24, %v4428_v18  ;;  %v4484_v17 = vcombine.low %v4297_v60, %v4328_v39  ;;  %v2981_v53 = vld [vmem:[%s4868_s1 + $0x58] sm:$0xff] }
  0x65   : > { %v2211_v13 = vor.u32 %v2210_v26, %v2209_v19  ;;  %v3106_v62 = vrot.slane %v4353_v36, 10  ;;  %v3008_v28 = vrot.slane %v4134_v6, 9  ;;  %v1209_v48 = vrot.slane %v4145_v5, 5 }
  0x66   : > { %v2215_v18 = vrot.slane %v2213_v1, 5  ;;  %v2299_v3 = vrot.slane %v4398_v29, 6  ;;  %v4498_v39 = vpack.c.bf16 %v4142_v44, %v4121_v23  ;;  %v4504_v36 = vpack.c.bf16 %v4479_v61, %v4479_v61  ;;  %3468 = vmatmul.mubr.msk.bf16.vlgmr.msra.gmra.mrb[0].mxu0 %vm390_vm3, %v4377_v46 }
  0x67   : > { %v2212_v2 = vrot.slane %v2211_v13, 4  ;;  %v4511_v6 = vsel %vm4196_vm12, %v2965_v63, %v870_v55  ;;  %3476 = vmatpush3.bf16.msra.mxu0 %v4332_v21  ;;  %3471 = vmatprep.mubr.msk.bf16.mxu0 %vm390_vm3, %v4388_v31  ;;  %v4522_v24 = vpack.c.bf16 %v2981_v53, %v2980_v4  ;;  %v4528_v63 = vcombine.low %v4441_v32, %v4469_v15 }
  0x68   : > { %v2217_v5 = vor.u32 %v2216_v42, %v2215_v18  ;;  %v4515_v23 = vsel %vm4196_vm12, %v3106_v62, %v2299_v3  ;;  %v2478_v55 = vshrl.u32 %v4504_v36, 16  ;;  %3485 = vmatprep.subr.bf16.mxu0 %v4422_v14  ;;  %v3189_v21 = vpack.c.bf16 %v195_v0, %v195_v0  ;;  %v4968_v42 = vld [vmem:[#allocation22_spill] sm:$0xff]  ;;  %v4969_v62 = vld [vmem:[#allocation12_spill] sm:$0xff]  ;;  %v4971_v0 = vld [vmem:[#allocation13_spill] sm:$0xff] }
  0x69   : > { %v2481_v1 = vshll.u32 %v4504_v36, 16  ;;  %3348 = vmatmul.mubr.msk.bf16.vlgmr.msra.gmra.mrb[0].mxu1 %vm390_vm3, %v4969_v62  ;;  %v867_v4 = vsel %vm4196_vm12, %v2964_v34, %v866_v47  ;;  %v4547_v53 = vsel %vm3904_vm2, %v3008_v28, %v1209_v48  ;;  %v4970_v18 = vld [vmem:[#allocation24_spill] sm:$0xff]  ;;  %v3134_v34 = vrot.slane %v4504_v36, 9 }
  0x6a   : > { %v4534_v26 = vsel %vm4050_vm9, %v2212_v2, %v2217_v5  ;;  %v2480_v2 = vrot.slane %v2478_v55, 4  ;;  %3356 = vmatpush3.bf16.msra.mxu1 %v4365_v20  ;;  %3351 = vmatprep.mubr.msk.bf16.mxu1 %vm390_vm3, %v4971_v0  ;;  %v2487_v62 = vshll.u32 %v3189_v21, 16  ;;  %v4556_v41 = vcombine.low %v4547_v53, %v4452_v57 }
  0x6b   : > { %v2483_v5 = vrot.slane %v2481_v1, 5  ;;  %v2043_v47 = vrot.slane %v2042_v12, 4  ;;  %v2047_v28 = vrot.slane %v2045_v25, 5  ;;  %3365 = vmatprep.subr.bf16.mxu1 %v4522_v24  ;;  %v2571_v48 = vrot.slane %v3189_v21, 5 }
  0x6c   : > { %v2651_v13 = vrot.slane %v2478_v55, 5  ;;  %v2489_v60 = vrot.slane %v2487_v62, 5  ;;  %v2652_v9 = vrot.slane %v2481_v1, 6  ;;  %v2655_v19 = vshrl.u32 %v3189_v21, 16 }
  0x6d   : > { %v2484_v20 = vor.u32 %v2483_v5, %v2480_v2  ;;  %v2972_v3 = vcombine.low %v867_v4, %v4511_v6  ;;  %v4565_v45 = vsel %vm3904_vm2, %v3134_v34, %v2571_v48  ;;  %v2658_v16 = vrot.slane %v2487_v62, 6  ;;  %v3079_v62 = vld [vmem:[%s4868_s1 + $0x120] sm:$0xff] }
  0x6e   : > { %v4972_v12 = vpack.c.bf16 %v4335_v59, %v4142_v44  ;;  %v3135_v25 = vcombine.low %v4456_v7, %v4565_v45  ;;  %v2653_v55 = vor.u32 %v2652_v9, %v2651_v13  ;;  %v2657_v2 = vrot.slane %v2655_v19, 5  ;;  %v4973_v44 = vld [vmem:[#allocation20_spill] sm:$0xff]  ;;  %v3080_v9 = vld [vmem:[%s4868_s1 + $0x128] sm:$0xff]  ;;  %v4975_v34 = vld [vmem:[#allocation14_spill] sm:$0xff] }
  0x6f   : > { %v2485_v29 = vrot.slane %v2484_v20, 4  ;;  %v2048_v35 = vsel %vm3993_vm8, %v2043_v47, %v2047_v28  ;;  %v4974_v13 = vld [vmem:[#allocation16_spill] sm:$0xff]  ;;  %v1951_v48 = vpack.c.bf16 %v3080_v9, %v3079_v62  ;;  %v2982_v20 = vld [vmem:[%s4868_s1 + $0x60] sm:$0xff] }
  0x70   : > { %3472 = vmatmul.mubr.msk.bf16.gmra.mrb[4].mxu0 %vm390_vm3, %v4972_v12  ;;  %v2654_v4 = vrot.slane %v2653_v55, 4  ;;  %v2659_v5 = vor.u32 %v2658_v16, %v2657_v2  ;;  %v3002_v47 = vcombine.low %v4975_v34, %v4974_v13  ;;  %v4976_v16 = vld [vmem:[#allocation17_spill] sm:$0xff]  ;;  %v2983_v12 = vld [vmem:[%s4868_s1 + $0x68] sm:$0xff]  ;;  %v3090_v2 = vcombine.low %v4469_v15, %v2048_v35  ;;  %v2984_v9 = vld [vmem:[%s4868_s1 + $0x70] sm:$0xff] }
  0x71   : > { %3477 = vmatprep.mubr.msk.bf16.mxu0 %vm390_vm3, %v4420_v51  ;;  %v2490_v1 = vsel %vm3993_vm8, %v2485_v29, %v2489_v60  ;;  %3352 = vmatmul.mubr.msk.bf16.gmra.mrb[4].mxu1 %vm390_vm3, %v4973_v44  ;;  %v3003_v60 = vcombine.low %v4976_v16, %v4441_v32  ;;  %v1005_v38 = vpack.c.bf16 %v2983_v12, %v2982_v20  ;;  %v3145_v32 = vrot.slane %v4504_v36, 10  ;;  %v4977_v29 = vld [vmem:[#allocation25_spill] sm:$0xff]  ;;  %v4978_v36 = vld [vmem:[#allocation8_spill] sm:$0xff]  ;;  %v4985_v34 = vld [vmem:[#allocation10_spill] sm:$0xff] }
  0x72   : > { %v4587_v19 = vcombine.low %v2048_v35, %v2490_v1  ;;  %3357 = vmatprep.mubr.msk.bf16.mxu1 %vm390_vm3, %v2972_v3  ;;  %v4594_v11 = vsel %vm4050_vm9, %v2654_v4, %v2659_v5  ;;  %v2741_v3 = vrot.slane %v3189_v21, 6  ;;  %v3082_v15 = vld [vmem:[%s4868_s1 + $0x138] sm:$0xff]  ;;  %v4980_v35 = vld [vmem:[#allocation4_spill] sm:$0xff]  ;;  %v4981_v1 = vld [vmem:[#allocation3_spill] sm:$0xff]  ;;  %v3012_v5 = vcombine.low %v4381_v56, %v4547_v53 }
  0x73   : > { %v3140_v28 = vcombine.low %v4534_v26, %v4594_v11  ;;  %v4982_v4 = vpack.c.bf16 %v4980_v35, %v4981_v1  ;;  %v1952_v62 = vpack.c.bf16 %v3082_v15, %v3081_v30  ;;  %v2985_v13 = vld [vmem:[%s4868_s1 + $0x78] sm:$0xff]  ;;  %v4983_v56 = vcombine.low %v4452_v57, %v4456_v7  ;;  %v4987_v20 = vld [vmem:[#allocation19_spill] sm:$0xff]  ;;  %v4992_v30 = vld [vmem:[#allocation28_spill] sm:$0xff] }
  0x74   : > { %v4614_v55 = vsel %vm4196_vm12, %v3145_v32, %v2741_v3  ;;  %v4984_v53 = vld [vmem:[#allocation9_spill] sm:$0xff]  ;;  %v3114_v32 = vld [vmem:[%s4868_s1 + $0x150] sm:$0xff]  ;;  %v4994_v35 = vld [vmem:[#allocation23_spill] sm:$0xff] }
  0x75   : > { %v4986_v16 = vcombine.low %v4984_v53, %v4985_v34  ;;  %v4990_v3 = vld [vmem:[#allocation5_spill] sm:$0xff]  ;;  %v3116_v1 = vld [vmem:[%s4868_s1 + $0x160] sm:$0xff] }
  0x78   : > { %3478 = vmatmul.mubr.msk.bf16.vlgmr.msra.gmra.mrb[0].mxu0 %vm390_vm3, %v3002_v47 }
  0x79   : > { %3486 = vmatpush3.bf16.msra.mxu0 %v4422_v14  ;;  %3481 = vmatprep.mubr.msk.bf16.mxu0 %vm390_vm3, %v3003_v60  ;;  %v3146_v14 = vcombine.low %v4515_v23, %v4614_v55 }
  0x7a   : > { %3495 = vmatprep.subr.bf16.mxu0 %v1951_v48  ;;  %3358 = vmatmul.mubr.msk.bf16.vlgmr.msra.gmra.mrb[0].mxu1 %vm390_vm3, %v4977_v29 }
  0x7b   : > { %3366 = vmatpush3.bf16.msra.mxu1 %v4522_v24  ;;  %3361 = vmatprep.mubr.msk.bf16.mxu1 %vm390_vm3, %v4319_v10  ;;  %v4979_v24 = vld [vmem:[#allocation7_spill] sm:$0xff] }
  0x7c   : > { %3375 = vmatprep.subr.bf16.mxu1 %v1005_v38  ;;  %v3011_v21 = vcombine.low %v4979_v24, %v4369_v37  ;;  %v1006_v37 = vpack.c.bf16 %v2985_v13, %v2984_v9  ;;  %v4993_v24 = vcombine.low %v4349_v33, %v4515_v23  ;;  %v3119_v13 = vld [vmem:[%s4868_s1 + $0x178] sm:$0xff] }
  0x80   : > { %3482 = vmatmul.mubr.msk.bf16.gmra.mrb[4].mxu0 %vm390_vm3, %v3090_v2  ;;  %v2988_v2 = vld [vmem:[%s4868_s1 + $0x90] sm:$0xff] }
  0x81   : > { %3487 = vmatprep.mubr.msk.bf16.mxu0 %vm390_vm3, %v4978_v36 }
  0x82   : > { %3362 = vmatmul.mubr.msk.bf16.gmra.mrb[4].mxu1 %vm390_vm3, %v4322_v54 }
  0x83   : > { %3367 = vmatprep.mubr.msk.bf16.mxu1 %vm390_vm3, %v4982_v4  ;;  %v3034_v4 = vld [vmem:[%s4868_s1 + $0xa0] sm:$0xff] }
  0x88   : > { %3488 = vmatmul.mubr.msk.bf16.vlgmr.msra.gmra.mrb[0].mxu0 %vm390_vm3, %v3011_v21 }
  0x89   : > { %3496 = vmatpush3.bf16.msra.mxu0 %v1951_v48  ;;  %3491 = vmatprep.mubr.msk.bf16.mxu0 %vm390_vm3, %v3012_v5  ;;  %v2986_v48 = vld [vmem:[%s4868_s1 + $0x80] sm:$0xff] }
  0x8a   : > { %3505 = vmatprep.subr.bf16.mxu0 %v1952_v62  ;;  %3368 = vmatmul.mubr.msk.bf16.vlgmr.msra.gmra.mrb[0].mxu1 %vm390_vm3, %v4287_v27  ;;  %v3112_v27 = vld [vmem:[%s4868_s1 + $0x140] sm:$0xff] }
  0x8b   : > { %3376 = vmatpush3.bf16.msra.mxu1 %v1005_v38  ;;  %3371 = vmatprep.mubr.msk.bf16.mxu1 %vm390_vm3, %v4377_v46  ;;  %v3113_v46 = vld [vmem:[%s4868_s1 + $0x148] sm:$0xff]  ;;  %v4988_v38 = vcombine.low %v4970_v18, %v4534_v26 }
  0x8c   : > { %3385 = vmatprep.subr.bf16.mxu1 %v1006_v37  ;;  %v2390_v57 = vpack.c.bf16 %v3113_v46, %v3112_v27 }
  0x90   : > { %3492 = vmatmul.mubr.msk.bf16.gmra.mrb[4].mxu0 %vm390_vm3, %v4983_v56  ;;  %v5000_v56 = vld [vmem:[#allocation18_spill] sm:$0xff] }
  0x91   : > { %3497 = vmatprep.mubr.msk.bf16.mxu0 %vm390_vm3, %v4446_v49 }
  0x92   : > { %3372 = vmatmul.mubr.msk.bf16.gmra.mrb[4].mxu1 %vm390_vm3, %v4388_v31  ;;  %v2987_v31 = vld [vmem:[%s4868_s1 + $0x88] sm:$0xff] }
  0x93   : > { %3377 = vmatprep.mubr.msk.bf16.mxu1 %vm390_vm3, %v4986_v16  ;;  %v1007_v12 = vpack.c.bf16 %v2987_v31, %v2986_v48 }
  0x98   : > { %3498 = vmatmul.mubr.msk.bf16.vlgmr.msra.gmra.mrb[0].mxu0 %vm390_vm3, %v4987_v20 }
  0x99   : > { %3506 = vmatpush3.bf16.msra.mxu0 %v1952_v62  ;;  %3501 = vmatprep.mubr.msk.bf16.mxu0 %vm390_vm3, %v4464_v8  ;;  %v4996_v62 = vld [vmem:[#allocation27_spill] sm:$0xff] }
  0x9a   : > { %3515 = vmatprep.subr.bf16.mxu0 %v2390_v57  ;;  %3378 = vmatmul.mubr.msk.bf16.vlgmr.msra.gmra.mrb[0].mxu1 %vm390_vm3, %v4420_v51  ;;  %v3115_v51 = vld [vmem:[%s4868_s1 + $0x158] sm:$0xff] }
  0x9b   : > { %3386 = vmatpush3.bf16.msra.mxu1 %v1006_v37  ;;  %3381 = vmatprep.mubr.msk.bf16.mxu1 %vm390_vm3, %v3002_v47  ;;  %v4989_v47 = vld [vmem:[#allocation6_spill] sm:$0xff]  ;;  %v2391_v18 = vpack.c.bf16 %v3115_v51, %v3114_v32  ;;  %v4999_v37 = vcombine.low %v4511_v6, %v4968_v42  ;;  %v5001_v42 = vld [vmem:[#allocation21_spill] sm:$0xff] }
  0x9c   : > { %3395 = vmatprep.subr.bf16.mxu1 %v1007_v12  ;;  %v4991_v29 = vcombine.low %v4989_v47, %v4990_v3  ;;  %v3120_v6 = vld [vmem:[%s4868_s1 + $0x180] sm:$0xff] }
  0xa0   : > { %3502 = vmatmul.mubr.msk.bf16.gmra.mrb[4].mxu0 %vm390_vm3, %v4988_v38 }
  0xa1   : > { %3507 = vmatprep.mubr.msk.bf16.mxu0 %vm390_vm3, %v4476_v40 }
  0xa2   : > { %3382 = vmatmul.mubr.msk.bf16.gmra.mrb[4].mxu1 %vm390_vm3, %v3003_v60  ;;  %v2989_v60 = vld [vmem:[%s4868_s1 + $0x98] sm:$0xff] }
  0xa3   : > { %3387 = vmatprep.mubr.msk.bf16.mxu1 %vm390_vm3, %v4991_v29  ;;  %v1008_v15 = vpack.c.bf16 %v2989_v60, %v2988_v2 }
  0xa8   : > { %3508 = vmatmul.mubr.msk.bf16.vlgmr.msra.gmra.mrb[0].mxu0 %vm390_vm3, %v4992_v30 }
  0xa9   : > { %3516 = vmatpush3.bf16.msra.mxu0 %v2390_v57  ;;  %3511 = vmatprep.mubr.msk.bf16.mxu0 %vm390_vm3, %v4484_v17 }
  0xaa   : > { %3525 = vmatprep.subr.bf16.mxu0 %v2391_v18  ;;  %3388 = vmatmul.mubr.msk.bf16.vlgmr.msra.gmra.mrb[0].mxu1 %vm390_vm3, %v4978_v36  ;;  %v3117_v36 = vld [vmem:[%s4868_s1 + $0x168] sm:$0xff] }
  0xab   : > { %3396 = vmatpush3.bf16.msra.mxu1 %v1007_v12  ;;  %3391 = vmatprep.mubr.msk.bf16.mxu1 %vm390_vm3, %v3011_v21  ;;  %v4995_v21 = vcombine.low %v4408_v22, %v4064_v52  ;;  %v2392_v33 = vpack.c.bf16 %v3117_v36, %v3116_v1  ;;  %v4997_v52 = vpack.c.bf16 %v4479_v61, %v4335_v59  ;;  %v4998_v22 = vld [vmem:[#allocation15_spill] sm:$0xff]  ;;  %v3036_v61 = vld [vmem:[%s4868_s1 + $0xb0] sm:$0xff] }
  0xac   : > { %3405 = vmatprep.subr.bf16.mxu1 %v1008_v15 }
  0xb0   : > { %3512 = vmatmul.mubr.msk.bf16.gmra.mrb[4].mxu0 %vm390_vm3, %v4993_v24 }
  0xb1   : > { %3517 = vmatprep.mubr.msk.bf16.mxu0 %vm390_vm3, %v4994_v35 }
  0xb2   : > { %3392 = vmatmul.mubr.msk.bf16.gmra.mrb[4].mxu1 %vm390_vm3, %v3012_v5  ;;  %v3035_v5 = vld [vmem:[%s4868_s1 + $0xa8] sm:$0xff] }
  0xb3   : > { %3397 = vmatprep.mubr.msk.bf16.mxu1 %vm390_vm3, %v4995_v21  ;;  %v1506_v9 = vpack.c.bf16 %v3035_v5, %v3034_v4 }
  0xb8   : > { %3518 = vmatmul.mubr.msk.bf16.vlgmr.msra.gmra.mrb[0].mxu0 %vm390_vm3, %v4996_v62 }
  0xb9   : > { %3526 = vmatpush3.bf16.msra.mxu0 %v2391_v18  ;;  %3521 = vmatprep.mubr.msk.bf16.mxu0 %vm390_vm3, %v4498_v39 }
  0xba   : > { %3535 = vmatprep.subr.bf16.mxu0 %v2392_v33  ;;  %3398 = vmatmul.mubr.msk.bf16.vlgmr.msra.gmra.mrb[0].mxu1 %vm390_vm3, %v4446_v49  ;;  %v3118_v49 = vld [vmem:[%s4868_s1 + $0x170] sm:$0xff] }
  0xbb   : > { %3406 = vmatpush3.bf16.msra.mxu1 %v1008_v15  ;;  %3401 = vmatprep.mubr.msk.bf16.mxu1 %vm390_vm3, %v4987_v20  ;;  %v2393_v59 = vpack.c.bf16 %v3119_v13, %v3118_v49 }
  0xbc   : > { %3415 = vmatprep.subr.bf16.mxu1 %v1506_v9 }
  0xc0   : > { %3522 = vmatmul.mubr.msk.bf16.gmra.mrb[4].mxu0 %vm390_vm3, %v4997_v52 }
  0xc1   : > { %3527 = vmatprep.mubr.msk.bf16.mxu0 %vm390_vm3, %v4998_v22 }
  0xc2   : > { %3402 = vmatmul.mubr.msk.bf16.gmra.mrb[4].mxu1 %vm390_vm3, %v4464_v8  ;;  %v3037_v8 = vld [vmem:[%s4868_s1 + $0xb8] sm:$0xff] }
  0xc3   : > { %3407 = vmatprep.mubr.msk.bf16.mxu1 %vm390_vm3, %v4999_v37  ;;  %v1507_v27 = vpack.c.bf16 %v3037_v8, %v3036_v61 }
  0xc8   : > { %3528 = vmatmul.mubr.msk.bf16.vlgmr.msra.gmra.mrb[0].mxu0 %vm390_vm3, %v5000_v56 }
  0xc9   : > { %3536 = vmatpush3.bf16.msra.mxu0 %v2392_v33  ;;  %3531 = vmatprep.mubr.msk.bf16.mxu0 %vm390_vm3, %v4528_v63 }
  0xca   : > { %3545 = vmatprep.subr.bf16.mxu0 %v2393_v59  ;;  %3408 = vmatmul.mubr.msk.bf16.vlgmr.msra.gmra.mrb[0].mxu1 %vm390_vm3, %v4476_v40  ;;  %v3121_v40 = vld [vmem:[%s4868_s1 + $0x188] sm:$0xff] }
  0xcb   : > { %3416 = vmatpush3.bf16.msra.mxu1 %v1506_v9  ;;  %3411 = vmatprep.mubr.msk.bf16.mxu1 %vm390_vm3, %v4992_v30  ;;  %v2394_v46 = vpack.c.bf16 %v3121_v40, %v3120_v6 }
  0xcc   : > { %3425 = vmatprep.subr.bf16.mxu1 %v1507_v27 }
  0xd0   : > { %3532 = vmatmul.mubr.msk.bf16.gmra.mrb[4].mxu0 %vm390_vm3, %v4587_v19  ;;  %v5004_v19 = vld [vmem:[#allocation26_spill] sm:$0xff] }
  0xd1   : > { %3537 = vmatprep.mubr.msk.bf16.mxu0 %vm390_vm3, %v3954_v58  ;;  %v5002_v58 = vld [vmem:[#allocation2_spill] sm:$0xff] }
  0xd2   : > { %3412 = vmatmul.mubr.msk.bf16.gmra.mrb[4].mxu1 %vm390_vm3, %v4484_v17  ;;  %v5003_v17 = vld [vmem:[#allocation11_spill] sm:$0xff] }
  0xd3   : > { %3417 = vmatprep.mubr.msk.bf16.mxu1 %vm390_vm3, %v5001_v42 }
  0xd8   : > { %3538 = vmatmul.mubr.msk.bf16.vlgmr.msra.gmra.mrb[0].mxu0 %vm390_vm3, %v4412_v43 }
  0xd9   : > { %3546 = vmatpush3.bf16.msra.mxu0 %v2393_v59  ;;  %3541 = vmatprep.mubr.msk.bf16.mxu0 %vm390_vm3, %v4556_v41 }
  0xda   : > { %3555 = vmatprep.subr.bf16.mxu0 %v2394_v46  ;;  %3418 = vmatmul.mubr.msk.bf16.vlgmr.msra.gmra.mrb[0].mxu1 %vm390_vm3, %v4994_v35 }
  0xdb   : > { %3426 = vmatpush3.bf16.msra.mxu1 %v1507_v27  ;;  %3421 = vmatprep.mubr.msk.bf16.mxu1 %vm390_vm3, %v4996_v62 }
  0xdc   : > { %3565 = vmatprep.subr.bf16.mxu1 %v5002_v58 }
  0xe0   : > { %3542 = vmatmul.mubr.msk.bf16.gmra.mrb[4].mxu0 %vm390_vm3, %v3135_v25 }
  0xe1   : > { %3547 = vmatprep.mubr.msk.bf16.mxu0 %vm390_vm3, %v4971_v0 }
  0xe2   : > { %3422 = vmatmul.mubr.msk.bf16.gmra.mrb[4].mxu1 %vm390_vm3, %v4498_v39 }
  0xe3   : > { %3427 = vmatprep.mubr.msk.bf16.mxu1 %vm390_vm3, %v5003_v17 }
  0xe8   : > { %3548 = vmatmul.mubr.msk.bf16.vlgmr.msra.gmra.mrb[0].mxu0 %vm390_vm3, %v4973_v44 }
  0xe9   : > { %3556 = vmatpush3.bf16.msra.mxu0 %v2394_v46  ;;  %3551 = vmatprep.mubr.msk.bf16.mxu0 %vm390_vm3, %v5004_v19 }
  0xea   : > { %3428 = vmatmul.mubr.msk.bf16.vlgmr.msra.gmra.mrb[0].mxu1 %vm390_vm3, %v4998_v22 }
  0xeb   : > { %3566 = vmatpush3.bf16.msra.mxu1 %v5002_v58  ;;  %3431 = vmatprep.mubr.msk.bf16.mxu1 %vm390_vm3, %v5000_v56 }
  0xf0   : > { %3552 = vmatmul.mubr.msk.bf16.gmra.mrb[4].mxu0 %vm390_vm3, %v3140_v28 }
  0xf1   : > { %3557 = vmatprep.mubr.msk.bf16.mxu0 %vm390_vm3, %v4319_v10 }
  0xf2   : > { %3432 = vmatmul.mubr.msk.bf16.gmra.mrb[4].mxu1 %vm390_vm3, %v4528_v63 }
  0xf3   : > { %3441 = vmatprep.mubr.msk.bf16.mxu1 %vm390_vm3, %v4412_v43 }
  0xf8   : > { %3558 = vmatmul.mubr.msk.bf16.vlgmr.msra.gmra.mrb[0].mxu0 %vm390_vm3, %v4322_v54  ;;  %v3151_v54 = vld [vmem:[%s4869_s2] ss:$0 sm:$0xff] }
  0xf9   : > { %3561 = vmatprep.mubr.msk.bf16.mxu0 %vm390_vm3, %v4373_v50 }
  0xfe   : > { %3442 = vmatmul.mubr.msk.bf16.vlgmr.msra.gmra.mrb[4].mxu1 %vm390_vm3, %v4556_v41 }
 0x100   : > { %3562 = vmatmul.mubr.msk.bf16.gmra.mrb[4].mxu0 %vm390_vm3, %v3146_v14 }
 0x1bd   : > { %v3429_v10 = vpop.f32.mrb[0].mxu1 }
 0x1be   : > { %v1646_v7 = vpop.f32.mrb[1].mxu1 }
 0x1bf   : > { %v3430_v45 = vpop.f32.mrb[2].mxu1 }
 0x1c0   : > { %v1649_v39 = vpop.f32.mrb[3].mxu1 }
 0x1cb   : > { %v3559_v43 = vpop.f32.mrb[0].mxu0 }
 0x1cc   : > { %v3567_v63 = vadd.f32 %v3559_v43, %v3429_v10  ;;  %v2782_v50 = vpop.f32.mrb[1].mxu0 }
 0x1cd   : > { %v3568_v23 = vadd.f32 %v2782_v50, %v1646_v7  ;;  %v3560_v26 = vpop.f32.mrb[2].mxu0 }
 0x1ce   : > { %v2830_v0 = vadd.f32 %v3567_v63, %v3151_v54  ;;  %v3569_v41 = vadd.f32 %v3560_v26, %v3430_v45  ;;  %v2785_v25 = vpop.f32.mrb[3].mxu0 }
 0x1cf   : > { %v2828_v44 = vadd.f32 %v3568_v23, %v3151_v54  ;;  %v3570_v11 = vadd.f32 %v2785_v25, %v1649_v39 }
 0x1d0   : > { %2839 = vst.msk [vmem:[%s4846_s23 + $0x10] sm:$0xff] %vm2836_vm13, %v2830_v0  ;;  %v2831_v28 = vadd.f32 %v3569_v41, %v3151_v54 }
 0x1d1   : > { %2837 = vst.msk [vmem:[%s4846_s23] sm:$0xff] %vm2836_vm13, %v2828_v44  ;;  %v2829_v55 = vadd.f32 %v3570_v11, %v3151_v54  ;;  %v3443_v14 = vpop.f32.mrb[4].mxu1 }
 0x1d2   : > { %2840 = vst.msk [vmem:[%s4846_s23 + $0x18] sm:$0xff] %vm2836_vm13, %v2831_v28  ;;  %v1744_v34 = vpop.f32.mrb[5].mxu1 }
 0x1d3   : > { %2838 = vst.msk [vmem:[%s4846_s23 + $0x8] sm:$0xff] %vm2836_vm13, %v2829_v55  ;;  %v3563_v53 = vpop.f32.mrb[4].mxu0  ;;  %v3444_v48 = vpop.f32.mrb[6].mxu1 }
 0x1d4   : > { %v2798_v16 = vpop.f32.mrb[5].mxu0  ;;  %v3571_v57 = vadd.f32 %v3563_v53, %v3443_v14  ;;  %v1747_v12 = vpop.f32.mrb[7].mxu1 }
 0x1d5   : > { %v3564_v31 = vpop.f32.mrb[6].mxu0  ;;  %v3572_v20 = vadd.f32 %v2798_v16, %v1744_v34 }
 0x1d6   : > { %v2801_v38 = vpop.f32.mrb[7].mxu0  ;;  %v2834_v32 = vadd.f32 %v3571_v57, %v3151_v54  ;;  %v3573_v51 = vadd.f32 %v3564_v31, %v3444_v48 }
 0x1d7   : > { %v2832_v47 = vadd.f32 %v3572_v20, %v3151_v54  ;;  %v3574_v3 = vadd.f32 %v2801_v38, %v1747_v12 }
 0x1d8   : > { %2843 = vst.msk [vmem:[%s4846_s23 + $0x30] sm:$0xff] %vm2836_vm13, %v2834_v32  ;;  %v2835_v29 = vadd.f32 %v3573_v51, %v3151_v54 }
 0x1d9   : > { %2841 = vst.msk [vmem:[%s4846_s23 + $0x20] sm:$0xff] %vm2836_vm13, %v2832_v47  ;;  %v2833_v18 = vadd.f32 %v3574_v3, %v3151_v54 }
 0x1da   : > { %2844 = vst.msk [vmem:[%s4846_s23 + $0x38] sm:$0xff] %vm2836_vm13, %v2835_v29 }
 0x1db   : > { %2842 = vst.msk [vmem:[%s4846_s23 + $0x28] sm:$0xff] %vm2836_vm13, %v2833_v18 }
 0x1dc PF: > { %s13_s12 = sadd.s32 1, %s3774_s12  }
 0x1dd   : > { %p10_p4 = scmp.ge.s32.totalorder %s13_s12, 4  }
 0x1df   :  { %12 = sbr.rel (!%p10_p4) target bundleno = 1 (0x1), region = 66 }

// kernel: cnn_forward.25
= control target key start
LH: loop header
LB: loop body
LE: loop exit
PB: predicated region body
PF: predicated region fallthrough
CT: control target
= control target key end

     0   :  { %v47_v6 = vlaneseq  ;;  %s333_s0 = inlined_call_operand.vmem [shape: f32[128,32], index: 0, kind: input, shape index: {}]   ;;  %s334_s1 = inlined_call_operand.vmem [shape: f32[1,32], index: 1, kind: input, shape index: {}]   ;;  %s335_s2 = inlined_call_operand.vmem [shape: f32[1,32], index: 2, kind: input, shape index: {}]   ;;  %s336_s3 = inlined_call_operand.vmem [shape: f32[1,32], index: 3, kind: input, shape index: {}]   ;;  %s337_s4 = inlined_call_operand.vmem [shape: f32[1,32], index: 4, kind: input, shape index: {}]   ;;  %s338_s5 = inlined_call_operand.hbm [shape: f32[128,32], index: 5, kind: output, shape index: {}]  }
   0x1   :  { %v37_v0 = vld [vmem:[%s334_s1] sm:$0x1] }
   0x2   :  { %v39_v1 = vld [vmem:[%s335_s2] sm:$0x1]  ;;  %v38_v2 = vmul.f32 0.0078125, %v37_v0 }
   0x3   :  { %v40_v3 = vmul.f32 0.0078125, %v39_v1 }
   0x4   :  { %v41_v4 = vmul.f32 %v38_v2, %v38_v2 }
   0x6   :  { %v42_v5 = vsub.f32 %v40_v3, %v41_v4 }
   0x8   :  { %v43_v7 = vmax.f32 %v42_v5, 0.0 }
   0x9   :  { %10 = vsyncpa [#allocation3], 0  ;;  %v48_v9 = vshrl.u32 %v47_v6, 7  ;;  %v21_v11 = vld [vmem:[%s333_s0] sm:$0xff]  ;;  %v22_v14 = vld [vmem:[%s333_s0 + $0x8] sm:$0xff]  ;;  %vm131_vm0 = vcmask 261120  }
   0xa   :  { %v44_v8 = vadd.f32 1e-05, %v43_v7  ;;  %v68_v13 = vld [vmem:[%s336_s3] sm:$0x1]  ;;  %v23_v15 = vld [vmem:[%s333_s0 + $0x10] sm:$0xff]  ;;  %v24_v16 = vld [vmem:[%s333_s0 + $0x18] sm:$0xff] }
   0xb   :  { %v49_v10 = vsub.s32 0, %v48_v9  ;;  %v25_v17 = vld [vmem:[%s333_s0 + $0x20] sm:$0xff]  ;;  %v26_v18 = vld [vmem:[%s333_s0 + $0x28] sm:$0xff]  ;;  %v27_v19 = vld [vmem:[%s333_s0 + $0x30] sm:$0xff] }
   0xc   :  { %168 = vrsqrt.f32 %v44_v8  ;;  %v28_v20 = vld [vmem:[%s333_s0 + $0x38] sm:$0xff]  ;;  %v29_v21 = vld [vmem:[%s333_s0 + $0x40] sm:$0xff]  ;;  %v30_v22 = vld [vmem:[%s333_s0 + $0x48] sm:$0xff] }
   0xd   :  { %v236_v12 = vrot.slane %v38_v2, %v49_v10  ;;  %v31_v26 = vld [vmem:[%s333_s0 + $0x50] sm:$0xff]  ;;  %v32_v27 = vld [vmem:[%s333_s0 + $0x58] sm:$0xff]  ;;  %v33_v28 = vld [vmem:[%s333_s0 + $0x60] sm:$0xff] }
   0xe   :  { %v34_v33 = vld [vmem:[%s333_s0 + $0x68] sm:$0xff]  ;;  %v35_v34 = vld [vmem:[%s333_s0 + $0x70] sm:$0xff]  ;;  %v36_v35 = vld [vmem:[%s333_s0 + $0x78] sm:$0xff]  ;;  %s194_s0 = smov [#allocation2]  }
   0xf   :  { %v52_v24 = vsub.f32 %v21_v11, %v236_v12  ;;  %v53_v25 = vsub.f32 %v22_v14, %v236_v12  ;;  %v54_v30 = vsub.f32 %v23_v15, %v236_v12  ;;  %v55_v31 = vsub.f32 %v24_v16, %v236_v12  ;;  %v164_v44 = vld [vmem:[%s337_s4] ss:$0 sm:$0xff]  ;;  %s153_s4 = sshll.u32 %s194_s0, 4  ;;  %s154_s4 = int_to_ptr.vmem [resolvable:$true] %s153_s4 }
  0x10   :  { %v56_v32 = vsub.f32 %v25_v17, %v236_v12  ;;  %v57_v36 = vsub.f32 %v26_v18, %v236_v12  ;;  %v58_v37 = vsub.f32 %v27_v19, %v236_v12  ;;  %v59_v38 = vsub.f32 %v28_v20, %v236_v12  ;;  %s170_s28 = scalar_lea.vmem %s154_s4, 2048  ;;  %p175_p1 = scmp.lt.s32.totalorder %s154_s4, %s154_s4 }
  0x11   :  { %v60_v39 = vsub.f32 %v29_v21, %v236_v12  ;;  %v61_v41 = vsub.f32 %v30_v22, %v236_v12  ;;  %v62_v42 = vsub.f32 %v31_v26, %v236_v12  ;;  %v63_v43 = vsub.f32 %v32_v27, %v236_v12  ;;  %p171_p0 = scmp.ne.s32.totalorder %s154_s4, %s170_s28  ;;  %p176_p2 = scmp.lt.s32.totalorder %s170_s28, %s170_s28 }
  0x12   :  { %v64_v45 = vsub.f32 %v33_v28, %v236_v12  ;;  %v65_v46 = vsub.f32 %v34_v33, %v236_v12  ;;  %v66_v47 = vsub.f32 %v35_v34, %v236_v12  ;;  %v67_v48 = vsub.f32 %v36_v35, %v236_v12 }
  0x13   :  { %p177_p3 = por %p176_p2, %p175_p1 }
  0x15   :  { %p178_p4 = pnand %p177_p3, %p171_p0 }
  0x16   :  { %v169_v23 = vpop.eup %168 }
  0x17   :  { %v69_v29 = vmul.f32 %v169_v23, %v68_v13 }
  0x19   :  { %v74_v40 = vrot.slane %v69_v29, %v49_v10 }
  0x1b   :  { %v76_v49 = vmul.f32 %v74_v40, %v52_v24  ;;  %v77_v50 = vmul.f32 %v74_v40, %v53_v25  ;;  %v78_v51 = vmul.f32 %v74_v40, %v54_v30  ;;  %v79_v52 = vmul.f32 %v74_v40, %v55_v31 }
  0x1c   :  { %v80_v53 = vmul.f32 %v74_v40, %v56_v32  ;;  %v81_v54 = vmul.f32 %v74_v40, %v57_v36  ;;  %v82_v55 = vmul.f32 %v74_v40, %v58_v37  ;;  %v83_v56 = vmul.f32 %v74_v40, %v59_v38 }
  0x1d   :  { %v99_v57 = vadd.f32 %v164_v44, %v76_v49  ;;  %v100_v58 = vadd.f32 %v164_v44, %v77_v50  ;;  %v101_v59 = vadd.f32 %v164_v44, %v78_v51  ;;  %v102_v60 = vadd.f32 %v164_v44, %v79_v52 }
  0x1e   :  { %v103_v61 = vadd.f32 %v164_v44, %v80_v53  ;;  %v104_v62 = vadd.f32 %v164_v44, %v81_v54  ;;  %v105_v63 = vadd.f32 %v164_v44, %v82_v55  ;;  %v106_v0 = vadd.f32 %v164_v44, %v83_v56 }
  0x1f   :  { %v115_v1 = vmax.f32 %v99_v57, 0.0  ;;  %v116_v2 = vmax.f32 %v100_v58, 0.0  ;;  %v117_v3 = vmax.f32 %v101_v59, 0.0  ;;  %v118_v4 = vmax.f32 %v102_v60, 0.0 }
  0x20   :  { %v119_v5 = vmax.f32 %v103_v61, 0.0  ;;  %v120_v6 = vmax.f32 %v104_v62, 0.0  ;;  %v121_v7 = vmax.f32 %v105_v63, 0.0  ;;  %v122_v8 = vmax.f32 %v106_v0, 0.0 }
  0x21   :  { %132 = vst.msk [vmem:[#allocation2] sm:$0xff] %vm131_vm0, %v115_v1  ;;  %133 = vst.msk [vmem:[#allocation2 + $0x8] sm:$0xff] %vm131_vm0, %v116_v2  ;;  %v84_v9 = vmul.f32 %v74_v40, %v60_v39  ;;  %v85_v10 = vmul.f32 %v74_v40, %v61_v41  ;;  %v86_v11 = vmul.f32 %v74_v40, %v62_v42 }
  0x22   :  { %134 = vst.msk [vmem:[#allocation2 + $0x10] sm:$0xff] %vm131_vm0, %v117_v3  ;;  %135 = vst.msk [vmem:[#allocation2 + $0x18] sm:$0xff] %vm131_vm0, %v118_v4  ;;  %v87_v12 = vmul.f32 %v74_v40, %v63_v43  ;;  %v88_v13 = vmul.f32 %v74_v40, %v64_v45  ;;  %v89_v14 = vmul.f32 %v74_v40, %v65_v46 }
  0x23   :  { %136 = vst.msk [vmem:[#allocation2 + $0x20] sm:$0xff] %vm131_vm0, %v119_v5  ;;  %137 = vst.msk [vmem:[#allocation2 + $0x28] sm:$0xff] %vm131_vm0, %v120_v6  ;;  %v90_v15 = vmul.f32 %v74_v40, %v66_v47  ;;  %v91_v16 = vmul.f32 %v74_v40, %v67_v48  ;;  %v107_v17 = vadd.f32 %v164_v44, %v84_v9 }
  0x24   :  { %138 = vst.msk [vmem:[#allocation2 + $0x30] sm:$0xff] %vm131_vm0, %v121_v7  ;;  %139 = vst.msk [vmem:[#allocation2 + $0x38] sm:$0xff] %vm131_vm0, %v122_v8  ;;  %v108_v18 = vadd.f32 %v164_v44, %v85_v10  ;;  %v109_v19 = vadd.f32 %v164_v44, %v86_v11  ;;  %v110_v20 = vadd.f32 %v164_v44, %v87_v12 }
  0x25   :  { %v111_v21 = vadd.f32 %v164_v44, %v88_v13  ;;  %v112_v22 = vadd.f32 %v164_v44, %v89_v14  ;;  %v113_v23 = vadd.f32 %v164_v44, %v90_v15  ;;  %v114_v24 = vadd.f32 %v164_v44, %v91_v16 }
  0x26   :  { %v123_v25 = vmax.f32 %v107_v17, 0.0  ;;  %v124_v26 = vmax.f32 %v108_v18, 0.0  ;;  %v125_v27 = vmax.f32 %v109_v19, 0.0  ;;  %v126_v28 = vmax.f32 %v110_v20, 0.0 }
  0x27   :  { %v127_v29 = vmax.f32 %v111_v21, 0.0  ;;  %v128_v30 = vmax.f32 %v112_v22, 0.0  ;;  %v129_v31 = vmax.f32 %v113_v23, 0.0  ;;  %v130_v32 = vmax.f32 %v114_v24, 0.0 }
  0x28   :  { %140 = vst.msk [vmem:[#allocation2 + $0x40] sm:$0xff] %vm131_vm0, %v123_v25  ;;  %141 = vst.msk [vmem:[#allocation2 + $0x48] sm:$0xff] %vm131_vm0, %v124_v26 }
  0x29   :  { %142 = vst.msk [vmem:[#allocation2 + $0x50] sm:$0xff] %vm131_vm0, %v125_v27  ;;  %143 = vst.msk [vmem:[#allocation2 + $0x58] sm:$0xff] %vm131_vm0, %v126_v28 }
  0x2a   :  { %144 = vst.msk [vmem:[#allocation2 + $0x60] sm:$0xff] %vm131_vm0, %v127_v29  ;;  %145 = vst.msk [vmem:[#allocation2 + $0x68] sm:$0xff] %vm131_vm0, %v128_v30 }
  0x2b   :  { %146 = vst.msk [vmem:[#allocation2 + $0x70] sm:$0xff] %vm131_vm0, %v129_v31  ;;  %147 = vst.msk [vmem:[#allocation2 + $0x78] sm:$0xff] %vm131_vm0, %v130_v32 }
  0x2c   :  { %181 = shalt.err (!%p178_p4)
}
  0x2d   :  { %s182_s6 = scalar_lea.hbm %s338_s5, 2048 }
  0x2e   :  { %p183_p5 = scmp.ne.s32.totalorder %s338_s5, %s182_s6  ;;  %p186_p6 = scmp.lt.u32.totalorder %s182_s6, %s338_s5 }
  0x30   :  { %p188_p7 = pnand %p186_p6, %p183_p5 }
  0x32   :  { %191 = shalt.err (!%p188_p7)
}
  0x33   :  { %s195_s10 = smov 128   ;;  %s196_s11 = smov 8  }
  0x34   :  { %159 = dma.vmem_to_hbm [thread:$0]  %s154_s4, 2048, %s338_s5, [#allocation3], %s195_s10, %s195_s10, %s196_s11  }
  0x35   :  { %192 = dma.done.wait [#allocation3], 2048  }
  0x36   :  { %193 = vsyncadd [#allocation3], 4294965248 }
  0x37   :  { %163 = vsyncpa [#allocation3], 1 }

</bundles_post_ra>
